<compile_context>
chip_gen: v7x
topology: tpu7x:2x2x1
jax: 0.10.0
libtpu: 0.0.40
codegen_flags: <defaults>
</compile_context>

<pallas_src>
import functools
import math

import jax
import jax.numpy as jnp
from jax.experimental import pallas as pl
from jax.experimental.pallas import tpu as pltpu

F32 = jnp.float32
_NT = (((1,), (1,)), ((), ()))   # dot_general: contract last dims of both operands


# ----------------------------- in-kernel helpers -----------------------------

def _iota(shape, dim):
    return jax.lax.broadcasted_iota(jnp.int32, shape, dim)


def _m(cond):
    """bool mask -> 0/1 float32 matrix."""
    return jnp.where(cond, 1.0, 0.0).astype(F32)


def _dot(a, b):
    return jnp.dot(a, b, preferred_element_type=F32)


def _norm_adj_sq(A):
    """A2 = (D^-1/2 (A+I) D^-1/2)^2 — two GCN hops collapsed into one matmul.
    # TODO(synk): Gra_inc's definition is not in the reference source; modelled as
    # K=2 hops of GCN-normalized propagation (same assumption as the baseline).
    """
    n = A.shape[0]
    eye = _m(_iota((n, n), 0) == _iota((n, n), 1))
    a_hat = A + eye
    deg_c = jnp.sum(a_hat, axis=1, keepdims=True)        # (n, 1)
    deg_r = jnp.sum(a_hat, axis=0, keepdims=True)        # (1, n)  (A symmetric)
    dinv_c = jnp.where(deg_c > 0, jax.lax.rsqrt(deg_c), 0.0)
    dinv_r = jnp.where(deg_r > 0, jax.lax.rsqrt(deg_r), 0.0)
    a_n = a_hat * dinv_c * dinv_r
    return _dot(a_n, a_n)


def _conv_g(x, a2, wt, relu):
    """ConvG: Linear(bias=False) followed by the 2-hop propagation (A2 @ (x W))."""
    y = _dot(a2, _dot(x, wt))
    return jnp.maximum(y, 0.0) if relu else y


def _ranks(s_col, s_row, graph_sizes):
    """Per-graph descending rank of a score (ties broken by lower node index).
    Returns the rank vector in both orientations: (n, 1) and (1, n)."""
    n = s_col.shape[0]
    ri = _iota((n, n), 0)
    ci = _iota((n, n), 1)
    same = None
    gsz_col = jnp.zeros((n, 1), F32)
    off = 0
    for sz in graph_sizes:
        blk = (ri >= off) & (ri < off + sz) & (ci >= off) & (ci < off + sz)
        same = blk if same is None else (same | blk)
        node = _iota((n, 1), 0)
        gsz_col = gsz_col + jnp.where((node >= off) & (node < off + sz), float(sz), 0.0)
        off += sz
    # beats[i, j]  <=>  node i precedes node j in its graph's descending order
    beats = same & ((s_col > s_row) | ((s_col == s_row) & (ri < ci)))
    beats_f = _m(beats)
    rank_row = jnp.sum(beats_f, axis=0, keepdims=True)                   # (1, n)
    rank_col = gsz_col - 1.0 - jnp.sum(beats_f, axis=1, keepdims=True)   # (n, 1)
    return rank_col, rank_row


def _pool_matrices(rank_col, rank_row, old_sizes, new_sizes):
    """Selection matrix P (n_new, n): P[r, i] = 1 iff node i becomes pooled row r.
    Also returns its materialized transpose PT (used for unpooling / A gather)."""
    n = rank_col.shape[0]
    m = int(sum(new_sizes))
    rp = _iota((m, n), 0); cp = _iota((m, n), 1)
    rt = _iota((n, m), 0); ct = _iota((n, m), 1)
    p_cond = None
    pt_cond = None
    off = noff = 0
    for sz, nsz in zip(old_sizes, new_sizes):
        cond_p = ((rp >= noff) & (rp < noff + nsz) & (cp >= off) & (cp < off + sz)
                  & (rank_row == (rp - noff).astype(F32)))
        cond_t = ((rt >= off) & (rt < off + sz) & (ct >= noff) & (ct < noff + nsz)
                  & (rank_col == (ct - noff).astype(F32)))
        p_cond = cond_p if p_cond is None else (p_cond | cond_p)
        pt_cond = cond_t if pt_cond is None else (pt_cond | cond_t)
        off += sz
        noff += nsz
    return _m(p_cond), _m(pt_cond)


def _topk_pool(x, A, w_row, old_sizes, new_sizes):
    """TopKPooling: score = tanh(x . w/||w||); keep top ceil(ratio*n) nodes per graph."""
    s_col = jnp.tanh(jax.lax.dot_general(x, w_row, _NT, preferred_element_type=F32))  # (n,1)
    s_row = jnp.tanh(jax.lax.dot_general(w_row, x, _NT, preferred_element_type=F32))  # (1,n)
    rank_col, rank_row = _ranks(s_col, s_row, old_sizes)
    P, PT = _pool_matrices(rank_col, rank_row, old_sizes, new_sizes)
    x_new = _dot(P, x * s_col)                 # == x[perm] * score[perm][:, None]
    A_new = _dot(_dot(P, A), PT)               # == A[perm][:, perm]
    return x_new, A_new, PT


def _graunet(x, A, dwt0, dwt_ref, pool_ref, uwt_ref, ula, ulb, level_sizes):
    depth = len(level_sizes) - 1
    a2 = {0: _norm_adj_sq(A)}                  # cached & squared per level
    x = _conv_g(x, a2[0], dwt0, relu=True)
    org = x
    xs = {0: x}
    pts = {}
    cur_A = A
    for i in range(1, depth + 1):
        x, cur_A, pt = _topk_pool(x, cur_A, pool_ref[i - 1],
                                  level_sizes[i - 1], level_sizes[i])
        a2[i] = _norm_adj_sq(cur_A)
        x = _conv_g(x, a2[i], dwt_ref[i - 1], relu=True)
        if i < depth:
            xs[i] = x
        pts[i] = pt
    for i in range(depth):
        j = depth - 1 - i
        up = _dot(pts[j + 1], x)               # scatter pooled rows back (up[perm] = x)
        x = xs[j] + up                         # sum_res=True
        x = _conv_g(x, a2[j], uwt_ref[i], relu=(i < depth - 1))
    lin = _dot(x, ula) + _dot(org, ulb)        # Linear on cat([x, org]) with split weight
    return _dot(a2[0], lin)                    # final ConvG propagation (no relu)


def _readout_mlp(gfeat, graph_sizes, k, c1w, c1b, c2w_ref, c2b, w1_ref, h1b, h2w, h2b):
    n0, d = gfeat.shape
    B = len(graph_sizes)

    # ---- global_sort_pool: per-graph sort by last channel (desc), keep top-k, zero-pad
    e_row = _m(_iota((1, d), 1) == d - 1)
    e_col = _m(_iota((d, 1), 0) == d - 1)
    last_row = jax.lax.dot_general(e_row, gfeat, _NT, preferred_element_type=F32)  # (1, n0)
    last_col = _dot(gfeat, e_col)                                                  # (n0, 1)
    _, rank_row = _ranks(last_col, last_row, graph_sizes)
    rs = _iota((B * k, n0), 0); cs = _iota((B * k, n0), 1)
    cond = None
    off = 0
    for b, sz in enumerate(graph_sizes):
        c = ((rs >= b * k) & (rs < (b + 1) * k) & (cs >= off) & (cs < off + sz)
             & (rank_row == (rs - b * k).astype(F32)))
        cond = c if cond is None else (cond | c)
        off += sz
    dense = _dot(_m(cond), gfeat)                                   # (B*k, d)

    # ---- conv1d_p1: Conv1d(1, 16, kernel=d, stride=d) == per-node linear, + ReLU
    conv1 = jnp.maximum(_dot(dense, c1w) + c1b, 0.0)                # (B*k, 16)

    # ---- MaxPool1d(2, 2) along node positions (per graph), fused (no extra kernel)
    p = k // 2
    rp = _iota((B * p, B * k), 0); cp = _iota((B * p, B * k), 1)
    e_cond = o_cond = None
    for b in range(B):
        row_in = (rp >= b * p) & (rp < (b + 1) * p)
        base = b * k + 2 * (rp - b * p)
        ce = row_in & (cp == base)
        co = row_in & (cp == base + 1)
        e_cond = ce if e_cond is None else (e_cond | ce)
        o_cond = co if o_cond is None else (o_cond | co)
    pooled = jnp.maximum(_dot(_m(e_cond), conv1), _dot(_m(o_cond), conv1))  # (B*p, 16)

    # ---- conv1d_p2: Conv1d(16, 32, 5, 1) as kw shifted matmuls, + ReLU
    kw = c2w_ref.shape[0]
    L = p - kw + 1
    rl = _iota((B * L, B * p), 0); cl = _iota((B * L, B * p), 1)
    acc = None
    for t in range(kw):
        sh = None
        for b in range(B):
            cb = ((rl >= b * L) & (rl < (b + 1) * L)
                  & (cl == (rl - b * L) + b * p + t))
            sh = cb if sh is None else (sh | cb)
        term = _dot(_dot(_m(sh), pooled), c2w_ref[t])
        acc = term if acc is None else acc + term
    conv2 = jnp.maximum(acc + c2b, 0.0)                             # (B*L, 32)
    # (the reference's second F.relu on the flattened tensor is a no-op here)

    # ---- MLP head; PyTorch's NCW flatten order is folded into w1_ref's layout
    rg = _iota((B, B * L), 0); cg = _iota((B, B * L), 1)
    h1 = None
    for l in range(L):
        g = _m(cg == rg * L + l)
        term = _dot(_dot(g, conv2), w1_ref[l])
        h1 = term if h1 is None else h1 + term
    h1 = jnp.maximum(h1 + h1b, 0.0)                                 # (B, hidden)
    logits = _dot(h1, h2w) + h2b                                    # (B, num_class)
    mx = jnp.max(logits, axis=-1, keepdims=True)
    z = logits - mx
    lse = jnp.log(jnp.sum(jnp.exp(z), axis=-1, keepdims=True))
    return z - lse                                                  # log_softmax


# ------------------------------- fused kernel -------------------------------

def _classifier_kernel(x_ref, A_ref, dwt0_ref, dwt_ref, pool_ref, uwt_ref,
                       ula_ref, ulb_ref, c1w_ref, c1b_ref, c2w_ref, c2b_ref,
                       w1_ref, h1b_ref, h2w_ref, h2b_ref, out_ref,
                       *, level_sizes, k):
    gfeat = _graunet(x_ref[...], A_ref[...], dwt0_ref[...], dwt_ref, pool_ref,
                     uwt_ref, ula_ref[...], ulb_ref[...], level_sizes)
    out = _readout_mlp(gfeat, level_sizes[0], k,
                       c1w_ref[...], c1b_ref[...], c2w_ref, c2b_ref[...],
                       w1_ref, h1b_ref[...], h2w_ref[...], h2b_ref[...])
    out_ref[...] = out.astype(out_ref.dtype)


def classifier_forward(prep, x, A, *, sizes, ks, k):
    level_sizes = [tuple(int(n) for n in sizes)]
    for r in ks:
        level_sizes.append(tuple(int(math.ceil(r * n)) for n in level_sizes[-1]))
    level_sizes = tuple(level_sizes)
    B = len(sizes)
    num_class = prep["h2b"].shape[1]

    operands = (x.astype(F32), A.astype(F32),
                prep["dwt0"], prep["dwt_rest"], prep["pool_w"], prep["uwt"],
                prep["up_last_a"], prep["up_last_b"],
                prep["c1w"], prep["c1b"], prep["c2w"], prep["c2b"],
                prep["w1"], prep["h1b"], prep["h2w"], prep["h2b"])

    vmem = pl.BlockSpec(memory_space=pltpu.MemorySpace.VMEM)
    return pl.pallas_call(
        functools.partial(_classifier_kernel, level_sizes=level_sizes, k=k),
        out_shape=jax.ShapeDtypeStruct((B, num_class), F32),
        in_specs=[vmem] * len(operands),
        out_specs=vmem,
    )(*operands)


# ---------------------------- params init & prep ----------------------------

def init_params(key, node_feat, nn_hid, nn_out, k, hidden, num_class, depth):
    keys = iter(jax.random.split(key, 32))

    def nrm(shape, scale=0.1):
        return scale * jax.random.normal(next(keys), shape, jnp.float32)

    params = {}
    params["down_w"] = [nrm((nn_hid, node_feat))] + \
                       [nrm((nn_hid, nn_hid)) for _ in range(depth)]
    params["pool_w"] = [nrm((nn_hid,)) for _ in range(depth)]
    params["up_w"] = [nrm((nn_hid, nn_hid)) for _ in range(depth)] + \
                     [nrm((nn_out, 2 * nn_hid))]
    params["conv1_w"] = nrm((16, 1, nn_out))
    params["conv1_b"] = nrm((16,))
    params["conv2_w"] = nrm((32, 16, 5))
    params["conv2_b"] = nrm((32,))
    dense_dim1 = (k - 2) // 2 + 1
    dense_dim = (dense_dim1 - 5 + 1) * 32
    params["h1_w"] = nrm((hidden, dense_dim))
    params["h1_b"] = nrm((hidden,))
    params["h2_w"] = nrm((num_class, hidden))
    params["h2_b"] = nrm((num_class,))
    return params


def prepare_params(params):
    """One-time host-side layout prep: pre-transpose / pre-normalize / pre-split
    weights so the fused kernel only performs plain row-major matmuls."""
    depth = len(params["pool_w"])
    hid = params["down_w"][1].shape[0]
    n_ch1, _, d_in = params["conv1_w"].shape
    c2_out = params["conv2_w"].shape[0]
    hidden, dense_dim = params["h1_w"].shape
    L = dense_dim // c2_out

    prep = {
        "dwt0": params["down_w"][0].T,                                  # (node_feat, hid)
        "dwt_rest": jnp.stack([w.T for w in params["down_w"][1:]]),     # (depth, hid, hid)
        "pool_w": jnp.stack([(w / jnp.linalg.norm(w)).reshape(1, hid)
                             for w in params["pool_w"]]),               # (depth, 1, hid)
        "uwt": jnp.stack([w.T for w in params["up_w"][:depth]]),        # (depth, hid, hid)
        "up_last_a": params["up_w"][depth][:, :hid].T,                  # (hid, nn_out)
        "up_last_b": params["up_w"][depth][:, hid:].T,                  # (hid, nn_out)
        "c1w": params["conv1_w"].reshape(n_ch1, d_in).T,                # (nn_out, 16)
        "c1b": params["conv1_b"].reshape(1, -1),
        "c2w": jnp.transpose(params["conv2_w"], (2, 1, 0)),             # (5, 16, 32)
        "c2b": params["conv2_b"].reshape(1, -1),
        "w1": jnp.transpose(params["h1_w"].reshape(hidden, c2_out, L),
                            (2, 1, 0)),                                 # (L, 32, hidden)
        "h1b": params["h1_b"].reshape(1, -1),
        "h2w": params["h2_w"].T,                                        # (hidden, num_class)
        "h2b": params["h2_b"].reshape(1, -1),
    }
    return jax.tree_util.tree_map(lambda a: a.astype(F32), prep)


# ---------------------------------- main ----------------------------------

if __name__ == "__main__":
    node_feat, nn_hid, nn_out = 16, 32, 16
    k, hidden, num_class = 16, 32, 4
    ks = (0.9, 0.7, 0.6, 0.5)
    sizes = (20, 16)                      # two graphs, nodes contiguous per graph
    N = sum(sizes)

    key = jax.random.PRNGKey(0)
    k_x, k_p = jax.random.split(key)
    x = jax.random.normal(k_x, (N, node_feat), jnp.float32)

    # Deterministic block-diagonal adjacency: ring + (i, i+3) chord per graph.
    A = jnp.zeros((N, N), jnp.float32)
    off = 0
    for n in sizes:
        idx = jnp.arange(n)
        src = off + idx
        for dst in (off + (idx + 1) % n, off + (idx + 3) % n):
            A = A.at[src, dst].set(1.0)
            A = A.at[dst, src].set(1.0)
        off += n

    params = init_params(k_p, node_feat, nn_hid, nn_out, k, hidden, num_class, len(ks))
    prep = prepare_params(params)        # layout prep done once, outside the hot path

    fwd = jax.jit(functools.partial(classifier_forward, sizes=sizes, ks=ks, k=k))
    out = fwd(prep, x, A)
    jax.block_until_ready(out)
    assert out.shape == (len(sizes), num_class), out.shape
    assert bool(jnp.all(jnp.isfinite(out)))
    print("KERNEL_OK")
</pallas_src>

<mosaic_0001>
module attributes {stable_mosaic.version = 11 : i64} {
  func.func @_classifier_kernel(%arg0: memref<36x16xf32, #tpu.memory_space<vmem>>, %arg1: memref<36x36xf32, #tpu.memory_space<vmem>>, %arg2: memref<16x32xf32, #tpu.memory_space<vmem>>, %arg3: memref<4x32x32xf32, #tpu.memory_space<vmem>>, %arg4: memref<4x1x32xf32, #tpu.memory_space<vmem>>, %arg5: memref<4x32x32xf32, #tpu.memory_space<vmem>>, %arg6: memref<32x16xf32, #tpu.memory_space<vmem>>, %arg7: memref<32x16xf32, #tpu.memory_space<vmem>>, %arg8: memref<16x16xf32, #tpu.memory_space<vmem>>, %arg9: memref<1x16xf32, #tpu.memory_space<vmem>>, %arg10: memref<5x16x32xf32, #tpu.memory_space<vmem>>, %arg11: memref<1x32xf32, #tpu.memory_space<vmem>>, %arg12: memref<4x32x32xf32, #tpu.memory_space<vmem>>, %arg13: memref<1x32xf32, #tpu.memory_space<vmem>>, %arg14: memref<32x4xf32, #tpu.memory_space<vmem>>, %arg15: memref<1x4xf32, #tpu.memory_space<vmem>>, %arg16: memref<2x4xf32, #tpu.memory_space<vmem>>) attributes {dimension_semantics = [], scalar_prefetch = 0 : i64, scratch_operands = 0 : i64, tpu.core_type = #tpu.core_type<tc>} {
    %c0 = arith.constant 0 : index
    %c0_0 = arith.constant 0 : index
    %0 = vector.load %arg0[%c0, %c0_0] : memref<36x16xf32, #tpu.memory_space<vmem>>, vector<36x16xf32>
    %c0_1 = arith.constant 0 : index
    %c0_2 = arith.constant 0 : index
    %1 = vector.load %arg1[%c0_1, %c0_2] : memref<36x36xf32, #tpu.memory_space<vmem>>, vector<36x36xf32>
    %c0_3 = arith.constant 0 : index
    %c0_4 = arith.constant 0 : index
    %2 = vector.load %arg2[%c0_3, %c0_4] : memref<16x32xf32, #tpu.memory_space<vmem>>, vector<16x32xf32>
    %c0_5 = arith.constant 0 : index
    %c0_6 = arith.constant 0 : index
    %3 = vector.load %arg6[%c0_5, %c0_6] : memref<32x16xf32, #tpu.memory_space<vmem>>, vector<32x16xf32>
    %c0_7 = arith.constant 0 : index
    %c0_8 = arith.constant 0 : index
    %4 = vector.load %arg7[%c0_7, %c0_8] : memref<32x16xf32, #tpu.memory_space<vmem>>, vector<32x16xf32>
    %5 = tpu.iota {dimensions = array<i32: 0>} : vector<36x36xi32>
    %6 = tpu.iota {dimensions = array<i32: 1>} : vector<36x36xi32>
    %7 = arith.cmpi eq, %5, %6 : vector<36x36xi32>
    %cst = arith.constant 1.000000e+00 : f32
    %cst_9 = arith.constant 0.000000e+00 : f32
    %8 = vector.broadcast %cst : f32 to vector<36x36xf32>
    %9 = vector.broadcast %cst_9 : f32 to vector<36x36xf32>
    %10 = arith.select %7, %8, %9 : vector<36x36xi1>, vector<36x36xf32>
    %11 = arith.addf %1, %10 : vector<36x36xf32>
    %cst_10 = arith.constant dense<0.000000e+00> : vector<36xf32>
    %12 = vector.multi_reduction <add>, %11, %cst_10 [1] : vector<36x36xf32> to vector<36xf32>
    %13 = vector.shape_cast %12 : vector<36xf32> to vector<36x1xf32>
    %cst_11 = arith.constant dense<0.000000e+00> : vector<36xf32>
    %14 = vector.multi_reduction <add>, %11, %cst_11 [0] : vector<36x36xf32> to vector<36xf32>
    %15 = vector.shape_cast %14 : vector<36xf32> to vector<1x36xf32>
    %cst_12 = arith.constant 0.000000e+00 : f32
    %16 = vector.broadcast %cst_12 : f32 to vector<36x1xf32>
    %17 = arith.cmpf ogt, %13, %16 : vector<36x1xf32>
    %18 = math.rsqrt %13 : vector<36x1xf32>
    %cst_13 = arith.constant 0.000000e+00 : f32
    %19 = vector.broadcast %cst_13 : f32 to vector<36x1xf32>
    %20 = arith.select %17, %18, %19 : vector<36x1xi1>, vector<36x1xf32>
    %cst_14 = arith.constant 0.000000e+00 : f32
    %21 = vector.broadcast %cst_14 : f32 to vector<1x36xf32>
    %22 = arith.cmpf ogt, %15, %21 : vector<1x36xf32>
    %23 = math.rsqrt %15 : vector<1x36xf32>
    %cst_15 = arith.constant 0.000000e+00 : f32
    %24 = vector.broadcast %cst_15 : f32 to vector<1x36xf32>
    %25 = arith.select %22, %23, %24 : vector<1x36xi1>, vector<1x36xf32>
    %26 = vector.broadcast %20 : vector<36x1xf32> to vector<36x36xf32>
    %27 = arith.mulf %11, %26 : vector<36x36xf32>
    %28 = vector.broadcast %25 : vector<1x36xf32> to vector<36x36xf32>
    %29 = arith.mulf %27, %28 : vector<36x36xf32>
    %cst_16 = arith.constant dense<0.000000e+00> : vector<36x36xf32>
    %30 = tpu.matmul %29, %29, %cst_16 {dimension_numbers = #tpu.dot_dimension_numbers<[1], [0], [0], [1], [0, 0, 1, 1], [], []>} : vector<36x36xf32>, vector<36x36xf32>, vector<36x36xf32> -> vector<36x36xf32>
    %cst_17 = arith.constant dense<0.000000e+00> : vector<36x32xf32>
    %31 = tpu.matmul %0, %2, %cst_17 {dimension_numbers = #tpu.dot_dimension_numbers<[1], [0], [0], [1], [0, 0, 1, 1], [], []>} : vector<36x16xf32>, vector<16x32xf32>, vector<36x32xf32> -> vector<36x32xf32>
    %cst_18 = arith.constant dense<0.000000e+00> : vector<36x32xf32>
    %32 = tpu.matmul %30, %31, %cst_18 {dimension_numbers = #tpu.dot_dimension_numbers<[1], [0], [0], [1], [0, 0, 1, 1], [], []>} : vector<36x36xf32>, vector<36x32xf32>, vector<36x32xf32> -> vector<36x32xf32>
    %cst_19 = arith.constant 0.000000e+00 : f32
    %33 = vector.broadcast %cst_19 : f32 to vector<36x32xf32>
    %34 = arith.maximumf %32, %33 : vector<36x32xf32>
    %c0_20 = arith.constant 0 : index
    %c0_21 = arith.constant 0 : index
    %c0_22 = arith.constant 0 : index
    %35 = vector.load %arg4[%c0_20, %c0_21, %c0_22] : memref<4x1x32xf32, #tpu.memory_space<vmem>>, vector<1x1x32xf32>
    %36 = vector.shape_cast %35 : vector<1x1x32xf32> to vector<1x32xf32>
    %cst_23 = arith.constant dense<0.000000e+00> : vector<36x1xf32>
    %37 = tpu.matmul %34, %36, %cst_23 {dimension_numbers = #tpu.dot_dimension_numbers<[1], [1], [0], [0], [0, 0, 1, 0], [], []>} : vector<36x32xf32>, vector<1x32xf32>, vector<36x1xf32> -> vector<36x1xf32>
    %38 = math.tanh %37 : vector<36x1xf32>
    %cst_24 = arith.constant dense<0.000000e+00> : vector<1x36xf32>
    %39 = tpu.matmul %36, %34, %cst_24 {dimension_numbers = #tpu.dot_dimension_numbers<[1], [1], [0], [0], [0, 0, 1, 0], [], []>} : vector<1x32xf32>, vector<36x32xf32>, vector<1x36xf32> -> vector<1x36xf32>
    %40 = math.tanh %39 : vector<1x36xf32>
    %41 = tpu.iota {dimensions = array<i32: 0>} : vector<36x36xi32>
    %42 = tpu.iota {dimensions = array<i32: 1>} : vector<36x36xi32>
    %cst_25 = arith.constant 0.000000e+00 : f32
    %43 = vector.broadcast %cst_25 : f32 to vector<36x1xf32>
    %c0_i32 = arith.constant 0 : i32
    %44 = vector.broadcast %c0_i32 : i32 to vector<36x36xi32>
    %45 = arith.cmpi sge, %41, %44 : vector<36x36xi32>
    %c20_i32 = arith.constant 20 : i32
    %46 = vector.broadcast %c20_i32 : i32 to vector<36x36xi32>
    %47 = arith.cmpi slt, %41, %46 : vector<36x36xi32>
    %48 = arith.andi %45, %47 : vector<36x36xi1>
    %c0_i32_26 = arith.constant 0 : i32
    %49 = vector.broadcast %c0_i32_26 : i32 to vector<36x36xi32>
    %50 = arith.cmpi sge, %42, %49 : vector<36x36xi32>
    %51 = arith.andi %48, %50 : vector<36x36xi1>
    %c20_i32_27 = arith.constant 20 : i32
    %52 = vector.broadcast %c20_i32_27 : i32 to vector<36x36xi32>
    %53 = arith.cmpi slt, %42, %52 : vector<36x36xi32>
    %54 = arith.andi %51, %53 : vector<36x36xi1>
    %55 = tpu.iota {dimensions = array<i32: 0>} : vector<36x1xi32>
    %c0_i32_28 = arith.constant 0 : i32
    %56 = vector.broadcast %c0_i32_28 : i32 to vector<36x1xi32>
    %57 = arith.cmpi sge, %55, %56 : vector<36x1xi32>
    %c20_i32_29 = arith.constant 20 : i32
    %58 = vector.broadcast %c20_i32_29 : i32 to vector<36x1xi32>
    %59 = arith.cmpi slt, %55, %58 : vector<36x1xi32>
    %60 = arith.andi %57, %59 : vector<36x1xi1>
    %cst_30 = arith.constant 2.000000e+01 : f32
    %cst_31 = arith.constant 0.000000e+00 : f32
    %61 = vector.broadcast %cst_30 : f32 to vector<36x1xf32>
    %62 = vector.broadcast %cst_31 : f32 to vector<36x1xf32>
    %63 = arith.select %60, %61, %62 : vector<36x1xi1>, vector<36x1xf32>
    %64 = arith.addf %43, %63 : vector<36x1xf32>
    %c20_i32_32 = arith.constant 20 : i32
    %65 = vector.broadcast %c20_i32_32 : i32 to vector<36x36xi32>
    %66 = arith.cmpi sge, %41, %65 : vector<36x36xi32>
    %c36_i32 = arith.constant 36 : i32
    %67 = vector.broadcast %c36_i32 : i32 to vector<36x36xi32>
    %68 = arith.cmpi slt, %41, %67 : vector<36x36xi32>
    %69 = arith.andi %66, %68 : vector<36x36xi1>
    %c20_i32_33 = arith.constant 20 : i32
    %70 = vector.broadcast %c20_i32_33 : i32 to vector<36x36xi32>
    %71 = arith.cmpi sge, %42, %70 : vector<36x36xi32>
    %72 = arith.andi %69, %71 : vector<36x36xi1>
    %c36_i32_34 = arith.constant 36 : i32
    %73 = vector.broadcast %c36_i32_34 : i32 to vector<36x36xi32>
    %74 = arith.cmpi slt, %42, %73 : vector<36x36xi32>
    %75 = arith.andi %72, %74 : vector<36x36xi1>
    %76 = arith.ori %54, %75 : vector<36x36xi1>
    %77 = tpu.iota {dimensions = array<i32: 0>} : vector<36x1xi32>
    %c20_i32_35 = arith.constant 20 : i32
    %78 = vector.broadcast %c20_i32_35 : i32 to vector<36x1xi32>
    %79 = arith.cmpi sge, %77, %78 : vector<36x1xi32>
    %c36_i32_36 = arith.constant 36 : i32
    %80 = vector.broadcast %c36_i32_36 : i32 to vector<36x1xi32>
    %81 = arith.cmpi slt, %77, %80 : vector<36x1xi32>
    %82 = arith.andi %79, %81 : vector<36x1xi1>
    %cst_37 = arith.constant 1.600000e+01 : f32
    %cst_38 = arith.constant 0.000000e+00 : f32
    %83 = vector.broadcast %cst_37 : f32 to vector<36x1xf32>
    %84 = vector.broadcast %cst_38 : f32 to vector<36x1xf32>
    %85 = arith.select %82, %83, %84 : vector<36x1xi1>, vector<36x1xf32>
    %86 = arith.addf %64, %85 : vector<36x1xf32>
    %87 = vector.broadcast %38 : vector<36x1xf32> to vector<36x36xf32>
    %88 = vector.broadcast %40 : vector<1x36xf32> to vector<36x36xf32>
    %89 = arith.cmpf ogt, %87, %88 : vector<36x36xf32>
    %90 = vector.broadcast %38 : vector<36x1xf32> to vector<36x36xf32>
    %91 = vector.broadcast %40 : vector<1x36xf32> to vector<36x36xf32>
    %92 = arith.cmpf oeq, %90, %91 : vector<36x36xf32>
    %93 = arith.cmpi slt, %41, %42 : vector<36x36xi32>
    %94 = arith.andi %92, %93 : vector<36x36xi1>
    %95 = arith.ori %89, %94 : vector<36x36xi1>
    %96 = arith.andi %76, %95 : vector<36x36xi1>
    %cst_39 = arith.constant 1.000000e+00 : f32
    %cst_40 = arith.constant 0.000000e+00 : f32
    %97 = vector.broadcast %cst_39 : f32 to vector<36x36xf32>
    %98 = vector.broadcast %cst_40 : f32 to vector<36x36xf32>
    %99 = arith.select %96, %97, %98 : vector<36x36xi1>, vector<36x36xf32>
    %cst_41 = arith.constant dense<0.000000e+00> : vector<36xf32>
    %100 = vector.multi_reduction <add>, %99, %cst_41 [0] : vector<36x36xf32> to vector<36xf32>
    %101 = vector.shape_cast %100 : vector<36xf32> to vector<1x36xf32>
    %cst_42 = arith.constant 1.000000e+00 : f32
    %102 = vector.broadcast %cst_42 : f32 to vector<36x1xf32>
    %103 = arith.subf %86, %102 : vector<36x1xf32>
    %cst_43 = arith.constant dense<0.000000e+00> : vector<36xf32>
    %104 = vector.multi_reduction <add>, %99, %cst_43 [1] : vector<36x36xf32> to vector<36xf32>
    %105 = vector.shape_cast %104 : vector<36xf32> to vector<36x1xf32>
    %106 = arith.subf %103, %105 : vector<36x1xf32>
    %107 = tpu.iota {dimensions = array<i32: 0>} : vector<33x36xi32>
    %108 = tpu.iota {dimensions = array<i32: 1>} : vector<33x36xi32>
    %109 = tpu.iota {dimensions = array<i32: 0>} : vector<36x33xi32>
    %110 = tpu.iota {dimensions = array<i32: 1>} : vector<36x33xi32>
    %c0_i32_44 = arith.constant 0 : i32
    %111 = vector.broadcast %c0_i32_44 : i32 to vector<33x36xi32>
    %112 = arith.cmpi sge, %107, %111 : vector<33x36xi32>
    %c18_i32 = arith.constant 18 : i32
    %113 = vector.broadcast %c18_i32 : i32 to vector<33x36xi32>
    %114 = arith.cmpi slt, %107, %113 : vector<33x36xi32>
    %115 = arith.andi %112, %114 : vector<33x36xi1>
    %c0_i32_45 = arith.constant 0 : i32
    %116 = vector.broadcast %c0_i32_45 : i32 to vector<33x36xi32>
    %117 = arith.cmpi sge, %108, %116 : vector<33x36xi32>
    %118 = arith.andi %115, %117 : vector<33x36xi1>
    %c20_i32_46 = arith.constant 20 : i32
    %119 = vector.broadcast %c20_i32_46 : i32 to vector<33x36xi32>
    %120 = arith.cmpi slt, %108, %119 : vector<33x36xi32>
    %121 = arith.andi %118, %120 : vector<33x36xi1>
    %c0_i32_47 = arith.constant 0 : i32
    %122 = vector.broadcast %c0_i32_47 : i32 to vector<33x36xi32>
    %123 = arith.subi %107, %122 : vector<33x36xi32>
    %124 = arith.sitofp %123 : vector<33x36xi32> to vector<33x36xf32>
    %125 = vector.broadcast %101 : vector<1x36xf32> to vector<33x36xf32>
    %126 = arith.cmpf oeq, %125, %124 : vector<33x36xf32>
    %127 = arith.andi %121, %126 : vector<33x36xi1>
    %c0_i32_48 = arith.constant 0 : i32
    %128 = vector.broadcast %c0_i32_48 : i32 to vector<36x33xi32>
    %129 = arith.cmpi sge, %109, %128 : vector<36x33xi32>
    %c20_i32_49 = arith.constant 20 : i32
    %130 = vector.broadcast %c20_i32_49 : i32 to vector<36x33xi32>
    %131 = arith.cmpi slt, %109, %130 : vector<36x33xi32>
    %132 = arith.andi %129, %131 : vector<36x33xi1>
    %c0_i32_50 = arith.constant 0 : i32
    %133 = vector.broadcast %c0_i32_50 : i32 to vector<36x33xi32>
    %134 = arith.cmpi sge, %110, %133 : vector<36x33xi32>
    %135 = arith.andi %132, %134 : vector<36x33xi1>
    %c18_i32_51 = arith.constant 18 : i32
    %136 = vector.broadcast %c18_i32_51 : i32 to vector<36x33xi32>
    %137 = arith.cmpi slt, %110, %136 : vector<36x33xi32>
    %138 = arith.andi %135, %137 : vector<36x33xi1>
    %c0_i32_52 = arith.constant 0 : i32
    %139 = vector.broadcast %c0_i32_52 : i32 to vector<36x33xi32>
    %140 = arith.subi %110, %139 : vector<36x33xi32>
    %141 = arith.sitofp %140 : vector<36x33xi32> to vector<36x33xf32>
    %142 = vector.broadcast %106 : vector<36x1xf32> to vector<36x33xf32>
    %143 = arith.cmpf oeq, %142, %141 : vector<36x33xf32>
    %144 = arith.andi %138, %143 : vector<36x33xi1>
    %c18_i32_53 = arith.constant 18 : i32
    %145 = vector.broadcast %c18_i32_53 : i32 to vector<33x36xi32>
    %146 = arith.cmpi sge, %107, %145 : vector<33x36xi32>
    %c33_i32 = arith.constant 33 : i32
    %147 = vector.broadcast %c33_i32 : i32 to vector<33x36xi32>
    %148 = arith.cmpi slt, %107, %147 : vector<33x36xi32>
    %149 = arith.andi %146, %148 : vector<33x36xi1>
    %c20_i32_54 = arith.constant 20 : i32
    %150 = vector.broadcast %c20_i32_54 : i32 to vector<33x36xi32>
    %151 = arith.cmpi sge, %108, %150 : vector<33x36xi32>
    %152 = arith.andi %149, %151 : vector<33x36xi1>
    %c36_i32_55 = arith.constant 36 : i32
    %153 = vector.broadcast %c36_i32_55 : i32 to vector<33x36xi32>
    %154 = arith.cmpi slt, %108, %153 : vector<33x36xi32>
    %155 = arith.andi %152, %154 : vector<33x36xi1>
    %c18_i32_56 = arith.constant 18 : i32
    %156 = vector.broadcast %c18_i32_56 : i32 to vector<33x36xi32>
    %157 = arith.subi %107, %156 : vector<33x36xi32>
    %158 = arith.sitofp %157 : vector<33x36xi32> to vector<33x36xf32>
    %159 = vector.broadcast %101 : vector<1x36xf32> to vector<33x36xf32>
    %160 = arith.cmpf oeq, %159, %158 : vector<33x36xf32>
    %161 = arith.andi %155, %160 : vector<33x36xi1>
    %c20_i32_57 = arith.constant 20 : i32
    %162 = vector.broadcast %c20_i32_57 : i32 to vector<36x33xi32>
    %163 = arith.cmpi sge, %109, %162 : vector<36x33xi32>
    %c36_i32_58 = arith.constant 36 : i32
    %164 = vector.broadcast %c36_i32_58 : i32 to vector<36x33xi32>
    %165 = arith.cmpi slt, %109, %164 : vector<36x33xi32>
    %166 = arith.andi %163, %165 : vector<36x33xi1>
    %c18_i32_59 = arith.constant 18 : i32
    %167 = vector.broadcast %c18_i32_59 : i32 to vector<36x33xi32>
    %168 = arith.cmpi sge, %110, %167 : vector<36x33xi32>
    %169 = arith.andi %166, %168 : vector<36x33xi1>
    %c33_i32_60 = arith.constant 33 : i32
    %170 = vector.broadcast %c33_i32_60 : i32 to vector<36x33xi32>
    %171 = arith.cmpi slt, %110, %170 : vector<36x33xi32>
    %172 = arith.andi %169, %171 : vector<36x33xi1>
    %c18_i32_61 = arith.constant 18 : i32
    %173 = vector.broadcast %c18_i32_61 : i32 to vector<36x33xi32>
    %174 = arith.subi %110, %173 : vector<36x33xi32>
    %175 = arith.sitofp %174 : vector<36x33xi32> to vector<36x33xf32>
    %176 = vector.broadcast %106 : vector<36x1xf32> to vector<36x33xf32>
    %177 = arith.cmpf oeq, %176, %175 : vector<36x33xf32>
    %178 = arith.andi %172, %177 : vector<36x33xi1>
    %179 = arith.ori %127, %161 : vector<33x36xi1>
    %180 = arith.ori %144, %178 : vector<36x33xi1>
    %cst_62 = arith.constant 1.000000e+00 : f32
    %cst_63 = arith.constant 0.000000e+00 : f32
    %181 = vector.broadcast %cst_62 : f32 to vector<33x36xf32>
    %182 = vector.broadcast %cst_63 : f32 to vector<33x36xf32>
    %183 = arith.select %179, %181, %182 : vector<33x36xi1>, vector<33x36xf32>
    %cst_64 = arith.constant 1.000000e+00 : f32
    %cst_65 = arith.constant 0.000000e+00 : f32
    %184 = vector.broadcast %cst_64 : f32 to vector<36x33xf32>
    %185 = vector.broadcast %cst_65 : f32 to vector<36x33xf32>
    %186 = arith.select %180, %184, %185 : vector<36x33xi1>, vector<36x33xf32>
    %187 = vector.broadcast %38 : vector<36x1xf32> to vector<36x32xf32>
    %188 = arith.mulf %34, %187 : vector<36x32xf32>
    %cst_66 = arith.constant dense<0.000000e+00> : vector<33x32xf32>
    %189 = tpu.matmul %183, %188, %cst_66 {dimension_numbers = #tpu.dot_dimension_numbers<[1], [0], [0], [1], [0, 0, 1, 1], [], []>} : vector<33x36xf32>, vector<36x32xf32>, vector<33x32xf32> -> vector<33x32xf32>
    %cst_67 = arith.constant dense<0.000000e+00> : vector<33x36xf32>
    %190 = tpu.matmul %183, %1, %cst_67 {dimension_numbers = #tpu.dot_dimension_numbers<[1], [0], [0], [1], [0, 0, 1, 1], [], []>} : vector<33x36xf32>, vector<36x36xf32>, vector<33x36xf32> -> vector<33x36xf32>
    %cst_68 = arith.constant dense<0.000000e+00> : vector<33x33xf32>
    %191 = tpu.matmul %190, %186, %cst_68 {dimension_numbers = #tpu.dot_dimension_numbers<[1], [0], [0], [1], [0, 0, 1, 1], [], []>} : vector<33x36xf32>, vector<36x33xf32>, vector<33x33xf32> -> vector<33x33xf32>
    %192 = tpu.iota {dimensions = array<i32: 0>} : vector<33x33xi32>
    %193 = tpu.iota {dimensions = array<i32: 1>} : vector<33x33xi32>
    %194 = arith.cmpi eq, %192, %193 : vector<33x33xi32>
    %cst_69 = arith.constant 1.000000e+00 : f32
    %cst_70 = arith.constant 0.000000e+00 : f32
    %195 = vector.broadcast %cst_69 : f32 to vector<33x33xf32>
    %196 = vector.broadcast %cst_70 : f32 to vector<33x33xf32>
    %197 = arith.select %194, %195, %196 : vector<33x33xi1>, vector<33x33xf32>
    %198 = arith.addf %191, %197 : vector<33x33xf32>
    %cst_71 = arith.constant dense<0.000000e+00> : vector<33xf32>
    %199 = vector.multi_reduction <add>, %198, %cst_71 [1] : vector<33x33xf32> to vector<33xf32>
    %200 = vector.shape_cast %199 : vector<33xf32> to vector<33x1xf32>
    %cst_72 = arith.constant dense<0.000000e+00> : vector<33xf32>
    %201 = vector.multi_reduction <add>, %198, %cst_72 [0] : vector<33x33xf32> to vector<33xf32>
    %202 = vector.shape_cast %201 : vector<33xf32> to vector<1x33xf32>
    %cst_73 = arith.constant 0.000000e+00 : f32
    %203 = vector.broadcast %cst_73 : f32 to vector<33x1xf32>
    %204 = arith.cmpf ogt, %200, %203 : vector<33x1xf32>
    %205 = math.rsqrt %200 : vector<33x1xf32>
    %cst_74 = arith.constant 0.000000e+00 : f32
    %206 = vector.broadcast %cst_74 : f32 to vector<33x1xf32>
    %207 = arith.select %204, %205, %206 : vector<33x1xi1>, vector<33x1xf32>
    %cst_75 = arith.constant 0.000000e+00 : f32
    %208 = vector.broadcast %cst_75 : f32 to vector<1x33xf32>
    %209 = arith.cmpf ogt, %202, %208 : vector<1x33xf32>
    %210 = math.rsqrt %202 : vector<1x33xf32>
    %cst_76 = arith.constant 0.000000e+00 : f32
    %211 = vector.broadcast %cst_76 : f32 to vector<1x33xf32>
    %212 = arith.select %209, %210, %211 : vector<1x33xi1>, vector<1x33xf32>
    %213 = vector.broadcast %207 : vector<33x1xf32> to vector<33x33xf32>
    %214 = arith.mulf %198, %213 : vector<33x33xf32>
    %215 = vector.broadcast %212 : vector<1x33xf32> to vector<33x33xf32>
    %216 = arith.mulf %214, %215 : vector<33x33xf32>
    %cst_77 = arith.constant dense<0.000000e+00> : vector<33x33xf32>
    %217 = tpu.matmul %216, %216, %cst_77 {dimension_numbers = #tpu.dot_dimension_numbers<[1], [0], [0], [1], [0, 0, 1, 1], [], []>} : vector<33x33xf32>, vector<33x33xf32>, vector<33x33xf32> -> vector<33x33xf32>
    %c0_78 = arith.constant 0 : index
    %c0_79 = arith.constant 0 : index
    %c0_80 = arith.constant 0 : index
    %218 = vector.load %arg3[%c0_78, %c0_79, %c0_80] : memref<4x32x32xf32, #tpu.memory_space<vmem>>, vector<1x32x32xf32>
    %219 = vector.shape_cast %218 : vector<1x32x32xf32> to vector<32x32xf32>
    %cst_81 = arith.constant dense<0.000000e+00> : vector<33x32xf32>
    %220 = tpu.matmul %189, %219, %cst_81 {dimension_numbers = #tpu.dot_dimension_numbers<[1], [0], [0], [1], [0, 0, 1, 1], [], []>} : vector<33x32xf32>, vector<32x32xf32>, vector<33x32xf32> -> vector<33x32xf32>
    %cst_82 = arith.constant dense<0.000000e+00> : vector<33x32xf32>
    %221 = tpu.matmul %217, %220, %cst_82 {dimension_numbers = #tpu.dot_dimension_numbers<[1], [0], [0], [1], [0, 0, 1, 1], [], []>} : vector<33x33xf32>, vector<33x32xf32>, vector<33x32xf32> -> vector<33x32xf32>
    %cst_83 = arith.constant 0.000000e+00 : f32
    %222 = vector.broadcast %cst_83 : f32 to vector<33x32xf32>
    %223 = arith.maximumf %221, %222 : vector<33x32xf32>
    %c1 = arith.constant 1 : index
    %c0_84 = arith.constant 0 : index
    %c0_85 = arith.constant 0 : index
    %224 = vector.load %arg4[%c1, %c0_84, %c0_85] : memref<4x1x32xf32, #tpu.memory_space<vmem>>, vector<1x1x32xf32>
    %225 = vector.shape_cast %224 : vector<1x1x32xf32> to vector<1x32xf32>
    %cst_86 = arith.constant dense<0.000000e+00> : vector<33x1xf32>
    %226 = tpu.matmul %223, %225, %cst_86 {dimension_numbers = #tpu.dot_dimension_numbers<[1], [1], [0], [0], [0, 0, 1, 0], [], []>} : vector<33x32xf32>, vector<1x32xf32>, vector<33x1xf32> -> vector<33x1xf32>
    %227 = math.tanh %226 : vector<33x1xf32>
    %cst_87 = arith.constant dense<0.000000e+00> : vector<1x33xf32>
    %228 = tpu.matmul %225, %223, %cst_87 {dimension_numbers = #tpu.dot_dimension_numbers<[1], [1], [0], [0], [0, 0, 1, 0], [], []>} : vector<1x32xf32>, vector<33x32xf32>, vector<1x33xf32> -> vector<1x33xf32>
    %229 = math.tanh %228 : vector<1x33xf32>
    %230 = tpu.iota {dimensions = array<i32: 0>} : vector<33x33xi32>
    %231 = tpu.iota {dimensions = array<i32: 1>} : vector<33x33xi32>
    %cst_88 = arith.constant 0.000000e+00 : f32
    %232 = vector.broadcast %cst_88 : f32 to vector<33x1xf32>
    %c0_i32_89 = arith.constant 0 : i32
    %233 = vector.broadcast %c0_i32_89 : i32 to vector<33x33xi32>
    %234 = arith.cmpi sge, %230, %233 : vector<33x33xi32>
    %c18_i32_90 = arith.constant 18 : i32
    %235 = vector.broadcast %c18_i32_90 : i32 to vector<33x33xi32>
    %236 = arith.cmpi slt, %230, %235 : vector<33x33xi32>
    %237 = arith.andi %234, %236 : vector<33x33xi1>
    %c0_i32_91 = arith.constant 0 : i32
    %238 = vector.broadcast %c0_i32_91 : i32 to vector<33x33xi32>
    %239 = arith.cmpi sge, %231, %238 : vector<33x33xi32>
    %240 = arith.andi %237, %239 : vector<33x33xi1>
    %c18_i32_92 = arith.constant 18 : i32
    %241 = vector.broadcast %c18_i32_92 : i32 to vector<33x33xi32>
    %242 = arith.cmpi slt, %231, %241 : vector<33x33xi32>
    %243 = arith.andi %240, %242 : vector<33x33xi1>
    %244 = tpu.iota {dimensions = array<i32: 0>} : vector<33x1xi32>
    %c0_i32_93 = arith.constant 0 : i32
    %245 = vector.broadcast %c0_i32_93 : i32 to vector<33x1xi32>
    %246 = arith.cmpi sge, %244, %245 : vector<33x1xi32>
    %c18_i32_94 = arith.constant 18 : i32
    %247 = vector.broadcast %c18_i32_94 : i32 to vector<33x1xi32>
    %248 = arith.cmpi slt, %244, %247 : vector<33x1xi32>
    %249 = arith.andi %246, %248 : vector<33x1xi1>
    %cst_95 = arith.constant 1.800000e+01 : f32
    %cst_96 = arith.constant 0.000000e+00 : f32
    %250 = vector.broadcast %cst_95 : f32 to vector<33x1xf32>
    %251 = vector.broadcast %cst_96 : f32 to vector<33x1xf32>
    %252 = arith.select %249, %250, %251 : vector<33x1xi1>, vector<33x1xf32>
    %253 = arith.addf %232, %252 : vector<33x1xf32>
    %c18_i32_97 = arith.constant 18 : i32
    %254 = vector.broadcast %c18_i32_97 : i32 to vector<33x33xi32>
    %255 = arith.cmpi sge, %230, %254 : vector<33x33xi32>
    %c33_i32_98 = arith.constant 33 : i32
    %256 = vector.broadcast %c33_i32_98 : i32 to vector<33x33xi32>
    %257 = arith.cmpi slt, %230, %256 : vector<33x33xi32>
    %258 = arith.andi %255, %257 : vector<33x33xi1>
    %c18_i32_99 = arith.constant 18 : i32
    %259 = vector.broadcast %c18_i32_99 : i32 to vector<33x33xi32>
    %260 = arith.cmpi sge, %231, %259 : vector<33x33xi32>
    %261 = arith.andi %258, %260 : vector<33x33xi1>
    %c33_i32_100 = arith.constant 33 : i32
    %262 = vector.broadcast %c33_i32_100 : i32 to vector<33x33xi32>
    %263 = arith.cmpi slt, %231, %262 : vector<33x33xi32>
    %264 = arith.andi %261, %263 : vector<33x33xi1>
    %265 = arith.ori %243, %264 : vector<33x33xi1>
    %266 = tpu.iota {dimensions = array<i32: 0>} : vector<33x1xi32>
    %c18_i32_101 = arith.constant 18 : i32
    %267 = vector.broadcast %c18_i32_101 : i32 to vector<33x1xi32>
    %268 = arith.cmpi sge, %266, %267 : vector<33x1xi32>
    %c33_i32_102 = arith.constant 33 : i32
    %269 = vector.broadcast %c33_i32_102 : i32 to vector<33x1xi32>
    %270 = arith.cmpi slt, %266, %269 : vector<33x1xi32>
    %271 = arith.andi %268, %270 : vector<33x1xi1>
    %cst_103 = arith.constant 1.500000e+01 : f32
    %cst_104 = arith.constant 0.000000e+00 : f32
    %272 = vector.broadcast %cst_103 : f32 to vector<33x1xf32>
    %273 = vector.broadcast %cst_104 : f32 to vector<33x1xf32>
    %274 = arith.select %271, %272, %273 : vector<33x1xi1>, vector<33x1xf32>
    %275 = arith.addf %253, %274 : vector<33x1xf32>
    %276 = vector.broadcast %227 : vector<33x1xf32> to vector<33x33xf32>
    %277 = vector.broadcast %229 : vector<1x33xf32> to vector<33x33xf32>
    %278 = arith.cmpf ogt, %276, %277 : vector<33x33xf32>
    %279 = vector.broadcast %227 : vector<33x1xf32> to vector<33x33xf32>
    %280 = vector.broadcast %229 : vector<1x33xf32> to vector<33x33xf32>
    %281 = arith.cmpf oeq, %279, %280 : vector<33x33xf32>
    %282 = arith.cmpi slt, %230, %231 : vector<33x33xi32>
    %283 = arith.andi %281, %282 : vector<33x33xi1>
    %284 = arith.ori %278, %283 : vector<33x33xi1>
    %285 = arith.andi %265, %284 : vector<33x33xi1>
    %cst_105 = arith.constant 1.000000e+00 : f32
    %cst_106 = arith.constant 0.000000e+00 : f32
    %286 = vector.broadcast %cst_105 : f32 to vector<33x33xf32>
    %287 = vector.broadcast %cst_106 : f32 to vector<33x33xf32>
    %288 = arith.select %285, %286, %287 : vector<33x33xi1>, vector<33x33xf32>
    %cst_107 = arith.constant dense<0.000000e+00> : vector<33xf32>
    %289 = vector.multi_reduction <add>, %288, %cst_107 [0] : vector<33x33xf32> to vector<33xf32>
    %290 = vector.shape_cast %289 : vector<33xf32> to vector<1x33xf32>
    %cst_108 = arith.constant 1.000000e+00 : f32
    %291 = vector.broadcast %cst_108 : f32 to vector<33x1xf32>
    %292 = arith.subf %275, %291 : vector<33x1xf32>
    %cst_109 = arith.constant dense<0.000000e+00> : vector<33xf32>
    %293 = vector.multi_reduction <add>, %288, %cst_109 [1] : vector<33x33xf32> to vector<33xf32>
    %294 = vector.shape_cast %293 : vector<33xf32> to vector<33x1xf32>
    %295 = arith.subf %292, %294 : vector<33x1xf32>
    %296 = tpu.iota {dimensions = array<i32: 0>} : vector<24x33xi32>
    %297 = tpu.iota {dimensions = array<i32: 1>} : vector<24x33xi32>
    %298 = tpu.iota {dimensions = array<i32: 0>} : vector<33x24xi32>
    %299 = tpu.iota {dimensions = array<i32: 1>} : vector<33x24xi32>
    %c0_i32_110 = arith.constant 0 : i32
    %300 = vector.broadcast %c0_i32_110 : i32 to vector<24x33xi32>
    %301 = arith.cmpi sge, %296, %300 : vector<24x33xi32>
    %c13_i32 = arith.constant 13 : i32
    %302 = vector.broadcast %c13_i32 : i32 to vector<24x33xi32>
    %303 = arith.cmpi slt, %296, %302 : vector<24x33xi32>
    %304 = arith.andi %301, %303 : vector<24x33xi1>
    %c0_i32_111 = arith.constant 0 : i32
    %305 = vector.broadcast %c0_i32_111 : i32 to vector<24x33xi32>
    %306 = arith.cmpi sge, %297, %305 : vector<24x33xi32>
    %307 = arith.andi %304, %306 : vector<24x33xi1>
    %c18_i32_112 = arith.constant 18 : i32
    %308 = vector.broadcast %c18_i32_112 : i32 to vector<24x33xi32>
    %309 = arith.cmpi slt, %297, %308 : vector<24x33xi32>
    %310 = arith.andi %307, %309 : vector<24x33xi1>
    %c0_i32_113 = arith.constant 0 : i32
    %311 = vector.broadcast %c0_i32_113 : i32 to vector<24x33xi32>
    %312 = arith.subi %296, %311 : vector<24x33xi32>
    %313 = arith.sitofp %312 : vector<24x33xi32> to vector<24x33xf32>
    %314 = vector.broadcast %290 : vector<1x33xf32> to vector<24x33xf32>
    %315 = arith.cmpf oeq, %314, %313 : vector<24x33xf32>
    %316 = arith.andi %310, %315 : vector<24x33xi1>
    %c0_i32_114 = arith.constant 0 : i32
    %317 = vector.broadcast %c0_i32_114 : i32 to vector<33x24xi32>
    %318 = arith.cmpi sge, %298, %317 : vector<33x24xi32>
    %c18_i32_115 = arith.constant 18 : i32
    %319 = vector.broadcast %c18_i32_115 : i32 to vector<33x24xi32>
    %320 = arith.cmpi slt, %298, %319 : vector<33x24xi32>
    %321 = arith.andi %318, %320 : vector<33x24xi1>
    %c0_i32_116 = arith.constant 0 : i32
    %322 = vector.broadcast %c0_i32_116 : i32 to vector<33x24xi32>
    %323 = arith.cmpi sge, %299, %322 : vector<33x24xi32>
    %324 = arith.andi %321, %323 : vector<33x24xi1>
    %c13_i32_117 = arith.constant 13 : i32
    %325 = vector.broadcast %c13_i32_117 : i32 to vector<33x24xi32>
    %326 = arith.cmpi slt, %299, %325 : vector<33x24xi32>
    %327 = arith.andi %324, %326 : vector<33x24xi1>
    %c0_i32_118 = arith.constant 0 : i32
    %328 = vector.broadcast %c0_i32_118 : i32 to vector<33x24xi32>
    %329 = arith.subi %299, %328 : vector<33x24xi32>
    %330 = arith.sitofp %329 : vector<33x24xi32> to vector<33x24xf32>
    %331 = vector.broadcast %295 : vector<33x1xf32> to vector<33x24xf32>
    %332 = arith.cmpf oeq, %331, %330 : vector<33x24xf32>
    %333 = arith.andi %327, %332 : vector<33x24xi1>
    %c13_i32_119 = arith.constant 13 : i32
    %334 = vector.broadcast %c13_i32_119 : i32 to vector<24x33xi32>
    %335 = arith.cmpi sge, %296, %334 : vector<24x33xi32>
    %c24_i32 = arith.constant 24 : i32
    %336 = vector.broadcast %c24_i32 : i32 to vector<24x33xi32>
    %337 = arith.cmpi slt, %296, %336 : vector<24x33xi32>
    %338 = arith.andi %335, %337 : vector<24x33xi1>
    %c18_i32_120 = arith.constant 18 : i32
    %339 = vector.broadcast %c18_i32_120 : i32 to vector<24x33xi32>
    %340 = arith.cmpi sge, %297, %339 : vector<24x33xi32>
    %341 = arith.andi %338, %340 : vector<24x33xi1>
    %c33_i32_121 = arith.constant 33 : i32
    %342 = vector.broadcast %c33_i32_121 : i32 to vector<24x33xi32>
    %343 = arith.cmpi slt, %297, %342 : vector<24x33xi32>
    %344 = arith.andi %341, %343 : vector<24x33xi1>
    %c13_i32_122 = arith.constant 13 : i32
    %345 = vector.broadcast %c13_i32_122 : i32 to vector<24x33xi32>
    %346 = arith.subi %296, %345 : vector<24x33xi32>
    %347 = arith.sitofp %346 : vector<24x33xi32> to vector<24x33xf32>
    %348 = vector.broadcast %290 : vector<1x33xf32> to vector<24x33xf32>
    %349 = arith.cmpf oeq, %348, %347 : vector<24x33xf32>
    %350 = arith.andi %344, %349 : vector<24x33xi1>
    %c18_i32_123 = arith.constant 18 : i32
    %351 = vector.broadcast %c18_i32_123 : i32 to vector<33x24xi32>
    %352 = arith.cmpi sge, %298, %351 : vector<33x24xi32>
    %c33_i32_124 = arith.constant 33 : i32
    %353 = vector.broadcast %c33_i32_124 : i32 to vector<33x24xi32>
    %354 = arith.cmpi slt, %298, %353 : vector<33x24xi32>
    %355 = arith.andi %352, %354 : vector<33x24xi1>
    %c13_i32_125 = arith.constant 13 : i32
    %356 = vector.broadcast %c13_i32_125 : i32 to vector<33x24xi32>
    %357 = arith.cmpi sge, %299, %356 : vector<33x24xi32>
    %358 = arith.andi %355, %357 : vector<33x24xi1>
    %c24_i32_126 = arith.constant 24 : i32
    %359 = vector.broadcast %c24_i32_126 : i32 to vector<33x24xi32>
    %360 = arith.cmpi slt, %299, %359 : vector<33x24xi32>
    %361 = arith.andi %358, %360 : vector<33x24xi1>
    %c13_i32_127 = arith.constant 13 : i32
    %362 = vector.broadcast %c13_i32_127 : i32 to vector<33x24xi32>
    %363 = arith.subi %299, %362 : vector<33x24xi32>
    %364 = arith.sitofp %363 : vector<33x24xi32> to vector<33x24xf32>
    %365 = vector.broadcast %295 : vector<33x1xf32> to vector<33x24xf32>
    %366 = arith.cmpf oeq, %365, %364 : vector<33x24xf32>
    %367 = arith.andi %361, %366 : vector<33x24xi1>
    %368 = arith.ori %316, %350 : vector<24x33xi1>
    %369 = arith.ori %333, %367 : vector<33x24xi1>
    %cst_128 = arith.constant 1.000000e+00 : f32
    %cst_129 = arith.constant 0.000000e+00 : f32
    %370 = vector.broadcast %cst_128 : f32 to vector<24x33xf32>
    %371 = vector.broadcast %cst_129 : f32 to vector<24x33xf32>
    %372 = arith.select %368, %370, %371 : vector<24x33xi1>, vector<24x33xf32>
    %cst_130 = arith.constant 1.000000e+00 : f32
    %cst_131 = arith.constant 0.000000e+00 : f32
    %373 = vector.broadcast %cst_130 : f32 to vector<33x24xf32>
    %374 = vector.broadcast %cst_131 : f32 to vector<33x24xf32>
    %375 = arith.select %369, %373, %374 : vector<33x24xi1>, vector<33x24xf32>
    %376 = vector.broadcast %227 : vector<33x1xf32> to vector<33x32xf32>
    %377 = arith.mulf %223, %376 : vector<33x32xf32>
    %cst_132 = arith.constant dense<0.000000e+00> : vector<24x32xf32>
    %378 = tpu.matmul %372, %377, %cst_132 {dimension_numbers = #tpu.dot_dimension_numbers<[1], [0], [0], [1], [0, 0, 1, 1], [], []>} : vector<24x33xf32>, vector<33x32xf32>, vector<24x32xf32> -> vector<24x32xf32>
    %cst_133 = arith.constant dense<0.000000e+00> : vector<24x33xf32>
    %379 = tpu.matmul %372, %191, %cst_133 {dimension_numbers = #tpu.dot_dimension_numbers<[1], [0], [0], [1], [0, 0, 1, 1], [], []>} : vector<24x33xf32>, vector<33x33xf32>, vector<24x33xf32> -> vector<24x33xf32>
    %cst_134 = arith.constant dense<0.000000e+00> : vector<24x24xf32>
    %380 = tpu.matmul %379, %375, %cst_134 {dimension_numbers = #tpu.dot_dimension_numbers<[1], [0], [0], [1], [0, 0, 1, 1], [], []>} : vector<24x33xf32>, vector<33x24xf32>, vector<24x24xf32> -> vector<24x24xf32>
    %381 = tpu.iota {dimensions = array<i32: 0>} : vector<24x24xi32>
    %382 = tpu.iota {dimensions = array<i32: 1>} : vector<24x24xi32>
    %383 = arith.cmpi eq, %381, %382 : vector<24x24xi32>
    %cst_135 = arith.constant 1.000000e+00 : f32
    %cst_136 = arith.constant 0.000000e+00 : f32
    %384 = vector.broadcast %cst_135 : f32 to vector<24x24xf32>
    %385 = vector.broadcast %cst_136 : f32 to vector<24x24xf32>
    %386 = arith.select %383, %384, %385 : vector<24x24xi1>, vector<24x24xf32>
    %387 = arith.addf %380, %386 : vector<24x24xf32>
    %cst_137 = arith.constant dense<0.000000e+00> : vector<24xf32>
    %388 = vector.multi_reduction <add>, %387, %cst_137 [1] : vector<24x24xf32> to vector<24xf32>
    %389 = vector.shape_cast %388 : vector<24xf32> to vector<24x1xf32>
    %cst_138 = arith.constant dense<0.000000e+00> : vector<24xf32>
    %390 = vector.multi_reduction <add>, %387, %cst_138 [0] : vector<24x24xf32> to vector<24xf32>
    %391 = vector.shape_cast %390 : vector<24xf32> to vector<1x24xf32>
    %cst_139 = arith.constant 0.000000e+00 : f32
    %392 = vector.broadcast %cst_139 : f32 to vector<24x1xf32>
    %393 = arith.cmpf ogt, %389, %392 : vector<24x1xf32>
    %394 = math.rsqrt %389 : vector<24x1xf32>
    %cst_140 = arith.constant 0.000000e+00 : f32
    %395 = vector.broadcast %cst_140 : f32 to vector<24x1xf32>
    %396 = arith.select %393, %394, %395 : vector<24x1xi1>, vector<24x1xf32>
    %cst_141 = arith.constant 0.000000e+00 : f32
    %397 = vector.broadcast %cst_141 : f32 to vector<1x24xf32>
    %398 = arith.cmpf ogt, %391, %397 : vector<1x24xf32>
    %399 = math.rsqrt %391 : vector<1x24xf32>
    %cst_142 = arith.constant 0.000000e+00 : f32
    %400 = vector.broadcast %cst_142 : f32 to vector<1x24xf32>
    %401 = arith.select %398, %399, %400 : vector<1x24xi1>, vector<1x24xf32>
    %402 = vector.broadcast %396 : vector<24x1xf32> to vector<24x24xf32>
    %403 = arith.mulf %387, %402 : vector<24x24xf32>
    %404 = vector.broadcast %401 : vector<1x24xf32> to vector<24x24xf32>
    %405 = arith.mulf %403, %404 : vector<24x24xf32>
    %cst_143 = arith.constant dense<0.000000e+00> : vector<24x24xf32>
    %406 = tpu.matmul %405, %405, %cst_143 {dimension_numbers = #tpu.dot_dimension_numbers<[1], [0], [0], [1], [0, 0, 1, 1], [], []>} : vector<24x24xf32>, vector<24x24xf32>, vector<24x24xf32> -> vector<24x24xf32>
    %c1_144 = arith.constant 1 : index
    %c0_145 = arith.constant 0 : index
    %c0_146 = arith.constant 0 : index
    %407 = vector.load %arg3[%c1_144, %c0_145, %c0_146] : memref<4x32x32xf32, #tpu.memory_space<vmem>>, vector<1x32x32xf32>
    %408 = vector.shape_cast %407 : vector<1x32x32xf32> to vector<32x32xf32>
    %cst_147 = arith.constant dense<0.000000e+00> : vector<24x32xf32>
    %409 = tpu.matmul %378, %408, %cst_147 {dimension_numbers = #tpu.dot_dimension_numbers<[1], [0], [0], [1], [0, 0, 1, 1], [], []>} : vector<24x32xf32>, vector<32x32xf32>, vector<24x32xf32> -> vector<24x32xf32>
    %cst_148 = arith.constant dense<0.000000e+00> : vector<24x32xf32>
    %410 = tpu.matmul %406, %409, %cst_148 {dimension_numbers = #tpu.dot_dimension_numbers<[1], [0], [0], [1], [0, 0, 1, 1], [], []>} : vector<24x24xf32>, vector<24x32xf32>, vector<24x32xf32> -> vector<24x32xf32>
    %cst_149 = arith.constant 0.000000e+00 : f32
    %411 = vector.broadcast %cst_149 : f32 to vector<24x32xf32>
    %412 = arith.maximumf %410, %411 : vector<24x32xf32>
    %c2 = arith.constant 2 : index
    %c0_150 = arith.constant 0 : index
    %c0_151 = arith.constant 0 : index
    %413 = vector.load %arg4[%c2, %c0_150, %c0_151] : memref<4x1x32xf32, #tpu.memory_space<vmem>>, vector<1x1x32xf32>
    %414 = vector.shape_cast %413 : vector<1x1x32xf32> to vector<1x32xf32>
    %cst_152 = arith.constant dense<0.000000e+00> : vector<24x1xf32>
    %415 = tpu.matmul %412, %414, %cst_152 {dimension_numbers = #tpu.dot_dimension_numbers<[1], [1], [0], [0], [0, 0, 1, 0], [], []>} : vector<24x32xf32>, vector<1x32xf32>, vector<24x1xf32> -> vector<24x1xf32>
    %416 = math.tanh %415 : vector<24x1xf32>
    %cst_153 = arith.constant dense<0.000000e+00> : vector<1x24xf32>
    %417 = tpu.matmul %414, %412, %cst_153 {dimension_numbers = #tpu.dot_dimension_numbers<[1], [1], [0], [0], [0, 0, 1, 0], [], []>} : vector<1x32xf32>, vector<24x32xf32>, vector<1x24xf32> -> vector<1x24xf32>
    %418 = math.tanh %417 : vector<1x24xf32>
    %419 = tpu.iota {dimensions = array<i32: 0>} : vector<24x24xi32>
    %420 = tpu.iota {dimensions = array<i32: 1>} : vector<24x24xi32>
    %cst_154 = arith.constant 0.000000e+00 : f32
    %421 = vector.broadcast %cst_154 : f32 to vector<24x1xf32>
    %c0_i32_155 = arith.constant 0 : i32
    %422 = vector.broadcast %c0_i32_155 : i32 to vector<24x24xi32>
    %423 = arith.cmpi sge, %419, %422 : vector<24x24xi32>
    %c13_i32_156 = arith.constant 13 : i32
    %424 = vector.broadcast %c13_i32_156 : i32 to vector<24x24xi32>
    %425 = arith.cmpi slt, %419, %424 : vector<24x24xi32>
    %426 = arith.andi %423, %425 : vector<24x24xi1>
    %c0_i32_157 = arith.constant 0 : i32
    %427 = vector.broadcast %c0_i32_157 : i32 to vector<24x24xi32>
    %428 = arith.cmpi sge, %420, %427 : vector<24x24xi32>
    %429 = arith.andi %426, %428 : vector<24x24xi1>
    %c13_i32_158 = arith.constant 13 : i32
    %430 = vector.broadcast %c13_i32_158 : i32 to vector<24x24xi32>
    %431 = arith.cmpi slt, %420, %430 : vector<24x24xi32>
    %432 = arith.andi %429, %431 : vector<24x24xi1>
    %433 = tpu.iota {dimensions = array<i32: 0>} : vector<24x1xi32>
    %c0_i32_159 = arith.constant 0 : i32
    %434 = vector.broadcast %c0_i32_159 : i32 to vector<24x1xi32>
    %435 = arith.cmpi sge, %433, %434 : vector<24x1xi32>
    %c13_i32_160 = arith.constant 13 : i32
    %436 = vector.broadcast %c13_i32_160 : i32 to vector<24x1xi32>
    %437 = arith.cmpi slt, %433, %436 : vector<24x1xi32>
    %438 = arith.andi %435, %437 : vector<24x1xi1>
    %cst_161 = arith.constant 1.300000e+01 : f32
    %cst_162 = arith.constant 0.000000e+00 : f32
    %439 = vector.broadcast %cst_161 : f32 to vector<24x1xf32>
    %440 = vector.broadcast %cst_162 : f32 to vector<24x1xf32>
    %441 = arith.select %438, %439, %440 : vector<24x1xi1>, vector<24x1xf32>
    %442 = arith.addf %421, %441 : vector<24x1xf32>
    %c13_i32_163 = arith.constant 13 : i32
    %443 = vector.broadcast %c13_i32_163 : i32 to vector<24x24xi32>
    %444 = arith.cmpi sge, %419, %443 : vector<24x24xi32>
    %c24_i32_164 = arith.constant 24 : i32
    %445 = vector.broadcast %c24_i32_164 : i32 to vector<24x24xi32>
    %446 = arith.cmpi slt, %419, %445 : vector<24x24xi32>
    %447 = arith.andi %444, %446 : vector<24x24xi1>
    %c13_i32_165 = arith.constant 13 : i32
    %448 = vector.broadcast %c13_i32_165 : i32 to vector<24x24xi32>
    %449 = arith.cmpi sge, %420, %448 : vector<24x24xi32>
    %450 = arith.andi %447, %449 : vector<24x24xi1>
    %c24_i32_166 = arith.constant 24 : i32
    %451 = vector.broadcast %c24_i32_166 : i32 to vector<24x24xi32>
    %452 = arith.cmpi slt, %420, %451 : vector<24x24xi32>
    %453 = arith.andi %450, %452 : vector<24x24xi1>
    %454 = arith.ori %432, %453 : vector<24x24xi1>
    %455 = tpu.iota {dimensions = array<i32: 0>} : vector<24x1xi32>
    %c13_i32_167 = arith.constant 13 : i32
    %456 = vector.broadcast %c13_i32_167 : i32 to vector<24x1xi32>
    %457 = arith.cmpi sge, %455, %456 : vector<24x1xi32>
    %c24_i32_168 = arith.constant 24 : i32
    %458 = vector.broadcast %c24_i32_168 : i32 to vector<24x1xi32>
    %459 = arith.cmpi slt, %455, %458 : vector<24x1xi32>
    %460 = arith.andi %457, %459 : vector<24x1xi1>
    %cst_169 = arith.constant 1.100000e+01 : f32
    %cst_170 = arith.constant 0.000000e+00 : f32
    %461 = vector.broadcast %cst_169 : f32 to vector<24x1xf32>
    %462 = vector.broadcast %cst_170 : f32 to vector<24x1xf32>
    %463 = arith.select %460, %461, %462 : vector<24x1xi1>, vector<24x1xf32>
    %464 = arith.addf %442, %463 : vector<24x1xf32>
    %465 = vector.broadcast %416 : vector<24x1xf32> to vector<24x24xf32>
    %466 = vector.broadcast %418 : vector<1x24xf32> to vector<24x24xf32>
    %467 = arith.cmpf ogt, %465, %466 : vector<24x24xf32>
    %468 = vector.broadcast %416 : vector<24x1xf32> to vector<24x24xf32>
    %469 = vector.broadcast %418 : vector<1x24xf32> to vector<24x24xf32>
    %470 = arith.cmpf oeq, %468, %469 : vector<24x24xf32>
    %471 = arith.cmpi slt, %419, %420 : vector<24x24xi32>
    %472 = arith.andi %470, %471 : vector<24x24xi1>
    %473 = arith.ori %467, %472 : vector<24x24xi1>
    %474 = arith.andi %454, %473 : vector<24x24xi1>
    %cst_171 = arith.constant 1.000000e+00 : f32
    %cst_172 = arith.constant 0.000000e+00 : f32
    %475 = vector.broadcast %cst_171 : f32 to vector<24x24xf32>
    %476 = vector.broadcast %cst_172 : f32 to vector<24x24xf32>
    %477 = arith.select %474, %475, %476 : vector<24x24xi1>, vector<24x24xf32>
    %cst_173 = arith.constant dense<0.000000e+00> : vector<24xf32>
    %478 = vector.multi_reduction <add>, %477, %cst_173 [0] : vector<24x24xf32> to vector<24xf32>
    %479 = vector.shape_cast %478 : vector<24xf32> to vector<1x24xf32>
    %cst_174 = arith.constant 1.000000e+00 : f32
    %480 = vector.broadcast %cst_174 : f32 to vector<24x1xf32>
    %481 = arith.subf %464, %480 : vector<24x1xf32>
    %cst_175 = arith.constant dense<0.000000e+00> : vector<24xf32>
    %482 = vector.multi_reduction <add>, %477, %cst_175 [1] : vector<24x24xf32> to vector<24xf32>
    %483 = vector.shape_cast %482 : vector<24xf32> to vector<24x1xf32>
    %484 = arith.subf %481, %483 : vector<24x1xf32>
    %485 = tpu.iota {dimensions = array<i32: 0>} : vector<15x24xi32>
    %486 = tpu.iota {dimensions = array<i32: 1>} : vector<15x24xi32>
    %487 = tpu.iota {dimensions = array<i32: 0>} : vector<24x15xi32>
    %488 = tpu.iota {dimensions = array<i32: 1>} : vector<24x15xi32>
    %c0_i32_176 = arith.constant 0 : i32
    %489 = vector.broadcast %c0_i32_176 : i32 to vector<15x24xi32>
    %490 = arith.cmpi sge, %485, %489 : vector<15x24xi32>
    %c8_i32 = arith.constant 8 : i32
    %491 = vector.broadcast %c8_i32 : i32 to vector<15x24xi32>
    %492 = arith.cmpi slt, %485, %491 : vector<15x24xi32>
    %493 = arith.andi %490, %492 : vector<15x24xi1>
    %c0_i32_177 = arith.constant 0 : i32
    %494 = vector.broadcast %c0_i32_177 : i32 to vector<15x24xi32>
    %495 = arith.cmpi sge, %486, %494 : vector<15x24xi32>
    %496 = arith.andi %493, %495 : vector<15x24xi1>
    %c13_i32_178 = arith.constant 13 : i32
    %497 = vector.broadcast %c13_i32_178 : i32 to vector<15x24xi32>
    %498 = arith.cmpi slt, %486, %497 : vector<15x24xi32>
    %499 = arith.andi %496, %498 : vector<15x24xi1>
    %c0_i32_179 = arith.constant 0 : i32
    %500 = vector.broadcast %c0_i32_179 : i32 to vector<15x24xi32>
    %501 = arith.subi %485, %500 : vector<15x24xi32>
    %502 = arith.sitofp %501 : vector<15x24xi32> to vector<15x24xf32>
    %503 = vector.broadcast %479 : vector<1x24xf32> to vector<15x24xf32>
    %504 = arith.cmpf oeq, %503, %502 : vector<15x24xf32>
    %505 = arith.andi %499, %504 : vector<15x24xi1>
    %c0_i32_180 = arith.constant 0 : i32
    %506 = vector.broadcast %c0_i32_180 : i32 to vector<24x15xi32>
    %507 = arith.cmpi sge, %487, %506 : vector<24x15xi32>
    %c13_i32_181 = arith.constant 13 : i32
    %508 = vector.broadcast %c13_i32_181 : i32 to vector<24x15xi32>
    %509 = arith.cmpi slt, %487, %508 : vector<24x15xi32>
    %510 = arith.andi %507, %509 : vector<24x15xi1>
    %c0_i32_182 = arith.constant 0 : i32
    %511 = vector.broadcast %c0_i32_182 : i32 to vector<24x15xi32>
    %512 = arith.cmpi sge, %488, %511 : vector<24x15xi32>
    %513 = arith.andi %510, %512 : vector<24x15xi1>
    %c8_i32_183 = arith.constant 8 : i32
    %514 = vector.broadcast %c8_i32_183 : i32 to vector<24x15xi32>
    %515 = arith.cmpi slt, %488, %514 : vector<24x15xi32>
    %516 = arith.andi %513, %515 : vector<24x15xi1>
    %c0_i32_184 = arith.constant 0 : i32
    %517 = vector.broadcast %c0_i32_184 : i32 to vector<24x15xi32>
    %518 = arith.subi %488, %517 : vector<24x15xi32>
    %519 = arith.sitofp %518 : vector<24x15xi32> to vector<24x15xf32>
    %520 = vector.broadcast %484 : vector<24x1xf32> to vector<24x15xf32>
    %521 = arith.cmpf oeq, %520, %519 : vector<24x15xf32>
    %522 = arith.andi %516, %521 : vector<24x15xi1>
    %c8_i32_185 = arith.constant 8 : i32
    %523 = vector.broadcast %c8_i32_185 : i32 to vector<15x24xi32>
    %524 = arith.cmpi sge, %485, %523 : vector<15x24xi32>
    %c15_i32 = arith.constant 15 : i32
    %525 = vector.broadcast %c15_i32 : i32 to vector<15x24xi32>
    %526 = arith.cmpi slt, %485, %525 : vector<15x24xi32>
    %527 = arith.andi %524, %526 : vector<15x24xi1>
    %c13_i32_186 = arith.constant 13 : i32
    %528 = vector.broadcast %c13_i32_186 : i32 to vector<15x24xi32>
    %529 = arith.cmpi sge, %486, %528 : vector<15x24xi32>
    %530 = arith.andi %527, %529 : vector<15x24xi1>
    %c24_i32_187 = arith.constant 24 : i32
    %531 = vector.broadcast %c24_i32_187 : i32 to vector<15x24xi32>
    %532 = arith.cmpi slt, %486, %531 : vector<15x24xi32>
    %533 = arith.andi %530, %532 : vector<15x24xi1>
    %c8_i32_188 = arith.constant 8 : i32
    %534 = vector.broadcast %c8_i32_188 : i32 to vector<15x24xi32>
    %535 = arith.subi %485, %534 : vector<15x24xi32>
    %536 = arith.sitofp %535 : vector<15x24xi32> to vector<15x24xf32>
    %537 = vector.broadcast %479 : vector<1x24xf32> to vector<15x24xf32>
    %538 = arith.cmpf oeq, %537, %536 : vector<15x24xf32>
    %539 = arith.andi %533, %538 : vector<15x24xi1>
    %c13_i32_189 = arith.constant 13 : i32
    %540 = vector.broadcast %c13_i32_189 : i32 to vector<24x15xi32>
    %541 = arith.cmpi sge, %487, %540 : vector<24x15xi32>
    %c24_i32_190 = arith.constant 24 : i32
    %542 = vector.broadcast %c24_i32_190 : i32 to vector<24x15xi32>
    %543 = arith.cmpi slt, %487, %542 : vector<24x15xi32>
    %544 = arith.andi %541, %543 : vector<24x15xi1>
    %c8_i32_191 = arith.constant 8 : i32
    %545 = vector.broadcast %c8_i32_191 : i32 to vector<24x15xi32>
    %546 = arith.cmpi sge, %488, %545 : vector<24x15xi32>
    %547 = arith.andi %544, %546 : vector<24x15xi1>
    %c15_i32_192 = arith.constant 15 : i32
    %548 = vector.broadcast %c15_i32_192 : i32 to vector<24x15xi32>
    %549 = arith.cmpi slt, %488, %548 : vector<24x15xi32>
    %550 = arith.andi %547, %549 : vector<24x15xi1>
    %c8_i32_193 = arith.constant 8 : i32
    %551 = vector.broadcast %c8_i32_193 : i32 to vector<24x15xi32>
    %552 = arith.subi %488, %551 : vector<24x15xi32>
    %553 = arith.sitofp %552 : vector<24x15xi32> to vector<24x15xf32>
    %554 = vector.broadcast %484 : vector<24x1xf32> to vector<24x15xf32>
    %555 = arith.cmpf oeq, %554, %553 : vector<24x15xf32>
    %556 = arith.andi %550, %555 : vector<24x15xi1>
    %557 = arith.ori %505, %539 : vector<15x24xi1>
    %558 = arith.ori %522, %556 : vector<24x15xi1>
    %cst_194 = arith.constant 1.000000e+00 : f32
    %cst_195 = arith.constant 0.000000e+00 : f32
    %559 = vector.broadcast %cst_194 : f32 to vector<15x24xf32>
    %560 = vector.broadcast %cst_195 : f32 to vector<15x24xf32>
    %561 = arith.select %557, %559, %560 : vector<15x24xi1>, vector<15x24xf32>
    %cst_196 = arith.constant 1.000000e+00 : f32
    %cst_197 = arith.constant 0.000000e+00 : f32
    %562 = vector.broadcast %cst_196 : f32 to vector<24x15xf32>
    %563 = vector.broadcast %cst_197 : f32 to vector<24x15xf32>
    %564 = arith.select %558, %562, %563 : vector<24x15xi1>, vector<24x15xf32>
    %565 = vector.broadcast %416 : vector<24x1xf32> to vector<24x32xf32>
    %566 = arith.mulf %412, %565 : vector<24x32xf32>
    %cst_198 = arith.constant dense<0.000000e+00> : vector<15x32xf32>
    %567 = tpu.matmul %561, %566, %cst_198 {dimension_numbers = #tpu.dot_dimension_numbers<[1], [0], [0], [1], [0, 0, 1, 1], [], []>} : vector<15x24xf32>, vector<24x32xf32>, vector<15x32xf32> -> vector<15x32xf32>
    %cst_199 = arith.constant dense<0.000000e+00> : vector<15x24xf32>
    %568 = tpu.matmul %561, %380, %cst_199 {dimension_numbers = #tpu.dot_dimension_numbers<[1], [0], [0], [1], [0, 0, 1, 1], [], []>} : vector<15x24xf32>, vector<24x24xf32>, vector<15x24xf32> -> vector<15x24xf32>
    %cst_200 = arith.constant dense<0.000000e+00> : vector<15x15xf32>
    %569 = tpu.matmul %568, %564, %cst_200 {dimension_numbers = #tpu.dot_dimension_numbers<[1], [0], [0], [1], [0, 0, 1, 1], [], []>} : vector<15x24xf32>, vector<24x15xf32>, vector<15x15xf32> -> vector<15x15xf32>
    %570 = tpu.iota {dimensions = array<i32: 0>} : vector<15x15xi32>
    %571 = tpu.iota {dimensions = array<i32: 1>} : vector<15x15xi32>
    %572 = arith.cmpi eq, %570, %571 : vector<15x15xi32>
    %cst_201 = arith.constant 1.000000e+00 : f32
    %cst_202 = arith.constant 0.000000e+00 : f32
    %573 = vector.broadcast %cst_201 : f32 to vector<15x15xf32>
    %574 = vector.broadcast %cst_202 : f32 to vector<15x15xf32>
    %575 = arith.select %572, %573, %574 : vector<15x15xi1>, vector<15x15xf32>
    %576 = arith.addf %569, %575 : vector<15x15xf32>
    %cst_203 = arith.constant dense<0.000000e+00> : vector<15xf32>
    %577 = vector.multi_reduction <add>, %576, %cst_203 [1] : vector<15x15xf32> to vector<15xf32>
    %578 = vector.shape_cast %577 : vector<15xf32> to vector<15x1xf32>
    %cst_204 = arith.constant dense<0.000000e+00> : vector<15xf32>
    %579 = vector.multi_reduction <add>, %576, %cst_204 [0] : vector<15x15xf32> to vector<15xf32>
    %580 = vector.shape_cast %579 : vector<15xf32> to vector<1x15xf32>
    %cst_205 = arith.constant 0.000000e+00 : f32
    %581 = vector.broadcast %cst_205 : f32 to vector<15x1xf32>
    %582 = arith.cmpf ogt, %578, %581 : vector<15x1xf32>
    %583 = math.rsqrt %578 : vector<15x1xf32>
    %cst_206 = arith.constant 0.000000e+00 : f32
    %584 = vector.broadcast %cst_206 : f32 to vector<15x1xf32>
    %585 = arith.select %582, %583, %584 : vector<15x1xi1>, vector<15x1xf32>
    %cst_207 = arith.constant 0.000000e+00 : f32
    %586 = vector.broadcast %cst_207 : f32 to vector<1x15xf32>
    %587 = arith.cmpf ogt, %580, %586 : vector<1x15xf32>
    %588 = math.rsqrt %580 : vector<1x15xf32>
    %cst_208 = arith.constant 0.000000e+00 : f32
    %589 = vector.broadcast %cst_208 : f32 to vector<1x15xf32>
    %590 = arith.select %587, %588, %589 : vector<1x15xi1>, vector<1x15xf32>
    %591 = vector.broadcast %585 : vector<15x1xf32> to vector<15x15xf32>
    %592 = arith.mulf %576, %591 : vector<15x15xf32>
    %593 = vector.broadcast %590 : vector<1x15xf32> to vector<15x15xf32>
    %594 = arith.mulf %592, %593 : vector<15x15xf32>
    %cst_209 = arith.constant dense<0.000000e+00> : vector<15x15xf32>
    %595 = tpu.matmul %594, %594, %cst_209 {dimension_numbers = #tpu.dot_dimension_numbers<[1], [0], [0], [1], [0, 0, 1, 1], [], []>} : vector<15x15xf32>, vector<15x15xf32>, vector<15x15xf32> -> vector<15x15xf32>
    %c2_210 = arith.constant 2 : index
    %c0_211 = arith.constant 0 : index
    %c0_212 = arith.constant 0 : index
    %596 = vector.load %arg3[%c2_210, %c0_211, %c0_212] : memref<4x32x32xf32, #tpu.memory_space<vmem>>, vector<1x32x32xf32>
    %597 = vector.shape_cast %596 : vector<1x32x32xf32> to vector<32x32xf32>
    %cst_213 = arith.constant dense<0.000000e+00> : vector<15x32xf32>
    %598 = tpu.matmul %567, %597, %cst_213 {dimension_numbers = #tpu.dot_dimension_numbers<[1], [0], [0], [1], [0, 0, 1, 1], [], []>} : vector<15x32xf32>, vector<32x32xf32>, vector<15x32xf32> -> vector<15x32xf32>
    %cst_214 = arith.constant dense<0.000000e+00> : vector<15x32xf32>
    %599 = tpu.matmul %595, %598, %cst_214 {dimension_numbers = #tpu.dot_dimension_numbers<[1], [0], [0], [1], [0, 0, 1, 1], [], []>} : vector<15x15xf32>, vector<15x32xf32>, vector<15x32xf32> -> vector<15x32xf32>
    %cst_215 = arith.constant 0.000000e+00 : f32
    %600 = vector.broadcast %cst_215 : f32 to vector<15x32xf32>
    %601 = arith.maximumf %599, %600 : vector<15x32xf32>
    %c3 = arith.constant 3 : index
    %c0_216 = arith.constant 0 : index
    %c0_217 = arith.constant 0 : index
    %602 = vector.load %arg4[%c3, %c0_216, %c0_217] : memref<4x1x32xf32, #tpu.memory_space<vmem>>, vector<1x1x32xf32>
    %603 = vector.shape_cast %602 : vector<1x1x32xf32> to vector<1x32xf32>
    %cst_218 = arith.constant dense<0.000000e+00> : vector<15x1xf32>
    %604 = tpu.matmul %601, %603, %cst_218 {dimension_numbers = #tpu.dot_dimension_numbers<[1], [1], [0], [0], [0, 0, 1, 0], [], []>} : vector<15x32xf32>, vector<1x32xf32>, vector<15x1xf32> -> vector<15x1xf32>
    %605 = math.tanh %604 : vector<15x1xf32>
    %cst_219 = arith.constant dense<0.000000e+00> : vector<1x15xf32>
    %606 = tpu.matmul %603, %601, %cst_219 {dimension_numbers = #tpu.dot_dimension_numbers<[1], [1], [0], [0], [0, 0, 1, 0], [], []>} : vector<1x32xf32>, vector<15x32xf32>, vector<1x15xf32> -> vector<1x15xf32>
    %607 = math.tanh %606 : vector<1x15xf32>
    %608 = tpu.iota {dimensions = array<i32: 0>} : vector<15x15xi32>
    %609 = tpu.iota {dimensions = array<i32: 1>} : vector<15x15xi32>
    %cst_220 = arith.constant 0.000000e+00 : f32
    %610 = vector.broadcast %cst_220 : f32 to vector<15x1xf32>
    %c0_i32_221 = arith.constant 0 : i32
    %611 = vector.broadcast %c0_i32_221 : i32 to vector<15x15xi32>
    %612 = arith.cmpi sge, %608, %611 : vector<15x15xi32>
    %c8_i32_222 = arith.constant 8 : i32
    %613 = vector.broadcast %c8_i32_222 : i32 to vector<15x15xi32>
    %614 = arith.cmpi slt, %608, %613 : vector<15x15xi32>
    %615 = arith.andi %612, %614 : vector<15x15xi1>
    %c0_i32_223 = arith.constant 0 : i32
    %616 = vector.broadcast %c0_i32_223 : i32 to vector<15x15xi32>
    %617 = arith.cmpi sge, %609, %616 : vector<15x15xi32>
    %618 = arith.andi %615, %617 : vector<15x15xi1>
    %c8_i32_224 = arith.constant 8 : i32
    %619 = vector.broadcast %c8_i32_224 : i32 to vector<15x15xi32>
    %620 = arith.cmpi slt, %609, %619 : vector<15x15xi32>
    %621 = arith.andi %618, %620 : vector<15x15xi1>
    %622 = tpu.iota {dimensions = array<i32: 0>} : vector<15x1xi32>
    %c0_i32_225 = arith.constant 0 : i32
    %623 = vector.broadcast %c0_i32_225 : i32 to vector<15x1xi32>
    %624 = arith.cmpi sge, %622, %623 : vector<15x1xi32>
    %c8_i32_226 = arith.constant 8 : i32
    %625 = vector.broadcast %c8_i32_226 : i32 to vector<15x1xi32>
    %626 = arith.cmpi slt, %622, %625 : vector<15x1xi32>
    %627 = arith.andi %624, %626 : vector<15x1xi1>
    %cst_227 = arith.constant 8.000000e+00 : f32
    %cst_228 = arith.constant 0.000000e+00 : f32
    %628 = vector.broadcast %cst_227 : f32 to vector<15x1xf32>
    %629 = vector.broadcast %cst_228 : f32 to vector<15x1xf32>
    %630 = arith.select %627, %628, %629 : vector<15x1xi1>, vector<15x1xf32>
    %631 = arith.addf %610, %630 : vector<15x1xf32>
    %c8_i32_229 = arith.constant 8 : i32
    %632 = vector.broadcast %c8_i32_229 : i32 to vector<15x15xi32>
    %633 = arith.cmpi sge, %608, %632 : vector<15x15xi32>
    %c15_i32_230 = arith.constant 15 : i32
    %634 = vector.broadcast %c15_i32_230 : i32 to vector<15x15xi32>
    %635 = arith.cmpi slt, %608, %634 : vector<15x15xi32>
    %636 = arith.andi %633, %635 : vector<15x15xi1>
    %c8_i32_231 = arith.constant 8 : i32
    %637 = vector.broadcast %c8_i32_231 : i32 to vector<15x15xi32>
    %638 = arith.cmpi sge, %609, %637 : vector<15x15xi32>
    %639 = arith.andi %636, %638 : vector<15x15xi1>
    %c15_i32_232 = arith.constant 15 : i32
    %640 = vector.broadcast %c15_i32_232 : i32 to vector<15x15xi32>
    %641 = arith.cmpi slt, %609, %640 : vector<15x15xi32>
    %642 = arith.andi %639, %641 : vector<15x15xi1>
    %643 = arith.ori %621, %642 : vector<15x15xi1>
    %644 = tpu.iota {dimensions = array<i32: 0>} : vector<15x1xi32>
    %c8_i32_233 = arith.constant 8 : i32
    %645 = vector.broadcast %c8_i32_233 : i32 to vector<15x1xi32>
    %646 = arith.cmpi sge, %644, %645 : vector<15x1xi32>
    %c15_i32_234 = arith.constant 15 : i32
    %647 = vector.broadcast %c15_i32_234 : i32 to vector<15x1xi32>
    %648 = arith.cmpi slt, %644, %647 : vector<15x1xi32>
    %649 = arith.andi %646, %648 : vector<15x1xi1>
    %cst_235 = arith.constant 7.000000e+00 : f32
    %cst_236 = arith.constant 0.000000e+00 : f32
    %650 = vector.broadcast %cst_235 : f32 to vector<15x1xf32>
    %651 = vector.broadcast %cst_236 : f32 to vector<15x1xf32>
    %652 = arith.select %649, %650, %651 : vector<15x1xi1>, vector<15x1xf32>
    %653 = arith.addf %631, %652 : vector<15x1xf32>
    %654 = vector.broadcast %605 : vector<15x1xf32> to vector<15x15xf32>
    %655 = vector.broadcast %607 : vector<1x15xf32> to vector<15x15xf32>
    %656 = arith.cmpf ogt, %654, %655 : vector<15x15xf32>
    %657 = vector.broadcast %605 : vector<15x1xf32> to vector<15x15xf32>
    %658 = vector.broadcast %607 : vector<1x15xf32> to vector<15x15xf32>
    %659 = arith.cmpf oeq, %657, %658 : vector<15x15xf32>
    %660 = arith.cmpi slt, %608, %609 : vector<15x15xi32>
    %661 = arith.andi %659, %660 : vector<15x15xi1>
    %662 = arith.ori %656, %661 : vector<15x15xi1>
    %663 = arith.andi %643, %662 : vector<15x15xi1>
    %cst_237 = arith.constant 1.000000e+00 : f32
    %cst_238 = arith.constant 0.000000e+00 : f32
    %664 = vector.broadcast %cst_237 : f32 to vector<15x15xf32>
    %665 = vector.broadcast %cst_238 : f32 to vector<15x15xf32>
    %666 = arith.select %663, %664, %665 : vector<15x15xi1>, vector<15x15xf32>
    %cst_239 = arith.constant dense<0.000000e+00> : vector<15xf32>
    %667 = vector.multi_reduction <add>, %666, %cst_239 [0] : vector<15x15xf32> to vector<15xf32>
    %668 = vector.shape_cast %667 : vector<15xf32> to vector<1x15xf32>
    %cst_240 = arith.constant 1.000000e+00 : f32
    %669 = vector.broadcast %cst_240 : f32 to vector<15x1xf32>
    %670 = arith.subf %653, %669 : vector<15x1xf32>
    %cst_241 = arith.constant dense<0.000000e+00> : vector<15xf32>
    %671 = vector.multi_reduction <add>, %666, %cst_241 [1] : vector<15x15xf32> to vector<15xf32>
    %672 = vector.shape_cast %671 : vector<15xf32> to vector<15x1xf32>
    %673 = arith.subf %670, %672 : vector<15x1xf32>
    %674 = tpu.iota {dimensions = array<i32: 0>} : vector<8x15xi32>
    %675 = tpu.iota {dimensions = array<i32: 1>} : vector<8x15xi32>
    %676 = tpu.iota {dimensions = array<i32: 0>} : vector<15x8xi32>
    %677 = tpu.iota {dimensions = array<i32: 1>} : vector<15x8xi32>
    %c0_i32_242 = arith.constant 0 : i32
    %678 = vector.broadcast %c0_i32_242 : i32 to vector<8x15xi32>
    %679 = arith.cmpi sge, %674, %678 : vector<8x15xi32>
    %c4_i32 = arith.constant 4 : i32
    %680 = vector.broadcast %c4_i32 : i32 to vector<8x15xi32>
    %681 = arith.cmpi slt, %674, %680 : vector<8x15xi32>
    %682 = arith.andi %679, %681 : vector<8x15xi1>
    %c0_i32_243 = arith.constant 0 : i32
    %683 = vector.broadcast %c0_i32_243 : i32 to vector<8x15xi32>
    %684 = arith.cmpi sge, %675, %683 : vector<8x15xi32>
    %685 = arith.andi %682, %684 : vector<8x15xi1>
    %c8_i32_244 = arith.constant 8 : i32
    %686 = vector.broadcast %c8_i32_244 : i32 to vector<8x15xi32>
    %687 = arith.cmpi slt, %675, %686 : vector<8x15xi32>
    %688 = arith.andi %685, %687 : vector<8x15xi1>
    %c0_i32_245 = arith.constant 0 : i32
    %689 = vector.broadcast %c0_i32_245 : i32 to vector<8x15xi32>
    %690 = arith.subi %674, %689 : vector<8x15xi32>
    %691 = arith.sitofp %690 : vector<8x15xi32> to vector<8x15xf32>
    %692 = vector.broadcast %668 : vector<1x15xf32> to vector<8x15xf32>
    %693 = arith.cmpf oeq, %692, %691 : vector<8x15xf32>
    %694 = arith.andi %688, %693 : vector<8x15xi1>
    %c0_i32_246 = arith.constant 0 : i32
    %695 = vector.broadcast %c0_i32_246 : i32 to vector<15x8xi32>
    %696 = arith.cmpi sge, %676, %695 : vector<15x8xi32>
    %c8_i32_247 = arith.constant 8 : i32
    %697 = vector.broadcast %c8_i32_247 : i32 to vector<15x8xi32>
    %698 = arith.cmpi slt, %676, %697 : vector<15x8xi32>
    %699 = arith.andi %696, %698 : vector<15x8xi1>
    %c0_i32_248 = arith.constant 0 : i32
    %700 = vector.broadcast %c0_i32_248 : i32 to vector<15x8xi32>
    %701 = arith.cmpi sge, %677, %700 : vector<15x8xi32>
    %702 = arith.andi %699, %701 : vector<15x8xi1>
    %c4_i32_249 = arith.constant 4 : i32
    %703 = vector.broadcast %c4_i32_249 : i32 to vector<15x8xi32>
    %704 = arith.cmpi slt, %677, %703 : vector<15x8xi32>
    %705 = arith.andi %702, %704 : vector<15x8xi1>
    %c0_i32_250 = arith.constant 0 : i32
    %706 = vector.broadcast %c0_i32_250 : i32 to vector<15x8xi32>
    %707 = arith.subi %677, %706 : vector<15x8xi32>
    %708 = arith.sitofp %707 : vector<15x8xi32> to vector<15x8xf32>
    %709 = vector.broadcast %673 : vector<15x1xf32> to vector<15x8xf32>
    %710 = arith.cmpf oeq, %709, %708 : vector<15x8xf32>
    %711 = arith.andi %705, %710 : vector<15x8xi1>
    %c4_i32_251 = arith.constant 4 : i32
    %712 = vector.broadcast %c4_i32_251 : i32 to vector<8x15xi32>
    %713 = arith.cmpi sge, %674, %712 : vector<8x15xi32>
    %c8_i32_252 = arith.constant 8 : i32
    %714 = vector.broadcast %c8_i32_252 : i32 to vector<8x15xi32>
    %715 = arith.cmpi slt, %674, %714 : vector<8x15xi32>
    %716 = arith.andi %713, %715 : vector<8x15xi1>
    %c8_i32_253 = arith.constant 8 : i32
    %717 = vector.broadcast %c8_i32_253 : i32 to vector<8x15xi32>
    %718 = arith.cmpi sge, %675, %717 : vector<8x15xi32>
    %719 = arith.andi %716, %718 : vector<8x15xi1>
    %c15_i32_254 = arith.constant 15 : i32
    %720 = vector.broadcast %c15_i32_254 : i32 to vector<8x15xi32>
    %721 = arith.cmpi slt, %675, %720 : vector<8x15xi32>
    %722 = arith.andi %719, %721 : vector<8x15xi1>
    %c4_i32_255 = arith.constant 4 : i32
    %723 = vector.broadcast %c4_i32_255 : i32 to vector<8x15xi32>
    %724 = arith.subi %674, %723 : vector<8x15xi32>
    %725 = arith.sitofp %724 : vector<8x15xi32> to vector<8x15xf32>
    %726 = vector.broadcast %668 : vector<1x15xf32> to vector<8x15xf32>
    %727 = arith.cmpf oeq, %726, %725 : vector<8x15xf32>
    %728 = arith.andi %722, %727 : vector<8x15xi1>
    %c8_i32_256 = arith.constant 8 : i32
    %729 = vector.broadcast %c8_i32_256 : i32 to vector<15x8xi32>
    %730 = arith.cmpi sge, %676, %729 : vector<15x8xi32>
    %c15_i32_257 = arith.constant 15 : i32
    %731 = vector.broadcast %c15_i32_257 : i32 to vector<15x8xi32>
    %732 = arith.cmpi slt, %676, %731 : vector<15x8xi32>
    %733 = arith.andi %730, %732 : vector<15x8xi1>
    %c4_i32_258 = arith.constant 4 : i32
    %734 = vector.broadcast %c4_i32_258 : i32 to vector<15x8xi32>
    %735 = arith.cmpi sge, %677, %734 : vector<15x8xi32>
    %736 = arith.andi %733, %735 : vector<15x8xi1>
    %c8_i32_259 = arith.constant 8 : i32
    %737 = vector.broadcast %c8_i32_259 : i32 to vector<15x8xi32>
    %738 = arith.cmpi slt, %677, %737 : vector<15x8xi32>
    %739 = arith.andi %736, %738 : vector<15x8xi1>
    %c4_i32_260 = arith.constant 4 : i32
    %740 = vector.broadcast %c4_i32_260 : i32 to vector<15x8xi32>
    %741 = arith.subi %677, %740 : vector<15x8xi32>
    %742 = arith.sitofp %741 : vector<15x8xi32> to vector<15x8xf32>
    %743 = vector.broadcast %673 : vector<15x1xf32> to vector<15x8xf32>
    %744 = arith.cmpf oeq, %743, %742 : vector<15x8xf32>
    %745 = arith.andi %739, %744 : vector<15x8xi1>
    %746 = arith.ori %694, %728 : vector<8x15xi1>
    %747 = arith.ori %711, %745 : vector<15x8xi1>
    %cst_261 = arith.constant 1.000000e+00 : f32
    %cst_262 = arith.constant 0.000000e+00 : f32
    %748 = vector.broadcast %cst_261 : f32 to vector<8x15xf32>
    %749 = vector.broadcast %cst_262 : f32 to vector<8x15xf32>
    %750 = arith.select %746, %748, %749 : vector<8x15xi1>, vector<8x15xf32>
    %cst_263 = arith.constant 1.000000e+00 : f32
    %cst_264 = arith.constant 0.000000e+00 : f32
    %751 = vector.broadcast %cst_263 : f32 to vector<15x8xf32>
    %752 = vector.broadcast %cst_264 : f32 to vector<15x8xf32>
    %753 = arith.select %747, %751, %752 : vector<15x8xi1>, vector<15x8xf32>
    %754 = vector.broadcast %605 : vector<15x1xf32> to vector<15x32xf32>
    %755 = arith.mulf %601, %754 : vector<15x32xf32>
    %cst_265 = arith.constant dense<0.000000e+00> : vector<8x32xf32>
    %756 = tpu.matmul %750, %755, %cst_265 {dimension_numbers = #tpu.dot_dimension_numbers<[1], [0], [0], [1], [0, 0, 1, 1], [], []>} : vector<8x15xf32>, vector<15x32xf32>, vector<8x32xf32> -> vector<8x32xf32>
    %cst_266 = arith.constant dense<0.000000e+00> : vector<8x15xf32>
    %757 = tpu.matmul %750, %569, %cst_266 {dimension_numbers = #tpu.dot_dimension_numbers<[1], [0], [0], [1], [0, 0, 1, 1], [], []>} : vector<8x15xf32>, vector<15x15xf32>, vector<8x15xf32> -> vector<8x15xf32>
    %cst_267 = arith.constant dense<0.000000e+00> : vector<8x8xf32>
    %758 = tpu.matmul %757, %753, %cst_267 {dimension_numbers = #tpu.dot_dimension_numbers<[1], [0], [0], [1], [0, 0, 1, 1], [], []>} : vector<8x15xf32>, vector<15x8xf32>, vector<8x8xf32> -> vector<8x8xf32>
    %759 = tpu.iota {dimensions = array<i32: 0>} : vector<8x8xi32>
    %760 = tpu.iota {dimensions = array<i32: 1>} : vector<8x8xi32>
    %761 = arith.cmpi eq, %759, %760 : vector<8x8xi32>
    %cst_268 = arith.constant 1.000000e+00 : f32
    %cst_269 = arith.constant 0.000000e+00 : f32
    %762 = vector.broadcast %cst_268 : f32 to vector<8x8xf32>
    %763 = vector.broadcast %cst_269 : f32 to vector<8x8xf32>
    %764 = arith.select %761, %762, %763 : vector<8x8xi1>, vector<8x8xf32>
    %765 = arith.addf %758, %764 : vector<8x8xf32>
    %cst_270 = arith.constant dense<0.000000e+00> : vector<8xf32>
    %766 = vector.multi_reduction <add>, %765, %cst_270 [1] : vector<8x8xf32> to vector<8xf32>
    %767 = vector.shape_cast %766 : vector<8xf32> to vector<8x1xf32>
    %cst_271 = arith.constant dense<0.000000e+00> : vector<8xf32>
    %768 = vector.multi_reduction <add>, %765, %cst_271 [0] : vector<8x8xf32> to vector<8xf32>
    %769 = vector.shape_cast %768 : vector<8xf32> to vector<1x8xf32>
    %cst_272 = arith.constant 0.000000e+00 : f32
    %770 = vector.broadcast %cst_272 : f32 to vector<8x1xf32>
    %771 = arith.cmpf ogt, %767, %770 : vector<8x1xf32>
    %772 = math.rsqrt %767 : vector<8x1xf32>
    %cst_273 = arith.constant 0.000000e+00 : f32
    %773 = vector.broadcast %cst_273 : f32 to vector<8x1xf32>
    %774 = arith.select %771, %772, %773 : vector<8x1xi1>, vector<8x1xf32>
    %cst_274 = arith.constant 0.000000e+00 : f32
    %775 = vector.broadcast %cst_274 : f32 to vector<1x8xf32>
    %776 = arith.cmpf ogt, %769, %775 : vector<1x8xf32>
    %777 = math.rsqrt %769 : vector<1x8xf32>
    %cst_275 = arith.constant 0.000000e+00 : f32
    %778 = vector.broadcast %cst_275 : f32 to vector<1x8xf32>
    %779 = arith.select %776, %777, %778 : vector<1x8xi1>, vector<1x8xf32>
    %780 = vector.broadcast %774 : vector<8x1xf32> to vector<8x8xf32>
    %781 = arith.mulf %765, %780 : vector<8x8xf32>
    %782 = vector.broadcast %779 : vector<1x8xf32> to vector<8x8xf32>
    %783 = arith.mulf %781, %782 : vector<8x8xf32>
    %cst_276 = arith.constant dense<0.000000e+00> : vector<8x8xf32>
    %784 = tpu.matmul %783, %783, %cst_276 {dimension_numbers = #tpu.dot_dimension_numbers<[1], [0], [0], [1], [0, 0, 1, 1], [], []>} : vector<8x8xf32>, vector<8x8xf32>, vector<8x8xf32> -> vector<8x8xf32>
    %c3_277 = arith.constant 3 : index
    %c0_278 = arith.constant 0 : index
    %c0_279 = arith.constant 0 : index
    %785 = vector.load %arg3[%c3_277, %c0_278, %c0_279] : memref<4x32x32xf32, #tpu.memory_space<vmem>>, vector<1x32x32xf32>
    %786 = vector.shape_cast %785 : vector<1x32x32xf32> to vector<32x32xf32>
    %cst_280 = arith.constant dense<0.000000e+00> : vector<8x32xf32>
    %787 = tpu.matmul %756, %786, %cst_280 {dimension_numbers = #tpu.dot_dimension_numbers<[1], [0], [0], [1], [0, 0, 1, 1], [], []>} : vector<8x32xf32>, vector<32x32xf32>, vector<8x32xf32> -> vector<8x32xf32>
    %cst_281 = arith.constant dense<0.000000e+00> : vector<8x32xf32>
    %788 = tpu.matmul %784, %787, %cst_281 {dimension_numbers = #tpu.dot_dimension_numbers<[1], [0], [0], [1], [0, 0, 1, 1], [], []>} : vector<8x8xf32>, vector<8x32xf32>, vector<8x32xf32> -> vector<8x32xf32>
    %cst_282 = arith.constant 0.000000e+00 : f32
    %789 = vector.broadcast %cst_282 : f32 to vector<8x32xf32>
    %790 = arith.maximumf %788, %789 : vector<8x32xf32>
    %cst_283 = arith.constant dense<0.000000e+00> : vector<15x32xf32>
    %791 = tpu.matmul %753, %790, %cst_283 {dimension_numbers = #tpu.dot_dimension_numbers<[1], [0], [0], [1], [0, 0, 1, 1], [], []>} : vector<15x8xf32>, vector<8x32xf32>, vector<15x32xf32> -> vector<15x32xf32>
    %792 = arith.addf %601, %791 : vector<15x32xf32>
    %c0_284 = arith.constant 0 : index
    %c0_285 = arith.constant 0 : index
    %c0_286 = arith.constant 0 : index
    %793 = vector.load %arg5[%c0_284, %c0_285, %c0_286] : memref<4x32x32xf32, #tpu.memory_space<vmem>>, vector<1x32x32xf32>
    %794 = vector.shape_cast %793 : vector<1x32x32xf32> to vector<32x32xf32>
    %cst_287 = arith.constant dense<0.000000e+00> : vector<15x32xf32>
    %795 = tpu.matmul %792, %794, %cst_287 {dimension_numbers = #tpu.dot_dimension_numbers<[1], [0], [0], [1], [0, 0, 1, 1], [], []>} : vector<15x32xf32>, vector<32x32xf32>, vector<15x32xf32> -> vector<15x32xf32>
    %cst_288 = arith.constant dense<0.000000e+00> : vector<15x32xf32>
    %796 = tpu.matmul %595, %795, %cst_288 {dimension_numbers = #tpu.dot_dimension_numbers<[1], [0], [0], [1], [0, 0, 1, 1], [], []>} : vector<15x15xf32>, vector<15x32xf32>, vector<15x32xf32> -> vector<15x32xf32>
    %cst_289 = arith.constant 0.000000e+00 : f32
    %797 = vector.broadcast %cst_289 : f32 to vector<15x32xf32>
    %798 = arith.maximumf %796, %797 : vector<15x32xf32>
    %cst_290 = arith.constant dense<0.000000e+00> : vector<24x32xf32>
    %799 = tpu.matmul %564, %798, %cst_290 {dimension_numbers = #tpu.dot_dimension_numbers<[1], [0], [0], [1], [0, 0, 1, 1], [], []>} : vector<24x15xf32>, vector<15x32xf32>, vector<24x32xf32> -> vector<24x32xf32>
    %800 = arith.addf %412, %799 : vector<24x32xf32>
    %c1_291 = arith.constant 1 : index
    %c0_292 = arith.constant 0 : index
    %c0_293 = arith.constant 0 : index
    %801 = vector.load %arg5[%c1_291, %c0_292, %c0_293] : memref<4x32x32xf32, #tpu.memory_space<vmem>>, vector<1x32x32xf32>
    %802 = vector.shape_cast %801 : vector<1x32x32xf32> to vector<32x32xf32>
    %cst_294 = arith.constant dense<0.000000e+00> : vector<24x32xf32>
    %803 = tpu.matmul %800, %802, %cst_294 {dimension_numbers = #tpu.dot_dimension_numbers<[1], [0], [0], [1], [0, 0, 1, 1], [], []>} : vector<24x32xf32>, vector<32x32xf32>, vector<24x32xf32> -> vector<24x32xf32>
    %cst_295 = arith.constant dense<0.000000e+00> : vector<24x32xf32>
    %804 = tpu.matmul %406, %803, %cst_295 {dimension_numbers = #tpu.dot_dimension_numbers<[1], [0], [0], [1], [0, 0, 1, 1], [], []>} : vector<24x24xf32>, vector<24x32xf32>, vector<24x32xf32> -> vector<24x32xf32>
    %cst_296 = arith.constant 0.000000e+00 : f32
    %805 = vector.broadcast %cst_296 : f32 to vector<24x32xf32>
    %806 = arith.maximumf %804, %805 : vector<24x32xf32>
    %cst_297 = arith.constant dense<0.000000e+00> : vector<33x32xf32>
    %807 = tpu.matmul %375, %806, %cst_297 {dimension_numbers = #tpu.dot_dimension_numbers<[1], [0], [0], [1], [0, 0, 1, 1], [], []>} : vector<33x24xf32>, vector<24x32xf32>, vector<33x32xf32> -> vector<33x32xf32>
    %808 = arith.addf %223, %807 : vector<33x32xf32>
    %c2_298 = arith.constant 2 : index
    %c0_299 = arith.constant 0 : index
    %c0_300 = arith.constant 0 : index
    %809 = vector.load %arg5[%c2_298, %c0_299, %c0_300] : memref<4x32x32xf32, #tpu.memory_space<vmem>>, vector<1x32x32xf32>
    %810 = vector.shape_cast %809 : vector<1x32x32xf32> to vector<32x32xf32>
    %cst_301 = arith.constant dense<0.000000e+00> : vector<33x32xf32>
    %811 = tpu.matmul %808, %810, %cst_301 {dimension_numbers = #tpu.dot_dimension_numbers<[1], [0], [0], [1], [0, 0, 1, 1], [], []>} : vector<33x32xf32>, vector<32x32xf32>, vector<33x32xf32> -> vector<33x32xf32>
    %cst_302 = arith.constant dense<0.000000e+00> : vector<33x32xf32>
    %812 = tpu.matmul %217, %811, %cst_302 {dimension_numbers = #tpu.dot_dimension_numbers<[1], [0], [0], [1], [0, 0, 1, 1], [], []>} : vector<33x33xf32>, vector<33x32xf32>, vector<33x32xf32> -> vector<33x32xf32>
    %cst_303 = arith.constant 0.000000e+00 : f32
    %813 = vector.broadcast %cst_303 : f32 to vector<33x32xf32>
    %814 = arith.maximumf %812, %813 : vector<33x32xf32>
    %cst_304 = arith.constant dense<0.000000e+00> : vector<36x32xf32>
    %815 = tpu.matmul %186, %814, %cst_304 {dimension_numbers = #tpu.dot_dimension_numbers<[1], [0], [0], [1], [0, 0, 1, 1], [], []>} : vector<36x33xf32>, vector<33x32xf32>, vector<36x32xf32> -> vector<36x32xf32>
    %816 = arith.addf %34, %815 : vector<36x32xf32>
    %c3_305 = arith.constant 3 : index
    %c0_306 = arith.constant 0 : index
    %c0_307 = arith.constant 0 : index
    %817 = vector.load %arg5[%c3_305, %c0_306, %c0_307] : memref<4x32x32xf32, #tpu.memory_space<vmem>>, vector<1x32x32xf32>
    %818 = vector.shape_cast %817 : vector<1x32x32xf32> to vector<32x32xf32>
    %cst_308 = arith.constant dense<0.000000e+00> : vector<36x32xf32>
    %819 = tpu.matmul %816, %818, %cst_308 {dimension_numbers = #tpu.dot_dimension_numbers<[1], [0], [0], [1], [0, 0, 1, 1], [], []>} : vector<36x32xf32>, vector<32x32xf32>, vector<36x32xf32> -> vector<36x32xf32>
    %cst_309 = arith.constant dense<0.000000e+00> : vector<36x32xf32>
    %820 = tpu.matmul %30, %819, %cst_309 {dimension_numbers = #tpu.dot_dimension_numbers<[1], [0], [0], [1], [0, 0, 1, 1], [], []>} : vector<36x36xf32>, vector<36x32xf32>, vector<36x32xf32> -> vector<36x32xf32>
    %cst_310 = arith.constant dense<0.000000e+00> : vector<36x16xf32>
    %821 = tpu.matmul %820, %3, %cst_310 {dimension_numbers = #tpu.dot_dimension_numbers<[1], [0], [0], [1], [0, 0, 1, 1], [], []>} : vector<36x32xf32>, vector<32x16xf32>, vector<36x16xf32> -> vector<36x16xf32>
    %cst_311 = arith.constant dense<0.000000e+00> : vector<36x16xf32>
    %822 = tpu.matmul %34, %4, %cst_311 {dimension_numbers = #tpu.dot_dimension_numbers<[1], [0], [0], [1], [0, 0, 1, 1], [], []>} : vector<36x32xf32>, vector<32x16xf32>, vector<36x16xf32> -> vector<36x16xf32>
    %823 = arith.addf %821, %822 : vector<36x16xf32>
    %cst_312 = arith.constant dense<0.000000e+00> : vector<36x16xf32>
    %824 = tpu.matmul %30, %823, %cst_312 {dimension_numbers = #tpu.dot_dimension_numbers<[1], [0], [0], [1], [0, 0, 1, 1], [], []>} : vector<36x36xf32>, vector<36x16xf32>, vector<36x16xf32> -> vector<36x16xf32>
    %c0_313 = arith.constant 0 : index
    %c0_314 = arith.constant 0 : index
    %825 = vector.load %arg8[%c0_313, %c0_314] : memref<16x16xf32, #tpu.memory_space<vmem>>, vector<16x16xf32>
    %c0_315 = arith.constant 0 : index
    %c0_316 = arith.constant 0 : index
    %826 = vector.load %arg9[%c0_315, %c0_316] : memref<1x16xf32, #tpu.memory_space<vmem>>, vector<1x16xf32>
    %c0_317 = arith.constant 0 : index
    %c0_318 = arith.constant 0 : index
    %827 = vector.load %arg11[%c0_317, %c0_318] : memref<1x32xf32, #tpu.memory_space<vmem>>, vector<1x32xf32>
    %c0_319 = arith.constant 0 : index
    %c0_320 = arith.constant 0 : index
    %828 = vector.load %arg13[%c0_319, %c0_320] : memref<1x32xf32, #tpu.memory_space<vmem>>, vector<1x32xf32>
    %c0_321 = arith.constant 0 : index
    %c0_322 = arith.constant 0 : index
    %829 = vector.load %arg14[%c0_321, %c0_322] : memref<32x4xf32, #tpu.memory_space<vmem>>, vector<32x4xf32>
    %c0_323 = arith.constant 0 : index
    %c0_324 = arith.constant 0 : index
    %830 = vector.load %arg15[%c0_323, %c0_324] : memref<1x4xf32, #tpu.memory_space<vmem>>, vector<1x4xf32>
    %831 = tpu.iota {dimensions = array<i32: 1>} : vector<1x16xi32>
    %c15_i32_325 = arith.constant 15 : i32
    %832 = vector.broadcast %c15_i32_325 : i32 to vector<1x16xi32>
    %833 = arith.cmpi eq, %831, %832 : vector<1x16xi32>
    %cst_326 = arith.constant 1.000000e+00 : f32
    %cst_327 = arith.constant 0.000000e+00 : f32
    %834 = vector.broadcast %cst_326 : f32 to vector<1x16xf32>
    %835 = vector.broadcast %cst_327 : f32 to vector<1x16xf32>
    %836 = arith.select %833, %834, %835 : vector<1x16xi1>, vector<1x16xf32>
    %837 = tpu.iota {dimensions = array<i32: 0>} : vector<16x1xi32>
    %c15_i32_328 = arith.constant 15 : i32
    %838 = vector.broadcast %c15_i32_328 : i32 to vector<16x1xi32>
    %839 = arith.cmpi eq, %837, %838 : vector<16x1xi32>
    %cst_329 = arith.constant 1.000000e+00 : f32
    %cst_330 = arith.constant 0.000000e+00 : f32
    %840 = vector.broadcast %cst_329 : f32 to vector<16x1xf32>
    %841 = vector.broadcast %cst_330 : f32 to vector<16x1xf32>
    %842 = arith.select %839, %840, %841 : vector<16x1xi1>, vector<16x1xf32>
    %cst_331 = arith.constant dense<0.000000e+00> : vector<1x36xf32>
    %843 = tpu.matmul %836, %824, %cst_331 {dimension_numbers = #tpu.dot_dimension_numbers<[1], [1], [0], [0], [0, 0, 1, 0], [], []>} : vector<1x16xf32>, vector<36x16xf32>, vector<1x36xf32> -> vector<1x36xf32>
    %cst_332 = arith.constant dense<0.000000e+00> : vector<36x1xf32>
    %844 = tpu.matmul %824, %842, %cst_332 {dimension_numbers = #tpu.dot_dimension_numbers<[1], [0], [0], [1], [0, 0, 1, 1], [], []>} : vector<36x16xf32>, vector<16x1xf32>, vector<36x1xf32> -> vector<36x1xf32>
    %845 = tpu.iota {dimensions = array<i32: 0>} : vector<36x36xi32>
    %846 = tpu.iota {dimensions = array<i32: 1>} : vector<36x36xi32>
    %c0_i32_333 = arith.constant 0 : i32
    %847 = vector.broadcast %c0_i32_333 : i32 to vector<36x36xi32>
    %848 = arith.cmpi sge, %845, %847 : vector<36x36xi32>
    %c20_i32_334 = arith.constant 20 : i32
    %849 = vector.broadcast %c20_i32_334 : i32 to vector<36x36xi32>
    %850 = arith.cmpi slt, %845, %849 : vector<36x36xi32>
    %851 = arith.andi %848, %850 : vector<36x36xi1>
    %c0_i32_335 = arith.constant 0 : i32
    %852 = vector.broadcast %c0_i32_335 : i32 to vector<36x36xi32>
    %853 = arith.cmpi sge, %846, %852 : vector<36x36xi32>
    %854 = arith.andi %851, %853 : vector<36x36xi1>
    %c20_i32_336 = arith.constant 20 : i32
    %855 = vector.broadcast %c20_i32_336 : i32 to vector<36x36xi32>
    %856 = arith.cmpi slt, %846, %855 : vector<36x36xi32>
    %857 = arith.andi %854, %856 : vector<36x36xi1>
    %c20_i32_337 = arith.constant 20 : i32
    %858 = vector.broadcast %c20_i32_337 : i32 to vector<36x36xi32>
    %859 = arith.cmpi sge, %845, %858 : vector<36x36xi32>
    %c36_i32_338 = arith.constant 36 : i32
    %860 = vector.broadcast %c36_i32_338 : i32 to vector<36x36xi32>
    %861 = arith.cmpi slt, %845, %860 : vector<36x36xi32>
    %862 = arith.andi %859, %861 : vector<36x36xi1>
    %c20_i32_339 = arith.constant 20 : i32
    %863 = vector.broadcast %c20_i32_339 : i32 to vector<36x36xi32>
    %864 = arith.cmpi sge, %846, %863 : vector<36x36xi32>
    %865 = arith.andi %862, %864 : vector<36x36xi1>
    %c36_i32_340 = arith.constant 36 : i32
    %866 = vector.broadcast %c36_i32_340 : i32 to vector<36x36xi32>
    %867 = arith.cmpi slt, %846, %866 : vector<36x36xi32>
    %868 = arith.andi %865, %867 : vector<36x36xi1>
    %869 = arith.ori %857, %868 : vector<36x36xi1>
    %870 = vector.broadcast %844 : vector<36x1xf32> to vector<36x36xf32>
    %871 = vector.broadcast %843 : vector<1x36xf32> to vector<36x36xf32>
    %872 = arith.cmpf ogt, %870, %871 : vector<36x36xf32>
    %873 = vector.broadcast %844 : vector<36x1xf32> to vector<36x36xf32>
    %874 = vector.broadcast %843 : vector<1x36xf32> to vector<36x36xf32>
    %875 = arith.cmpf oeq, %873, %874 : vector<36x36xf32>
    %876 = arith.cmpi slt, %845, %846 : vector<36x36xi32>
    %877 = arith.andi %875, %876 : vector<36x36xi1>
    %878 = arith.ori %872, %877 : vector<36x36xi1>
    %879 = arith.andi %869, %878 : vector<36x36xi1>
    %cst_341 = arith.constant 1.000000e+00 : f32
    %cst_342 = arith.constant 0.000000e+00 : f32
    %880 = vector.broadcast %cst_341 : f32 to vector<36x36xf32>
    %881 = vector.broadcast %cst_342 : f32 to vector<36x36xf32>
    %882 = arith.select %879, %880, %881 : vector<36x36xi1>, vector<36x36xf32>
    %cst_343 = arith.constant dense<0.000000e+00> : vector<36xf32>
    %883 = vector.multi_reduction <add>, %882, %cst_343 [0] : vector<36x36xf32> to vector<36xf32>
    %884 = vector.shape_cast %883 : vector<36xf32> to vector<1x36xf32>
    %885 = tpu.iota {dimensions = array<i32: 0>} : vector<32x36xi32>
    %886 = tpu.iota {dimensions = array<i32: 1>} : vector<32x36xi32>
    %c0_i32_344 = arith.constant 0 : i32
    %887 = vector.broadcast %c0_i32_344 : i32 to vector<32x36xi32>
    %888 = arith.cmpi sge, %885, %887 : vector<32x36xi32>
    %c16_i32 = arith.constant 16 : i32
    %889 = vector.broadcast %c16_i32 : i32 to vector<32x36xi32>
    %890 = arith.cmpi slt, %885, %889 : vector<32x36xi32>
    %891 = arith.andi %888, %890 : vector<32x36xi1>
    %c0_i32_345 = arith.constant 0 : i32
    %892 = vector.broadcast %c0_i32_345 : i32 to vector<32x36xi32>
    %893 = arith.cmpi sge, %886, %892 : vector<32x36xi32>
    %894 = arith.andi %891, %893 : vector<32x36xi1>
    %c20_i32_346 = arith.constant 20 : i32
    %895 = vector.broadcast %c20_i32_346 : i32 to vector<32x36xi32>
    %896 = arith.cmpi slt, %886, %895 : vector<32x36xi32>
    %897 = arith.andi %894, %896 : vector<32x36xi1>
    %c0_i32_347 = arith.constant 0 : i32
    %898 = vector.broadcast %c0_i32_347 : i32 to vector<32x36xi32>
    %899 = arith.subi %885, %898 : vector<32x36xi32>
    %900 = arith.sitofp %899 : vector<32x36xi32> to vector<32x36xf32>
    %901 = vector.broadcast %884 : vector<1x36xf32> to vector<32x36xf32>
    %902 = arith.cmpf oeq, %901, %900 : vector<32x36xf32>
    %903 = arith.andi %897, %902 : vector<32x36xi1>
    %c16_i32_348 = arith.constant 16 : i32
    %904 = vector.broadcast %c16_i32_348 : i32 to vector<32x36xi32>
    %905 = arith.cmpi sge, %885, %904 : vector<32x36xi32>
    %c32_i32 = arith.constant 32 : i32
    %906 = vector.broadcast %c32_i32 : i32 to vector<32x36xi32>
    %907 = arith.cmpi slt, %885, %906 : vector<32x36xi32>
    %908 = arith.andi %905, %907 : vector<32x36xi1>
    %c20_i32_349 = arith.constant 20 : i32
    %909 = vector.broadcast %c20_i32_349 : i32 to vector<32x36xi32>
    %910 = arith.cmpi sge, %886, %909 : vector<32x36xi32>
    %911 = arith.andi %908, %910 : vector<32x36xi1>
    %c36_i32_350 = arith.constant 36 : i32
    %912 = vector.broadcast %c36_i32_350 : i32 to vector<32x36xi32>
    %913 = arith.cmpi slt, %886, %912 : vector<32x36xi32>
    %914 = arith.andi %911, %913 : vector<32x36xi1>
    %c16_i32_351 = arith.constant 16 : i32
    %915 = vector.broadcast %c16_i32_351 : i32 to vector<32x36xi32>
    %916 = arith.subi %885, %915 : vector<32x36xi32>
    %917 = arith.sitofp %916 : vector<32x36xi32> to vector<32x36xf32>
    %918 = vector.broadcast %884 : vector<1x36xf32> to vector<32x36xf32>
    %919 = arith.cmpf oeq, %918, %917 : vector<32x36xf32>
    %920 = arith.andi %914, %919 : vector<32x36xi1>
    %921 = arith.ori %903, %920 : vector<32x36xi1>
    %cst_352 = arith.constant 1.000000e+00 : f32
    %cst_353 = arith.constant 0.000000e+00 : f32
    %922 = vector.broadcast %cst_352 : f32 to vector<32x36xf32>
    %923 = vector.broadcast %cst_353 : f32 to vector<32x36xf32>
    %924 = arith.select %921, %922, %923 : vector<32x36xi1>, vector<32x36xf32>
    %cst_354 = arith.constant dense<0.000000e+00> : vector<32x16xf32>
    %925 = tpu.matmul %924, %824, %cst_354 {dimension_numbers = #tpu.dot_dimension_numbers<[1], [0], [0], [1], [0, 0, 1, 1], [], []>} : vector<32x36xf32>, vector<36x16xf32>, vector<32x16xf32> -> vector<32x16xf32>
    %cst_355 = arith.constant dense<0.000000e+00> : vector<32x16xf32>
    %926 = tpu.matmul %925, %825, %cst_355 {dimension_numbers = #tpu.dot_dimension_numbers<[1], [0], [0], [1], [0, 0, 1, 1], [], []>} : vector<32x16xf32>, vector<16x16xf32>, vector<32x16xf32> -> vector<32x16xf32>
    %927 = vector.broadcast %826 : vector<1x16xf32> to vector<32x16xf32>
    %928 = arith.addf %926, %927 : vector<32x16xf32>
    %cst_356 = arith.constant 0.000000e+00 : f32
    %929 = vector.broadcast %cst_356 : f32 to vector<32x16xf32>
    %930 = arith.maximumf %928, %929 : vector<32x16xf32>
    %931 = tpu.iota {dimensions = array<i32: 0>} : vector<16x32xi32>
    %932 = tpu.iota {dimensions = array<i32: 1>} : vector<16x32xi32>
    %c0_i32_357 = arith.constant 0 : i32
    %933 = vector.broadcast %c0_i32_357 : i32 to vector<16x32xi32>
    %934 = arith.cmpi sge, %931, %933 : vector<16x32xi32>
    %c8_i32_358 = arith.constant 8 : i32
    %935 = vector.broadcast %c8_i32_358 : i32 to vector<16x32xi32>
    %936 = arith.cmpi slt, %931, %935 : vector<16x32xi32>
    %937 = arith.andi %934, %936 : vector<16x32xi1>
    %c0_i32_359 = arith.constant 0 : i32
    %938 = vector.broadcast %c0_i32_359 : i32 to vector<16x32xi32>
    %939 = arith.subi %931, %938 : vector<16x32xi32>
    %c2_i32 = arith.constant 2 : i32
    %940 = vector.broadcast %c2_i32 : i32 to vector<16x32xi32>
    %941 = arith.muli %940, %939 : vector<16x32xi32>
    %c0_i32_360 = arith.constant 0 : i32
    %942 = vector.broadcast %c0_i32_360 : i32 to vector<16x32xi32>
    %943 = arith.addi %942, %941 : vector<16x32xi32>
    %944 = arith.cmpi eq, %932, %943 : vector<16x32xi32>
    %945 = arith.andi %937, %944 : vector<16x32xi1>
    %c1_i32 = arith.constant 1 : i32
    %946 = vector.broadcast %c1_i32 : i32 to vector<16x32xi32>
    %947 = arith.addi %943, %946 : vector<16x32xi32>
    %948 = arith.cmpi eq, %932, %947 : vector<16x32xi32>
    %949 = arith.andi %937, %948 : vector<16x32xi1>
    %c8_i32_361 = arith.constant 8 : i32
    %950 = vector.broadcast %c8_i32_361 : i32 to vector<16x32xi32>
    %951 = arith.cmpi sge, %931, %950 : vector<16x32xi32>
    %c16_i32_362 = arith.constant 16 : i32
    %952 = vector.broadcast %c16_i32_362 : i32 to vector<16x32xi32>
    %953 = arith.cmpi slt, %931, %952 : vector<16x32xi32>
    %954 = arith.andi %951, %953 : vector<16x32xi1>
    %c8_i32_363 = arith.constant 8 : i32
    %955 = vector.broadcast %c8_i32_363 : i32 to vector<16x32xi32>
    %956 = arith.subi %931, %955 : vector<16x32xi32>
    %c2_i32_364 = arith.constant 2 : i32
    %957 = vector.broadcast %c2_i32_364 : i32 to vector<16x32xi32>
    %958 = arith.muli %957, %956 : vector<16x32xi32>
    %c16_i32_365 = arith.constant 16 : i32
    %959 = vector.broadcast %c16_i32_365 : i32 to vector<16x32xi32>
    %960 = arith.addi %959, %958 : vector<16x32xi32>
    %961 = arith.cmpi eq, %932, %960 : vector<16x32xi32>
    %962 = arith.andi %954, %961 : vector<16x32xi1>
    %c1_i32_366 = arith.constant 1 : i32
    %963 = vector.broadcast %c1_i32_366 : i32 to vector<16x32xi32>
    %964 = arith.addi %960, %963 : vector<16x32xi32>
    %965 = arith.cmpi eq, %932, %964 : vector<16x32xi32>
    %966 = arith.andi %954, %965 : vector<16x32xi1>
    %967 = arith.ori %945, %962 : vector<16x32xi1>
    %968 = arith.ori %949, %966 : vector<16x32xi1>
    %cst_367 = arith.constant 1.000000e+00 : f32
    %cst_368 = arith.constant 0.000000e+00 : f32
    %969 = vector.broadcast %cst_367 : f32 to vector<16x32xf32>
    %970 = vector.broadcast %cst_368 : f32 to vector<16x32xf32>
    %971 = arith.select %967, %969, %970 : vector<16x32xi1>, vector<16x32xf32>
    %cst_369 = arith.constant dense<0.000000e+00> : vector<16x16xf32>
    %972 = tpu.matmul %971, %930, %cst_369 {dimension_numbers = #tpu.dot_dimension_numbers<[1], [0], [0], [1], [0, 0, 1, 1], [], []>} : vector<16x32xf32>, vector<32x16xf32>, vector<16x16xf32> -> vector<16x16xf32>
    %cst_370 = arith.constant 1.000000e+00 : f32
    %cst_371 = arith.constant 0.000000e+00 : f32
    %973 = vector.broadcast %cst_370 : f32 to vector<16x32xf32>
    %974 = vector.broadcast %cst_371 : f32 to vector<16x32xf32>
    %975 = arith.select %968, %973, %974 : vector<16x32xi1>, vector<16x32xf32>
    %cst_372 = arith.constant dense<0.000000e+00> : vector<16x16xf32>
    %976 = tpu.matmul %975, %930, %cst_372 {dimension_numbers = #tpu.dot_dimension_numbers<[1], [0], [0], [1], [0, 0, 1, 1], [], []>} : vector<16x32xf32>, vector<32x16xf32>, vector<16x16xf32> -> vector<16x16xf32>
    %977 = arith.maximumf %972, %976 : vector<16x16xf32>
    %978 = tpu.iota {dimensions = array<i32: 0>} : vector<8x16xi32>
    %979 = tpu.iota {dimensions = array<i32: 1>} : vector<8x16xi32>
    %c0_i32_373 = arith.constant 0 : i32
    %980 = vector.broadcast %c0_i32_373 : i32 to vector<8x16xi32>
    %981 = arith.cmpi sge, %978, %980 : vector<8x16xi32>
    %c4_i32_374 = arith.constant 4 : i32
    %982 = vector.broadcast %c4_i32_374 : i32 to vector<8x16xi32>
    %983 = arith.cmpi slt, %978, %982 : vector<8x16xi32>
    %984 = arith.andi %981, %983 : vector<8x16xi1>
    %c0_i32_375 = arith.constant 0 : i32
    %985 = vector.broadcast %c0_i32_375 : i32 to vector<8x16xi32>
    %986 = arith.subi %978, %985 : vector<8x16xi32>
    %c0_i32_376 = arith.constant 0 : i32
    %987 = vector.broadcast %c0_i32_376 : i32 to vector<8x16xi32>
    %988 = arith.addi %986, %987 : vector<8x16xi32>
    %c0_i32_377 = arith.constant 0 : i32
    %989 = vector.broadcast %c0_i32_377 : i32 to vector<8x16xi32>
    %990 = arith.addi %988, %989 : vector<8x16xi32>
    %991 = arith.cmpi eq, %979, %990 : vector<8x16xi32>
    %992 = arith.andi %984, %991 : vector<8x16xi1>
    %c4_i32_378 = arith.constant 4 : i32
    %993 = vector.broadcast %c4_i32_378 : i32 to vector<8x16xi32>
    %994 = arith.cmpi sge, %978, %993 : vector<8x16xi32>
    %c8_i32_379 = arith.constant 8 : i32
    %995 = vector.broadcast %c8_i32_379 : i32 to vector<8x16xi32>
    %996 = arith.cmpi slt, %978, %995 : vector<8x16xi32>
    %997 = arith.andi %994, %996 : vector<8x16xi1>
    %c4_i32_380 = arith.constant 4 : i32
    %998 = vector.broadcast %c4_i32_380 : i32 to vector<8x16xi32>
    %999 = arith.subi %978, %998 : vector<8x16xi32>
    %c8_i32_381 = arith.constant 8 : i32
    %1000 = vector.broadcast %c8_i32_381 : i32 to vector<8x16xi32>
    %1001 = arith.addi %999, %1000 : vector<8x16xi32>
    %c0_i32_382 = arith.constant 0 : i32
    %1002 = vector.broadcast %c0_i32_382 : i32 to vector<8x16xi32>
    %1003 = arith.addi %1001, %1002 : vector<8x16xi32>
    %1004 = arith.cmpi eq, %979, %1003 : vector<8x16xi32>
    %1005 = arith.andi %997, %1004 : vector<8x16xi1>
    %1006 = arith.ori %992, %1005 : vector<8x16xi1>
    %cst_383 = arith.constant 1.000000e+00 : f32
    %cst_384 = arith.constant 0.000000e+00 : f32
    %1007 = vector.broadcast %cst_383 : f32 to vector<8x16xf32>
    %1008 = vector.broadcast %cst_384 : f32 to vector<8x16xf32>
    %1009 = arith.select %1006, %1007, %1008 : vector<8x16xi1>, vector<8x16xf32>
    %cst_385 = arith.constant dense<0.000000e+00> : vector<8x16xf32>
    %1010 = tpu.matmul %1009, %977, %cst_385 {dimension_numbers = #tpu.dot_dimension_numbers<[1], [0], [0], [1], [0, 0, 1, 1], [], []>} : vector<8x16xf32>, vector<16x16xf32>, vector<8x16xf32> -> vector<8x16xf32>
    %c0_386 = arith.constant 0 : index
    %c0_387 = arith.constant 0 : index
    %c0_388 = arith.constant 0 : index
    %1011 = vector.load %arg10[%c0_386, %c0_387, %c0_388] : memref<5x16x32xf32, #tpu.memory_space<vmem>>, vector<1x16x32xf32>
    %1012 = vector.shape_cast %1011 : vector<1x16x32xf32> to vector<16x32xf32>
    %cst_389 = arith.constant dense<0.000000e+00> : vector<8x32xf32>
    %1013 = tpu.matmul %1010, %1012, %cst_389 {dimension_numbers = #tpu.dot_dimension_numbers<[1], [0], [0], [1], [0, 0, 1, 1], [], []>} : vector<8x16xf32>, vector<16x32xf32>, vector<8x32xf32> -> vector<8x32xf32>
    %c0_i32_390 = arith.constant 0 : i32
    %1014 = vector.broadcast %c0_i32_390 : i32 to vector<8x16xi32>
    %1015 = arith.cmpi sge, %978, %1014 : vector<8x16xi32>
    %c4_i32_391 = arith.constant 4 : i32
    %1016 = vector.broadcast %c4_i32_391 : i32 to vector<8x16xi32>
    %1017 = arith.cmpi slt, %978, %1016 : vector<8x16xi32>
    %1018 = arith.andi %1015, %1017 : vector<8x16xi1>
    %c0_i32_392 = arith.constant 0 : i32
    %1019 = vector.broadcast %c0_i32_392 : i32 to vector<8x16xi32>
    %1020 = arith.subi %978, %1019 : vector<8x16xi32>
    %c0_i32_393 = arith.constant 0 : i32
    %1021 = vector.broadcast %c0_i32_393 : i32 to vector<8x16xi32>
    %1022 = arith.addi %1020, %1021 : vector<8x16xi32>
    %c1_i32_394 = arith.constant 1 : i32
    %1023 = vector.broadcast %c1_i32_394 : i32 to vector<8x16xi32>
    %1024 = arith.addi %1022, %1023 : vector<8x16xi32>
    %1025 = arith.cmpi eq, %979, %1024 : vector<8x16xi32>
    %1026 = arith.andi %1018, %1025 : vector<8x16xi1>
    %c4_i32_395 = arith.constant 4 : i32
    %1027 = vector.broadcast %c4_i32_395 : i32 to vector<8x16xi32>
    %1028 = arith.cmpi sge, %978, %1027 : vector<8x16xi32>
    %c8_i32_396 = arith.constant 8 : i32
    %1029 = vector.broadcast %c8_i32_396 : i32 to vector<8x16xi32>
    %1030 = arith.cmpi slt, %978, %1029 : vector<8x16xi32>
    %1031 = arith.andi %1028, %1030 : vector<8x16xi1>
    %c4_i32_397 = arith.constant 4 : i32
    %1032 = vector.broadcast %c4_i32_397 : i32 to vector<8x16xi32>
    %1033 = arith.subi %978, %1032 : vector<8x16xi32>
    %c8_i32_398 = arith.constant 8 : i32
    %1034 = vector.broadcast %c8_i32_398 : i32 to vector<8x16xi32>
    %1035 = arith.addi %1033, %1034 : vector<8x16xi32>
    %c1_i32_399 = arith.constant 1 : i32
    %1036 = vector.broadcast %c1_i32_399 : i32 to vector<8x16xi32>
    %1037 = arith.addi %1035, %1036 : vector<8x16xi32>
    %1038 = arith.cmpi eq, %979, %1037 : vector<8x16xi32>
    %1039 = arith.andi %1031, %1038 : vector<8x16xi1>
    %1040 = arith.ori %1026, %1039 : vector<8x16xi1>
    %cst_400 = arith.constant 1.000000e+00 : f32
    %cst_401 = arith.constant 0.000000e+00 : f32
    %1041 = vector.broadcast %cst_400 : f32 to vector<8x16xf32>
    %1042 = vector.broadcast %cst_401 : f32 to vector<8x16xf32>
    %1043 = arith.select %1040, %1041, %1042 : vector<8x16xi1>, vector<8x16xf32>
    %cst_402 = arith.constant dense<0.000000e+00> : vector<8x16xf32>
    %1044 = tpu.matmul %1043, %977, %cst_402 {dimension_numbers = #tpu.dot_dimension_numbers<[1], [0], [0], [1], [0, 0, 1, 1], [], []>} : vector<8x16xf32>, vector<16x16xf32>, vector<8x16xf32> -> vector<8x16xf32>
    %c1_403 = arith.constant 1 : index
    %c0_404 = arith.constant 0 : index
    %c0_405 = arith.constant 0 : index
    %1045 = vector.load %arg10[%c1_403, %c0_404, %c0_405] : memref<5x16x32xf32, #tpu.memory_space<vmem>>, vector<1x16x32xf32>
    %1046 = vector.shape_cast %1045 : vector<1x16x32xf32> to vector<16x32xf32>
    %cst_406 = arith.constant dense<0.000000e+00> : vector<8x32xf32>
    %1047 = tpu.matmul %1044, %1046, %cst_406 {dimension_numbers = #tpu.dot_dimension_numbers<[1], [0], [0], [1], [0, 0, 1, 1], [], []>} : vector<8x16xf32>, vector<16x32xf32>, vector<8x32xf32> -> vector<8x32xf32>
    %1048 = arith.addf %1013, %1047 : vector<8x32xf32>
    %c0_i32_407 = arith.constant 0 : i32
    %1049 = vector.broadcast %c0_i32_407 : i32 to vector<8x16xi32>
    %1050 = arith.cmpi sge, %978, %1049 : vector<8x16xi32>
    %c4_i32_408 = arith.constant 4 : i32
    %1051 = vector.broadcast %c4_i32_408 : i32 to vector<8x16xi32>
    %1052 = arith.cmpi slt, %978, %1051 : vector<8x16xi32>
    %1053 = arith.andi %1050, %1052 : vector<8x16xi1>
    %c0_i32_409 = arith.constant 0 : i32
    %1054 = vector.broadcast %c0_i32_409 : i32 to vector<8x16xi32>
    %1055 = arith.subi %978, %1054 : vector<8x16xi32>
    %c0_i32_410 = arith.constant 0 : i32
    %1056 = vector.broadcast %c0_i32_410 : i32 to vector<8x16xi32>
    %1057 = arith.addi %1055, %1056 : vector<8x16xi32>
    %c2_i32_411 = arith.constant 2 : i32
    %1058 = vector.broadcast %c2_i32_411 : i32 to vector<8x16xi32>
    %1059 = arith.addi %1057, %1058 : vector<8x16xi32>
    %1060 = arith.cmpi eq, %979, %1059 : vector<8x16xi32>
    %1061 = arith.andi %1053, %1060 : vector<8x16xi1>
    %c4_i32_412 = arith.constant 4 : i32
    %1062 = vector.broadcast %c4_i32_412 : i32 to vector<8x16xi32>
    %1063 = arith.cmpi sge, %978, %1062 : vector<8x16xi32>
    %c8_i32_413 = arith.constant 8 : i32
    %1064 = vector.broadcast %c8_i32_413 : i32 to vector<8x16xi32>
    %1065 = arith.cmpi slt, %978, %1064 : vector<8x16xi32>
    %1066 = arith.andi %1063, %1065 : vector<8x16xi1>
    %c4_i32_414 = arith.constant 4 : i32
    %1067 = vector.broadcast %c4_i32_414 : i32 to vector<8x16xi32>
    %1068 = arith.subi %978, %1067 : vector<8x16xi32>
    %c8_i32_415 = arith.constant 8 : i32
    %1069 = vector.broadcast %c8_i32_415 : i32 to vector<8x16xi32>
    %1070 = arith.addi %1068, %1069 : vector<8x16xi32>
    %c2_i32_416 = arith.constant 2 : i32
    %1071 = vector.broadcast %c2_i32_416 : i32 to vector<8x16xi32>
    %1072 = arith.addi %1070, %1071 : vector<8x16xi32>
    %1073 = arith.cmpi eq, %979, %1072 : vector<8x16xi32>
    %1074 = arith.andi %1066, %1073 : vector<8x16xi1>
    %1075 = arith.ori %1061, %1074 : vector<8x16xi1>
    %cst_417 = arith.constant 1.000000e+00 : f32
    %cst_418 = arith.constant 0.000000e+00 : f32
    %1076 = vector.broadcast %cst_417 : f32 to vector<8x16xf32>
    %1077 = vector.broadcast %cst_418 : f32 to vector<8x16xf32>
    %1078 = arith.select %1075, %1076, %1077 : vector<8x16xi1>, vector<8x16xf32>
    %cst_419 = arith.constant dense<0.000000e+00> : vector<8x16xf32>
    %1079 = tpu.matmul %1078, %977, %cst_419 {dimension_numbers = #tpu.dot_dimension_numbers<[1], [0], [0], [1], [0, 0, 1, 1], [], []>} : vector<8x16xf32>, vector<16x16xf32>, vector<8x16xf32> -> vector<8x16xf32>
    %c2_420 = arith.constant 2 : index
    %c0_421 = arith.constant 0 : index
    %c0_422 = arith.constant 0 : index
    %1080 = vector.load %arg10[%c2_420, %c0_421, %c0_422] : memref<5x16x32xf32, #tpu.memory_space<vmem>>, vector<1x16x32xf32>
    %1081 = vector.shape_cast %1080 : vector<1x16x32xf32> to vector<16x32xf32>
    %cst_423 = arith.constant dense<0.000000e+00> : vector<8x32xf32>
    %1082 = tpu.matmul %1079, %1081, %cst_423 {dimension_numbers = #tpu.dot_dimension_numbers<[1], [0], [0], [1], [0, 0, 1, 1], [], []>} : vector<8x16xf32>, vector<16x32xf32>, vector<8x32xf32> -> vector<8x32xf32>
    %1083 = arith.addf %1048, %1082 : vector<8x32xf32>
    %c0_i32_424 = arith.constant 0 : i32
    %1084 = vector.broadcast %c0_i32_424 : i32 to vector<8x16xi32>
    %1085 = arith.cmpi sge, %978, %1084 : vector<8x16xi32>
    %c4_i32_425 = arith.constant 4 : i32
    %1086 = vector.broadcast %c4_i32_425 : i32 to vector<8x16xi32>
    %1087 = arith.cmpi slt, %978, %1086 : vector<8x16xi32>
    %1088 = arith.andi %1085, %1087 : vector<8x16xi1>
    %c0_i32_426 = arith.constant 0 : i32
    %1089 = vector.broadcast %c0_i32_426 : i32 to vector<8x16xi32>
    %1090 = arith.subi %978, %1089 : vector<8x16xi32>
    %c0_i32_427 = arith.constant 0 : i32
    %1091 = vector.broadcast %c0_i32_427 : i32 to vector<8x16xi32>
    %1092 = arith.addi %1090, %1091 : vector<8x16xi32>
    %c3_i32 = arith.constant 3 : i32
    %1093 = vector.broadcast %c3_i32 : i32 to vector<8x16xi32>
    %1094 = arith.addi %1092, %1093 : vector<8x16xi32>
    %1095 = arith.cmpi eq, %979, %1094 : vector<8x16xi32>
    %1096 = arith.andi %1088, %1095 : vector<8x16xi1>
    %c4_i32_428 = arith.constant 4 : i32
    %1097 = vector.broadcast %c4_i32_428 : i32 to vector<8x16xi32>
    %1098 = arith.cmpi sge, %978, %1097 : vector<8x16xi32>
    %c8_i32_429 = arith.constant 8 : i32
    %1099 = vector.broadcast %c8_i32_429 : i32 to vector<8x16xi32>
    %1100 = arith.cmpi slt, %978, %1099 : vector<8x16xi32>
    %1101 = arith.andi %1098, %1100 : vector<8x16xi1>
    %c4_i32_430 = arith.constant 4 : i32
    %1102 = vector.broadcast %c4_i32_430 : i32 to vector<8x16xi32>
    %1103 = arith.subi %978, %1102 : vector<8x16xi32>
    %c8_i32_431 = arith.constant 8 : i32
    %1104 = vector.broadcast %c8_i32_431 : i32 to vector<8x16xi32>
    %1105 = arith.addi %1103, %1104 : vector<8x16xi32>
    %c3_i32_432 = arith.constant 3 : i32
    %1106 = vector.broadcast %c3_i32_432 : i32 to vector<8x16xi32>
    %1107 = arith.addi %1105, %1106 : vector<8x16xi32>
    %1108 = arith.cmpi eq, %979, %1107 : vector<8x16xi32>
    %1109 = arith.andi %1101, %1108 : vector<8x16xi1>
    %1110 = arith.ori %1096, %1109 : vector<8x16xi1>
    %cst_433 = arith.constant 1.000000e+00 : f32
    %cst_434 = arith.constant 0.000000e+00 : f32
    %1111 = vector.broadcast %cst_433 : f32 to vector<8x16xf32>
    %1112 = vector.broadcast %cst_434 : f32 to vector<8x16xf32>
    %1113 = arith.select %1110, %1111, %1112 : vector<8x16xi1>, vector<8x16xf32>
    %cst_435 = arith.constant dense<0.000000e+00> : vector<8x16xf32>
    %1114 = tpu.matmul %1113, %977, %cst_435 {dimension_numbers = #tpu.dot_dimension_numbers<[1], [0], [0], [1], [0, 0, 1, 1], [], []>} : vector<8x16xf32>, vector<16x16xf32>, vector<8x16xf32> -> vector<8x16xf32>
    %c3_436 = arith.constant 3 : index
    %c0_437 = arith.constant 0 : index
    %c0_438 = arith.constant 0 : index
    %1115 = vector.load %arg10[%c3_436, %c0_437, %c0_438] : memref<5x16x32xf32, #tpu.memory_space<vmem>>, vector<1x16x32xf32>
    %1116 = vector.shape_cast %1115 : vector<1x16x32xf32> to vector<16x32xf32>
    %cst_439 = arith.constant dense<0.000000e+00> : vector<8x32xf32>
    %1117 = tpu.matmul %1114, %1116, %cst_439 {dimension_numbers = #tpu.dot_dimension_numbers<[1], [0], [0], [1], [0, 0, 1, 1], [], []>} : vector<8x16xf32>, vector<16x32xf32>, vector<8x32xf32> -> vector<8x32xf32>
    %1118 = arith.addf %1083, %1117 : vector<8x32xf32>
    %c0_i32_440 = arith.constant 0 : i32
    %1119 = vector.broadcast %c0_i32_440 : i32 to vector<8x16xi32>
    %1120 = arith.cmpi sge, %978, %1119 : vector<8x16xi32>
    %c4_i32_441 = arith.constant 4 : i32
    %1121 = vector.broadcast %c4_i32_441 : i32 to vector<8x16xi32>
    %1122 = arith.cmpi slt, %978, %1121 : vector<8x16xi32>
    %1123 = arith.andi %1120, %1122 : vector<8x16xi1>
    %c0_i32_442 = arith.constant 0 : i32
    %1124 = vector.broadcast %c0_i32_442 : i32 to vector<8x16xi32>
    %1125 = arith.subi %978, %1124 : vector<8x16xi32>
    %c0_i32_443 = arith.constant 0 : i32
    %1126 = vector.broadcast %c0_i32_443 : i32 to vector<8x16xi32>
    %1127 = arith.addi %1125, %1126 : vector<8x16xi32>
    %c4_i32_444 = arith.constant 4 : i32
    %1128 = vector.broadcast %c4_i32_444 : i32 to vector<8x16xi32>
    %1129 = arith.addi %1127, %1128 : vector<8x16xi32>
    %1130 = arith.cmpi eq, %979, %1129 : vector<8x16xi32>
    %1131 = arith.andi %1123, %1130 : vector<8x16xi1>
    %c4_i32_445 = arith.constant 4 : i32
    %1132 = vector.broadcast %c4_i32_445 : i32 to vector<8x16xi32>
    %1133 = arith.cmpi sge, %978, %1132 : vector<8x16xi32>
    %c8_i32_446 = arith.constant 8 : i32
    %1134 = vector.broadcast %c8_i32_446 : i32 to vector<8x16xi32>
    %1135 = arith.cmpi slt, %978, %1134 : vector<8x16xi32>
    %1136 = arith.andi %1133, %1135 : vector<8x16xi1>
    %c4_i32_447 = arith.constant 4 : i32
    %1137 = vector.broadcast %c4_i32_447 : i32 to vector<8x16xi32>
    %1138 = arith.subi %978, %1137 : vector<8x16xi32>
    %c8_i32_448 = arith.constant 8 : i32
    %1139 = vector.broadcast %c8_i32_448 : i32 to vector<8x16xi32>
    %1140 = arith.addi %1138, %1139 : vector<8x16xi32>
    %c4_i32_449 = arith.constant 4 : i32
    %1141 = vector.broadcast %c4_i32_449 : i32 to vector<8x16xi32>
    %1142 = arith.addi %1140, %1141 : vector<8x16xi32>
    %1143 = arith.cmpi eq, %979, %1142 : vector<8x16xi32>
    %1144 = arith.andi %1136, %1143 : vector<8x16xi1>
    %1145 = arith.ori %1131, %1144 : vector<8x16xi1>
    %cst_450 = arith.constant 1.000000e+00 : f32
    %cst_451 = arith.constant 0.000000e+00 : f32
    %1146 = vector.broadcast %cst_450 : f32 to vector<8x16xf32>
    %1147 = vector.broadcast %cst_451 : f32 to vector<8x16xf32>
    %1148 = arith.select %1145, %1146, %1147 : vector<8x16xi1>, vector<8x16xf32>
    %cst_452 = arith.constant dense<0.000000e+00> : vector<8x16xf32>
    %1149 = tpu.matmul %1148, %977, %cst_452 {dimension_numbers = #tpu.dot_dimension_numbers<[1], [0], [0], [1], [0, 0, 1, 1], [], []>} : vector<8x16xf32>, vector<16x16xf32>, vector<8x16xf32> -> vector<8x16xf32>
    %c4 = arith.constant 4 : index
    %c0_453 = arith.constant 0 : index
    %c0_454 = arith.constant 0 : index
    %1150 = vector.load %arg10[%c4, %c0_453, %c0_454] : memref<5x16x32xf32, #tpu.memory_space<vmem>>, vector<1x16x32xf32>
    %1151 = vector.shape_cast %1150 : vector<1x16x32xf32> to vector<16x32xf32>
    %cst_455 = arith.constant dense<0.000000e+00> : vector<8x32xf32>
    %1152 = tpu.matmul %1149, %1151, %cst_455 {dimension_numbers = #tpu.dot_dimension_numbers<[1], [0], [0], [1], [0, 0, 1, 1], [], []>} : vector<8x16xf32>, vector<16x32xf32>, vector<8x32xf32> -> vector<8x32xf32>
    %1153 = arith.addf %1118, %1152 : vector<8x32xf32>
    %1154 = vector.broadcast %827 : vector<1x32xf32> to vector<8x32xf32>
    %1155 = arith.addf %1153, %1154 : vector<8x32xf32>
    %cst_456 = arith.constant 0.000000e+00 : f32
    %1156 = vector.broadcast %cst_456 : f32 to vector<8x32xf32>
    %1157 = arith.maximumf %1155, %1156 : vector<8x32xf32>
    %1158 = tpu.iota {dimensions = array<i32: 0>} : vector<2x8xi32>
    %1159 = tpu.iota {dimensions = array<i32: 1>} : vector<2x8xi32>
    %c4_i32_457 = arith.constant 4 : i32
    %1160 = vector.broadcast %c4_i32_457 : i32 to vector<2x8xi32>
    %1161 = arith.muli %1158, %1160 : vector<2x8xi32>
    %c0_i32_458 = arith.constant 0 : i32
    %1162 = vector.broadcast %c0_i32_458 : i32 to vector<2x8xi32>
    %1163 = arith.addi %1161, %1162 : vector<2x8xi32>
    %1164 = arith.cmpi eq, %1159, %1163 : vector<2x8xi32>
    %cst_459 = arith.constant 1.000000e+00 : f32
    %cst_460 = arith.constant 0.000000e+00 : f32
    %1165 = vector.broadcast %cst_459 : f32 to vector<2x8xf32>
    %1166 = vector.broadcast %cst_460 : f32 to vector<2x8xf32>
    %1167 = arith.select %1164, %1165, %1166 : vector<2x8xi1>, vector<2x8xf32>
    %cst_461 = arith.constant dense<0.000000e+00> : vector<2x32xf32>
    %1168 = tpu.matmul %1167, %1157, %cst_461 {dimension_numbers = #tpu.dot_dimension_numbers<[1], [0], [0], [1], [0, 0, 1, 1], [], []>} : vector<2x8xf32>, vector<8x32xf32>, vector<2x32xf32> -> vector<2x32xf32>
    %c0_462 = arith.constant 0 : index
    %c0_463 = arith.constant 0 : index
    %c0_464 = arith.constant 0 : index
    %1169 = vector.load %arg12[%c0_462, %c0_463, %c0_464] : memref<4x32x32xf32, #tpu.memory_space<vmem>>, vector<1x32x32xf32>
    %1170 = vector.shape_cast %1169 : vector<1x32x32xf32> to vector<32x32xf32>
    %cst_465 = arith.constant dense<0.000000e+00> : vector<2x32xf32>
    %1171 = tpu.matmul %1168, %1170, %cst_465 {dimension_numbers = #tpu.dot_dimension_numbers<[1], [0], [0], [1], [0, 0, 1, 1], [], []>} : vector<2x32xf32>, vector<32x32xf32>, vector<2x32xf32> -> vector<2x32xf32>
    %c4_i32_466 = arith.constant 4 : i32
    %1172 = vector.broadcast %c4_i32_466 : i32 to vector<2x8xi32>
    %1173 = arith.muli %1158, %1172 : vector<2x8xi32>
    %c1_i32_467 = arith.constant 1 : i32
    %1174 = vector.broadcast %c1_i32_467 : i32 to vector<2x8xi32>
    %1175 = arith.addi %1173, %1174 : vector<2x8xi32>
    %1176 = arith.cmpi eq, %1159, %1175 : vector<2x8xi32>
    %cst_468 = arith.constant 1.000000e+00 : f32
    %cst_469 = arith.constant 0.000000e+00 : f32
    %1177 = vector.broadcast %cst_468 : f32 to vector<2x8xf32>
    %1178 = vector.broadcast %cst_469 : f32 to vector<2x8xf32>
    %1179 = arith.select %1176, %1177, %1178 : vector<2x8xi1>, vector<2x8xf32>
    %cst_470 = arith.constant dense<0.000000e+00> : vector<2x32xf32>
    %1180 = tpu.matmul %1179, %1157, %cst_470 {dimension_numbers = #tpu.dot_dimension_numbers<[1], [0], [0], [1], [0, 0, 1, 1], [], []>} : vector<2x8xf32>, vector<8x32xf32>, vector<2x32xf32> -> vector<2x32xf32>
    %c1_471 = arith.constant 1 : index
    %c0_472 = arith.constant 0 : index
    %c0_473 = arith.constant 0 : index
    %1181 = vector.load %arg12[%c1_471, %c0_472, %c0_473] : memref<4x32x32xf32, #tpu.memory_space<vmem>>, vector<1x32x32xf32>
    %1182 = vector.shape_cast %1181 : vector<1x32x32xf32> to vector<32x32xf32>
    %cst_474 = arith.constant dense<0.000000e+00> : vector<2x32xf32>
    %1183 = tpu.matmul %1180, %1182, %cst_474 {dimension_numbers = #tpu.dot_dimension_numbers<[1], [0], [0], [1], [0, 0, 1, 1], [], []>} : vector<2x32xf32>, vector<32x32xf32>, vector<2x32xf32> -> vector<2x32xf32>
    %1184 = arith.addf %1171, %1183 : vector<2x32xf32>
    %c4_i32_475 = arith.constant 4 : i32
    %1185 = vector.broadcast %c4_i32_475 : i32 to vector<2x8xi32>
    %1186 = arith.muli %1158, %1185 : vector<2x8xi32>
    %c2_i32_476 = arith.constant 2 : i32
    %1187 = vector.broadcast %c2_i32_476 : i32 to vector<2x8xi32>
    %1188 = arith.addi %1186, %1187 : vector<2x8xi32>
    %1189 = arith.cmpi eq, %1159, %1188 : vector<2x8xi32>
    %cst_477 = arith.constant 1.000000e+00 : f32
    %cst_478 = arith.constant 0.000000e+00 : f32
    %1190 = vector.broadcast %cst_477 : f32 to vector<2x8xf32>
    %1191 = vector.broadcast %cst_478 : f32 to vector<2x8xf32>
    %1192 = arith.select %1189, %1190, %1191 : vector<2x8xi1>, vector<2x8xf32>
    %cst_479 = arith.constant dense<0.000000e+00> : vector<2x32xf32>
    %1193 = tpu.matmul %1192, %1157, %cst_479 {dimension_numbers = #tpu.dot_dimension_numbers<[1], [0], [0], [1], [0, 0, 1, 1], [], []>} : vector<2x8xf32>, vector<8x32xf32>, vector<2x32xf32> -> vector<2x32xf32>
    %c2_480 = arith.constant 2 : index
    %c0_481 = arith.constant 0 : index
    %c0_482 = arith.constant 0 : index
    %1194 = vector.load %arg12[%c2_480, %c0_481, %c0_482] : memref<4x32x32xf32, #tpu.memory_space<vmem>>, vector<1x32x32xf32>
    %1195 = vector.shape_cast %1194 : vector<1x32x32xf32> to vector<32x32xf32>
    %cst_483 = arith.constant dense<0.000000e+00> : vector<2x32xf32>
    %1196 = tpu.matmul %1193, %1195, %cst_483 {dimension_numbers = #tpu.dot_dimension_numbers<[1], [0], [0], [1], [0, 0, 1, 1], [], []>} : vector<2x32xf32>, vector<32x32xf32>, vector<2x32xf32> -> vector<2x32xf32>
    %1197 = arith.addf %1184, %1196 : vector<2x32xf32>
    %c4_i32_484 = arith.constant 4 : i32
    %1198 = vector.broadcast %c4_i32_484 : i32 to vector<2x8xi32>
    %1199 = arith.muli %1158, %1198 : vector<2x8xi32>
    %c3_i32_485 = arith.constant 3 : i32
    %1200 = vector.broadcast %c3_i32_485 : i32 to vector<2x8xi32>
    %1201 = arith.addi %1199, %1200 : vector<2x8xi32>
    %1202 = arith.cmpi eq, %1159, %1201 : vector<2x8xi32>
    %cst_486 = arith.constant 1.000000e+00 : f32
    %cst_487 = arith.constant 0.000000e+00 : f32
    %1203 = vector.broadcast %cst_486 : f32 to vector<2x8xf32>
    %1204 = vector.broadcast %cst_487 : f32 to vector<2x8xf32>
    %1205 = arith.select %1202, %1203, %1204 : vector<2x8xi1>, vector<2x8xf32>
    %cst_488 = arith.constant dense<0.000000e+00> : vector<2x32xf32>
    %1206 = tpu.matmul %1205, %1157, %cst_488 {dimension_numbers = #tpu.dot_dimension_numbers<[1], [0], [0], [1], [0, 0, 1, 1], [], []>} : vector<2x8xf32>, vector<8x32xf32>, vector<2x32xf32> -> vector<2x32xf32>
    %c3_489 = arith.constant 3 : index
    %c0_490 = arith.constant 0 : index
    %c0_491 = arith.constant 0 : index
    %1207 = vector.load %arg12[%c3_489, %c0_490, %c0_491] : memref<4x32x32xf32, #tpu.memory_space<vmem>>, vector<1x32x32xf32>
    %1208 = vector.shape_cast %1207 : vector<1x32x32xf32> to vector<32x32xf32>
    %cst_492 = arith.constant dense<0.000000e+00> : vector<2x32xf32>
    %1209 = tpu.matmul %1206, %1208, %cst_492 {dimension_numbers = #tpu.dot_dimension_numbers<[1], [0], [0], [1], [0, 0, 1, 1], [], []>} : vector<2x32xf32>, vector<32x32xf32>, vector<2x32xf32> -> vector<2x32xf32>
    %1210 = arith.addf %1197, %1209 : vector<2x32xf32>
    %1211 = vector.broadcast %828 : vector<1x32xf32> to vector<2x32xf32>
    %1212 = arith.addf %1210, %1211 : vector<2x32xf32>
    %cst_493 = arith.constant 0.000000e+00 : f32
    %1213 = vector.broadcast %cst_493 : f32 to vector<2x32xf32>
    %1214 = arith.maximumf %1212, %1213 : vector<2x32xf32>
    %cst_494 = arith.constant dense<0.000000e+00> : vector<2x4xf32>
    %1215 = tpu.matmul %1214, %829, %cst_494 {dimension_numbers = #tpu.dot_dimension_numbers<[1], [0], [0], [1], [0, 0, 1, 1], [], []>} : vector<2x32xf32>, vector<32x4xf32>, vector<2x4xf32> -> vector<2x4xf32>
    %1216 = vector.broadcast %830 : vector<1x4xf32> to vector<2x4xf32>
    %1217 = arith.addf %1215, %1216 : vector<2x4xf32>
    %cst_495 = arith.constant dense<0xFF800000> : vector<2xf32>
    %1218 = vector.multi_reduction <maximumf>, %1217, %cst_495 [1] : vector<2x4xf32> to vector<2xf32>
    %1219 = vector.shape_cast %1218 : vector<2xf32> to vector<2x1xf32>
    %1220 = vector.broadcast %1219 : vector<2x1xf32> to vector<2x4xf32>
    %1221 = arith.subf %1217, %1220 : vector<2x4xf32>
    %1222 = math.exp %1221 : vector<2x4xf32>
    %cst_496 = arith.constant dense<0.000000e+00> : vector<2xf32>
    %1223 = vector.multi_reduction <add>, %1222, %cst_496 [1] : vector<2x4xf32> to vector<2xf32>
    %1224 = vector.shape_cast %1223 : vector<2xf32> to vector<2x1xf32>
    %1225 = math.log %1224 : vector<2x1xf32>
    %1226 = vector.broadcast %1225 : vector<2x1xf32> to vector<2x4xf32>
    %1227 = arith.subf %1221, %1226 : vector<2x4xf32>
    %c0_497 = arith.constant 0 : index
    %c0_498 = arith.constant 0 : index
    %1228 = vector.load %arg16[%c0_497, %c0_498] : memref<2x4xf32, #tpu.memory_space<vmem>>, vector<2x4xf32>
    tpu.vector_store %arg16[%c0_497, %c0_498], %1227 {strides = array<i32>} : memref<2x4xf32, #tpu.memory_space<vmem>>, vector<2x4xf32>,
    return
  }
}

</mosaic_0001>

<bundles_post_ra>
// kernel: classifier_forward.1
= control target key start
LH: loop header
LB: loop body
LE: loop exit
PB: predicated region body
PF: predicated region fallthrough
CT: control target
= control target key end

     0   :  { %s12236_s0 = inlined_call_operand.vmem [shape: f32[36,16], index: 0, kind: input, shape index: {}]   ;;  %s12237_s1 = inlined_call_operand.vmem [shape: f32[36,36], index: 1, kind: input, shape index: {}]   ;;  %s12238_s2 = inlined_call_operand.hbm [shape: f32[16,32], index: 2, kind: input, shape index: {}]   ;;  %s12239_s3 = inlined_call_operand.vmem [shape: f32[4,32,32], index: 3, kind: input, shape index: {}]   ;;  %s12240_s4 = inlined_call_operand.vmem [shape: f32[4,1,32], index: 4, kind: input, shape index: {}]   ;;  %s12241_s5 = inlined_call_operand.hbm [shape: f32[4,32,32], index: 5, kind: input, shape index: {}]   ;;  %s12242_s6 = inlined_call_operand.vmem [shape: f32[32,16], index: 6, kind: input, shape index: {}]   ;;  %s12243_s7 = inlined_call_operand.vmem [shape: f32[32,16], index: 7, kind: input, shape index: {}]   ;;  %s12244_s8 = inlined_call_operand.hbm [shape: f32[16,16], index: 8, kind: input, shape index: {}]   ;;  %s12245_s9 = inlined_call_operand.vmem [shape: f32[1,16], index: 9, kind: input, shape index: {}]   ;;  %s12246_s10 = inlined_call_operand.hbm [shape: f32[5,16,32], index: 10, kind: input, shape index: {}]   ;;  %s12247_s11 = inlined_call_operand.vmem [shape: f32[1,32], index: 11, kind: input, shape index: {}]   ;;  %s12248_s12 = inlined_call_operand.hbm [shape: f32[4,32,32], index: 12, kind: input, shape index: {}]   ;;  %s12249_s13 = inlined_call_operand.hbm [shape: f32[1,32], index: 13, kind: input, shape index: {}]   ;;  %s12250_s14 = inlined_call_operand.vmem [shape: f32[32,4], index: 14, kind: input, shape index: {}]   ;;  %s12251_s15 = inlined_call_operand.hbm [shape: f32[1,4], index: 15, kind: input, shape index: {}]   ;;  %s12252_s16 = inlined_call_operand.hbm [shape: f32[2,4], index: 16, kind: output, shape index: {}]  }
   0x1   :  { %12373 = sst [smem:[#allocation40_spill]] %s12236_s0 }
   0x2   :  { %21 = vsyncpa [#allocation3], 0 }
   0x3   :  { %22 = vsyncpa [#allocation6], 0 }
   0x4   :  { %23 = vsyncpa [#allocation9], 0 }
   0x5   :  { %24 = vsyncpa [#allocation12], 0 }
   0x6   :  { %25 = vsyncpa [#allocation4], 0  ;;  %s10021_s21 = smov [#allocation5]   ;;  %s10022_s23 = smov [#allocation8]  }
   0x7   :  { %s51_s22 = sshll.u32 %s10021_s21, 4  ;;  %s81_s24 = sshll.u32 %s10022_s23, 4  ;;  %s52_s22 = int_to_ptr.vmem [resolvable:$true] %s51_s22  ;;  %s10123_s24 = int_to_ptr.vmem [resolvable:$true] %s81_s24 }
   0x8   :  { %s9835_s27 = scalar_lea.hbm %s12241_s5, 2048 }
   0x9   :  { %p9836_p0 = scmp.ne.s32.totalorder %s12241_s5, %s9835_s27  ;;  %p9839_p1 = scmp.lt.u32.totalorder %s9835_s27, %s12241_s5 }
   0xb   :  { %p9841_p2 = pnand %p9839_p1, %p9836_p0 }
   0xd   :  { %9844 = shalt.err (!%p9841_p2)
}
   0xe   :  { %s9845_s17 = scalar_lea.vmem %s52_s22, 2048  ;;  %p9850_p4 = scmp.lt.s32.totalorder %s52_s22, %s52_s22 }
   0xf   :  { %p9846_p3 = scmp.ne.s32.totalorder %s52_s22, %s9845_s17  ;;  %p9851_p5 = scmp.lt.s32.totalorder %s9845_s17, %s9845_s17 }
  0x11   :  { %p9852_p6 = por %p9851_p5, %p9850_p4 }
  0x13   :  { %p9853_p7 = pnand %p9852_p6, %p9846_p3 }
  0x15   :  { %9856 = shalt.err (!%p9853_p7)
}
  0x16   :  { %s10023_s18 = smov 128   ;;  %s10024_s19 = smov 8  }
  0x17   :  { %57 = dma.hbm_to_vmem [thread:$0]  %s12241_s5, 2048, %s52_s22, [#allocation6], %s10023_s18, %s10023_s18, %s10024_s19  }
  0x18   :  { %s9857_s26 = scalar_lea.hbm %s12246_s10, 1280 }
  0x19   :  { %p9858_p8 = scmp.ne.s32.totalorder %s12246_s10, %s9857_s26  ;;  %p9861_p9 = scmp.lt.u32.totalorder %s9857_s26, %s12246_s10 }
  0x1b   :  { %p9863_p10 = pnand %p9861_p9, %p9858_p8 }
  0x1d   :  { %9866 = shalt.err (!%p9863_p10)
}
  0x1e   :  { %s9867_s0 = scalar_lea.vmem %s10123_s24, 1280  ;;  %p9872_p12 = scmp.lt.s32.totalorder %s10123_s24, %s10123_s24 }
  0x1f   :  { %p9868_p11 = scmp.ne.s32.totalorder %s10123_s24, %s9867_s0  ;;  %p9873_p13 = scmp.lt.s32.totalorder %s9867_s0, %s9867_s0 }
  0x21   :  { %p9874_p0 = por %p9873_p13, %p9872_p12 }
  0x23   :  { %p9875_p1 = pnand %p9874_p0, %p9868_p11 }
  0x25   :  { %9878 = shalt.err (!%p9875_p1)
}
  0x26   :  { %87 = dma.hbm_to_vmem [thread:$0]  %s12246_s10, 1280, %s10123_s24, [#allocation9], %s10023_s18, %s10023_s18, %s10024_s19  }
  0x27   :  { %s10025_s17 = smov [#allocation11]   ;;  %s10026_s21 = smov [#allocation2]  }
  0x28   :  { %s108_s20 = sshll.u32 %s10025_s17, 4  ;;  %s35_s23 = sshll.u32 %s10026_s21, 4  ;;  %s109_s20 = int_to_ptr.vmem [resolvable:$true] %s108_s20  ;;  %s10160_s23 = int_to_ptr.vmem [resolvable:$true] %s35_s23 }
  0x29   :  { %s9879_s27 = scalar_lea.hbm %s12249_s13, 16 }
  0x2a   :  { %p9880_p2 = scmp.ne.s32.totalorder %s12249_s13, %s9879_s27  ;;  %p9883_p3 = scmp.lt.u32.totalorder %s9879_s27, %s12249_s13 }
  0x2c   :  { %p9885_p4 = pnand %p9883_p3, %p9880_p2 }
  0x2e   :  { %9888 = shalt.err (!%p9885_p4)
}
  0x2f   :  { %s9889_s10 = scalar_lea.vmem %s109_s20, 16  ;;  %s9893_s24 = scalar_lea.vmem %s109_s20, 32 }
  0x30   :  { %p9890_p5 = scmp.ne.s32.totalorder %s109_s20, %s9889_s10  ;;  %p9894_p6 = scmp.lt.s32.totalorder %s109_s20, %s109_s20 }
  0x31   :  { %p9895_p7 = scmp.lt.s32.totalorder %s9893_s24, %s9889_s10 }
  0x33   :  { %p9896_p8 = por %p9895_p7, %p9894_p6 }
  0x35   :  { %p9897_p9 = pnand %p9896_p8, %p9890_p5 }
  0x37   :  { %9900 = shalt.err (!%p9897_p9)
}
  0x38   :  { %111 = dma.hbm_to_vmem [thread:$0]  %s12249_s13, 16, %s109_s20, [#allocation12]  }
  0x39   :  { %s9901_s25 = scalar_lea.hbm %s12238_s2, 256 }
  0x3a   :  { %p9902_p10 = scmp.ne.s32.totalorder %s12238_s2, %s9901_s25  ;;  %p9905_p11 = scmp.lt.u32.totalorder %s9901_s25, %s12238_s2 }
  0x3c   :  { %p9907_p12 = pnand %p9905_p11, %p9902_p10 }
  0x3e   :  { %9910 = shalt.err (!%p9907_p12)
}
  0x3f   :  { %s9911_s30 = scalar_lea.vmem %s10160_s23, 256  ;;  %p9916_p0 = scmp.lt.s32.totalorder %s10160_s23, %s10160_s23 }
  0x40   :  { %p9912_p13 = scmp.ne.s32.totalorder %s10160_s23, %s9911_s30  ;;  %p9917_p1 = scmp.lt.s32.totalorder %s9911_s30, %s9911_s30 }
  0x42   :  { %p9918_p2 = por %p9917_p1, %p9916_p0 }
  0x44   :  { %p9919_p3 = pnand %p9918_p2, %p9912_p13 }
  0x46   :  { %9922 = shalt.err (!%p9919_p3)
}
  0x47   :  { %41 = dma.hbm_to_vmem [thread:$0]  %s12238_s2, 256, %s10160_s23, [#allocation3], %s10023_s18, %s10023_s18, %s10024_s19  }
  0x48   :  { %s10027_s0 = smov [#allocation7]   ;;  %s10028_s24 = smov [#allocation10]  }
  0x49   :  { %s67_s10 = sshll.u32 %s10027_s0, 4  ;;  %s95_s5 = sshll.u32 %s10028_s24, 4  ;;  %s68_s10 = int_to_ptr.vmem [resolvable:$true] %s67_s10  ;;  %s10194_s5 = int_to_ptr.vmem [resolvable:$true] %s95_s5 }
  0x4a   :  { %s9923_s21 = scalar_lea.hbm %s12244_s8, 256 }
  0x4b   :  { %p9924_p4 = scmp.ne.s32.totalorder %s12244_s8, %s9923_s21  ;;  %p9927_p5 = scmp.lt.u32.totalorder %s9923_s21, %s12244_s8 }
  0x4d   :  { %p9929_p6 = pnand %p9927_p5, %p9924_p4 }
  0x4f   :  { %9932 = shalt.err (!%p9929_p6)
}
  0x50   :  { %s9933_s2 = scalar_lea.vmem %s68_s10, 256  ;;  %p9938_p8 = scmp.lt.s32.totalorder %s68_s10, %s68_s10 }
  0x51   :  { %p9934_p7 = scmp.ne.s32.totalorder %s68_s10, %s9933_s2  ;;  %p9939_p9 = scmp.lt.s32.totalorder %s9933_s2, %s9933_s2 }
  0x53   :  { %p9940_p10 = por %p9939_p9, %p9938_p8 }
  0x55   :  { %p9941_p11 = pnand %p9940_p10, %p9934_p7 }
  0x57   :  { %9944 = shalt.err (!%p9941_p11)
}
  0x58   :  { %73 = dma.hbm_to_vmem [thread:$0]  %s12244_s8, 256, %s68_s10, [#allocation6], %s10023_s18, %s10023_s18, %s10024_s19  }
  0x59   :  { %s9945_s20 = scalar_lea.hbm %s12248_s12, 2048 }
  0x5a   :  { %p9946_p12 = scmp.ne.s32.totalorder %s12248_s12, %s9945_s20  ;;  %p9949_p13 = scmp.lt.u32.totalorder %s9945_s20, %s12248_s12 }
  0x5c   :  { %p9951_p0 = pnand %p9949_p13, %p9946_p12 }
  0x5e   :  { %9954 = shalt.err (!%p9951_p0)
}
  0x5f   :  { %s9955_s21 = scalar_lea.vmem %s10194_s5, 2048  ;;  %p9960_p2 = scmp.lt.s32.totalorder %s10194_s5, %s10194_s5 }
  0x60   :  { %p9956_p1 = scmp.ne.s32.totalorder %s10194_s5, %s9955_s21  ;;  %p9961_p3 = scmp.lt.s32.totalorder %s9955_s21, %s9955_s21 }
  0x62   :  { %p9962_p4 = por %p9961_p3, %p9960_p2 }
  0x64   :  { %p9963_p5 = pnand %p9962_p4, %p9956_p1 }
  0x66   :  { %9966 = shalt.err (!%p9963_p5)
}
  0x67   :  { %101 = dma.hbm_to_vmem [thread:$0]  %s12248_s12, 2048, %s10194_s5, [#allocation9], %s10023_s18, %s10023_s18, %s10024_s19  }
  0x68   :  { %s10029_s25 = smov [#allocation13]   ;;  %s9967_s2 = scalar_lea.hbm %s12251_s15, 16 }
  0x69   :  { %s120_s26 = sshll.u32 %s10029_s25, 4  ;;  %p9968_p6 = scmp.ne.s32.totalorder %s12251_s15, %s9967_s2  ;;  %s121_s26 = int_to_ptr.vmem [resolvable:$true] %s120_s26 }
  0x6a   :  { %p9971_p7 = scmp.lt.u32.totalorder %s9967_s2, %s12251_s15 }
  0x6c   :  { %p9973_p8 = pnand %p9971_p7, %p9968_p6 }
  0x6e   :  { %9976 = shalt.err (!%p9973_p8)
}
  0x6f   :  { %s9977_s20 = scalar_lea.vmem %s121_s26, 16  ;;  %s9981_s12 = scalar_lea.vmem %s121_s26, 32 }
  0x70   :  { %p9978_p9 = scmp.ne.s32.totalorder %s121_s26, %s9977_s20  ;;  %p9982_p10 = scmp.lt.s32.totalorder %s121_s26, %s121_s26 }
  0x71   :  { %p9983_p11 = scmp.lt.s32.totalorder %s9981_s12, %s9977_s20 }
  0x73   :  { %p9984_p12 = por %p9983_p11, %p9982_p10 }
  0x75   :  { %p9985_p13 = pnand %p9984_p12, %p9978_p9 }
  0x77   :  { %9988 = shalt.err (!%p9985_p13)
}
  0x78   :  { %123 = dma.hbm_to_vmem [thread:$0]  %s12251_s15, 16, %s121_s26, [#allocation12]  }
  0x79   :  { %10011 = dma.done.wait [#allocation3], 256  }
  0x7a   :  { %10012 = vsyncadd [#allocation3], 4294967040 }
  0x7b   :  { %10013 = dma.done.wait [#allocation6], 2304  }
  0x7c   :  { %10014 = vsyncadd [#allocation6], 4294964992 }
  0x7d   :  { %10015 = dma.done.wait [#allocation9], 3328  }
  0x7e   :  { %10016 = vsyncadd [#allocation9], 4294963968 }
  0x7f   :  { %10017 = dma.done.wait [#allocation12], 32  }
  0x80   :  { %10018 = vsyncadd [#allocation12], 4294967264  ;;  %v165_v0 = vlaneseq  ;;  %v12291_v6 = vmov 0.0   ;;  %vm12262_vm2 = vcmask 293888   ;;  %v10273_v9 = vld [vmem:[%s12237_s1 + $0x10] sm:$0xff]  ;;  %v10281_v11 = vld [vmem:[%s12237_s1] sm:$0xff] }
  0x81   :  { %v10286_v12 = vld [vmem:[%s12237_s1 + $0x18] sm:$0xff]  ;;  %v10313_v19 = vld [vmem:[%s12237_s1 + $0x8] sm:$0xff]  ;;  %v10324_v22 = vld [vmem:[%s12237_s1 + $0x20] sm:$0xf]  ;;  %vm12261_vm6 = vcmask 289792   ;;  %v12293_v37 = vmov 0.0|0.0  }
  0x82   :  { %v10243_v1 = vshrl.u32 %v165_v0, 7  ;;  %v10245_v2 = vand.u32 127, %v165_v0  ;;  %v9418_v18 = vpack.c.bf16 %v10286_v12, %v10273_v9  ;;  %v9415_v21 = vpack.c.bf16 %v10313_v19, %v10281_v11  ;;  %v155_v34 = vld [vmem:[#allocation2] sm:$0xff]  ;;  %v156_v35 = vld [vmem:[#allocation2 + $0x8] sm:$0xff]  ;;  %9391 = vmatprep.subr.bf16.mxu1 %v12293_v37  ;;  %9385 = vmatprep.subr.bf16.mxu0 %v12293_v37  ;;  %s12377_s27 = sld [smem:[#allocation40_spill]] }
  0x83   :  { %v9392_v36 = vpack.c.bf16 %v156_v35, %v155_v34  ;;  %vm12259_vm7 = vmmov 0   ;;  %vm12254_vm8 = vcmask 130048   ;;  %vm12256_vm15 = vcmask 1043456  }
  0x84   :  { %v10248_v3 = vadd.s32 16, %v10243_v1  ;;  %vm173_vm0 = vcmp.eq.s32.totalorder %v10243_v1, %v10245_v2  ;;  %v10253_v4 = vadd.s32 24, %v10243_v1  ;;  %v10256_v5 = vadd.s32 8, %v10243_v1  ;;  %8451 = vmatprep.mubr.msk.f32.mxu1 %vm12259_vm7, %v12291_v6  ;;  %8432 = vmatprep.mubr.msk.f32.mxu0 %vm12259_vm7, %v12291_v6 }
  0x85   :  { %v10259_v7 = vsel %vm173_vm0, 1.0, %v12291_v6  ;;  %v10262_v8 = vadd.s32 32, %v10243_v1  ;;  %9393 = vmatpush3.bf16.msra.mxu1 %v9392_v36  ;;  %vm12255_vm0 = vcmask 261120  }
  0x86   :  { %12374 = vst [vmem:[#allocation20_spill] sm:$0xff] %v10248_v3  ;;  %12375 = vst [vmem:[#allocation21_spill] sm:$0xff] %v10253_v4  ;;  %vm175_vm1 = vcmp.eq.s32.totalorder %v10248_v3, %v10245_v2  ;;  %vm176_vm3 = vcmp.eq.s32.totalorder %v10253_v4, %v10245_v2  ;;  %vm174_vm4 = vcmp.eq.s32.totalorder %v10256_v5, %v10245_v2  ;;  %9394 = vmatprep.subr.bf16.mxu1 %v12293_v37 }
  0x87   :  { %12376 = vst [vmem:[#allocation22_spill] sm:$0xff] %v10262_v8  ;;  %v10276_v10 = vsel %vm175_vm1, 1.0, %v12291_v6  ;;  %v10289_v13 = vsel %vm176_vm3, 1.0, %v12291_v6  ;;  %v10292_v14 = vsel %vm174_vm4, 1.0, %v12291_v6  ;;  %vm177_vm5 = vcmp.eq.s32.totalorder %v10262_v8, %v10245_v2  ;;  %vm10464_vm1 = vmpackc.low %vm12255_vm0, %vm12255_vm0 }
  0x88   :  { %v10298_v15 = vadd.f32 %v10276_v10, %v10273_v9  ;;  %v10302_v16 = vadd.f32 %v10259_v7, %v10281_v11  ;;  %v10306_v17 = vadd.f32 %v10289_v13, %v10286_v12  ;;  %v10317_v20 = vadd.f32 %v10292_v14, %v10313_v19  ;;  %v145_v38 = vld [vmem:[%s12377_s27] sm:$0xff]  ;;  %v146_v39 = vld [vmem:[%s12377_s27 + $0x8] sm:$0xff]  ;;  %v147_v40 = vld [vmem:[%s12377_s27 + $0x10] sm:$0xff] }
  0x89   :  { %v10327_v23 = vsel %vm177_vm5, 1.0, %v12291_v6  ;;  %8452 = vmatmul.mubr.msk.f32.vlgmr.msra.gmra.mrb[0].mxu1 %vm12254_vm8, %v145_v38  ;;  %v148_v41 = vld [vmem:[%s12377_s27 + $0x18] sm:$0xff]  ;;  %v149_v42 = vld [vmem:[%s12377_s27 + $0x20] sm:$0xf]  ;;  %vm595_vm3 = vcmask 257024   ;;  %vm12257_vm4 = vcmp.ge.s32.totalorder %v10248_v3, 20 }
  0x8a   :  { %v195_v24 = vsel %vm12262_vm2, %v10298_v15, 0.0  ;;  %v189_v25 = vsel %vm12262_vm2, %v10302_v16, 0.0  ;;  %v192_v26 = vsel %vm12262_vm2, %v10317_v20, 0.0  ;;  %v198_v27 = vsel %vm12262_vm2, %v10306_v17, 0.0  ;;  %8454 = vmatprep.mubr.msk.f32.mxu1 %vm12259_vm7, %v12291_v6 }
  0x8b   :  { %196 = vadd.xlane.f32.xlu1 %v195_v24  ;;  %190 = vadd.xlane.f32.xlu0 %v189_v25  ;;  %v205_v28 = vadd.f32 %v192_v26, %v189_v25  ;;  %v10339_v29 = vadd.f32 %v10327_v23, %v10324_v22  ;;  %vm12270_vm5 = vcmp.ge.s32.totalorder %v10245_v2, 20 }
  0x8d   :  { %v206_v30 = vadd.f32 %v205_v28, %v195_v24  ;;  %v202_v31 = vsel %vm12261_vm6, %v10339_v29, 0.0  ;;  %8455 = vmatmul.mubr.msk.f32.gmra.mrb[2].mxu1 %vm12254_vm8, %v146_v39  ;;  %vm10552_vm6 = vcmp.lt.s32.totalorder %v10256_v5, %v10245_v2 }
  0x8e   :  { %8457 = vmatprep.mubr.msk.f32.mxu1 %vm12259_vm7, %v12291_v6 }
  0x8f   :  { %199 = vadd.xlane.f32.xlu1 %v198_v27  ;;  %193 = vadd.xlane.f32.xlu0 %v192_v26  ;;  %v207_v32 = vadd.f32 %v206_v30, %v198_v27 }
  0x91   :  { %v208_v33 = vadd.f32 %v207_v32, %v202_v31  ;;  %8458 = vmatmul.mubr.msk.f32.gmra.mrb[4].mxu1 %vm12254_vm8, %v147_v40 }
  0x92   :  { %8460 = vmatprep.mubr.msk.f32.mxu1 %vm12259_vm7, %v12291_v6 }
  0x93   :  { %203 = vadd.xlane.f32.xlu0 %v202_v31  ;;  %v209_v43 = vrot.slane %v208_v33, 4 }
  0x95   :  { %8461 = vmatmul.mubr.msk.f32.gmra.mrb[6].mxu1 %vm12254_vm8, %v148_v41  ;;  %v210_v44 = vadd.f32 %v209_v43, %v208_v33 }
  0x96   :  { %8463 = vmatprep.mubr.msk.f32.mxu1 %vm12259_vm7, %v12291_v6 }
  0x97   :  { %v211_v45 = vrot.slane %v210_v44, 2 }
  0x99   :  { %8464 = vmatmul.mubr.msk.f32.gmra.mrb[8].mxu1 %vm12254_vm8, %v149_v42  ;;  %v212_v46 = vadd.f32 %v211_v45, %v210_v44  ;;  %vm10536_vm8 = vcmp.lt.s32.totalorder %v10243_v1, %v10245_v2 }
  0x9a   :  { %8476 = vmatprep.mubr.msk.f32.mxu1 %vm12259_vm7, %v12291_v6 }
  0x9b   :  { %v213_v47 = vrot.slane %v212_v46, 1 }
  0x9d   :  { %v214_v48 = vadd.f32 %v213_v47, %v212_v46 }
  0x9f   :  { %vm230_vm10 = vcmp.gt.f32.partialorder %v214_v48, 0.0 }
 0x118   :  { %v197_v49 = vpop.xlane.xlu1 %196  ;;  %v191_v50 = vpop.xlane.xlu0 %190 }
 0x119   :  { %9751 = vrsqrt.f32 %v191_v50  ;;  %vm215_vm9 = vcmp.gt.f32.partialorder %v191_v50, 0.0  ;;  %vm217_vm12 = vcmp.gt.f32.partialorder %v197_v49, 0.0 }
 0x11a   :  { %9753 = vrsqrt.f32 %v214_v48 }
 0x11b   :  { %9755 = vrsqrt.f32 %v197_v49 }
 0x11c   :  { %v200_v51 = vpop.xlane.xlu1 %199  ;;  %v194_v52 = vpop.xlane.xlu0 %193 }
 0x11d   :  { %9757 = vrsqrt.f32 %v200_v51  ;;  %vm218_vm11 = vcmp.gt.f32.partialorder %v200_v51, 0.0  ;;  %vm216_vm13 = vcmp.gt.f32.partialorder %v194_v52, 0.0 }
 0x11e   :  { %9759 = vrsqrt.f32 %v194_v52 }
 0x120   :  { %v204_v53 = vpop.xlane.xlu0 %203 }
 0x121   :  { %9761 = vrsqrt.f32 %v204_v53  ;;  %vm219_vm14 = vcmp.gt.f32.partialorder %v204_v53, 0.0 }
 0x123   :  { %v9752_v54 = vpop.eup %9751 }
 0x124   :  { %v9754_v55 = vpop.eup %9753  ;;  %v225_v56 = vsel %vm215_vm9, %v9752_v54, 0.0  ;;  %vm12280_vm9 = vcmp.lt.s32.totalorder %v10245_v2, 20 }
 0x125   :  { %v9756_v57 = vpop.eup %9755  ;;  %v233_v60 = vmul.f32 %v225_v56, %v10302_v16  ;;  %v232_v62 = vsel %vm230_vm10, %v9754_v55, 0.0  ;;  %vm12258_vm10 = vcmp.lt.s32.totalorder %v10248_v3, 20 }
 0x126   :  { %v227_v63 = vsel %vm217_vm12, %v9756_v57, 0.0  ;;  %vm12272_vm12 = vcmp.lt.s32.totalorder %v10245_v2, 36 }
 0x127   :  { %v9758_v58 = vpop.eup %9757  ;;  %v235_v27 = vmul.f32 %v227_v63, %v10298_v15  ;;  %v238_v28 = vmul.f32 %v233_v60, %v232_v62  ;;  %v12385_v60 = vmov 0 }
 0x128   :  { %v9760_v59 = vpop.eup %9759  ;;  %v228_v61 = vsel %vm218_vm11, %v9758_v58, 0.0  ;;  %v12386_v60 = vsel %vm10464_vm1, 4294967295, %v12385_v60  ;;  %vm747_vm11 = vmand %vm12257_vm4, %vm12270_vm5 }
 0x129   :  { %v226_v0 = vsel %vm216_vm13, %v9760_v59, 0.0  ;;  %v236_v24 = vmul.f32 %v228_v61, %v10306_v17  ;;  %v240_v34 = vmul.f32 %v235_v27, %v232_v62  ;;  %vm10522_vm13 = vmand %vm12258_vm10, %vm12280_vm9 }
 0x12a   :  { %v234_v25 = vmul.f32 %v226_v0, %v10317_v20 }
 0x12b   :  { %v9762_v26 = vpop.eup %9761  ;;  %v241_v31 = vmul.f32 %v236_v24, %v232_v62 }
 0x12c   :  { %v239_v30 = vmul.f32 %v234_v25, %v232_v62  ;;  %v229_v33 = vsel %vm219_vm14, %v9762_v26, 0.0  ;;  %vm10528_vm14 = vmand %vm747_vm11, %vm12272_vm12 }
 0x12d   :  { %v237_v16 = vmul.f32 %v229_v33, %v10339_v29  ;;  %v9389_v35 = vpack.c.bf16 %v241_v31, %v240_v34 }
 0x12e   :  { %v9386_v32 = vpack.c.bf16 %v239_v30, %v238_v28 }
 0x12f   :  { %v242_v17 = vmul.f32 %v237_v16, %v232_v62 }
 0x130   :  { %9387 = vmatpush3.bf16.msra.mxu0 %v9386_v32 }
 0x131   :  { %9388 = vmatprep.subr.bf16.mxu0 %v12293_v37 }
 0x134   :  { %9390 = vmatpush3.bf16.msra.mxu0 %v9389_v35 }
 0x135   :  { %8430 = vmatprep.subr.mxu0 %v12291_v6 }
 0x138   :  { %8431 = vmatpush3.msk.msra.mxu0 %vm12256_vm15, %v242_v17 }
 0x139   :  { %8433 = vmatmul.mubr.msk.f32.vlgmr.msra.gmra.mrb[0].mxu0 %vm12262_vm2, %v238_v28  ;;  %9400 = vmatprep.subr.bf16.mxu0 %v12293_v37 }
 0x13a   :  { %8435 = vmatprep.mubr.msk.f32.mxu0 %vm12259_vm7, %v12291_v6 }
 0x13d   :  { %8436 = vmatmul.mubr.msk.f32.gmra.mrb[2].mxu0 %vm12262_vm2, %v239_v30 }
 0x13e   :  { %8438 = vmatprep.mubr.msk.f32.mxu0 %vm12259_vm7, %v12291_v6 }
 0x141   :  { %8439 = vmatmul.mubr.msk.f32.gmra.mrb[4].mxu0 %vm12262_vm2, %v240_v34 }
 0x142   :  { %8441 = vmatprep.mubr.msk.f32.mxu0 %vm12259_vm7, %v12291_v6 }
 0x145   :  { %8442 = vmatmul.mubr.msk.f32.gmra.mrb[6].mxu0 %vm12262_vm2, %v241_v31 }
 0x146   :  { %8444 = vmatprep.mubr.msk.f32.mxu0 %vm12259_vm7, %v12291_v6 }
 0x149   :  { %8445 = vmatmul.mubr.msk.f32.gmra.mrb[8].mxu0 %vm12262_vm2, %v242_v17 }
 0x14a   :  { %8501 = vmatprep.mubr.msk.f32.mxu0 %vm12259_vm7, %v12291_v6 }
 0x15c   :  { %v433_v15 = vpop.f32.mrb[0].mxu1 }
 0x15d   :  { %v8453_v20 = vpop.f32.mrb[1].mxu1 }
 0x160   :  { %v438_v29 = vpop.f32.mrb[2].mxu1 }
 0x161   :  { %v9395_v36 = vpack.c.bf16 %v438_v29, %v433_v15  ;;  %v8456_v38 = vpop.f32.mrb[3].mxu1 }
 0x163   :  { %9396 = vmatpush3.bf16.msra.mxu1 %v9395_v36 }
 0x164   :  { %v443_v39 = vpop.f32.mrb[4].mxu1  ;;  %9397 = vmatprep.subr.bf16.mxu1 %v12293_v37 }
 0x165   :  { %v8459_v40 = vpop.f32.mrb[5].mxu1 }
 0x168   :  { %v448_v41 = vpop.f32.mrb[6].mxu1 }
 0x169   :  { %v9398_v42 = vpack.c.bf16 %v448_v41, %v443_v39  ;;  %v8462_v43 = vpop.f32.mrb[7].mxu1 }
 0x16b   :  { %9399 = vmatpush3.bf16.msra.mxu1 %v9398_v42 }
 0x16c   :  { %8474 = vmatprep.subr.mxu1 %v12291_v6  ;;  %v453_v44 = vpop.f32.mrb[8].mxu1 }
 0x16d   :  { %v8465_v45 = vpop.f32.mrb[9].mxu1 }
 0x16f   :  { %8475 = vmatpush3.msk.msra.mxu1 %vm12256_vm15, %v453_v44 }
 0x170   :  { %9414 = vmatprep.subr.bf16.mxu1 %v12293_v37 }
 0x20c   :  { %v10408_v46 = vpop.f32.mrb[0].mxu0 }
 0x20d   :  { %12378 = vst [vmem:[#allocation23_spill] sm:$0xff] %v10408_v46  ;;  %v8434_v47 = vpop.f32.mrb[1].mxu0  ;;  %8477 = vmatmul.mubr.msk.f32.vlgmr.msra.gmra.mrb[10].mxu1 %vm12262_vm2, %v10408_v46 }
 0x20e   :  { %8479 = vmatprep.mubr.msk.f32.mxu1 %vm12259_vm7, %v12291_v6  ;;  %9416 = vmatpush3.bf16.msra.mxu1 %v9415_v21  ;;  %v10450_v21 = vsub.s32 0, %v10243_v1 }
 0x20f   :  { %9417 = vmatprep.subr.bf16.mxu1 %v12293_v37 }
 0x210   :  { %v10418_v48 = vpop.f32.mrb[2].mxu0 }
 0x211   :  { %12379 = vst [vmem:[#allocation24_spill] sm:$0xff] %v10418_v48  ;;  %v8437_v49 = vpop.f32.mrb[3].mxu0  ;;  %8480 = vmatmul.mubr.msk.f32.gmra.mrb[12].mxu1 %vm12262_vm2, %v10418_v48 }
 0x212   :  { %8482 = vmatprep.mubr.msk.f32.mxu1 %vm12259_vm7, %v12291_v6  ;;  %9419 = vmatpush3.bf16.msra.mxu1 %v9418_v18 }
 0x213   :  { %8537 = vmatprep.subr.mxu1 %v12291_v6 }
 0x214   :  { %v10428_v50 = vpop.f32.mrb[4].mxu0 }
 0x215   :  { %12380 = vst [vmem:[#allocation25_spill] sm:$0xff] %v10428_v50  ;;  %v8440_v11 = vpop.f32.mrb[5].mxu0  ;;  %8483 = vmatmul.mubr.msk.f32.gmra.mrb[14].mxu1 %vm12262_vm2, %v10428_v50 }
 0x216   :  { %8485 = vmatprep.mubr.msk.f32.mxu1 %vm12259_vm7, %v12291_v6  ;;  %8538 = vmatpush3.msk.msra.mxu1 %vm12256_vm15, %v10324_v22  ;;  %v570_v22 = vld [vmem:[%s12240_s4] sm:$0x1] }
 0x217   :  { %9427 = vmatprep.subr.bf16.mxu1 %v12293_v37  ;;  %v575_v51 = vrot.slane %v570_v22, %v10450_v21 }
 0x218   :  { %v10437_v19 = vpop.f32.mrb[6].mxu0 }
 0x219   :  { %12381 = vst [vmem:[#allocation26_spill] sm:$0xff] %v10437_v19  ;;  %v8443_v9 = vpop.f32.mrb[7].mxu0  ;;  %8486 = vmatmul.mubr.msk.f32.gmra.mrb[16].mxu1 %vm12262_vm2, %v10437_v19 }
 0x21a   :  { %8488 = vmatprep.mubr.msk.f32.mxu1 %vm12259_vm7, %v12291_v6 }
 0x21c   :  { %v10443_v12 = vpop.f32.mrb[8].mxu0 }
 0x21d   :  { %12382 = vst [vmem:[#allocation27_spill] sm:$0xff] %v10443_v12  ;;  %v8446_v18 = vpop.f32.mrb[9].mxu0  ;;  %8489 = vmatmul.mubr.msk.f32.gmra.mrb[18].mxu1 %vm12262_vm2, %v10443_v12 }
 0x21e   :  { %8539 = vmatprep.mubr.msk.f32.mxu1 %vm12259_vm7, %v12291_v6 }
 0x2e0   :  { %v541_v52 = vpop.f32.mrb[10].mxu1 }
 0x2e1   :  { %v10456_v53 = vmax.f32 %v541_v52, 0.0  ;;  %v8478_v54 = vpop.f32.mrb[11].mxu1 }
 0x2e3   :  { %12383 = vst [vmem:[#allocation28_spill] sm:$0xff] %v10456_v53  ;;  %v577_v55 = vmul.f32 %v575_v51, %v10456_v53 }
 0x2e4   :  { %v546_v56 = vpop.f32.mrb[12].mxu1 }
 0x2e5   :  { %v10459_v57 = vmax.f32 %v546_v56, 0.0  ;;  %v8481_v58 = vpop.f32.mrb[13].mxu1  ;;  %v583_v59 = vsel %vm12255_vm0, %v577_v55, 0.0  ;;  %v12390_v55 = vmov 0  ;;  %v12393_v56 = vmov 0 }
 0x2e6   :  { %584 = vadd.xlane.f32.xlu1 %v583_v59  ;;  %v12391_v55 = vsel %vm10522_vm13, 4294967295, %v12390_v55  ;;  %v12394_v56 = vsel %vm10528_vm14, 4294967295, %v12393_v56  ;;  %vm12275_vm14 = vcmp.lt.s32.totalorder %v10248_v3, %v10245_v2 }
 0x2e7   :  { %12384 = vst [vmem:[#allocation29_spill] sm:$0xff] %v10459_v57  ;;  %v9401_v61 = vpack.c.bf16 %v10459_v57, %v10456_v53  ;;  %v578_v62 = vmul.f32 %v575_v51, %v10459_v57  ;;  %12392 = vst [vmem:[#allocation33_spill] sm:$0xff] %v12391_v55 }
 0x2e8   :  { %v551_v63 = vpop.f32.mrb[14].mxu1  ;;  %12395 = vst [vmem:[#allocation34_spill] sm:$0xff] %v12394_v56 }
 0x2e9   :  { %v10471_v0 = vmax.f32 %v551_v63, 0.0  ;;  %v8484_v24 = vpop.f32.mrb[15].mxu1  ;;  %9403 = vmatpush3.bf16.xpose.msk.msra.mxu0 %vm10464_vm1, %v9401_v61  ;;  %v586_v25 = vsel %vm12255_vm0, %v578_v62, 0.0  ;;  %v12396_v61 = vmov 0  ;;  %v12398_v62 = vmov 0 }
 0x2ea   :  { %587 = vadd.xlane.f32.xlu0 %v586_v25  ;;  %9404 = vmatprep.subr.bf16.mxu0 %v12293_v37  ;;  %v12397_v61 = vsel %vm10536_vm8, 4294967295, %v12396_v61  ;;  %v12399_v62 = vsel %vm10552_vm6, 4294967295, %v12398_v62  ;;  %v12400_v63 = vmov 0  ;;  %v12403_v25 = vmov 0 }
 0x2eb   :  { %12387 = vst [vmem:[#allocation30_spill] sm:$0xff] %v10471_v0  ;;  %v579_v26 = vmul.f32 %v575_v51, %v10471_v0 }
 0x2ec   :  { %v556_v27 = vpop.f32.mrb[16].mxu1 }
 0x2ed   :  { %v10478_v28 = vmax.f32 %v556_v27, 0.0  ;;  %v8487_v30 = vpop.f32.mrb[17].mxu1  ;;  %v589_v31 = vsel %vm12255_vm0, %v579_v26, 0.0 }
 0x2ee   :  { %590 = vadd.xlane.f32.xlu1 %v589_v31 }
 0x2ef   :  { %12388 = vst [vmem:[#allocation31_spill] sm:$0xff] %v10478_v28  ;;  %v9405_v32 = vpack.c.bf16 %v10478_v28, %v10471_v0  ;;  %v580_v33 = vmul.f32 %v575_v51, %v10478_v28 }
 0x2f0   :  { %v561_v34 = vpop.f32.mrb[18].mxu1 }
 0x2f1   :  { %v10484_v16 = vmax.f32 %v561_v34, 0.0  ;;  %v8490_v35 = vpop.f32.mrb[19].mxu1  ;;  %9407 = vmatpush3.bf16.xpose.msk.msra.mxu0 %vm10464_vm1, %v9405_v32  ;;  %v592_v17 = vsel %vm12255_vm0, %v580_v33, 0.0 }
 0x2f2   :  { %593 = vadd.xlane.f32.xlu0 %v592_v17  ;;  %8499 = vmatprep.subr.mxu0 %v12291_v6 }
 0x2f3   :  { %12389 = vst [vmem:[#allocation32_spill] sm:$0xff] %v10484_v16  ;;  %v581_v15 = vmul.f32 %v575_v51, %v10484_v16 }
 0x2f5   :  { %v596_v20 = vsel %vm595_vm3, %v581_v15, 0.0  ;;  %vm12263_vm3 = vcmp.lt.s32.totalorder %v10262_v8, 36 }
 0x2f6   :  { %597 = vadd.xlane.f32.xlu1 %v596_v20  ;;  %vm749_vm4 = vmand %vm12263_vm3, %vm12270_vm5 }
 0x2f9   :  { %8500 = vmatpush3.xpose.msk.msra.mxu0 %vm12255_vm0, %v10484_v16 }
 0x2fa   :  { %9408 = vmatprep.subr.bf16.mxu0 %v12293_v37 }
 0x2fc   :  { %8502 = vmatmul.mubr.msk.f32.vlgmr.msra.gmra.mrb[10].mxu0 %vm12255_vm0, %v570_v22  ;;  %vm10560_vm0 = vmand %vm12270_vm5, %vm12272_vm12 }
 0x2fd   :  { %8514 = vmatprep.mubr.msk.f32.mxu0 %vm12259_vm7, %v12291_v6  ;;  %v12401_v63 = vsel %vm10560_vm0, 4294967295, %v12400_v63  ;;  %vm10573_vm5 = vmand %vm749_vm4, %vm12272_vm12  ;;  %vm12276_vm4 = vcmp.lt.s32.totalorder %v10253_v4, %v10245_v2 }
 0x2fe   :  { %12402 = vst [vmem:[#allocation35_spill] sm:$0xff] %v12401_v63  ;;  %v12404_v25 = vsel %vm10573_vm5, 4294967295, %v12403_v25 }
 0x2ff   :  { %12405 = vst [vmem:[#allocation36_spill] sm:$0xff] %v12404_v25 }
 0x373   :  { %v585_v29 = vpop.xlane.xlu1 %584 }
 0x374   :  { %9763 = vtanh.f32 %v585_v29 }
 0x377   :  { %v588_v36 = vpop.xlane.xlu0 %587 }
 0x378   :  { %9765 = vtanh.f32 %v588_v36 }
 0x37b   :  { %v591_v38 = vpop.xlane.xlu1 %590 }
 0x37c   :  { %9767 = vtanh.f32 %v591_v38 }
 0x37e   :  { %v9764_v40 = vpop.eup %9763 }
 0x37f   :  { %v594_v39 = vpop.xlane.xlu0 %593  ;;  %v986_v43 = vmul.f32 %v9764_v40, %v10456_v53 }
 0x380   :  { %9769 = vtanh.f32 %v594_v39 }
 0x382   :  { %v9766_v41 = vpop.eup %9765 }
 0x383   :  { %v598_v42 = vpop.xlane.xlu1 %597  ;;  %v987_v44 = vmul.f32 %v9766_v41, %v10459_v57 }
 0x384   :  { %9771 = vtanh.f32 %v598_v42 }
 0x385   :  { %v9409_v45 = vpack.c.bf16 %v987_v44, %v986_v43  ;;  %v10615_v43 = vcvt.s32.f32 %v10243_v1 }
 0x386   :  { %v9768_v47 = vpop.eup %9767 }
 0x387   :  { %9410 = vmatpush3.bf16.msra.mxu0 %v9409_v45  ;;  %v988_v11 = vmul.f32 %v9768_v47, %v10471_v0  ;;  %v10618_v45 = vcvt.s32.f32 %v10256_v5 }
 0x388   :  { %9411 = vmatprep.subr.bf16.mxu0 %v12293_v37 }
 0x389   :  { %12413 = vst [vmem:[#allocation37_spill] sm:$0xff] %v10618_v45 }
 0x38a   :  { %v9770_v49 = vpop.eup %9769 }
 0x38b   :  { %v989_v9 = vmul.f32 %v9770_v49, %v10478_v28 }
 0x38d   :  { %v9412_v18 = vpack.c.bf16 %v989_v9, %v988_v11 }
 0x38e   :  { %v10502_v22 = vpop.eup %9771 }
 0x38f   :  { %9413 = vmatpush3.bf16.msra.mxu0 %v9412_v18  ;;  %v990_v51 = vmul.f32 %v10502_v22, %v10484_v16 }
 0x390   :  { %8512 = vmatprep.subr.mxu0 %v12291_v6 }
 0x393   :  { %8513 = vmatpush3.msk.msra.mxu0 %vm12256_vm15, %v990_v51  ;;  %v7761_v51 = vadd.s32 4294967278, %v10253_v4 }
 0x394   :  { %9420 = vmatprep.subr.bf16.mxu0 %v12293_v37 }
 0x3cf   :  { %v687_v52 = vpop.f32.mrb[10].mxu0 }
 0x3d0   :  { %9773 = vtanh.f32 %v687_v52  ;;  %v8503_v54 = vpop.f32.mrb[11].mxu0 }
 0x3da   :  { %v9774_v58 = vpop.eup %9773 }
 0x3db   :  { %v774_v59 = vrot.slane %v9774_v58, %v10450_v21  ;;  %v930_v58 = vcvt.s32.f32 %v7761_v51 }
 0x3dd   :  { %vm775_vm11 = vcmp.gt.f32.partialorder %v9764_v40, %v774_v59  ;;  %vm780_vm15 = vcmp.eq.f32.partialorder %v9764_v40, %v774_v59  ;;  %vm781_vm7 = vcmp.eq.f32.partialorder %v9766_v41, %v774_v59  ;;  %vm776_vm3 = vcmp.gt.f32.partialorder %v9766_v41, %v774_v59 }
 0x3de   :  { %vm790_vm10 = vmand %vm780_vm15, %vm10536_vm8  ;;  %vm782_vm1 = vcmp.eq.f32.partialorder %v9768_v47, %v774_v59  ;;  %vm777_vm0 = vcmp.gt.f32.partialorder %v9768_v47, %v774_v59  ;;  %v7760_v41 = vadd.s32 4294967278, %v10248_v3  ;;  %v867_v47 = vcvt.s32.f32 %v10248_v3 }
 0x3df   :  { %vm795_vm2 = vmor %vm775_vm11, %vm790_vm10  ;;  %vm12406_vm10 = vcmask 293888  }
 0x3e0   :  { %vm800_vm15 = vmand %vm12280_vm9, %vm795_vm2 }
 0x3e1   :  { %v805_v24 = vsel %vm800_vm15, 1.0, %v12291_v6  ;;  %vm791_vm8 = vmand %vm781_vm7, %vm10552_vm6  ;;  %vm783_vm15 = vcmp.eq.f32.partialorder %v9770_v49, %v774_v59 }
 0x3e2   :  { %v810_v26 = vsel %vm12406_vm10, %v805_v24, 0.0  ;;  %vm796_vm11 = vmor %vm776_vm3, %vm791_vm8  ;;  %vm12408_vm8 = vnez %v12394_v56 }
 0x3e3   :  { %830 = vadd.xlane.f32.xlu0 %v810_v26  ;;  %vm801_vm2 = vmand %vm12280_vm9, %vm796_vm11 }
 0x3e4   :  { %v806_v27 = vsel %vm801_vm2, 1.0, %v12291_v6  ;;  %vm792_vm7 = vmand %vm782_vm1, %vm12275_vm14  ;;  %vm784_vm2 = vcmp.eq.f32.partialorder %v10502_v22, %v774_v59  ;;  %vm779_vm14 = vcmp.gt.f32.partialorder %v10502_v22, %v774_v59  ;;  %v12290_v22 = vmov 1.0|1.0  }
 0x3e5   :  { %vm12407_vm12 = vmmov %vm12406_vm10  ;;  %vm778_vm10 = vcmp.gt.f32.partialorder %v9770_v49, %v774_v59  ;;  %v929_v49 = vcvt.s32.f32 %v7760_v41  ;;  %v7762_v59 = vadd.s32 4294967278, %v10262_v8  ;;  %v12445_v41 = vmov 0 }
 0x3e6   :  { %v811_v30 = vsel %vm12407_vm12, %v806_v27, 0.0  ;;  %vm797_vm6 = vmor %vm777_vm0, %vm792_vm7  ;;  %vm12277_vm0 = vcmp.lt.s32.totalorder %v10262_v8, %v10245_v2 }
 0x3e7   :  { %v812_v31 = vadd.f32 %v811_v30, %v810_v26  ;;  %832 = vadd.xlane.f32.xlu1 %v811_v30  ;;  %vm12409_vm3 = vmor %vm10522_vm13, %vm12408_vm8  ;;  %v931_v26 = vcvt.s32.f32 %v7762_v59 }
 0x3e8   :  { %vm802_vm11 = vmand %vm12409_vm3, %vm797_vm6  ;;  %vm12410_vm6 = vnez %v12401_v63 }
 0x3e9   :  { %v807_v32 = vsel %vm802_vm11, 1.0, %v12291_v6  ;;  %vm793_vm1 = vmand %vm783_vm15, %vm12276_vm4 }
 0x3ea   :  { %v813_v33 = vsel %vm12407_vm12, %v807_v32, 0.0  ;;  %vm798_vm7 = vmor %vm778_vm10, %vm793_vm1  ;;  %vm12412_vm1 = vcmask 289792  }
 0x3eb   :  { %834 = vadd.xlane.f32.xlu0 %v813_v33  ;;  %v814_v34 = vadd.f32 %v813_v33, %v812_v31  ;;  %vm803_vm3 = vmand %vm12410_vm6, %vm798_vm7 }
 0x3ec   :  { %v808_v35 = vsel %vm803_vm3, 1.0, %v12291_v6  ;;  %vm794_vm15 = vmand %vm784_vm2, %vm12277_vm0  ;;  %vm12279_vm2 = vcmp.ge.s32.totalorder %v10248_v3, 18 }
 0x3ed   :  { %vm12411_vm11 = vmmov %vm12407_vm12 }
 0x3ee   :  { %v815_v17 = vsel %vm12411_vm11, %v808_v35, 0.0  ;;  %vm799_vm4 = vmor %vm779_vm14, %vm794_vm15  ;;  %vm12278_vm14 = vcmp.lt.s32.totalorder %v10248_v3, 18 }
 0x3ef   :  { %v816_v15 = vadd.f32 %v815_v17, %v814_v34  ;;  %836 = vadd.xlane.f32.xlu1 %v815_v17  ;;  %vm804_vm10 = vmand %vm10573_vm5, %vm799_vm4  ;;  %vm12414_vm4 = vcmp.ge.s32.totalorder %v10245_v2, 20  ;;  %v10716_v34 = vcvt.s32.f32 %v10245_v2 }
 0x3f0   :  { %v809_v20 = vsel %vm804_vm10, 1.0, %v12291_v6  ;;  %vm914_vm12 = vmand %vm12279_vm2, %vm12414_vm4  ;;  %vm12419_vm10 = vcmp.lt.s32.totalorder %v10245_v2, 36  ;;  %vm12424_vm2 = vcmask 293888  }
 0x3f1   :  { %v817_v29 = vsel %vm12412_vm1, %v809_v20, 0.0  ;;  %vm10630_vm7 = vmand %vm12278_vm14, %vm12280_vm9  ;;  %v7763_v20 = vadd.s32 4294967278, %v10245_v2 }
 0x3f2   :  { %838 = vadd.xlane.f32.xlu0 %v817_v29  ;;  %v818_v36 = vadd.f32 %v817_v29, %v816_v15  ;;  %vm10642_vm1 = vmand %vm914_vm12, %vm12419_vm10 }
 0x3f3   :  { %vm12425_vm12 = vmmov %vm12424_vm2 }
 0x3f4   :  { %v819_v38 = vrot.slane %v818_v36, 4 }
 0x3f6   :  { %v820_v39 = vadd.f32 %v819_v38, %v818_v36 }
 0x3f8   :  { %v821_v40 = vrot.slane %v820_v39, 2 }
 0x3fa   :  { %v822_v42 = vadd.f32 %v821_v40, %v820_v39 }
 0x3fc   :  { %v823_v44 = vrot.slane %v822_v42, 1 }
 0x3fe   :  { %v824_v11 = vadd.f32 %v823_v44, %v822_v42  ;;  %v12447_v42 = vmov 0  ;;  %v955_v44 = vcvt.s32.f32 %v7763_v20 }
 0x400   :  { %vm870_vm3 = vcmp.eq.f32.partialorder %v824_v11, %v10615_v43  ;;  %vm871_vm15 = vcmp.eq.f32.partialorder %v824_v11, %v10618_v45  ;;  %vm10636_vm11 = vcmp.eq.f32.partialorder %v824_v11, %v867_v47  ;;  %vm10649_vm0 = vcmp.eq.f32.partialorder %v824_v11, %v929_v49 }
 0x401   :  { %vm875_vm4 = vmand %vm12280_vm9, %vm870_vm3  ;;  %vm12426_vm3 = vmmov 0  }
 0x402   :  { %v976_v54 = vsel %vm875_vm4, 1.0, %v12291_v6  ;;  %vm876_vm14 = vmand %vm12280_vm9, %vm871_vm15  ;;  %vm936_vm9 = vcmp.eq.f32.partialorder %v824_v11, %v931_v26 }
 0x403   :  { %8515 = vmatmul.mubr.msk.f32.vlgmr.msra.gmra.mrb[12].mxu0 %vm12424_vm2, %v976_v54  ;;  %8540 = vmatmul.mubr.msk.f32.vlgmr.msra.gmra.mrb[20].mxu1 %vm12425_vm12, %v976_v54  ;;  %vm877_vm10 = vmand %vm10630_vm7, %vm10636_vm11  ;;  %v977_v24 = vsel %vm876_vm14, 1.0, %v12291_v6  ;;  %vm12281_vm2 = vcmp.lt.s32.totalorder %v10262_v8, 33 }
 0x404   :  { %8517 = vmatprep.mubr.msk.f32.mxu0 %vm12426_vm3, %v12291_v6  ;;  %8542 = vmatprep.mubr.msk.f32.mxu1 %vm12426_vm3, %v12291_v6  ;;  %vm939_vm15 = vmand %vm10642_vm1, %vm10649_vm0  ;;  %vm12429_vm0 = vcmp.ge.s32.totalorder %v10245_v2, 20 }
 0x405   :  { %vm12427_vm4 = vmmov %vm12425_vm12  ;;  %vm935_vm12 = vcmp.eq.f32.partialorder %v824_v11, %v930_v58  ;;  %v12451_v11 = vmov 0  ;;  %v12456_v58 = vmov 0 }
 0x406   :  { %vm12428_vm7 = vmmov %vm12427_vm4 }
 0x407   :  { %8518 = vmatmul.mubr.msk.f32.gmra.mrb[14].mxu0 %vm12427_vm4, %v977_v24  ;;  %8543 = vmatmul.mubr.msk.f32.gmra.mrb[22].mxu1 %vm12428_vm7, %v977_v24  ;;  %vm968_vm11 = vmor %vm877_vm10, %vm939_vm15  ;;  %vm12432_vm15 = vcmp.lt.s32.totalorder %v10245_v2, 36 }
 0x408   :  { %8520 = vmatprep.mubr.msk.f32.mxu0 %vm12426_vm3, %v12291_v6  ;;  %8545 = vmatprep.mubr.msk.f32.mxu1 %vm12426_vm3, %v12291_v6  ;;  %vm916_vm14 = vmand %vm12281_vm2, %vm12429_vm0  ;;  %v978_v27 = vsel %vm968_vm11, 1.0, %v12291_v6 }
 0x409   :  { %vm12430_vm1 = vmmov %vm12427_vm4 }
 0x40a   :  { %vm12431_vm4 = vmmov %vm12430_vm1 }
 0x40b   :  { %8521 = vmatmul.mubr.msk.f32.gmra.mrb[16].mxu0 %vm12430_vm1, %v978_v27  ;;  %8546 = vmatmul.mubr.msk.f32.gmra.mrb[24].mxu1 %vm12431_vm4, %v978_v27  ;;  %vm940_vm10 = vmand %vm12410_vm6, %vm935_vm12  ;;  %v12288_v27 = vmov 1.0  }
 0x40c   :  { %8523 = vmatprep.mubr.msk.f32.mxu0 %vm12426_vm3, %v12291_v6  ;;  %8548 = vmatprep.mubr.msk.f32.mxu1 %vm12426_vm3, %v12291_v6  ;;  %vm921_vm7 = vmand %vm916_vm14, %vm12432_vm15  ;;  %v979_v30 = vsel %vm940_vm10, 1.0, %v12291_v6  ;;  %vm12438_vm14 = vcmp.ge.s32.totalorder %v10248_v3, 20  ;;  %vm12286_vm10 = vcmp.ge.s32.totalorder %v10245_v2, 18 }
 0x40d   :  { %vm12433_vm11 = vmmov %vm12430_vm1  ;;  %v763_v33 = vsel %vm12438_vm14, 16.0, %v12291_v6 }
 0x40e   :  { %vm12434_vm0 = vmmov %vm12430_vm1 }
 0x40f   :  { %8524 = vmatmul.mubr.msk.f32.gmra.mrb[18].mxu0 %vm12433_vm11, %v979_v30  ;;  %8549 = vmatmul.mubr.msk.f32.gmra.mrb[26].mxu1 %vm12434_vm0, %v979_v30  ;;  %vm941_vm1 = vmand %vm921_vm7, %vm936_vm9  ;;  %vm12437_vm9 = vcmp.lt.s32.totalorder %v10248_v3, 20  ;;  %vm12282_vm11 = vcmp.lt.s32.totalorder %v10245_v2, 33 }
 0x410   :  { %8526 = vmatprep.mubr.msk.f32.mxu0 %vm12426_vm3, %v12291_v6  ;;  %8551 = vmatprep.mubr.msk.f32.mxu1 %vm12426_vm3, %v12291_v6  ;;  %v980_v31 = vsel %vm941_vm1, 1.0, %v12291_v6  ;;  %vm12435_vm12 = vmmov %vm12434_vm0  ;;  %v721_v32 = vsel %vm12437_vm9, 20.0, %v12291_v6 }
 0x411   :  { %vm12436_vm4 = vmmov %vm12434_vm0  ;;  %v768_v35 = vadd.f32 %v763_v33, %v721_v32  ;;  %vm12285_vm0 = vcmp.lt.s32.totalorder %v10245_v2, 18  ;;  %v1468_v32 = vld [vmem:[%s12239_s3] sm:$0xff]  ;;  %v1469_v33 = vld [vmem:[%s12239_s3 + $0x8] sm:$0xff] }
 0x412   :  { %vm12439_vm15 = vmmov %vm12438_vm14 }
 0x413   :  { %8527 = vmatmul.mubr.msk.f32.gmra.mrb[20].mxu0 %vm12435_vm12, %v980_v31  ;;  %8552 = vmatmul.mubr.msk.f32.gmra.mrb[28].mxu1 %vm12436_vm4, %v980_v31  ;;  %vm945_vm7 = vmand %vm12439_vm15, %vm12286_vm10  ;;  %v7756_v38 = vadd.f32 -1.0, %v768_v35  ;;  %v9434_v35 = vpack.c.bf16 %v1469_v33, %v1468_v32 }
 0x414   :  { %8564 = vmatprep.mubr.msk.f32.mxu0 %vm12426_vm3, %v12291_v6  ;;  %8589 = vmatprep.mubr.msk.f32.mxu1 %vm12426_vm3, %v12291_v6  ;;  %vm12440_vm1 = vmmov %vm12437_vm9 }
 0x415   :  { %vm10729_vm12 = vmand %vm12440_vm1, %vm12285_vm0  ;;  %vm12449_vm1 = vcmp.lt.s32.totalorder %v10262_v8, 36 }
 0x416   :  { %vm10736_vm9 = vmand %vm945_vm7, %vm12282_vm11  ;;  %v765_v49 = vsel %vm12449_vm1, 16.0, %v12291_v6 }
 0x417   :  { %vm10744_vm14 = vmand %vm12286_vm10, %vm12282_vm11  ;;  %v7757_v51 = vadd.f32 -1.0, %v765_v49 }
 0x418   :  { %v12446_v41 = vsel %vm10744_vm14, 4294967295, %v12445_v41  ;;  %vm12450_vm2 = vmmov %vm12449_vm1 }
 0x419   :  { %vm947_vm11 = vmand %vm12450_vm2, %vm12286_vm10  ;;  %vm12453_vm2 = vcmp.lt.s32.totalorder %v10245_v2, 33 }
 0x470   :  { %v831_v17 = vpop.xlane.xlu0 %830 }
 0x471   :  { %v840_v15 = vsub.f32 19.0, %v831_v17  ;;  %v1470_v17 = vld [vmem:[%s12239_s3 + $0x10] sm:$0xff] }
 0x473   :  { %vm887_vm4 = vcmp.eq.f32.partialorder %v840_v15, %v10716_v34  ;;  %v1471_v15 = vld [vmem:[%s12239_s3 + $0x18] sm:$0xff] }
 0x474   :  { %v833_v36 = vpop.xlane.xlu1 %832  ;;  %vm10750_vm15 = vmand %vm12285_vm0, %vm887_vm4  ;;  %v9437_v39 = vpack.c.bf16 %v1471_v15, %v1470_v17 }
 0x475   :  { %v841_v40 = vsub.f32 19.0, %v833_v36  ;;  %v12448_v42 = vsel %vm10750_vm15, 4294967295, %v12447_v42 }
 0x477   :  { %vm888_vm7 = vcmp.eq.f32.partialorder %v841_v40, %v10716_v34 }
 0x478   :  { %v835_v47 = vpop.xlane.xlu0 %834  ;;  %vm10764_vm5 = vmand %vm12285_vm0, %vm888_vm7 }
 0x479   :  { %v12452_v11 = vsel %vm10764_vm5, 4294967295, %v12451_v11  ;;  %v842_v9 = vsub.f32 %v7756_v38, %v835_v47  ;;  %vm9421_vm4 = vmpackc.low %vm10764_vm5, %vm10750_vm15 }
 0x47a   :  { %9422 = vmatpush3.bf16.msk.msra.mxu0 %vm9421_vm4, %v12290_v22  ;;  %vm10776_vm7 = vmand %vm947_vm11, %vm12453_vm2  ;;  %vm12306_vm11 = vmmov 1  }
 0x47b   :  { %vm889_vm6 = vcmp.eq.f32.partialorder %v842_v9, %v10716_v34  ;;  %vm958_vm1 = vcmp.eq.f32.partialorder %v842_v9, %v955_v44  ;;  %9423 = vmatprep.subr.bf16.mxu0 %v12293_v37 }
 0x47c   :  { %v837_v18 = vpop.xlane.xlu1 %836  ;;  %vm894_vm0 = vmand %vm10729_vm12, %vm889_vm6  ;;  %vm12460_vm12 = vcmask 1043456  }
 0x47d   :  { %v843_v54 = vsub.f32 15.0, %v837_v18  ;;  %vm963_vm10 = vmand %vm10736_vm9, %vm958_vm1  ;;  %vm12461_vm9 = vcmask 293888  }
 0x47e   :  { %vm973_vm8 = vmor %vm894_vm0, %vm963_vm10 }
 0x47f   :  { %vm10785_vm13 = vcmp.eq.f32.partialorder %v843_v54, %v955_v44  ;;  %v839_v59 = vpop.xlane.xlu0 %838  ;;  %v10790_v24 = vsel %vm973_vm8, 1.0, %v12291_v6  ;;  %vm12462_vm4 = vmmov %vm12461_vm9 }
 0x480   :  { %v12457_v58 = vsel %vm10785_vm13, 4294967295, %v12456_v58  ;;  %vm12304_vm6 = vmand %vm10744_vm14, %vm10785_vm13  ;;  %v844_v26 = vsub.f32 %v7757_v51, %v839_v59  ;;  %v9424_v30 = vpack.c.bf16 %v12288_v27, %v10790_v24 }
 0x481   :  { %12458 = vst [vmem:[#allocation38_spill] sm:$0xff] %v12457_v58  ;;  %vm9425_vm10 = vmpackc.low %vm12304_vm6, %vm12306_vm11 }
 0x482   :  { %vm960_vm8 = vcmp.eq.f32.partialorder %v844_v26, %v955_v44  ;;  %9426 = vmatpush3.bf16.msk.msra.mxu0 %vm9425_vm10, %v9424_v30  ;;  %vm12463_vm1 = vmmov %vm12462_vm4  ;;  %vm12466_vm10 = vcmask 261120  }
 0x483   :  { %vm965_vm0 = vmand %vm10776_vm7, %vm960_vm8  ;;  %8562 = vmatprep.subr.mxu0 %v12291_v6 }
 0x484   :  { %v10808_v31 = vsel %vm965_vm0, 1.0, %v12291_v6  ;;  %vm12464_vm2 = vmmov %vm12463_vm1 }
 0x485   :  { %12459 = vst [vmem:[#allocation39_spill] sm:$0xff] %v10808_v31  ;;  %vm12465_vm7 = vmmov %vm12463_vm1 }
 0x486   :  { %8563 = vmatpush3.msk.msra.mxu0 %vm12460_vm12, %v10808_v31  ;;  %vm12467_vm8 = vmmov %vm12466_vm10 }
 0x487   :  { %9433 = vmatprep.subr.bf16.mxu0 %v12293_v37  ;;  %vm12468_vm0 = vmmov %vm12467_vm8 }
 0x488   :  { %vm12469_vm12 = vmmov %vm12468_vm0 }
 0x4d6   :  { %v1075_v20 = vpop.f32.mrb[12].mxu0  ;;  %v1168_v29 = vpop.f32.mrb[20].mxu1 }
 0x4d7   :  { %v8516_v36 = vpop.f32.mrb[13].mxu0  ;;  %v8541_v38 = vpop.f32.mrb[21].mxu1  ;;  %8565 = vmatmul.mubr.msk.f32.vlgmr.msra.gmra.mrb[22].mxu0 %vm12461_vm9, %v1168_v29  ;;  %vm12470_vm9 = vmmov %vm12468_vm0 }
 0x4d8   :  { %8567 = vmatprep.mubr.msk.f32.mxu0 %vm12426_vm3, %v12291_v6  ;;  %9435 = vmatpush3.bf16.msra.mxu0 %v9434_v35 }
 0x4d9   :  { %9436 = vmatprep.subr.bf16.mxu0 %v12293_v37 }
 0x4da   :  { %v1080_v40 = vpop.f32.mrb[14].mxu0  ;;  %v1173_v44 = vpop.f32.mrb[22].mxu1 }
 0x4db   :  { %v8519_v47 = vpop.f32.mrb[15].mxu0  ;;  %v8544_v49 = vpop.f32.mrb[23].mxu1  ;;  %8568 = vmatmul.mubr.msk.f32.gmra.mrb[24].mxu0 %vm12462_vm4, %v1173_v44  ;;  %vm12309_vm4 = vcmask 269312  }
 0x4dc   :  { %8570 = vmatprep.mubr.msk.f32.mxu0 %vm12426_vm3, %v12291_v6  ;;  %9438 = vmatpush3.bf16.msra.mxu0 %v9437_v39 }
 0x4dd   :  { %9445 = vmatprep.subr.bf16.mxu0 %v12293_v37 }
 0x4de   :  { %v1085_v9 = vpop.f32.mrb[16].mxu0  ;;  %v1178_v18 = vpop.f32.mrb[24].mxu1 }
 0x4df   :  { %v8522_v51 = vpop.f32.mrb[17].mxu0  ;;  %v8547_v52 = vpop.f32.mrb[25].mxu1  ;;  %8571 = vmatmul.mubr.msk.f32.gmra.mrb[26].mxu0 %vm12463_vm1, %v1178_v18  ;;  %vm12308_vm1 = vcmask 262144  }
 0x4e0   :  { %8573 = vmatprep.mubr.msk.f32.mxu0 %vm12426_vm3, %v12291_v6 }
 0x4e2   :  { %v1090_v54 = vpop.f32.mrb[18].mxu0  ;;  %v1183_v59 = vpop.f32.mrb[26].mxu1 }
 0x4e3   :  { %v8525_v26 = vpop.f32.mrb[19].mxu0  ;;  %v8550_v30 = vpop.f32.mrb[27].mxu1  ;;  %8574 = vmatmul.mubr.msk.f32.gmra.mrb[28].mxu0 %vm12464_vm2, %v1183_v59 }
 0x4e4   :  { %8576 = vmatprep.mubr.msk.f32.mxu0 %vm12426_vm3, %v12291_v6 }
 0x4e6   :  { %v1095_v32 = vpop.f32.mrb[20].mxu0  ;;  %v1188_v33 = vpop.f32.mrb[28].mxu1 }
 0x4e7   :  { %v8528_v35 = vpop.f32.mrb[21].mxu0  ;;  %v8553_v17 = vpop.f32.mrb[29].mxu1  ;;  %8577 = vmatmul.mubr.msk.f32.gmra.mrb[30].mxu0 %vm12465_vm7, %v1188_v33 }
 0x4e8   :  { %8612 = vmatprep.mubr.msk.f32.mxu0 %vm12426_vm3, %v12291_v6 }
 0x4eb   :  { %8613 = vmatmul.mubr.msk.f32.vlgmr.msra.gmra.mrb[32].mxu0 %vm12466_vm10, %v1075_v20 }
 0x4ec   :  { %8615 = vmatprep.mubr.msk.f32.mxu0 %vm12426_vm3, %v12291_v6 }
 0x4ef   :  { %8616 = vmatmul.mubr.msk.f32.gmra.mrb[34].mxu0 %vm12467_vm8, %v1080_v40 }
 0x4f0   :  { %8618 = vmatprep.mubr.msk.f32.mxu0 %vm12426_vm3, %v12291_v6 }
 0x4f3   :  { %8619 = vmatmul.mubr.msk.f32.gmra.mrb[36].mxu0 %vm12468_vm0, %v1085_v9 }
 0x4f4   :  { %8621 = vmatprep.mubr.msk.f32.mxu0 %vm12426_vm3, %v12291_v6 }
 0x4f7   :  { %8622 = vmatmul.mubr.msk.f32.gmra.mrb[38].mxu0 %vm12469_vm12, %v1090_v54 }
 0x4f8   :  { %8624 = vmatprep.mubr.msk.f32.mxu0 %vm12426_vm3, %v12291_v6 }
 0x4fb   :  { %8625 = vmatmul.mubr.msk.f32.gmra.mrb[40].mxu0 %vm12470_vm9, %v1095_v32  ;;  %vm12305_vm9 = vcmask 1040384  }
 0x4fc   :  { %8662 = vmatprep.mubr.msk.f32.mxu0 %vm12426_vm3, %v12291_v6 }
 0x5aa   :  { %v10857_v15 = vpop.f32.mrb[22].mxu0 }
 0x5ab   :  { %v10861_v20 = vadd.f32 %v10857_v15, %v10259_v7  ;;  %v8566_v29 = vpop.f32.mrb[23].mxu0 }
 0x5ad   :  { %v1306_v36 = vsel %vm12309_vm4, %v10861_v20, 0.0 }
 0x5ae   :  { %1307 = vadd.xlane.f32.xlu1 %v1306_v36  ;;  %v10865_v38 = vpop.f32.mrb[24].mxu0 }
 0x5af   :  { %v10869_v39 = vadd.f32 %v10865_v38, %v10292_v14  ;;  %v8569_v44 = vpop.f32.mrb[25].mxu0 }
 0x5b1   :  { %v1309_v47 = vsel %vm12309_vm4, %v10869_v39, 0.0 }
 0x5b2   :  { %1310 = vadd.xlane.f32.xlu0 %v1309_v47  ;;  %v1322_v49 = vadd.f32 %v1309_v47, %v1306_v36  ;;  %v10875_v9 = vpop.f32.mrb[26].mxu0 }
 0x5b3   :  { %v10879_v18 = vadd.f32 %v10875_v9, %v10276_v10  ;;  %v8572_v51 = vpop.f32.mrb[27].mxu0 }
 0x5b5   :  { %v1312_v52 = vsel %vm12309_vm4, %v10879_v18, 0.0 }
 0x5b6   :  { %1313 = vadd.xlane.f32.xlu1 %v1312_v52  ;;  %v1323_v54 = vadd.f32 %v1322_v49, %v1312_v52  ;;  %v10883_v59 = vpop.f32.mrb[28].mxu0 }
 0x5b7   :  { %v10887_v26 = vadd.f32 %v10883_v59, %v10289_v13  ;;  %v8575_v32 = vpop.f32.mrb[29].mxu0 }
 0x5b9   :  { %v1315_v33 = vsel %vm12309_vm4, %v10887_v26, 0.0 }
 0x5ba   :  { %1316 = vadd.xlane.f32.xlu0 %v1315_v33  ;;  %v1324_v35 = vadd.f32 %v1323_v54, %v1315_v33  ;;  %v10893_v17 = vpop.f32.mrb[30].mxu0 }
 0x5bb   :  { %v10897_v29 = vadd.f32 %v10893_v17, %v10327_v23  ;;  %v8578_v36 = vpop.f32.mrb[31].mxu0 }
 0x5bd   :  { %v1319_v13 = vsel %vm12308_vm1, %v10897_v29, 0.0 }
 0x5be   :  { %1320 = vadd.xlane.f32.xlu1 %v1319_v13  ;;  %v1325_v44 = vadd.f32 %v1324_v35, %v1319_v13  ;;  %v10901_v47 = vpop.f32.mrb[32].mxu0 }
 0x5bf   :  { %v8614_v49 = vpop.f32.mrb[33].mxu0 }
 0x5c0   :  { %v1326_v13 = vrot.slane %v1325_v44, 4 }
 0x5c2   :  { %v10903_v51 = vpop.f32.mrb[34].mxu0  ;;  %v1327_v49 = vadd.f32 %v1326_v13, %v1325_v44 }
 0x5c3   :  { %v8617_v54 = vpop.f32.mrb[35].mxu0 }
 0x5c4   :  { %v1328_v30 = vrot.slane %v1327_v49, 2 }
 0x5c6   :  { %v10907_v32 = vpop.f32.mrb[36].mxu0  ;;  %v1329_v40 = vadd.f32 %v1328_v30, %v1327_v49 }
 0x5c7   :  { %v8620_v33 = vpop.f32.mrb[37].mxu0 }
 0x5c8   :  { %v1330_v6 = vrot.slane %v1329_v40, 1 }
 0x5ca   :  { %v10909_v23 = vpop.f32.mrb[38].mxu0  ;;  %v1331_v37 = vadd.f32 %v1330_v6, %v1329_v40 }
 0x5cb   :  { %v8623_v27 = vpop.f32.mrb[39].mxu0 }
 0x5cc   :  { %vm1347_vm10 = vcmp.gt.f32.partialorder %v1331_v37, 0.0 }
 0x5ce   :  { %v10913_v22 = vpop.f32.mrb[40].mxu0 }
 0x5cf   :  { %v8626_v35 = vpop.f32.mrb[41].mxu0 }
 0x63b   :  { %v1308_v52 = vpop.xlane.xlu1 %1307 }
 0x63c   :  { %9775 = vrsqrt.f32 %v1308_v52  ;;  %vm1332_vm2 = vcmp.gt.f32.partialorder %v1308_v52, 0.0 }
 0x63d   :  { %9777 = vrsqrt.f32 %v1331_v37 }
 0x63f   :  { %v1311_v54 = vpop.xlane.xlu0 %1310 }
 0x640   :  { %9779 = vrsqrt.f32 %v1311_v54  ;;  %vm1333_vm7 = vcmp.gt.f32.partialorder %v1311_v54, 0.0 }
 0x643   :  { %v1314_v33 = vpop.xlane.xlu1 %1313 }
 0x644   :  { %9781 = vrsqrt.f32 %v1314_v33  ;;  %vm1334_vm8 = vcmp.gt.f32.partialorder %v1314_v33, 0.0 }
 0x646   :  { %v9776_v25 = vpop.eup %9775 }
 0x647   :  { %v1342_v36 = vsel %vm1332_vm2, %v9776_v25, 0.0  ;;  %v1317_v27 = vpop.xlane.xlu0 %1316  ;;  %v9778_v63 = vpop.eup %9777  ;;  %vm12475_vm2 = vcmask 261120  }
 0x648   :  { %9783 = vrsqrt.f32 %v1317_v27  ;;  %v1350_v44 = vmul.f32 %v1342_v36, %v10861_v20  ;;  %v1349_v40 = vsel %vm1347_vm10, %v9778_v63, 0.0  ;;  %vm1335_vm0 = vcmp.gt.f32.partialorder %v1317_v27, 0.0  ;;  %vm12477_vm10 = vmmov %vm12475_vm2 }
 0x649   :  { %v12471_v36 = vmov 0.0|0.0  }
 0x64a   :  { %v9780_v35 = vpop.eup %9779  ;;  %v1355_v56 = vmul.f32 %v1350_v44, %v1349_v40 }
 0x64b   :  { %v1343_v30 = vsel %vm1333_vm7, %v9780_v35, 0.0  ;;  %v1321_v13 = vpop.xlane.xlu1 %1320  ;;  %vm12476_vm7 = vnez %v12386_v60 }
 0x64c   :  { %v1351_v6 = vmul.f32 %v1343_v30, %v10869_v39  ;;  %9785 = vrsqrt.f32 %v1321_v13  ;;  %vm1336_vm12 = vcmp.gt.f32.partialorder %v1321_v13, 0.0  ;;  %v12472_v30 = vmov 0.0   ;;  %v7802_v13 = vld [vmem:[%s12240_s4 + $0x1] sm:$0x1] }
 0x64e   :  { %v9782_v49 = vpop.eup %9781  ;;  %v1356_v55 = vmul.f32 %v1351_v6, %v1349_v40  ;;  %v1696_v6 = vrot.slane %v7802_v13, %v10450_v21 }
 0x64f   :  { %v1344_v52 = vsel %vm1334_vm8, %v9782_v49, 0.0  ;;  %vm12478_vm8 = vmmov %vm12475_vm2 }
 0x650   :  { %v9428_v25 = vpack.c.bf16 %v1356_v55, %v1355_v56  ;;  %v1352_v19 = vmul.f32 %v1344_v52, %v10879_v18 }
 0x652   :  { %v9784_v12 = vpop.eup %9783  ;;  %9429 = vmatpush3.bf16.msra.mxu1 %v9428_v25  ;;  %v1357_v39 = vmul.f32 %v1352_v19, %v1349_v40  ;;  %v12473_v19 = vpack.c.bf16 %v10903_v51, %v10901_v47 }
 0x653   :  { %v1345_v20 = vsel %vm1335_vm0, %v9784_v12, 0.0  ;;  %9430 = vmatprep.subr.bf16.mxu1 %v12471_v36  ;;  %v12474_v12 = vpack.c.bf16 %v10909_v23, %v10907_v32  ;;  %vm12479_vm0 = vmmov %vm12475_vm2 }
 0x654   :  { %v1353_v37 = vmul.f32 %v1345_v20, %v10887_v26 }
 0x656   :  { %v9786_v54 = vpop.eup %9785  ;;  %v1358_v35 = vmul.f32 %v1353_v37, %v1349_v40 }
 0x657   :  { %v1346_v63 = vsel %vm1336_vm12, %v9786_v54, 0.0  ;;  %vm1715_vm12 = vcmask 253952  }
 0x658   :  { %v1354_v44 = vmul.f32 %v1346_v63, %v10897_v29  ;;  %v9431_v33 = vpack.c.bf16 %v1358_v35, %v1357_v39 }
 0x65a   :  { %9432 = vmatpush3.bf16.msra.mxu1 %v9431_v33  ;;  %v1359_v18 = vmul.f32 %v1354_v44, %v1349_v40 }
 0x65b   :  { %8587 = vmatprep.subr.mxu1 %v12472_v30 }
 0x65e   :  { %8588 = vmatpush3.msk.msra.mxu1 %vm12305_vm9, %v1359_v18 }
 0x65f   :  { %8590 = vmatmul.mubr.msk.f32.vlgmr.msra.gmra.mrb[30].mxu1 %vm12309_vm4, %v1355_v56  ;;  %9439 = vmatprep.subr.bf16.mxu1 %v12471_v36 }
 0x660   :  { %9441 = vmatpush3.bf16.msra.mxu1 %v12473_v19  ;;  %8592 = vmatprep.mubr.msk.f32.mxu1 %vm12426_vm3, %v12472_v30 }
 0x661   :  { %9442 = vmatprep.subr.bf16.mxu1 %v12471_v36 }
 0x663   :  { %8593 = vmatmul.mubr.msk.f32.gmra.mrb[32].mxu1 %vm12309_vm4, %v1356_v55 }
 0x664   :  { %9444 = vmatpush3.bf16.msra.mxu1 %v12474_v12  ;;  %8595 = vmatprep.mubr.msk.f32.mxu1 %vm12426_vm3, %v12472_v30 }
 0x665   :  { %8635 = vmatprep.subr.mxu1 %v12472_v30 }
 0x667   :  { %8596 = vmatmul.mubr.msk.f32.gmra.mrb[34].mxu1 %vm12309_vm4, %v1357_v39 }
 0x668   :  { %8636 = vmatpush3.msk.msra.mxu1 %vm12305_vm9, %v10913_v22  ;;  %8598 = vmatprep.mubr.msk.f32.mxu1 %vm12426_vm3, %v12472_v30 }
 0x669   :  { %9453 = vmatprep.subr.bf16.mxu1 %v12471_v36 }
 0x66b   :  { %8599 = vmatmul.mubr.msk.f32.gmra.mrb[36].mxu1 %vm12309_vm4, %v1358_v35 }
 0x66c   :  { %8601 = vmatprep.mubr.msk.f32.mxu1 %vm12426_vm3, %v12472_v30 }
 0x66f   :  { %8602 = vmatmul.mubr.msk.f32.gmra.mrb[38].mxu1 %vm12309_vm4, %v1359_v18 }
 0x670   :  { %8637 = vmatprep.mubr.msk.f32.mxu1 %vm12426_vm3, %v12472_v30 }
 0x732   :  { %v10950_v55 = vpop.f32.mrb[30].mxu1 }
 0x733   :  { %v8591_v56 = vpop.f32.mrb[31].mxu1  ;;  %8638 = vmatmul.mubr.msk.f32.vlgmr.msra.gmra.mrb[40].mxu1 %vm12309_vm4, %v10950_v55 }
 0x734   :  { %8640 = vmatprep.mubr.msk.f32.mxu1 %vm12426_vm3, %v12472_v30 }
 0x736   :  { %v10956_v22 = vpop.f32.mrb[32].mxu1 }
 0x737   :  { %v8594_v26 = vpop.f32.mrb[33].mxu1  ;;  %8641 = vmatmul.mubr.msk.f32.gmra.mrb[42].mxu1 %vm12309_vm4, %v10956_v22 }
 0x738   :  { %8643 = vmatprep.mubr.msk.f32.mxu1 %vm12426_vm3, %v12472_v30 }
 0x73a   :  { %v10962_v29 = vpop.f32.mrb[34].mxu1 }
 0x73b   :  { %v8597_v47 = vpop.f32.mrb[35].mxu1  ;;  %8644 = vmatmul.mubr.msk.f32.gmra.mrb[44].mxu1 %vm12309_vm4, %v10962_v29 }
 0x73c   :  { %8646 = vmatprep.mubr.msk.f32.mxu1 %vm12426_vm3, %v12472_v30 }
 0x73e   :  { %v10968_v51 = vpop.f32.mrb[36].mxu1 }
 0x73f   :  { %v8600_v32 = vpop.f32.mrb[37].mxu1  ;;  %8647 = vmatmul.mubr.msk.f32.gmra.mrb[46].mxu1 %vm12309_vm4, %v10968_v51 }
 0x740   :  { %8649 = vmatprep.mubr.msk.f32.mxu1 %vm12426_vm3, %v12472_v30 }
 0x742   :  { %v10974_v23 = vpop.f32.mrb[38].mxu1 }
 0x743   :  { %v8603_v27 = vpop.f32.mrb[39].mxu1  ;;  %8650 = vmatmul.mubr.msk.f32.gmra.mrb[48].mxu1 %vm12309_vm4, %v10974_v23 }
 0x744   :  { %8675 = vmatprep.mubr.msk.f32.mxu1 %vm12426_vm3, %v12472_v30 }
 0x806   :  { %v1661_v40 = vpop.f32.mrb[40].mxu1 }
 0x807   :  { %v10984_v49 = vmax.f32 %v1661_v40, 0.0  ;;  %v8639_v52 = vpop.f32.mrb[41].mxu1 }
 0x809   :  { %v1698_v25 = vmul.f32 %v1696_v6, %v10984_v49 }
 0x80a   :  { %v1666_v20 = vpop.f32.mrb[42].mxu1 }
 0x80b   :  { %v10987_v37 = vmax.f32 %v1666_v20, 0.0  ;;  %v8642_v54 = vpop.f32.mrb[43].mxu1  ;;  %v1703_v39 = vsel %vm12475_vm2, %v1698_v25, 0.0  ;;  %vm12480_vm2 = vmmov %vm12479_vm0 }
 0x80c   :  { %1704 = vadd.xlane.f32.xlu0 %v1703_v39 }
 0x80d   :  { %v9446_v35 = vpack.c.bf16 %v10987_v37, %v10984_v49  ;;  %v1699_v63 = vmul.f32 %v1696_v6, %v10987_v37 }
 0x80e   :  { %v1671_v44 = vpop.f32.mrb[44].mxu1 }
 0x80f   :  { %v10993_v33 = vmax.f32 %v1671_v44, 0.0  ;;  %v8645_v18 = vpop.f32.mrb[45].mxu1  ;;  %9448 = vmatpush3.bf16.xpose.msk.msra.mxu0 %vm12476_vm7, %v9446_v35  ;;  %v1706_v19 = vsel %vm12477_vm10, %v1699_v63, 0.0  ;;  %vm12481_vm10 = vmmov %vm12479_vm0  ;;  %v12482_v63 = vpack.c.bf16 %v10865_v38, %v10857_v15 }
 0x810   :  { %1707 = vadd.xlane.f32.xlu1 %v1706_v19  ;;  %9449 = vmatprep.subr.bf16.mxu0 %v12471_v36 }
 0x811   :  { %v1700_v12 = vmul.f32 %v1696_v6, %v10993_v33 }
 0x812   :  { %v1676_v56 = vpop.f32.mrb[46].mxu1 }
 0x813   :  { %v11000_v26 = vmax.f32 %v1676_v56, 0.0  ;;  %v8648_v47 = vpop.f32.mrb[47].mxu1  ;;  %v1709_v32 = vsel %vm12478_vm8, %v1700_v12, 0.0  ;;  %vm12484_vm8 = vcmp.ge.s32.totalorder %v10245_v2, 18 }
 0x814   :  { %1710 = vadd.xlane.f32.xlu0 %v1709_v32 }
 0x815   :  { %v9450_v27 = vpack.c.bf16 %v11000_v26, %v10993_v33  ;;  %v1701_v40 = vmul.f32 %v1696_v6, %v11000_v26 }
 0x816   :  { %v1681_v52 = vpop.f32.mrb[48].mxu1 }
 0x817   :  { %v11006_v25 = vmax.f32 %v1681_v52, 0.0  ;;  %v8651_v20 = vpop.f32.mrb[49].mxu1  ;;  %9452 = vmatpush3.bf16.xpose.msk.msra.mxu0 %vm12476_vm7, %v9450_v27  ;;  %v1712_v54 = vsel %vm12479_vm0, %v1701_v40, 0.0  ;;  %vm12485_vm0 = vcmp.ge.s32.totalorder %v10248_v3, 18  ;;  %vm12496_vm7 = vcmp.lt.s32.totalorder %v10245_v2, 18 }
 0x818   :  { %1713 = vadd.xlane.f32.xlu1 %v1712_v54  ;;  %8660 = vmatprep.subr.mxu0 %v12472_v30 }
 0x819   :  { %v1702_v39 = vmul.f32 %v1696_v6, %v11006_v25  ;;  %v12483_v6 = vpack.c.bf16 %v10883_v59, %v10875_v9 }
 0x81b   :  { %v1716_v35 = vsel %vm1715_vm12, %v1702_v39, 0.0  ;;  %vm1829_vm12 = vmand %vm12485_vm0, %vm12484_vm8 }
 0x81c   :  { %1717 = vadd.xlane.f32.xlu0 %v1716_v35  ;;  %v12488_v35 = vmov 0 }
 0x81f   :  { %8661 = vmatpush3.xpose.msk.msra.mxu0 %vm12480_vm2, %v11006_v25  ;;  %vm12486_vm2 = vcmp.lt.s32.totalorder %v10245_v2, 18 }
 0x820   :  { %9459 = vmatprep.subr.bf16.mxu0 %v12471_v36 }
 0x822   :  { %8663 = vmatmul.mubr.msk.f32.vlgmr.msra.gmra.mrb[42].mxu0 %vm12481_vm10, %v7802_v13  ;;  %vm12487_vm10 = vcmp.lt.s32.totalorder %v10248_v3, 18 }
 0x823   :  { %9461 = vmatpush3.bf16.msra.mxu0 %v12482_v63  ;;  %8694 = vmatprep.mubr.msk.f32.mxu0 %vm12426_vm3, %v12472_v30  ;;  %vm11047_vm6 = vmand %vm12487_vm10, %vm12486_vm2  ;;  %v12491_v63 = vmov 0  ;;  %vm12494_vm10 = vcmp.lt.s32.totalorder %v10262_v8, 33 }
 0x824   :  { %9462 = vmatprep.subr.bf16.mxu0 %v12471_v36  ;;  %v12489_v35 = vsel %vm11047_vm6, 4294967295, %v12488_v35  ;;  %vm12493_vm2 = vmmov %vm12484_vm8  ;;  %vm12497_vm8 = vnez %v12399_v62  ;;  %vm12498_vm6 = vcmp.lt.s32.totalorder %v10245_v2, 33 }
 0x825   :  { %vm1831_vm4 = vmand %vm12494_vm10, %vm12493_vm2  ;;  %vm12501_vm10 = vcmask 269312  }
 0x826   :  { %vm11075_vm2 = vmand %vm1831_vm4, %vm12498_vm6 }
 0x827   :  { %9464 = vmatpush3.bf16.msra.mxu0 %v12483_v6 }
 0x828   :  { %8692 = vmatprep.subr.mxu0 %v12472_v30 }
 0x82b   :  { %8693 = vmatpush3.msk.msra.mxu0 %vm12305_vm9, %v10893_v17 }
 0x82c   :  { %9472 = vmatprep.subr.bf16.mxu0 %v12471_v36 }
 0x899   :  { %v1705_v13 = vpop.xlane.xlu0 %1704 }
 0x89a   :  { %9787 = vtanh.f32 %v1705_v13 }
 0x89d   :  { %v1708_v15 = vpop.xlane.xlu1 %1707 }
 0x89e   :  { %9789 = vtanh.f32 %v1708_v15 }
 0x8a1   :  { %v1711_v38 = vpop.xlane.xlu0 %1710 }
 0x8a2   :  { %9791 = vtanh.f32 %v1711_v38 }
 0x8a4   :  { %v9788_v18 = vpop.eup %9787 }
 0x8a5   :  { %v1714_v44 = vpop.xlane.xlu1 %1713  ;;  %v2022_v9 = vmul.f32 %v9788_v18, %v10984_v49 }
 0x8a6   :  { %9793 = vtanh.f32 %v1714_v44 }
 0x8a8   :  { %v9790_v19 = vpop.eup %9789 }
 0x8a9   :  { %v1718_v12 = vpop.xlane.xlu0 %1717  ;;  %v2023_v59 = vmul.f32 %v9790_v19, %v10987_v37 }
 0x8aa   :  { %9795 = vtanh.f32 %v1718_v12 }
 0x8ab   :  { %v9454_v56 = vpack.c.bf16 %v2023_v59, %v2022_v9 }
 0x8ac   :  { %v9792_v17 = vpop.eup %9791 }
 0x8ad   :  { %9455 = vmatpush3.bf16.msra.mxu1 %v9454_v56  ;;  %v2024_v32 = vmul.f32 %v9792_v17, %v10993_v33 }
 0x8ae   :  { %9456 = vmatprep.subr.bf16.mxu1 %v12471_v36 }
 0x8b0   :  { %v9794_v47 = vpop.eup %9793 }
 0x8b1   :  { %v2025_v27 = vmul.f32 %v9794_v47, %v11000_v26 }
 0x8b3   :  { %v9457_v40 = vpack.c.bf16 %v2025_v27, %v2024_v32 }
 0x8b4   :  { %v9796_v52 = vpop.eup %9795 }
 0x8b5   :  { %9458 = vmatpush3.bf16.msra.mxu1 %v9457_v40  ;;  %v2026_v20 = vmul.f32 %v9796_v52, %v11006_v25 }
 0x8b6   :  { %8673 = vmatprep.subr.mxu1 %v12472_v30 }
 0x8b9   :  { %8674 = vmatpush3.msk.msra.mxu1 %vm12305_vm9, %v2026_v20  ;;  %vm12490_vm9 = vcmp.lt.s32.totalorder %v10245_v2, 33 }
 0x8ba   :  { %9465 = vmatprep.subr.bf16.mxu1 %v12471_v36  ;;  %vm11053_vm11 = vmand %vm1829_vm12, %vm12490_vm9  ;;  %vm12495_vm9 = vnez %v12397_v61 }
 0x8bb   :  { %v12492_v63 = vsel %vm11053_vm11, 4294967295, %v12491_v63 }
 0x8f5   :  { %v1807_v54 = vpop.f32.mrb[42].mxu0 }
 0x8f6   :  { %9797 = vtanh.f32 %v1807_v54  ;;  %v8664_v39 = vpop.f32.mrb[43].mxu0 }
 0x900   :  { %v9798_v6 = vpop.eup %9797 }
 0x901   :  { %v1855_v13 = vrot.slane %v9798_v6, %v10450_v21 }
 0x903   :  { %vm1856_vm0 = vcmp.gt.f32.partialorder %v9788_v18, %v1855_v13  ;;  %vm1861_vm1 = vcmp.eq.f32.partialorder %v9788_v18, %v1855_v13  ;;  %vm1862_vm13 = vcmp.eq.f32.partialorder %v9790_v19, %v1855_v13  ;;  %vm1857_vm15 = vcmp.gt.f32.partialorder %v9790_v19, %v1855_v13 }
 0x904   :  { %vm1866_vm12 = vmand %vm1861_vm1, %vm12495_vm9  ;;  %vm1863_vm11 = vcmp.eq.f32.partialorder %v9792_v17, %v1855_v13  ;;  %vm1859_vm4 = vcmp.gt.f32.partialorder %v9794_v47, %v1855_v13 }
 0x905   :  { %vm1871_vm5 = vmor %vm1856_vm0, %vm1866_vm12  ;;  %vm1858_vm0 = vcmp.gt.f32.partialorder %v9792_v17, %v1855_v13 }
 0x906   :  { %vm1876_vm3 = vmand %vm12496_vm7, %vm1871_vm5 }
 0x907   :  { %v1881_v15 = vsel %vm1876_vm3, 1.0, %v12472_v30  ;;  %vm1867_vm14 = vmand %vm1862_vm13, %vm12497_vm8  ;;  %vm12503_vm13 = vcmp.lt.s32.totalorder %v10248_v3, %v10245_v2 }
 0x908   :  { %v1886_v44 = vsel %vm12501_vm10, %v1881_v15, 0.0  ;;  %vm1872_vm1 = vmor %vm1857_vm15, %vm1867_vm14  ;;  %vm12505_vm14 = vnez %v12489_v35  ;;  %vm12506_vm15 = vnez %v12492_v63  ;;  %v7812_v35 = vadd.s32 4294967283, %v10256_v5 }
 0x909   :  { %1906 = vadd.xlane.f32.xlu1 %v1886_v44  ;;  %vm12502_vm12 = vmmov %vm12496_vm7  ;;  %vm1864_vm7 = vcmp.eq.f32.partialorder %v9794_v47, %v1855_v13  ;;  %v7813_v15 = vadd.s32 4294967283, %v10248_v3 }
 0x90a   :  { %vm1877_vm5 = vmand %vm12502_vm12, %vm1872_vm1  ;;  %vm12508_vm1 = vcmp.lt.s32.totalorder %v10253_v4, %v10245_v2 }
 0x90b   :  { %v1882_v18 = vsel %vm1877_vm5, 1.0, %v12472_v30  ;;  %vm1868_vm3 = vmand %vm1863_vm11, %vm12503_vm13  ;;  %vm1865_vm11 = vcmp.eq.f32.partialorder %v9796_v52, %v1855_v13  ;;  %vm12510_vm13 = vnez %v12446_v41 }
 0x90c   :  { %vm12504_vm9 = vmmov %vm12501_vm10 }
 0x90d   :  { %v1887_v19 = vsel %vm12504_vm9, %v1882_v18, 0.0  ;;  %vm1873_vm6 = vmor %vm1858_vm0, %vm1868_vm3  ;;  %vm1860_vm0 = vcmp.gt.f32.partialorder %v9796_v52, %v1855_v13  ;;  %v1974_v13 = vcvt.s32.f32 %v7812_v35  ;;  %v12535_v35 = vmov 0 }
 0x90e   :  { %v1888_v12 = vadd.f32 %v1887_v19, %v1886_v44  ;;  %1908 = vadd.xlane.f32.xlu0 %v1887_v19  ;;  %vm12507_vm10 = vmor %vm12505_vm14, %vm12506_vm15  ;;  %v1975_v44 = vcvt.s32.f32 %v7813_v15  ;;  %v12539_v15 = vmov 0 }
 0x90f   :  { %vm1878_vm8 = vmand %vm12507_vm10, %vm1873_vm6  ;;  %vm12511_vm6 = vcmp.lt.s32.totalorder %v10262_v8, %v10245_v2  ;;  %vm12320_vm10 = vcmp.ge.s32.totalorder %v10256_v5, 13 }
 0x910   :  { %v1883_v9 = vsel %vm1878_vm8, 1.0, %v12472_v30  ;;  %vm1869_vm12 = vmand %vm1864_vm7, %vm12508_vm1  ;;  %vm12319_vm1 = vcmp.lt.s32.totalorder %v10256_v5, 13 }
 0x911   :  { %vm12509_vm5 = vmmov %vm12504_vm9 }
 0x912   :  { %v1889_v59 = vsel %vm12509_vm5, %v1883_v9, 0.0  ;;  %vm1874_vm9 = vmor %vm1859_vm4, %vm1869_vm12  ;;  %vm12513_vm4 = vcmask 262144  }
 0x913   :  { %1910 = vadd.xlane.f32.xlu1 %v1889_v59  ;;  %v1890_v56 = vadd.f32 %v1889_v59, %v1888_v12  ;;  %vm1879_vm3 = vmand %vm12510_vm13, %vm1874_vm9 }
 0x914   :  { %v1884_v17 = vsel %vm1879_vm3, 1.0, %v12472_v30  ;;  %vm1870_vm8 = vmand %vm1865_vm11, %vm12511_vm6  ;;  %vm12515_vm11 = vcmp.lt.s32.totalorder %v10245_v2, 18  ;;  %vm12516_vm3 = vcmp.lt.s32.totalorder %v10245_v2, 33 }
 0x915   :  { %vm12512_vm14 = vmmov %vm12509_vm5 }
 0x916   :  { %v1891_v47 = vsel %vm12512_vm14, %v1884_v17, 0.0  ;;  %vm1875_vm15 = vmor %vm1860_vm0, %vm1870_vm8 }
 0x917   :  { %v1892_v32 = vadd.f32 %v1891_v47, %v1890_v56  ;;  %1912 = vadd.xlane.f32.xlu0 %v1891_v47  ;;  %vm1880_vm7 = vmand %vm11075_vm2, %vm1875_vm15  ;;  %vm12514_vm2 = vcmp.ge.s32.totalorder %v10245_v2, 18 }
 0x918   :  { %v1885_v27 = vsel %vm1880_vm7, 1.0, %v12472_v30  ;;  %vm1965_vm12 = vmand %vm12320_vm10, %vm12514_vm2 }
 0x919   :  { %v1893_v40 = vsel %vm12513_vm4, %v1885_v27, 0.0  ;;  %vm1931_vm5 = vmand %vm12319_vm1, %vm12515_vm11  ;;  %vm12518_vm4 = vcmask 269312   ;;  %vm12520_vm1 = vmmov 0  }
 0x91a   :  { %1914 = vadd.xlane.f32.xlu1 %v1893_v40  ;;  %v1894_v52 = vadd.f32 %v1893_v40, %v1892_v32  ;;  %vm1968_vm6 = vmand %vm1965_vm12, %vm12516_vm3  ;;  %v7814_v32 = vadd.s32 4294967283, %v10245_v2 }
 0x91b   :  { %vm12517_vm14 = vmmov %vm12515_vm11 }
 0x91c   :  { %v1895_v20 = vrot.slane %v1894_v52, 4  ;;  %vm12519_vm2 = vmmov %vm12518_vm4 }
 0x91d   :  { %vm12521_vm10 = vmmov %vm12519_vm2 }
 0x91e   :  { %v1896_v54 = vadd.f32 %v1895_v20, %v1894_v52  ;;  %v7834_v20 = vld [vmem:[%s12239_s3 + $0x28] sm:$0xff] }
 0x920   :  { %v1897_v39 = vrot.slane %v1896_v54, 2 }
 0x922   :  { %v1898_v63 = vadd.f32 %v1897_v39, %v1896_v54  ;;  %v12533_v39 = vmov 0 }
 0x924   :  { %v1899_v6 = vrot.slane %v1898_v63, 1 }
 0x926   :  { %v1900_v38 = vadd.f32 %v1899_v6, %v1898_v63  ;;  %v1995_v63 = vcvt.s32.f32 %v7814_v32  ;;  %v12546_v32 = vmov 1.0  }
 0x928   :  { %vm1933_vm9 = vcmp.eq.f32.partialorder %v1900_v38, %v10615_v43  ;;  %vm1934_vm0 = vcmp.eq.f32.partialorder %v1900_v38, %v10618_v45  ;;  %vm1977_vm8 = vcmp.eq.f32.partialorder %v1900_v38, %v1974_v13  ;;  %vm1978_vm3 = vcmp.eq.f32.partialorder %v1900_v38, %v1975_v44 }
 0x929   :  { %vm1936_vm15 = vmand %vm12517_vm14, %vm1933_vm9  ;;  %vm12322_vm14 = vcmp.ge.s32.totalorder %v10245_v2, 13 }
 0x92a   :  { %v2014_v18 = vsel %vm1936_vm15, 1.0, %v12472_v30  ;;  %vm1937_vm7 = vmand %vm1931_vm5, %vm1934_vm0 }
 0x92b   :  { %8676 = vmatmul.mubr.msk.f32.vlgmr.msra.gmra.mrb[50].mxu1 %vm12518_vm4, %v2014_v18  ;;  %8695 = vmatmul.mubr.msk.f32.vlgmr.msra.gmra.mrb[44].mxu0 %vm12519_vm2, %v2014_v18  ;;  %vm1980_vm11 = vmand %vm1968_vm6, %vm1977_vm8  ;;  %vm12526_vm8 = vcmp.ge.s32.totalorder %v10248_v3, 18  ;;  %vm12348_vm4 = vcmp.lt.s32.totalorder %v10245_v2, 24  ;;  %v12541_v18 = vmov 1.0|1.0  }
 0x92c   :  { %8678 = vmatprep.mubr.msk.f32.mxu1 %vm12520_vm1, %v12472_v30  ;;  %8697 = vmatprep.mubr.msk.f32.mxu0 %vm12520_vm1, %v12472_v30  ;;  %vm2007_vm12 = vmor %vm1937_vm7, %vm1980_vm11  ;;  %v1844_v59 = vsel %vm12526_vm8, 15.0, %v12472_v30 }
 0x92d   :  { %v2015_v19 = vsel %vm2007_vm12, 1.0, %v12472_v30  ;;  %vm12522_vm9 = vmmov %vm12519_vm2 }
 0x92e   :  { %vm1981_vm5 = vmand %vm12510_vm13, %vm1978_vm3 }
 0x92f   :  { %8679 = vmatmul.mubr.msk.f32.gmra.mrb[52].mxu1 %vm12521_vm10, %v2015_v19  ;;  %8698 = vmatmul.mubr.msk.f32.gmra.mrb[46].mxu0 %vm12522_vm9, %v2015_v19  ;;  %v2016_v12 = vsel %vm1981_vm5, 1.0, %v12472_v30  ;;  %vm12523_vm0 = vmmov %vm12519_vm2  ;;  %vm12525_vm10 = vcmp.lt.s32.totalorder %v10248_v3, 18  ;;  %vm12321_vm2 = vcmp.lt.s32.totalorder %v10245_v2, 13 }
 0x930   :  { %8681 = vmatprep.mubr.msk.f32.mxu1 %vm12520_vm1, %v12472_v30  ;;  %8700 = vmatprep.mubr.msk.f32.mxu0 %vm12520_vm1, %v12472_v30  ;;  %vm12524_vm6 = vmmov %vm12523_vm0  ;;  %v1819_v9 = vsel %vm12525_vm10, 18.0, %v12472_v30 }
 0x931   :  { %v1849_v56 = vadd.f32 %v1844_v59, %v1819_v9  ;;  %vm12527_vm15 = vmmov %vm12526_vm8  ;;  %v12544_v59 = vmov 0 }
 0x932   :  { %vm1985_vm7 = vmand %vm12527_vm15, %vm12322_vm14 }
 0x933   :  { %8682 = vmatmul.mubr.msk.f32.gmra.mrb[54].mxu1 %vm12523_vm0, %v2016_v12  ;;  %8701 = vmatmul.mubr.msk.f32.gmra.mrb[48].mxu0 %vm12524_vm6, %v2016_v12  ;;  %vm12528_vm11 = vmmov %vm12525_vm10  ;;  %v7809_v52 = vadd.f32 -1.0, %v1849_v56  ;;  %vm12537_vm10 = vcmp.lt.s32.totalorder %v10262_v8, 33 }
 0x934   :  { %8713 = vmatprep.mubr.msk.f32.mxu1 %vm12520_vm1, %v12472_v30  ;;  %8728 = vmatprep.mubr.msk.f32.mxu0 %vm12520_vm1, %v12472_v30  ;;  %vm11167_vm12 = vmand %vm12528_vm11, %vm12321_vm2  ;;  %v1846_v13 = vsel %vm12537_vm10, 15.0, %v12472_v30 }
 0x935   :  { %vm11174_vm9 = vmand %vm1985_vm7, %vm12348_vm4  ;;  %v7810_v19 = vadd.f32 -1.0, %v1846_v13 }
 0x936   :  { %vm11182_vm5 = vmand %vm12322_vm14, %vm12348_vm4 }
 0x937   :  { %v12534_v39 = vsel %vm11182_vm5, 4294967295, %v12533_v39  ;;  %vm12538_vm8 = vmmov %vm12537_vm10 }
 0x938   :  { %vm1987_vm15 = vmand %vm12538_vm8, %vm12322_vm14 }
 0x939   :  { %vm11214_vm8 = vmand %vm1987_vm15, %vm12348_vm4  ;;  %vm12547_vm15 = vmmov 1  }
 0x996   :  { %v1907_v17 = vpop.xlane.xlu1 %1906 }
 0x997   :  { %v1916_v47 = vsub.f32 17.0, %v1907_v17 }
 0x999   :  { %vm1945_vm3 = vcmp.eq.f32.partialorder %v1916_v47, %v10716_v34 }
 0x99a   :  { %vm11188_vm0 = vmand %vm12321_vm2, %vm1945_vm3 }
 0x99b   :  { %v1909_v40 = vpop.xlane.xlu0 %1908  ;;  %v12536_v35 = vsel %vm11188_vm0, 4294967295, %v12535_v35 }
 0x99c   :  { %v1917_v54 = vsub.f32 17.0, %v1909_v40 }
 0x99e   :  { %vm1946_vm6 = vcmp.eq.f32.partialorder %v1917_v54, %v10716_v34 }
 0x99f   :  { %vm11202_vm7 = vmand %vm12321_vm2, %vm1946_vm6 }
 0x9a0   :  { %v1911_v6 = vpop.xlane.xlu1 %1910  ;;  %v12540_v15 = vsel %vm11202_vm7, 4294967295, %v12539_v15  ;;  %vm9466_vm11 = vmpackc.low %vm11202_vm7, %vm11188_vm0  ;;  %vm12565_vm0 = vnez %v12399_v62 }
 0x9a1   :  { %v1918_v38 = vsub.f32 %v7809_v52, %v1911_v6  ;;  %9467 = vmatpush3.bf16.msk.msra.mxu1 %vm9466_vm11, %v12541_v18  ;;  %vm12548_vm11 = vcmask 1040384   ;;  %v7833_v52 = vld [vmem:[%s12239_s3 + $0x20] sm:$0xff]  ;;  %v7836_v6 = vld [vmem:[%s12239_s3 + $0x38] sm:$0xff] }
 0x9a2   :  { %9468 = vmatprep.subr.bf16.mxu1 %v12471_v36  ;;  %v9476_v54 = vpack.c.bf16 %v7834_v20, %v7833_v52 }
 0x9a3   :  { %vm1947_vm3 = vcmp.eq.f32.partialorder %v1918_v38, %v10716_v34  ;;  %vm1998_vm10 = vcmp.eq.f32.partialorder %v1918_v38, %v1995_v63 }
 0x9a4   :  { %v1913_v44 = vpop.xlane.xlu0 %1912  ;;  %vm1952_vm6 = vmand %vm11167_vm12, %vm1947_vm3  ;;  %vm12549_vm3 = vcmask 269312  }
 0x9a5   :  { %v1919_v9 = vsub.f32 14.0, %v1913_v44  ;;  %vm2003_vm2 = vmand %vm11174_vm9, %vm1998_vm10 }
 0x9a6   :  { %vm2011_vm14 = vmor %vm1952_vm6, %vm2003_vm2  ;;  %vm12552_vm6 = vcmask 261120  }
 0x9a7   :  { %vm11223_vm13 = vcmp.eq.f32.partialorder %v1919_v9, %v1995_v63  ;;  %v1915_v56 = vpop.xlane.xlu1 %1914  ;;  %v11228_v17 = vsel %vm2011_vm14, 1.0, %v12472_v30  ;;  %vm12550_vm10 = vmmov %vm12549_vm3 }
 0x9a8   :  { %v12545_v59 = vsel %vm11223_vm13, 4294967295, %v12544_v59  ;;  %vm12340_vm12 = vmand %vm11182_vm5, %vm11223_vm13  ;;  %v1920_v47 = vsub.f32 %v7810_v19, %v1915_v56  ;;  %v9469_v27 = vpack.c.bf16 %v12546_v32, %v11228_v17 }
 0x9a9   :  { %vm9470_vm2 = vmpackc.low %vm12340_vm12, %vm12547_vm15 }
 0x9aa   :  { %vm2000_vm9 = vcmp.eq.f32.partialorder %v1920_v47, %v1995_v63  ;;  %9471 = vmatpush3.bf16.msk.msra.mxu1 %vm9470_vm2, %v9469_v27  ;;  %v7835_v63 = vld [vmem:[%s12239_s3 + $0x30] sm:$0xff]  ;;  %vm12553_vm2 = vmmov %vm12552_vm6 }
 0x9ab   :  { %vm2005_vm14 = vmand %vm11214_vm8, %vm2000_vm9  ;;  %8711 = vmatprep.subr.mxu1 %v12472_v30  ;;  %v9479_v19 = vpack.c.bf16 %v7836_v6, %v7835_v63 }
 0x9ac   :  { %v11246_v40 = vsel %vm2005_vm14, 1.0, %v12472_v30  ;;  %vm12551_vm8 = vmmov %vm12549_vm3  ;;  %vm12341_vm14 = vcmask 195584  }
 0x9ad   :  { %vm12554_vm9 = vmmov %vm12553_vm2 }
 0x9ae   :  { %8712 = vmatpush3.msk.msra.mxu1 %vm12548_vm11, %v11246_v40 }
 0x9af   :  { %9475 = vmatprep.subr.bf16.mxu1 %v12471_v36 }
 0x9fe   :  { %v2105_v13 = vpop.f32.mrb[50].mxu1  ;;  %v2188_v38 = vpop.f32.mrb[44].mxu0 }
 0x9ff   :  { %v8677_v44 = vpop.f32.mrb[51].mxu1  ;;  %v8696_v18 = vpop.f32.mrb[45].mxu0  ;;  %8714 = vmatmul.mubr.msk.f32.vlgmr.msra.gmra.mrb[56].mxu1 %vm12549_vm3, %v2188_v38 }
 0xa00   :  { %8716 = vmatprep.mubr.msk.f32.mxu1 %vm12520_vm1, %v12472_v30  ;;  %9477 = vmatpush3.bf16.msra.mxu1 %v9476_v54 }
 0xa01   :  { %9478 = vmatprep.subr.bf16.mxu1 %v12471_v36 }
 0xa02   :  { %v2110_v12 = vpop.f32.mrb[52].mxu1  ;;  %v2193_v9 = vpop.f32.mrb[46].mxu0 }
 0xa03   :  { %v8680_v56 = vpop.f32.mrb[53].mxu1  ;;  %v8699_v47 = vpop.f32.mrb[47].mxu0  ;;  %8717 = vmatmul.mubr.msk.f32.gmra.mrb[58].mxu1 %vm12550_vm10, %v2193_v9 }
 0xa04   :  { %8719 = vmatprep.mubr.msk.f32.mxu1 %vm12520_vm1, %v12472_v30  ;;  %9480 = vmatpush3.bf16.msra.mxu1 %v9479_v19 }
 0xa05   :  { %9484 = vmatprep.subr.bf16.mxu1 %v12471_v36 }
 0xa06   :  { %v2115_v27 = vpop.f32.mrb[54].mxu1  ;;  %v2198_v52 = vpop.f32.mrb[48].mxu0 }
 0xa07   :  { %v8683_v20 = vpop.f32.mrb[55].mxu1  ;;  %v8702_v38 = vpop.f32.mrb[49].mxu0  ;;  %8720 = vmatmul.mubr.msk.f32.gmra.mrb[60].mxu1 %vm12551_vm8, %v2198_v52 }
 0xa08   :  { %8745 = vmatprep.mubr.msk.f32.mxu1 %vm12520_vm1, %v12472_v30 }
 0xa0b   :  { %8746 = vmatmul.mubr.msk.f32.vlgmr.msra.gmra.mrb[62].mxu1 %vm12552_vm6, %v2105_v13  ;;  %vm12555_vm6 = vmmov %vm12553_vm2 }
 0xa0c   :  { %8748 = vmatprep.mubr.msk.f32.mxu1 %vm12520_vm1, %v12472_v30 }
 0xa0f   :  { %8749 = vmatmul.mubr.msk.f32.gmra.mrb[64].mxu1 %vm12553_vm2, %v2110_v12  ;;  %vm12556_vm2 = vnez %v12386_v60 }
 0xa10   :  { %8751 = vmatprep.mubr.msk.f32.mxu1 %vm12520_vm1, %v12472_v30 }
 0xa13   :  { %8752 = vmatmul.mubr.msk.f32.gmra.mrb[66].mxu1 %vm12554_vm9, %v2115_v27  ;;  %vm12557_vm9 = vmmov %vm12555_vm6 }
 0xa14   :  { %8775 = vmatprep.mubr.msk.f32.mxu1 %vm12520_vm1, %v12472_v30 }
 0xad2   :  { %v2280_v54 = vpop.f32.mrb[56].mxu1 }
 0xad3   :  { %v2294_v63 = vadd.f32 %v2280_v54, %v10259_v7  ;;  %v8715_v6 = vpop.f32.mrb[57].mxu1 }
 0xad5   :  { %v2298_v13 = vsel %vm12341_vm14, %v2294_v63, 0.0 }
 0xad6   :  { %2299 = vadd.xlane.f32.xlu0 %v2298_v13  ;;  %v2285_v44 = vpop.f32.mrb[58].mxu1 }
 0xad7   :  { %v2295_v18 = vadd.f32 %v2285_v44, %v10292_v14  ;;  %v11286_v19 = vpack.c.bf16 %v2285_v44, %v2280_v54  ;;  %v8718_v12 = vpop.f32.mrb[59].mxu1 }
 0xad9   :  { %v2301_v9 = vsel %vm12341_vm14, %v2295_v18, 0.0 }
 0xada   :  { %2302 = vadd.xlane.f32.xlu1 %v2301_v9  ;;  %v2307_v56 = vadd.f32 %v2301_v9, %v2298_v13  ;;  %v11289_v47 = vpop.f32.mrb[60].mxu1 }
 0xadb   :  { %v8721_v27 = vpop.f32.mrb[61].mxu1  ;;  %v2296_v52 = vadd.f32 %v11289_v47, %v10276_v10 }
 0xadd   :  { %v2304_v20 = vsel %vm12341_vm14, %v2296_v52, 0.0 }
 0xade   :  { %2305 = vadd.xlane.f32.xlu0 %v2304_v20  ;;  %v2308_v38 = vadd.f32 %v2307_v56, %v2304_v20  ;;  %v2502_v6 = vpop.f32.mrb[62].mxu1 }
 0xadf   :  { %v8747_v45 = vpop.f32.mrb[63].mxu1 }
 0xae0   :  { %v2309_v50 = vrot.slane %v2308_v38, 4 }
 0xae2   :  { %v2507_v8 = vpop.f32.mrb[64].mxu1  ;;  %v2310_v48 = vadd.f32 %v2309_v50, %v2308_v38 }
 0xae3   :  { %v9482_v54 = vpack.c.bf16 %v2507_v8, %v2502_v6  ;;  %v8750_v44 = vpop.f32.mrb[65].mxu1 }
 0xae4   :  { %v2311_v13 = vrot.slane %v2310_v48, 2 }
 0xae6   :  { %v2512_v12 = vpop.f32.mrb[66].mxu1  ;;  %v2312_v9 = vadd.f32 %v2311_v13, %v2310_v48 }
 0xae7   :  { %v8753_v4 = vpop.f32.mrb[67].mxu1 }
 0xae8   :  { %v2313_v46 = vrot.slane %v2312_v9, 1 }
 0xaea   :  { %v2314_v27 = vadd.f32 %v2313_v46, %v2312_v9 }
 0xaec   :  { %vm2324_vm10 = vcmp.gt.f32.partialorder %v2314_v27, 0.0 }
 0xb63   :  { %v2300_v16 = vpop.xlane.xlu0 %2299 }
 0xb64   :  { %9799 = vrsqrt.f32 %v2300_v16  ;;  %vm2315_vm11 = vcmp.gt.f32.partialorder %v2300_v16, 0.0 }
 0xb65   :  { %9801 = vrsqrt.f32 %v2314_v27 }
 0xb67   :  { %v2303_v10 = vpop.xlane.xlu1 %2302 }
 0xb68   :  { %9803 = vrsqrt.f32 %v2303_v10  ;;  %vm2316_vm3 = vcmp.gt.f32.partialorder %v2303_v10, 0.0 }
 0xb6b   :  { %v2306_v28 = vpop.xlane.xlu0 %2305 }
 0xb6c   :  { %9805 = vrsqrt.f32 %v2306_v28  ;;  %vm2317_vm8 = vcmp.gt.f32.partialorder %v2306_v28, 0.0 }
 0xb6e   :  { %v9800_v56 = vpop.eup %9799 }
 0xb6f   :  { %v2321_v45 = vsel %vm2315_vm11, %v9800_v56, 0.0  ;;  %v9802_v8 = vpop.eup %9801  ;;  %vm12558_vm11 = vmmov %vm12555_vm6 }
 0xb70   :  { %v2327_v6 = vmul.f32 %v2321_v45, %v2294_v63  ;;  %v2326_v48 = vsel %vm2324_vm10, %v9802_v8, 0.0 }
 0xb72   :  { %v9804_v20 = vpop.eup %9803  ;;  %v2330_v46 = vmul.f32 %v2327_v6, %v2326_v48 }
 0xb73   :  { %v2322_v4 = vsel %vm2316_vm3, %v9804_v20, 0.0  ;;  %vm12559_vm3 = vmmov %vm12555_vm6 }
 0xb74   :  { %v2328_v50 = vmul.f32 %v2322_v4, %v2295_v18  ;;  %vm12560_vm10 = vmmov %vm12559_vm3 }
 0xb76   :  { %v9806_v38 = vpop.eup %9805  ;;  %v2331_v44 = vmul.f32 %v2328_v50, %v2326_v48 }
 0xb77   :  { %v2323_v13 = vsel %vm2317_vm8, %v9806_v38, 0.0  ;;  %vm12561_vm8 = vcmp.ge.s32.totalorder %v10245_v2, 13 }
 0xb78   :  { %v2329_v9 = vmul.f32 %v2323_v13, %v2296_v52  ;;  %v9473_v0 = vpack.c.bf16 %v2331_v44, %v2330_v46 }
 0xb7a   :  { %9474 = vmatpush3.bf16.msra.mxu0 %v9473_v0  ;;  %v2332_v16 = vmul.f32 %v2329_v9, %v2326_v48 }
 0xb7b   :  { %8726 = vmatprep.subr.mxu0 %v12472_v30 }
 0xb7e   :  { %8727 = vmatpush3.msra.mxu0 %v2332_v16 }
 0xb7f   :  { %8729 = vmatmul.mubr.msk.f32.vlgmr.msra.gmra.mrb[50].mxu0 %vm12341_vm14, %v2330_v46  ;;  %9481 = vmatprep.subr.bf16.mxu0 %v12471_v36 }
 0xb80   :  { %9483 = vmatpush3.bf16.msra.mxu0 %v9482_v54  ;;  %8731 = vmatprep.mubr.msk.f32.mxu0 %vm12520_vm1, %v12472_v30 }
 0xb81   :  { %8758 = vmatprep.subr.mxu0 %v12472_v30 }
 0xb83   :  { %8732 = vmatmul.mubr.msk.f32.gmra.mrb[52].mxu0 %vm12341_vm14, %v2331_v44 }
 0xb84   :  { %8759 = vmatpush3.msra.mxu0 %v2512_v12  ;;  %8734 = vmatprep.mubr.msk.f32.mxu0 %vm12520_vm1, %v12472_v30  ;;  %v7843_v12 = vld [vmem:[%s12240_s4 + $0x2] sm:$0x1] }
 0xb85   :  { %v2614_v27 = vrot.slane %v7843_v12, %v10450_v21 }
 0xb87   :  { %8735 = vmatmul.mubr.msk.f32.gmra.mrb[54].mxu0 %vm12341_vm14, %v2332_v16 }
 0xb88   :  { %8760 = vmatprep.mubr.msk.f32.mxu0 %vm12520_vm1, %v12472_v30 }
 0xc52   :  { %v11306_v0 = vpop.f32.mrb[50].mxu0 }
 0xc53   :  { %v8730_v28 = vpop.f32.mrb[51].mxu0  ;;  %8761 = vmatmul.mubr.msk.f32.vlgmr.msra.gmra.mrb[56].mxu0 %vm12341_vm14, %v11306_v0 }
 0xc54   :  { %8763 = vmatprep.mubr.msk.f32.mxu0 %vm12520_vm1, %v12472_v30 }
 0xc56   :  { %v11312_v63 = vpop.f32.mrb[52].mxu0 }
 0xc57   :  { %v8733_v18 = vpop.f32.mrb[53].mxu0  ;;  %8764 = vmatmul.mubr.msk.f32.gmra.mrb[58].mxu0 %vm12341_vm14, %v11312_v63 }
 0xc58   :  { %8766 = vmatprep.mubr.msk.f32.mxu0 %vm12520_vm1, %v12472_v30 }
 0xc5a   :  { %v11318_v52 = vpop.f32.mrb[54].mxu0 }
 0xc5b   :  { %v8736_v54 = vpop.f32.mrb[55].mxu0  ;;  %8767 = vmatmul.mubr.msk.f32.gmra.mrb[60].mxu0 %vm12341_vm14, %v11318_v52 }
 0xd26   :  { %v2591_v10 = vpop.f32.mrb[56].mxu0 }
 0xd27   :  { %v11326_v56 = vmax.f32 %v2591_v10, 0.0  ;;  %v8762_v45 = vpop.f32.mrb[57].mxu0 }
 0xd29   :  { %v2616_v8 = vmul.f32 %v2614_v27, %v11326_v56 }
 0xd2a   :  { %v2596_v20 = vpop.f32.mrb[58].mxu0 }
 0xd2b   :  { %v11329_v6 = vmax.f32 %v2596_v20, 0.0  ;;  %v8765_v4 = vpop.f32.mrb[59].mxu0  ;;  %v2619_v50 = vsel %vm12555_vm6, %v2616_v8, 0.0  ;;  %vm12562_vm6 = vcmp.ge.s32.totalorder %v10256_v5, 13 }
 0xd2c   :  { %2620 = vadd.xlane.f32.xlu1 %v2619_v50 }
 0xd2d   :  { %v9485_v48 = vpack.c.bf16 %v11329_v6, %v11326_v56  ;;  %v2617_v38 = vmul.f32 %v2614_v27, %v11329_v6 }
 0xd2e   :  { %v2601_v46 = vpop.f32.mrb[60].mxu0 }
 0xd2f   :  { %v11335_v44 = vmax.f32 %v2601_v46, 0.0  ;;  %v8768_v13 = vpop.f32.mrb[61].mxu0  ;;  %9487 = vmatpush3.bf16.xpose.msk.msra.mxu1 %vm12556_vm2, %v9485_v48  ;;  %v2622_v9 = vsel %vm12557_vm9, %v2617_v38, 0.0  ;;  %vm2723_vm9 = vmand %vm12562_vm6, %vm12561_vm8 }
 0xd30   :  { %2623 = vadd.xlane.f32.xlu0 %v2622_v9  ;;  %8773 = vmatprep.subr.mxu1 %v12472_v30  ;;  %vm2726_vm12 = vmand %vm2723_vm9, %vm12348_vm4  ;;  %vm12567_vm4 = vcmask 195584  }
 0xd31   :  { %v2618_v16 = vmul.f32 %v2614_v27, %v11335_v44 }
 0xd33   :  { %v2625_v28 = vsel %vm12558_vm11, %v2618_v16, 0.0  ;;  %vm12563_vm11 = vcmp.lt.s32.totalorder %v10245_v2, 13 }
 0xd34   :  { %2626 = vadd.xlane.f32.xlu1 %v2625_v28 }
 0xd37   :  { %8774 = vmatpush3.xpose.msk.msra.mxu1 %vm12559_vm3, %v11335_v44  ;;  %vm12564_vm3 = vcmp.lt.s32.totalorder %v10256_v5, 13 }
 0xd38   :  { %9493 = vmatprep.subr.bf16.mxu1 %v11286_v19 }
 0xd3a   :  { %8776 = vmatmul.mubr.msk.f32.vlgmr.msra.gmra.mrb[68].mxu1 %vm12560_vm10, %v7843_v12  ;;  %vm2714_vm10 = vmand %vm12564_vm3, %vm12563_vm11  ;;  %vm12566_vm11 = vnez %v12397_v61 }
 0xd3b   :  { %9495 = vmatpush3.bf16.msra.mxu1 %v11286_v19  ;;  %vm2729_vm14 = vmor %vm2714_vm10, %vm2726_vm12  ;;  %vm12568_vm12 = vcmp.lt.s32.totalorder %v10245_v2, 13 }
 0xd3c   :  { %8791 = vmatprep.subr.mxu1 %v11289_v47 }
 0xd3f   :  { %8792 = vmatpush3.msra.mxu1 %v11289_v47 }
 0xdb9   :  { %v2621_v18 = vpop.xlane.xlu1 %2620 }
 0xdba   :  { %9807 = vtanh.f32 %v2621_v18 }
 0xdbd   :  { %v2624_v54 = vpop.xlane.xlu0 %2623 }
 0xdbe   :  { %9809 = vtanh.f32 %v2624_v54 }
 0xdc1   :  { %v2627_v27 = vpop.xlane.xlu1 %2626 }
 0xdc2   :  { %9811 = vtanh.f32 %v2627_v27 }
 0xdc4   :  { %v9808_v10 = vpop.eup %9807 }
 0xdc5   :  { %v2845_v8 = vmul.f32 %v9808_v10, %v11326_v56 }
 0xdc8   :  { %v9810_v45 = vpop.eup %9809 }
 0xdc9   :  { %v2846_v20 = vmul.f32 %v9810_v45, %v11329_v6 }
 0xdcb   :  { %v9488_v4 = vpack.c.bf16 %v2846_v20, %v2845_v8 }
 0xdcc   :  { %v9812_v12 = vpop.eup %9811 }
 0xdcd   :  { %9489 = vmatprep.subr.bf16.mxu0 %v9488_v4  ;;  %v2847_v19 = vmul.f32 %v9812_v12, %v11335_v44 }
 0xdce   :  { %9491 = vmatpush3.bf16.msra.mxu0 %v9488_v4 }
 0xdcf   :  { %8782 = vmatprep.subr.mxu0 %v2847_v19 }
 0xdd2   :  { %8783 = vmatpush3.msra.mxu0 %v2847_v19 }
 0xe0d   :  { %v2708_v47 = vpop.f32.mrb[68].mxu1 }
 0xe0e   :  { %9813 = vtanh.f32 %v2708_v47  ;;  %v8777_v50 = vpop.f32.mrb[69].mxu1 }
 0xe18   :  { %v9814_v48 = vpop.eup %9813 }
 0xe19   :  { %v2740_v38 = vrot.slane %v9814_v48, %v10450_v21 }
 0xe1b   :  { %vm2742_vm13 = vcmp.gt.f32.partialorder %v9810_v45, %v2740_v38  ;;  %vm2745_vm7 = vcmp.eq.f32.partialorder %v9810_v45, %v2740_v38  ;;  %vm2744_vm1 = vcmp.eq.f32.partialorder %v9808_v10, %v2740_v38  ;;  %vm2741_vm8 = vcmp.gt.f32.partialorder %v9808_v10, %v2740_v38 }
 0xe1c   :  { %vm2748_vm2 = vmand %vm2745_vm7, %vm12565_vm0  ;;  %vm2746_vm5 = vcmp.eq.f32.partialorder %v9812_v12, %v2740_v38  ;;  %vm2743_vm10 = vcmp.gt.f32.partialorder %v9812_v12, %v2740_v38 }
 0xe1d   :  { %vm2751_vm15 = vmor %vm2742_vm13, %vm2748_vm2  ;;  %vm12569_vm13 = vcmp.lt.s32.totalorder %v10248_v3, %v10245_v2 }
 0xe1e   :  { %vm2754_vm6 = vmand %vm2729_vm14, %vm2751_vm15 }
 0xe1f   :  { %v2757_v46 = vsel %vm2754_vm6, 1.0, %v12472_v30  ;;  %vm2747_vm3 = vmand %vm2744_vm1, %vm12566_vm11  ;;  %vm12571_vm1 = vnez %v12534_v39  ;;  %vm12574_vm6 = vcmp.lt.s32.totalorder %v10245_v2, 24 }
 0xe20   :  { %v2760_v13 = vsel %vm12567_vm4, %v2757_v46, 0.0  ;;  %vm2750_vm9 = vmor %vm2741_vm8, %vm2747_vm3  ;;  %v7850_v46 = vadd.s32 4294967288, %v10245_v2 }
 0xe21   :  { %2775 = vadd.xlane.f32.xlu0 %v2760_v13  ;;  %vm2753_vm0 = vmand %vm12568_vm12, %vm2750_vm9 }
 0xe22   :  { %v2756_v9 = vsel %vm2753_vm0, 1.0, %v12472_v30  ;;  %vm2749_vm7 = vmand %vm2746_vm5, %vm12569_vm13  ;;  %vm12364_vm0 = vcmp.lt.s32.totalorder %v10256_v5, 15  ;;  %vm12573_vm5 = vcmp.ge.s32.totalorder %v10245_v2, 13 }
 0xe23   :  { %vm12570_vm15 = vmmov %vm12567_vm4 }
 0xe24   :  { %v2759_v16 = vsel %vm12570_vm15, %v2756_v9, 0.0  ;;  %vm2752_vm14 = vmor %vm2743_vm10, %vm2749_vm7  ;;  %v2828_v9 = vcvt.s32.f32 %v7850_v46 }
 0xe25   :  { %2773 = vadd.xlane.f32.xlu1 %v2759_v16  ;;  %v2761_v28 = vadd.f32 %v2760_v13, %v2759_v16  ;;  %vm2755_vm4 = vmand %vm12571_vm1, %vm2752_vm14 }
 0xe26   :  { %v2758_v18 = vsel %vm2755_vm4, 1.0, %v12472_v30  ;;  %vm12572_vm2 = vmmov %vm12570_vm15 }
 0xe27   :  { %v2762_v54 = vsel %vm12572_vm2, %v2758_v18, 0.0  ;;  %vm2811_vm8 = vmand %vm12364_vm0, %vm12573_vm5  ;;  %vm12581_vm5 = vcmp.ge.s32.totalorder %v10256_v5, 13 }
 0xe28   :  { %2777 = vadd.xlane.f32.xlu0 %v2762_v54  ;;  %v2763_v27 = vadd.f32 %v2762_v54, %v2761_v28  ;;  %vm2813_vm3 = vmand %vm2811_vm8, %vm12574_vm6  ;;  %v2732_v48 = vsel %vm12581_vm5, 11.0, %v12472_v30  ;;  %vm12365_vm8 = vcmp.ge.s32.totalorder %v10245_v2, 8  ;;  %vm12358_vm6 = vcmp.lt.s32.totalorder %v10245_v2, 8 }
 0xe29   :  { %vm12575_vm10 = vmmov %vm12568_vm12 }
 0xe2a   :  { %v2764_v10 = vrot.slane %v2763_v27, 4  ;;  %vm12576_vm7 = vmmov %vm12572_vm2 }
 0xe2b   :  { %vm12577_vm15 = vmmov %vm12572_vm2 }
 0xe2c   :  { %v2765_v45 = vadd.f32 %v2764_v10, %v2763_v27  ;;  %vm12578_vm14 = vmmov %vm12572_vm2 }
 0xe2d   :  { %vm12579_vm4 = vmmov %vm12572_vm2  ;;  %vm12580_vm2 = vcmp.lt.s32.totalorder %v10256_v5, 13 }
 0xe2e   :  { %v2766_v8 = vrot.slane %v2765_v45, 2  ;;  %v2717_v50 = vsel %vm12580_vm2, 13.0, %v12472_v30 }
 0xe2f   :  { %v2735_v38 = vadd.f32 %v2732_v48, %v2717_v50 }
 0xe30   :  { %v2767_v20 = vadd.f32 %v2766_v8, %v2765_v45  ;;  %v12584_v45 = vmov 0 }
 0xe31   :  { %v7848_v13 = vadd.f32 -1.0, %v2735_v38 }
 0xe32   :  { %v2768_v4 = vrot.slane %v2767_v20, 1 }
 0xe34   :  { %v2769_v12 = vadd.f32 %v2768_v4, %v2767_v20  ;;  %v12587_v4 = vmov 0 }
 0xe36   :  { %vm2790_vm9 = vcmp.eq.f32.partialorder %v2769_v12, %v10615_v43 }
 0xe37   :  { %vm2792_vm12 = vmand %vm12575_vm10, %vm2790_vm9  ;;  %vm12366_vm10 = vcmp.lt.s32.totalorder %v10245_v2, 15 }
 0xe38   :  { %vm2818_vm13 = vmand %vm2813_vm3, %vm2790_vm9  ;;  %v2840_v19 = vsel %vm2792_vm12, 1.0, %v12472_v30 }
 0xe39   :  { %v2841_v47 = vsel %vm2818_vm13, 1.0, %v12472_v30  ;;  %8784 = vmatprep.mubr.msk.f32.mxu0 %vm12576_vm7, %v2840_v19  ;;  %8793 = vmatprep.mubr.msk.f32.mxu1 %vm12577_vm15, %v2840_v19  ;;  %vm12582_vm3 = vmmov %vm12581_vm5 }
 0xe3a   :  { %8785 = vmatmul.mubr.msk.f32.vlgmr.msra.gmra.mrb[62].mxu0 %vm12578_vm14, %v2841_v47  ;;  %8794 = vmatmul.mubr.msk.f32.vlgmr.msra.gmra.mrb[70].mxu1 %vm12579_vm4, %v2841_v47  ;;  %vm2821_vm9 = vmand %vm12582_vm3, %vm12365_vm8 }
 0xe3b   :  { %vm12583_vm12 = vmmov %vm12580_vm2 }
 0xe3c   :  { %vm2796_vm13 = vmand %vm12583_vm12, %vm12358_vm6 }
 0xe3d   :  { %vm2825_vm7 = vmand %vm2821_vm9, %vm12366_vm10 }
 0xe3e   :  { %vm2826_vm9 = vmand %vm12365_vm8, %vm12366_vm10 }
 0xeae   :  { %v2776_v16 = vpop.xlane.xlu0 %2775 }
 0xeaf   :  { %v2780_v28 = vsub.f32 %v7848_v13, %v2776_v16 }
 0xeb1   :  { %vm2799_vm15 = vcmp.eq.f32.partialorder %v2780_v28, %v10716_v34  ;;  %vm2830_vm14 = vcmp.eq.f32.partialorder %v2780_v28, %v2828_v9 }
 0xeb2   :  { %v2774_v18 = vpop.xlane.xlu1 %2773  ;;  %vm2802_vm4 = vmand %vm2796_vm13, %vm2799_vm15 }
 0xeb3   :  { %v2779_v54 = vsub.f32 12.0, %v2774_v18  ;;  %vm2833_vm2 = vmand %vm2825_vm7, %vm2830_vm14  ;;  %vm12586_vm7 = vmmov 1  }
 0xeb4   :  { %vm2838_vm5 = vmor %vm2802_vm4, %vm2833_vm2  ;;  %vm12589_vm4 = vcmask 195584  }
 0xeb5   :  { %vm2798_vm3 = vcmp.eq.f32.partialorder %v2779_v54, %v10716_v34  ;;  %v2778_v27 = vpop.xlane.xlu0 %2777  ;;  %v11420_v10 = vsel %vm2838_vm5, 1.0, %v12472_v30  ;;  %vm12590_vm2 = vmmov %vm12589_vm4  ;;  %vm12359_vm5 = vcmask 120832  }
 0xeb6   :  { %vm11424_vm12 = vmand %vm12358_vm6, %vm2798_vm3  ;;  %v2781_v8 = vsub.f32 10.0, %v2778_v27  ;;  %v9496_v20 = vpack.c.bf16 %v11420_v10, %v12546_v32  ;;  %vm12357_vm3 = vcmask 121856   ;;  %vm12599_vm6 = vnez %v12399_v62  ;;  %v12717_v62 = vld [vmem:[#allocation34_spill] sm:$0xff] }
 0xeb7   :  { %v12585_v45 = vsel %vm11424_vm12, 4294967295, %v12584_v45  ;;  %vm9497_vm15 = vmpackc.low %vm12586_vm7, %vm11424_vm12 }
 0xeb8   :  { %vm2831_vm13 = vcmp.eq.f32.partialorder %v2781_v8, %v2828_v9  ;;  %9498 = vmatprep.subr.msk.bf16.mxu0 %vm9497_vm15, %v9496_v20 }
 0xeb9   :  { %9501 = vmatpush3.bf16.msk.msra.mxu0 %vm9497_vm15, %v9496_v20  ;;  %vm11437_vm14 = vmand %vm2826_vm9, %vm2831_vm13 }
 0xeba   :  { %v12588_v4 = vsel %vm11437_vm14, 4294967295, %v12587_v4  ;;  %8800 = vmatprep.subr.msk.mxu0 %vm11437_vm14, %v12546_v32 }
 0xebd   :  { %8801 = vmatpush3.msk.msra.mxu0 %vm11437_vm14, %v12546_v32 }
 0xf0d   :  { %v8786_v12 = vpop.f32.mrb[62].mxu0  ;;  %v8795_v19 = vpop.f32.mrb[70].mxu1 }
 0xf0e   :  { %v2920_v47 = vpop.f32.mrb[63].mxu0  ;;  %v2995_v50 = vpop.f32.mrb[71].mxu1 }
 0xf0f   :  { %8802 = vmatprep.mubr.msk.f32.mxu0 %vm12589_vm4, %v2995_v50  ;;  %vm12356_vm4 = vcmask 1046528  }
 0xf10   :  { %8803 = vmatmul.mubr.msk.f32.vlgmr.msra.gmra.mrb[64].mxu0 %vm12590_vm2, %v8795_v19  ;;  %vm11469_vm2 = vmpackc.low %vm12356_vm4, %vm12586_vm7  ;;  %vm12597_vm4 = vcmask 261120  }
 0xfe3   :  { %v11449_v48 = vpop.f32.mrb[64].mxu0 }
 0xfe4   :  { %v3086_v38 = vadd.f32 %v11449_v48, %v10292_v14  ;;  %v11453_v46 = vpop.f32.mrb[65].mxu0 }
 0xfe5   :  { %v3085_v13 = vadd.f32 %v11453_v46, %v10259_v7 }
 0xfe6   :  { %v3092_v16 = vsel %vm12359_vm5, %v3086_v38, 0.0 }
 0xfe7   :  { %3093 = vadd.xlane.f32.xlu0 %v3092_v16  ;;  %v3088_v28 = vsel %vm12357_vm3, %v3085_v13, 0.0 }
 0xfe8   :  { %3089 = vadd.xlane.f32.xlu1 %v3088_v28  ;;  %v3095_v18 = vadd.f32 %v3092_v16, %v3088_v28 }
 0xfea   :  { %v3096_v54 = vrot.slane %v3095_v18, 4 }
 0xfec   :  { %v3097_v27 = vadd.f32 %v3096_v54, %v3095_v18 }
 0xfee   :  { %v3098_v8 = vrot.slane %v3097_v27, 2 }
 0xff0   :  { %v3099_v14 = vadd.f32 %v3098_v8, %v3097_v27  ;;  %v7862_v27 = vld [vmem:[%s12239_s3 + $0x40] sm:$0xff]  ;;  %v7863_v8 = vld [vmem:[%s12239_s3 + $0x48] sm:$0xff] }
 0xff2   :  { %v3100_v20 = vrot.slane %v3099_v14, 1 }
 0xff4   :  { %v3101_v19 = vadd.f32 %v3100_v20, %v3099_v14 }
 0xff6   :  { %9815 = vrsqrt.f32 %v3101_v19  ;;  %vm3108_vm15 = vcmp.gt.f32.partialorder %v3101_v19, 0.0 }
0x1000   :  { %v9816_v57 = vpop.eup %9815 }
0x1001   :  { %v3110_v28 = vsel %vm3108_vm15, %v9816_v57, 0.0  ;;  %v9508_v57 = vpack.c.bf16 %v7863_v8, %v7862_v27  ;;  %vm12595_vm15 = vmmov 0  }
0x1074   :  { %v3094_v50 = vpop.xlane.xlu0 %3093 }
0x1075   :  { %9817 = vrsqrt.f32 %v3094_v50  ;;  %v3090_v3 = vpop.xlane.xlu1 %3089  ;;  %vm3103_vm9 = vcmp.gt.f32.partialorder %v3094_v50, 0.0 }
0x1076   :  { %9819 = vrsqrt.f32 %v3090_v3  ;;  %vm3102_vm13 = vcmp.gt.f32.partialorder %v3090_v3, 0.0  ;;  %v12591_v3 = vmov 0 }
0x1077   :  { %v12592_v3 = vsel %vm11469_vm2, 4294967295, %v12591_v3 }
0x107f   :  { %v9818_v9 = vpop.eup %9817 }
0x1080   :  { %v9820_v53 = vpop.eup %9819  ;;  %v3107_v31 = vsel %vm3103_vm9, %v9818_v9, 0.0  ;;  %vm12593_vm9 = vcmask 261120  }
0x1081   :  { %v3112_v58 = vmul.f32 %v3107_v31, %v3086_v38  ;;  %v3106_v16 = vsel %vm3102_vm13, %v9820_v53, 0.0  ;;  %v7865_v31 = vld [vmem:[%s12239_s3 + $0x58] sm:$0xff]  ;;  %vm12594_vm13 = vmmov %vm12593_vm9 }
0x1082   :  { %v3111_v18 = vmul.f32 %v3106_v16, %v3085_v13 }
0x1083   :  { %v3114_v54 = vmul.f32 %v3112_v58, %v3110_v28  ;;  %v7864_v58 = vld [vmem:[%s12239_s3 + $0x50] sm:$0xff] }
0x1084   :  { %v3113_v14 = vmul.f32 %v3111_v18, %v3110_v28  ;;  %v9512_v38 = vpack.c.bf16 %v7865_v31, %v7864_v58 }
0x1086   :  { %8809 = vmatprep.mubr.msk.f32.mxu1 %vm12357_vm3, %v3113_v14  ;;  %v9502_v53 = vpack.c.bf16 %v3114_v54, %v3113_v14 }
0x1088   :  { %9504 = vmatprep.subr.msk.bf16.mxu1 %vm11469_vm2, %v9502_v53 }
0x1089   :  { %9507 = vmatpush3.bf16.msk.msra.mxu1 %vm11469_vm2, %v9502_v53 }
0x108a   :  { %9509 = vmatprep.subr.bf16.mxu1 %v9508_v57 }
0x108c   :  { %8810 = vmatmul.mubr.msk.f32.vlgmr.msra.gmra.mrb[72].mxu1 %vm12357_vm3, %v3114_v54 }
0x108d   :  { %9511 = vmatpush3.bf16.msra.mxu1 %v9508_v57  ;;  %8820 = vmatprep.mubr.msk.f32.mxu1 %vm12593_vm9, %v2920_v47  ;;  %vm3384_vm9 = vcmask 260096  }
0x108e   :  { %9513 = vmatprep.subr.bf16.mxu1 %v9512_v38 }
0x1091   :  { %9515 = vmatpush3.bf16.msra.mxu1 %v9512_v38 }
0x1092   :  { %9526 = vmatprep.subr.bf16.mxu1 %v12471_v36 }
0x1094   :  { %8821 = vmatmul.mubr.msk.f32.vlgmr.msra.gmra.mrb[74].mxu1 %vm12594_vm13, %v8786_v12  ;;  %v7871_v12 = vld [vmem:[%s12240_s4 + $0x3] sm:$0x1]  ;;  %vm12596_vm13 = vnez %v12386_v60 }
0x1095   :  { %8841 = vmatprep.mubr.msk.f32.mxu1 %vm12595_vm15, %v12472_v30  ;;  %v3377_v47 = vrot.slane %v7871_v12, %v10450_v21 }
0x115f   :  { %v11490_v13 = vpop.f32.mrb[72].mxu1 }
0x1160   :  { %v11492_v9 = vpop.f32.mrb[73].mxu1 }
0x1161   :  { %8827 = vmatprep.mubr.msk.f32.mxu0 %vm12357_vm3, %v11492_v9 }
0x1167   :  { %v8822_v20 = vpop.f32.mrb[74].mxu1 }
0x1168   :  { %v3276_v19 = vpop.f32.mrb[75].mxu1 }
0x1169   :  { %v9516_v50 = vpack.c.bf16 %v8822_v20, %v3276_v19 }
0x116b   :  { %9518 = vmatprep.subr.msk.bf16.mxu0 %vm11469_vm2, %v9516_v50 }
0x116c   :  { %9521 = vmatpush3.bf16.msk.msra.mxu0 %vm11469_vm2, %v9516_v50 }
0x116d   :  { %9522 = vmatprep.subr.bf16.mxu0 %v12471_v36 }
0x116f   :  { %8828 = vmatmul.mubr.msk.f32.vlgmr.msra.gmra.mrb[66].mxu0 %vm12357_vm3, %v11490_v13  ;;  %vm12598_vm3 = vmmov %vm12597_vm4 }
0x1170   :  { %8834 = vmatprep.mubr.msk.f32.mxu0 %vm12595_vm15, %v12472_v30 }
0x1242   :  { %v8829_v16 = vpop.f32.mrb[66].mxu0 }
0x1243   :  { %v11509_v28 = vmax.f32 %v8829_v16, 0.0  ;;  %v3360_v18 = vpop.f32.mrb[67].mxu0 }
0x1244   :  { %v11511_v54 = vmax.f32 %v3360_v18, 0.0 }
0x1245   :  { %v3380_v27 = vmul.f32 %v3377_v47, %v11509_v28 }
0x1246   :  { %v9523_v8 = vpack.c.bf16 %v11509_v28, %v11511_v54  ;;  %v3379_v14 = vmul.f32 %v3377_v47, %v11511_v54 }
0x1247   :  { %v3385_v53 = vsel %vm3384_vm9, %v3380_v27, 0.0 }
0x1248   :  { %3386 = vadd.xlane.f32.xlu0 %v3385_v53  ;;  %9525 = vmatpush3.bf16.xpose.msk.msra.mxu0 %vm12596_vm13, %v9523_v8  ;;  %v3381_v57 = vsel %vm12597_vm4, %v3379_v14, 0.0 }
0x1249   :  { %3382 = vadd.xlane.f32.xlu1 %v3381_v57  ;;  %9534 = vmatprep.subr.bf16.mxu0 %v12471_v36 }
0x124f   :  { %8835 = vmatmul.mubr.msk.f32.vlgmr.msra.gmra.mrb[68].mxu0 %vm12598_vm3, %v7871_v12  ;;  %vm3476_vm3 = vmand %vm12364_vm0, %vm12365_vm8  ;;  %vm12600_vm0 = vcmask 120832  }
0x1250   :  { %8855 = vmatprep.mubr.msk.f32.mxu0 %vm12595_vm15, %v12472_v30  ;;  %vm3478_vm4 = vmand %vm3476_vm3, %vm12366_vm10  ;;  %vm12601_vm3 = vcmp.lt.s32.totalorder %v10245_v2, 8 }
0x12d5   :  { %v3387_v58 = vpop.xlane.xlu0 %3386 }
0x12d6   :  { %9821 = vtanh.f32 %v3387_v58  ;;  %v3383_v31 = vpop.xlane.xlu1 %3382 }
0x12d7   :  { %9823 = vtanh.f32 %v3383_v31 }
0x12e0   :  { %v9822_v38 = vpop.eup %9821 }
0x12e1   :  { %v9824_v20 = vpop.eup %9823  ;;  %v3557_v19 = vmul.f32 %v9822_v38, %v11509_v28 }
0x12e2   :  { %v3556_v60 = vmul.f32 %v9824_v20, %v11511_v54 }
0x12e4   :  { %v9527_v50 = vpack.c.bf16 %v3557_v19, %v3556_v60 }
0x12e6   :  { %9529 = vmatpush3.bf16.msk.msra.mxu1 %vm11469_vm2, %v9527_v50  ;;  %vm12602_vm2 = vcmask 121856  }
0x12e7   :  { %9530 = vmatprep.subr.bf16.mxu1 %v12471_v36 }
0x1322   :  { %v3464_v12 = vpop.f32.mrb[68].mxu0 }
0x1323   :  { %9825 = vtanh.f32 %v3464_v12  ;;  %v8836_v47 = vpop.f32.mrb[69].mxu0 }
0x132d   :  { %v9826_v16 = vpop.eup %9825 }
0x132e   :  { %v3488_v18 = vrot.slane %v9826_v16, %v10450_v21  ;;  %v12607_v16 = vpack.c.bf16 %v11449_v48, %v11453_v46  ;;  %v7877_v48 = vadd.s32 4294967292, %v10245_v2 }
0x1330   :  { %vm3490_vm9 = vcmp.gt.f32.partialorder %v9822_v38, %v3488_v18  ;;  %vm3492_vm13 = vcmp.eq.f32.partialorder %v9822_v38, %v3488_v18  ;;  %vm3491_vm7 = vcmp.eq.f32.partialorder %v9824_v20, %v3488_v18  ;;  %vm3489_vm14 = vcmp.gt.f32.partialorder %v9824_v20, %v3488_v18 }
0x1331   :  { %vm3494_vm5 = vmand %vm3492_vm13, %vm12599_vm6  ;;  %v11547_v20 = vadd.s32 4294967292, %v10243_v1 }
0x1332   :  { %vm3496_vm1 = vmor %vm3490_vm9, %vm3494_vm5 }
0x1333   :  { %vm3498_vm12 = vmand %vm3478_vm4, %vm3496_vm1  ;;  %vm12370_vm1 = vcmp.ge.s32.totalorder %v10243_v1, 4  ;;  %v3536_v50 = vcvt.s32.f32 %v11547_v20 }
0x1334   :  { %v3500_v27 = vsel %vm3498_vm12, 1.0, %v12472_v30  ;;  %vm3493_vm15 = vmand %vm3491_vm7, %vm12566_vm11 }
0x1335   :  { %v3502_v8 = vsel %vm12600_vm0, %v3500_v27, 0.0  ;;  %vm3495_vm8 = vmor %vm3489_vm14, %vm3493_vm15  ;;  %vm12371_vm0 = vcmp.lt.s32.totalorder %v10243_v1, 4  ;;  %vm12605_vm14 = vcmp.lt.s32.totalorder %v10245_v2, 15  ;;  %v3545_v27 = vcvt.s32.f32 %v7877_v48 }
0x1336   :  { %3514 = vadd.xlane.f32.xlu1 %v3502_v8  ;;  %vm3497_vm10 = vmand %vm12601_vm3, %vm3495_vm8  ;;  %vm12603_vm8 = vcmp.ge.s32.totalorder %v10245_v2, 8 }
0x1337   :  { %v3499_v14 = vsel %vm3497_vm10, 1.0, %v12472_v30  ;;  %vm3533_vm10 = vmand %vm12370_vm1, %vm12603_vm8  ;;  %vm12608_vm8 = vnez %v12592_v3 }
0x1338   :  { %v3501_v53 = vsel %vm12602_vm2, %v3499_v14, 0.0  ;;  %vm12604_vm12 = vmmov %vm12601_vm3  ;;  %vm12606_vm3 = vcmask 121856  }
0x1339   :  { %3512 = vadd.xlane.f32.xlu0 %v3501_v53  ;;  %v3503_v57 = vadd.f32 %v3502_v8, %v3501_v53  ;;  %vm3521_vm7 = vmand %vm12371_vm0, %vm12604_vm12  ;;  %vm12609_vm12 = vmmov 0  }
0x133a   :  { %vm3534_vm5 = vmand %vm3533_vm10, %vm12605_vm14  ;;  %vm3539_vm14 = vcmp.ge.s32.totalorder %v10245_v2, 4 }
0x133b   :  { %v3504_v58 = vrot.slane %v3503_v57, 4  ;;  %vm12610_vm10 = vmmov %vm12606_vm3 }
0x133d   :  { %v3505_v31 = vadd.f32 %v3504_v58, %v3503_v57 }
0x133f   :  { %v3506_v38 = vrot.slane %v3505_v31, 2 }
0x1341   :  { %v3507_v19 = vadd.f32 %v3506_v38, %v3505_v31  ;;  %v4110_v38 = vld [vmem:[#allocation5 + $0x10] sm:$0xff] }
0x1343   :  { %v3508_v60 = vrot.slane %v3507_v19, 1 }
0x1345   :  { %v3509_v12 = vadd.f32 %v3508_v60, %v3507_v19  ;;  %v7886_v19 = vld [vmem:[%s12239_s3 + $0x60] sm:$0xff] }
0x1347   :  { %vm3522_vm2 = vcmp.eq.f32.partialorder %v3509_v12, %v10615_v43  ;;  %vm3537_vm15 = vcmp.eq.f32.partialorder %v3509_v12, %v3536_v50 }
0x1348   :  { %vm3523_vm4 = vmand %vm3521_vm7, %vm3522_vm2  ;;  %vm12611_vm7 = vcmp.lt.s32.totalorder %v10256_v5, 15 }
0x1349   :  { %vm3538_vm9 = vmand %vm3534_vm5, %vm3537_vm15  ;;  %v3482_v18 = vsel %vm12611_vm7, 7.0, %v12472_v30  ;;  %vm12613_vm15 = vcmp.lt.s32.totalorder %v10245_v2, 8 }
0x134a   :  { %vm3550_vm13 = vmor %vm3523_vm4, %vm3538_vm9  ;;  %v7875_v46 = vadd.f32 -1.0, %v3482_v18 }
0x134b   :  { %v3553_v47 = vsel %vm3550_vm13, 1.0, %v12472_v30  ;;  %vm12612_vm5 = vmmov %vm12611_vm7  ;;  %vm3524_vm13 = vcmp.lt.s32.totalorder %v10245_v2, 4 }
0x134c   :  { %8842 = vmatmul.mubr.msk.f32.vlgmr.msra.gmra.mrb[76].mxu1 %vm12606_vm3, %v3553_v47  ;;  %vm3541_vm2 = vmand %vm12612_vm5, %vm3539_vm14  ;;  %vm12616_vm14 = vcmask 1046528  }
0x134d   :  { %9533 = vmatpush3.bf16.msk.msra.mxu1 %vm12608_vm8, %v12607_v16  ;;  %8848 = vmatprep.mubr.msk.f32.mxu1 %vm12609_vm12, %v12472_v30  ;;  %vm3543_vm4 = vmand %vm3541_vm2, %vm12613_vm15  ;;  %v7889_v16 = vld [vmem:[%s12239_s3 + $0x78] sm:$0xff]  ;;  %vm12617_vm2 = vcmask 121856   ;;  %vm12618_vm15 = vcmask 261120  }
0x134e   :  { %8858 = vmatprep.subr.mxu1 %v12472_v30 }
0x1350   :  { %8849 = vmatmul.mubr.msk.f32.vlgmr.msra.gmra.mrb[78].mxu1 %vm12610_vm10, %v3553_v47  ;;  %v7888_v47 = vld [vmem:[%s12239_s3 + $0x70] sm:$0xff] }
0x1351   :  { %8860 = vmatprep.mubr.msk.f32.mxu1 %vm12609_vm12, %v12472_v30 }
0x13c3   :  { %v3515_v8 = vpop.xlane.xlu1 %3514 }
0x13c4   :  { %v3517_v14 = vsub.f32 %v7875_v46, %v3515_v8  ;;  %v9542_v46 = vpack.c.bf16 %v7889_v16, %v7888_v47 }
0x13c6   :  { %v3513_v53 = vpop.xlane.xlu0 %3512  ;;  %vm3547_vm9 = vcmp.eq.f32.partialorder %v3517_v14, %v3545_v27 }
0x13c7   :  { %v3516_v57 = vsub.f32 7.0, %v3513_v53  ;;  %vm3549_vm3 = vmand %vm3543_vm4, %vm3547_vm9  ;;  %vm12369_vm4 = vcmask 64512  }
0x13c8   :  { %v11587_v58 = vsel %vm3549_vm3, 1.0, %v12472_v30  ;;  %vm12619_vm3 = vmmov %vm12617_vm2 }
0x13c9   :  { %vm3527_vm10 = vcmp.eq.f32.partialorder %v3516_v57, %v10716_v34  ;;  %v9535_v31 = vpack.c.bf16 %v11587_v58, %v12546_v32  ;;  %v7887_v34 = vld [vmem:[%s12239_s3 + $0x68] sm:$0xff] }
0x13ca   :  { %vm11592_vm7 = vmand %vm3524_vm13, %vm3527_vm10  ;;  %v9539_v12 = vpack.c.bf16 %v7887_v34, %v7886_v19 }
0x13cb   :  { %vm9536_vm5 = vmpackc.low %vm12616_vm14, %vm11592_vm7 }
0x13cc   :  { %9537 = vmatpush3.bf16.msk.msra.mxu0 %vm9536_vm5, %v9535_v31  ;;  %vm12620_vm10 = vmmov %vm12618_vm15  ;;  %vm12623_vm5 = vnez %v12585_v45  ;;  %v4371_v45 = vld [vmem:[#allocation5 + $0x30] sm:$0xff] }
0x13cd   :  { %9538 = vmatprep.subr.bf16.mxu0 %v12471_v36  ;;  %vm12622_vm14 = vmmov %vm12617_vm2 }
0x141f   :  { %v3630_v60 = vpop.f32.mrb[76].mxu1 }
0x1420   :  { %v8843_v50 = vpop.f32.mrb[77].mxu1 }
0x1423   :  { %v3703_v18 = vpop.f32.mrb[78].mxu1 }
0x1424   :  { %v8850_v48 = vpop.f32.mrb[79].mxu1  ;;  %8856 = vmatmul.mubr.msk.f32.vlgmr.msra.gmra.mrb[70].mxu0 %vm12617_vm2, %v3703_v18 }
0x1425   :  { %9540 = vmatpush3.bf16.msra.mxu0 %v9539_v12  ;;  %8871 = vmatprep.mubr.msk.f32.mxu0 %vm12609_vm12, %v12472_v30 }
0x1426   :  { %9541 = vmatprep.subr.bf16.mxu0 %v12471_v36 }
0x1429   :  { %9543 = vmatpush3.bf16.msra.mxu0 %v9542_v46 }
0x142c   :  { %8872 = vmatmul.mubr.msk.f32.vlgmr.msra.gmra.mrb[72].mxu0 %vm12618_vm15, %v3630_v60  ;;  %vm12624_vm15 = vmmov %vm12617_vm2 }
0x14f7   :  { %v3779_v27 = vpop.f32.mrb[70].mxu0 }
0x14f8   :  { %v3780_v8 = vadd.f32 %v3779_v27, %v10259_v7  ;;  %v8857_v14 = vpop.f32.mrb[71].mxu0 }
0x14fa   :  { %v3784_v53 = vsel %vm12369_vm4, %v3780_v8, 0.0 }
0x14fb   :  { %3785 = vadd.xlane.f32.xlu1 %v3784_v53  ;;  %v3787_v19 = vrot.slane %v3784_v53, 4 }
0x14fd   :  { %v3788_v34 = vadd.f32 %v3787_v19, %v3784_v53  ;;  %v3554_v19 = vsel %vm11592_vm7, 1.0, %v12472_v30  ;;  %vm12621_vm7 = vmmov %vm12620_vm10 }
0x14ff   :  { %v3948_v57 = vpop.f32.mrb[72].mxu0  ;;  %v3789_v50 = vrot.slane %v3788_v34, 2 }
0x1500   :  { %v8873_v31 = vpop.f32.mrb[73].mxu0 }
0x1501   :  { %v3790_v12 = vadd.f32 %v3789_v50, %v3788_v34  ;;  %v4109_v34 = vld [vmem:[#allocation5 + $0x8] sm:$0xff] }
0x1503   :  { %v3791_v47 = vrot.slane %v3790_v12, 1 }
0x1505   :  { %v3792_v16 = vadd.f32 %v3791_v47, %v3790_v12 }
0x1507   :  { %9827 = vrsqrt.f32 %v3792_v16  ;;  %vm3796_vm13 = vcmp.gt.f32.partialorder %v3792_v16, 0.0  ;;  %v4111_v16 = vld [vmem:[#allocation5 + $0x18] sm:$0xff] }
0x1511   :  { %v9828_v60 = vpop.eup %9827 }
0x1512   :  { %v3798_v27 = vsel %vm3796_vm13, %v9828_v60, 0.0  ;;  %vm12627_vm13 = vmmov %vm12621_vm7 }
0x1588   :  { %v3786_v18 = vpop.xlane.xlu1 %3785 }
0x1589   :  { %9829 = vrsqrt.f32 %v3786_v18  ;;  %vm3793_vm9 = vcmp.gt.f32.partialorder %v3786_v18, 0.0  ;;  %v9548_v18 = vpack.c.bf16 %v4111_v16, %v4110_v38 }
0x1593   :  { %v9830_v48 = vpop.eup %9829 }
0x1594   :  { %v3795_v46 = vsel %vm3793_vm9, %v9830_v48, 0.0  ;;  %vm12626_vm9 = vmmov %vm12617_vm2 }
0x1595   :  { %v3799_v7 = vmul.f32 %v3795_v46, %v3780_v8  ;;  %v4108_v8 = vld [vmem:[#allocation5] sm:$0xff] }
0x1596   :  { %v9544_v50 = vpack.c.bf16 %v4109_v34, %v4108_v8 }
0x1597   :  { %v3800_v14 = vmul.f32 %v3799_v7, %v3798_v27 }
0x1598   :  { %9545 = vmatprep.subr.bf16.mxu0 %v9544_v50 }
0x1599   :  { %8859 = vmatpush3.msra.mxu1 %v3800_v14  ;;  %9547 = vmatpush3.bf16.msra.mxu0 %v9544_v50  ;;  %v4372_v50 = vld [vmem:[#allocation5 + $0x38] sm:$0xff] }
0x159a   :  { %8861 = vmatmul.mubr.msk.f32.vlgmr.msra.gmra.mrb[80].mxu1 %vm12369_vm4, %v3800_v14  ;;  %8874 = vmatprep.subr.mxu1 %v12472_v30 }
0x159b   :  { %8875 = vmatpush3.msra.mxu1 %v3948_v57  ;;  %8876 = vmatprep.mubr.msk.f32.mxu1 %vm12609_vm12, %v12472_v30 }
0x159c   :  { %9549 = vmatprep.subr.bf16.mxu0 %v9548_v18 }
0x159d   :  { %9551 = vmatpush3.bf16.msra.mxu0 %v9548_v18 }
0x159e   :  { %9562 = vmatprep.subr.bf16.mxu0 %v12471_v36 }
0x166d   :  { %v3870_v53 = vpop.f32.mrb[80].mxu1 }
0x166e   :  { %v8862_v31 = vpop.f32.mrb[81].mxu1  ;;  %8877 = vmatmul.mubr.msk.f32.vlgmr.msra.gmra.mrb[82].mxu1 %vm12369_vm4, %v3870_v53 }
0x166f   :  { %8881 = vmatprep.mubr.msk.f32.mxu1 %vm12369_vm4, %v3554_v19 }
0x1741   :  { %v4021_v12 = vpop.f32.mrb[82].mxu1 }
0x1742   :  { %v4025_v57 = vmax.f32 %v4021_v12, 0.0  ;;  %v8878_v47 = vpop.f32.mrb[83].mxu1  ;;  %v9566_v12 = vpack.c.bf16 %v4372_v50, %v4371_v45 }
0x1744   :  { %8879 = vmatprep.subr.mxu1 %v4025_v57 }
0x1745   :  { %8880 = vmatpush3.msra.mxu1 %v4025_v57 }
0x1746   :  { %8882 = vmatmul.mubr.msk.f32.vlgmr.msra.gmra.mrb[84].mxu1 %vm12369_vm4, %v11587_v58 }
0x1747   :  { %8899 = vmatprep.mubr.msk.f32.mxu1 %vm12619_vm3, %v11492_v9  ;;  %vm12628_vm3 = vmmov %vm12621_vm7 }
0x1819   :  { %v8883_v60 = vpop.f32.mrb[84].mxu1 }
0x181a   :  { %v4097_v48 = vpop.f32.mrb[85].mxu1  ;;  %v4107_v7 = vadd.f32 %v8883_v60, %v11509_v28  ;;  %v4369_v28 = vld [vmem:[#allocation5 + $0x20] sm:$0xff] }
0x181b   :  { %v4106_v46 = vadd.f32 %v4097_v48, %v11511_v54  ;;  %v4370_v54 = vld [vmem:[#allocation5 + $0x28] sm:$0xff] }
0x181c   :  { %v9563_v14 = vpack.c.bf16 %v4370_v54, %v4369_v28  ;;  %v4656_v28 = vld [vmem:[#allocation5 + $0x48] sm:$0xff] }
0x181d   :  { %8892 = vmatprep.mubr.msk.f32.mxu0 %vm12620_vm10, %v4106_v46  ;;  %vm12629_vm10 = vmmov %vm12628_vm3 }
0x181e   :  { %8893 = vmatmul.mubr.msk.f32.vlgmr.msra.gmra.mrb[74].mxu0 %vm12621_vm7, %v4107_v7  ;;  %vm12630_vm7 = vcmask 195584  }
0x181f   :  { %8923 = vmatprep.mubr.msk.f32.mxu0 %vm12609_vm12, %v12472_v30  ;;  %9564 = vmatpush3.bf16.msra.mxu0 %v9563_v14 }
0x1820   :  { %9565 = vmatprep.subr.bf16.mxu0 %v12471_v36 }
0x1823   :  { %9567 = vmatpush3.bf16.msra.mxu0 %v9566_v12 }
0x1824   :  { %9571 = vmatprep.subr.bf16.mxu0 %v12471_v36 }
0x18f1   :  { %v8894_v9 = vpop.f32.mrb[74].mxu0 }
0x18f2   :  { %v4184_v58 = vpop.f32.mrb[75].mxu0 }
0x18f3   :  { %v9552_v27 = vpack.c.bf16 %v8894_v9, %v4184_v58 }
0x18f5   :  { %9554 = vmatprep.subr.msk.bf16.mxu1 %vm12608_vm8, %v9552_v27 }
0x18f6   :  { %9557 = vmatpush3.bf16.msk.msra.mxu1 %vm12608_vm8, %v9552_v27 }
0x18f7   :  { %9558 = vmatprep.subr.bf16.mxu1 %v12471_v36 }
0x18f9   :  { %8900 = vmatmul.mubr.msk.f32.vlgmr.msra.gmra.mrb[86].mxu1 %vm12622_vm14, %v11490_v13  ;;  %v2842_v13 = vsel %vm12623_vm5, 1.0, %v12472_v30  ;;  %vm12631_vm14 = vmmov %vm12630_vm7 }
0x18fa   :  { %8906 = vmatprep.mubr.msk.f32.mxu1 %vm12609_vm12, %v12472_v30  ;;  %vm12632_vm5 = vmmov %vm12630_vm7 }
0x19cc   :  { %v8901_v53 = vpop.f32.mrb[86].mxu1 }
0x19cd   :  { %v4272_v31 = vmax.f32 %v8901_v53, 0.0  ;;  %v4262_v19 = vpop.f32.mrb[87].mxu1 }
0x19ce   :  { %v4271_v8 = vmax.f32 %v4262_v19, 0.0 }
0x19d0   :  { %v9559_v34 = vpack.c.bf16 %v4272_v31, %v4271_v8 }
0x19d2   :  { %9561 = vmatpush3.bf16.msk.msra.mxu1 %vm12608_vm8, %v9559_v34  ;;  %vm12625_vm8 = vnez %v12588_v4 }
0x19d3   :  { %9568 = vmatprep.subr.bf16.mxu1 %v12471_v36  ;;  %v2844_v3 = vsel %vm12625_vm8, 1.0, %v12472_v30  ;;  %vm12635_vm8 = vnez %v12540_v15  ;;  %v4657_v15 = vld [vmem:[#allocation5 + $0x50] sm:$0xff] }
0x19d4   :  { %v2018_v45 = vsel %vm12635_vm8, 1.0, %v12472_v30 }
0x19d5   :  { %8907 = vmatmul.mubr.msk.f32.vlgmr.msra.gmra.mrb[88].mxu1 %vm12617_vm2, %v2842_v13  ;;  %vm12633_vm2 = vnez %v12536_v35 }
0x19d6   :  { %8909 = vmatprep.mubr.msk.f32.mxu1 %vm12609_vm12, %v12472_v30 }
0x19d9   :  { %8910 = vmatmul.mubr.msk.f32.gmra.mrb[90].mxu1 %vm12624_vm15, %v11420_v10  ;;  %vm12634_vm15 = vmmov %vm12632_vm5 }
0x19da   :  { %8912 = vmatprep.mubr.msk.f32.mxu1 %vm12609_vm12, %v12472_v30 }
0x19dd   :  { %8913 = vmatmul.mubr.msk.f32.gmra.mrb[92].mxu1 %vm12626_vm9, %v2844_v3  ;;  %v2017_v3 = vsel %vm12633_vm2, 1.0, %v12472_v30  ;;  %vm12636_vm9 = vmmov %vm12632_vm5  ;;  %vm12642_vm2 = vcmask 261120  }
0x19de   :  { %8938 = vmatprep.mubr.msk.f32.mxu1 %vm12609_vm12, %v12472_v30  ;;  %vm12644_vm8 = vmmov %vm12642_vm2 }
0x1aa8   :  { %v4351_v57 = vpop.f32.mrb[88].mxu1 }
0x1aa9   :  { %v4365_v10 = vadd.f32 %v4351_v57, %v11326_v56  ;;  %v8908_v47 = vpop.f32.mrb[89].mxu1 }
0x1aab   :  { %8924 = vmatmul.mubr.msk.f32.vlgmr.msra.gmra.mrb[76].mxu0 %vm12627_vm13, %v4365_v10  ;;  %vm12637_vm13 = vmmov %vm12632_vm5 }
0x1aac   :  { %v4356_v38 = vpop.f32.mrb[90].mxu1  ;;  %8926 = vmatprep.mubr.msk.f32.mxu0 %vm12609_vm12, %v12472_v30 }
0x1aad   :  { %v4366_v4 = vadd.f32 %v4356_v38, %v11329_v6  ;;  %v8911_v16 = vpop.f32.mrb[91].mxu1 }
0x1aaf   :  { %8927 = vmatmul.mubr.msk.f32.gmra.mrb[78].mxu0 %vm12628_vm3, %v4366_v4  ;;  %vm12638_vm3 = vnez %v12534_v39 }
0x1ab0   :  { %v4361_v18 = vpop.f32.mrb[92].mxu1  ;;  %8929 = vmatprep.mubr.msk.f32.mxu0 %vm12609_vm12, %v12472_v30 }
0x1ab1   :  { %v4367_v60 = vadd.f32 %v4361_v18, %v11335_v44  ;;  %v8914_v48 = vpop.f32.mrb[93].mxu1  ;;  %v4655_v44 = vld [vmem:[#allocation5 + $0x40] sm:$0xff] }
0x1ab3   :  { %8930 = vmatmul.mubr.msk.f32.gmra.mrb[80].mxu0 %vm12629_vm10, %v4367_v60  ;;  %vm12639_vm10 = vnez %v12545_v59 }
0x1ab4   :  { %8953 = vmatprep.mubr.msk.f32.mxu0 %vm12609_vm12, %v12472_v30 }
0x1b7e   :  { %v4448_v56 = vpop.f32.mrb[76].mxu0 }
0x1b7f   :  { %v8925_v46 = vpop.f32.mrb[77].mxu0 }
0x1b82   :  { %v4453_v7 = vpop.f32.mrb[78].mxu0 }
0x1b83   :  { %v9569_v9 = vpack.c.bf16 %v4453_v7, %v4448_v56  ;;  %v8928_v6 = vpop.f32.mrb[79].mxu0 }
0x1b85   :  { %9570 = vmatpush3.bf16.msra.mxu1 %v9569_v9 }
0x1b86   :  { %v4458_v58 = vpop.f32.mrb[80].mxu0  ;;  %8936 = vmatprep.subr.mxu1 %v12472_v30 }
0x1b87   :  { %v8931_v27 = vpop.f32.mrb[81].mxu0 }
0x1b89   :  { %8937 = vmatpush3.msra.mxu1 %v4458_v58 }
0x1b8a   :  { %8939 = vmatmul.mubr.msk.f32.vlgmr.msra.gmra.mrb[94].mxu1 %vm12630_vm7, %v11306_v0  ;;  %9574 = vmatprep.subr.bf16.mxu1 %v12471_v36  ;;  %v9575_v0 = vpack.c.bf16 %v4656_v28, %v4655_v44  ;;  %vm12640_vm7 = vmand %vm12638_vm3, %vm12639_vm10  ;;  %vm12647_vm3 = vcmask 1040384   ;;  %vm12648_vm10 = vcmask 269312  }
0x1b8b   :  { %8941 = vmatprep.mubr.msk.f32.mxu1 %vm12609_vm12, %v12472_v30  ;;  %v2020_v35 = vsel %vm12640_vm7, 1.0, %v12472_v30  ;;  %vm12649_vm7 = vmmov %vm12648_vm10 }
0x1b8c   :  { %9576 = vmatpush3.bf16.msra.mxu1 %v9575_v0 }
0x1b8d   :  { %9577 = vmatprep.subr.bf16.mxu1 %v12471_v36 }
0x1b8e   :  { %8942 = vmatmul.mubr.msk.f32.gmra.mrb[96].mxu1 %vm12631_vm14, %v11312_v63  ;;  %vm12641_vm14 = vmmov %vm12632_vm5 }
0x1b8f   :  { %8944 = vmatprep.mubr.msk.f32.mxu1 %vm12609_vm12, %v12472_v30 }
0x1b92   :  { %8945 = vmatmul.mubr.msk.f32.gmra.mrb[98].mxu1 %vm12632_vm5, %v11318_v52 }
0x1b93   :  { %8976 = vmatprep.mubr.msk.f32.mxu1 %vm12609_vm12, %v12472_v30 }
0x1c5d   :  { %v4528_v54 = vpop.f32.mrb[94].mxu1 }
0x1c5e   :  { %v8940_v14 = vpop.f32.mrb[95].mxu1  ;;  %v4542_v31 = vmax.f32 %v4528_v54, 0.0 }
0x1c61   :  { %v4533_v53 = vpop.f32.mrb[96].mxu1 }
0x1c62   :  { %v4543_v63 = vmax.f32 %v4533_v53, 0.0  ;;  %v8943_v19 = vpop.f32.mrb[97].mxu1 }
0x1c64   :  { %v9572_v8 = vpack.c.bf16 %v4543_v63, %v4542_v31 }
0x1c65   :  { %v4538_v34 = vpop.f32.mrb[98].mxu1 }
0x1c66   :  { %v8946_v13 = vpop.f32.mrb[99].mxu1  ;;  %9573 = vmatpush3.bf16.msra.mxu0 %v9572_v8  ;;  %v4544_v52 = vmax.f32 %v4538_v34, 0.0 }
0x1c67   :  { %8951 = vmatprep.subr.mxu0 %v12472_v30 }
0x1c6a   :  { %8952 = vmatpush3.msra.mxu0 %v4544_v52 }
0x1c6b   :  { %8954 = vmatmul.mubr.msk.f32.vlgmr.msra.gmra.mrb[82].mxu0 %vm12634_vm15, %v2017_v3  ;;  %9580 = vmatprep.subr.bf16.mxu0 %v12471_v36  ;;  %vm12643_vm15 = vmmov %vm12642_vm2 }
0x1c6c   :  { %8956 = vmatprep.mubr.msk.f32.mxu0 %vm12609_vm12, %v12472_v30 }
0x1c6f   :  { %8957 = vmatmul.mubr.msk.f32.gmra.mrb[84].mxu0 %vm12636_vm9, %v2018_v45  ;;  %vm12645_vm9 = vmmov %vm12642_vm2 }
0x1c70   :  { %8959 = vmatprep.mubr.msk.f32.mxu0 %vm12609_vm12, %v12472_v30 }
0x1c73   :  { %8960 = vmatmul.mubr.msk.f32.gmra.mrb[86].mxu0 %vm12637_vm13, %v11228_v17  ;;  %v4658_v17 = vld [vmem:[#allocation5 + $0x58] sm:$0xff]  ;;  %vm12646_vm13 = vmmov %vm12642_vm2 }
0x1c74   :  { %8962 = vmatprep.mubr.msk.f32.mxu0 %vm12609_vm12, %v12472_v30  ;;  %v9578_v50 = vpack.c.bf16 %v4658_v17, %v4657_v15 }
0x1c76   :  { %9579 = vmatpush3.bf16.msra.mxu1 %v9578_v50 }
0x1c77   :  { %8963 = vmatmul.mubr.msk.f32.gmra.mrb[88].mxu0 %vm12641_vm14, %v2020_v35  ;;  %9586 = vmatprep.subr.bf16.mxu1 %v12471_v36  ;;  %vm12650_vm14 = vmmov %vm12649_vm7 }
0x1c78   :  { %8965 = vmatprep.mubr.msk.f32.mxu0 %vm12609_vm12, %v12472_v30 }
0x1c7b   :  { %8966 = vmatmul.mubr.msk.f32.gmra.mrb[90].mxu0 %vm12632_vm5, %v11246_v40  ;;  %vm12651_vm5 = vmmov %vm12649_vm7 }
0x1c7c   :  { %9001 = vmatprep.mubr.msk.f32.mxu0 %vm12609_vm12, %v12472_v30 }
0x1d3e   :  { %v4625_v39 = vpop.f32.mrb[82].mxu0 }
0x1d3f   :  { %v4649_v59 = vadd.f32 %v4625_v39, %v10984_v49  ;;  %v8955_v12 = vpop.f32.mrb[83].mxu0 }
0x1d41   :  { %8977 = vmatmul.mubr.msk.f32.vlgmr.msra.gmra.mrb[100].mxu1 %vm12642_vm2, %v4649_v59  ;;  %vm12652_vm2 = vmmov %vm12651_vm5  ;;  %v4978_v59 = vld [vmem:[#allocation5 + $0x78] sm:$0xff] }
0x1d42   :  { %v4630_v57 = vpop.f32.mrb[84].mxu0  ;;  %8979 = vmatprep.mubr.msk.f32.mxu1 %vm12609_vm12, %v12472_v30 }
0x1d43   :  { %v4650_v40 = vadd.f32 %v4630_v57, %v10987_v37  ;;  %v8958_v10 = vpop.f32.mrb[85].mxu0  ;;  %v162_v57 = vld [vmem:[%s12243_s7 + $0x8] sm:$0xff] }
0x1d45   :  { %8980 = vmatmul.mubr.msk.f32.gmra.mrb[102].mxu1 %vm12643_vm15, %v4650_v40  ;;  %vm12653_vm15 = vnez %v12448_v42  ;;  %v12660_v42 = vld [vmem:[#allocation38_spill] sm:$0xff] }
0x1d46   :  { %v4635_v47 = vpop.f32.mrb[86].mxu0  ;;  %8982 = vmatprep.mubr.msk.f32.mxu1 %vm12609_vm12, %v12472_v30  ;;  %v981_v17 = vsel %vm12653_vm15, 1.0, %v12472_v30  ;;  %vm12664_vm15 = vmmov %vm12652_vm2 }
0x1d47   :  { %v4651_v38 = vadd.f32 %v4635_v47, %v10993_v33  ;;  %v8961_v4 = vpop.f32.mrb[87].mxu0  ;;  %v12665_v47 = vld [vmem:[#allocation28_spill] sm:$0xff] }
0x1d49   :  { %8983 = vmatmul.mubr.msk.f32.gmra.mrb[104].mxu1 %vm12644_vm8, %v4651_v38  ;;  %vm12654_vm8 = vmmov %vm12647_vm3 }
0x1d4a   :  { %v4640_v49 = vpop.f32.mrb[88].mxu0  ;;  %8985 = vmatprep.mubr.msk.f32.mxu1 %vm12609_vm12, %v12472_v30 }
0x1d4b   :  { %v4652_v16 = vadd.f32 %v4640_v49, %v11000_v26  ;;  %v8964_v18 = vpop.f32.mrb[89].mxu0  ;;  %v163_v49 = vld [vmem:[%s12243_s7 + $0x10] sm:$0xff] }
0x1d4d   :  { %8986 = vmatmul.mubr.msk.f32.gmra.mrb[106].mxu1 %vm12645_vm9, %v4652_v16  ;;  %vm12655_vm9 = vmmov %vm12652_vm2  ;;  %v164_v16 = vld [vmem:[%s12243_s7 + $0x18] sm:$0xff] }
0x1d4e   :  { %v4645_v37 = vpop.f32.mrb[90].mxu0  ;;  %8988 = vmatprep.mubr.msk.f32.mxu1 %vm12609_vm12, %v12472_v30 }
0x1d4f   :  { %v4653_v60 = vadd.f32 %v4645_v37, %v11006_v25  ;;  %v8967_v48 = vpop.f32.mrb[91].mxu0  ;;  %v9608_v37 = vpack.c.bf16 %v164_v16, %v163_v49 }
0x1d51   :  { %8989 = vmatmul.mubr.msk.f32.gmra.mrb[108].mxu1 %vm12646_vm13, %v4653_v60  ;;  %vm12656_vm13 = vnez %v12452_v11  ;;  %v12663_v11 = vld [vmem:[#allocation39_spill] sm:$0xff]  ;;  %v12667_v60 = vld [vmem:[#allocation29_spill] sm:$0xff] }
0x1d52   :  { %9026 = vmatprep.mubr.msk.f32.mxu1 %vm12609_vm12, %v12472_v30  ;;  %v982_v50 = vsel %vm12656_vm13, 1.0, %v12472_v30 }
0x1e14   :  { %v4740_v33 = vpop.f32.mrb[100].mxu1 }
0x1e15   :  { %v8978_v56 = vpop.f32.mrb[101].mxu1 }
0x1e18   :  { %v4745_v46 = vpop.f32.mrb[102].mxu1 }
0x1e19   :  { %v9581_v7 = vpack.c.bf16 %v4745_v46, %v4740_v33  ;;  %v8981_v26 = vpop.f32.mrb[103].mxu1  ;;  %v12669_v46 = vld [vmem:[#allocation30_spill] sm:$0xff] }
0x1e1b   :  { %9582 = vmatpush3.bf16.msra.mxu0 %v9581_v7 }
0x1e1c   :  { %v4750_v9 = vpop.f32.mrb[104].mxu1  ;;  %9583 = vmatprep.subr.bf16.mxu0 %v12471_v36 }
0x1e1d   :  { %v8984_v6 = vpop.f32.mrb[105].mxu1 }
0x1e1e   :  { %v12671_v6 = vld [vmem:[#allocation31_spill] sm:$0xff] }
0x1e20   :  { %v4755_v58 = vpop.f32.mrb[106].mxu1 }
0x1e21   :  { %v9584_v27 = vpack.c.bf16 %v4755_v58, %v4750_v9  ;;  %v8987_v44 = vpop.f32.mrb[107].mxu1 }
0x1e23   :  { %9585 = vmatpush3.bf16.msra.mxu0 %v9584_v27 }
0x1e24   :  { %v4760_v25 = vpop.f32.mrb[108].mxu1  ;;  %8999 = vmatprep.subr.mxu0 %v12472_v30 }
0x1e25   :  { %v8990_v28 = vpop.f32.mrb[109].mxu1 }
0x1e27   :  { %9000 = vmatpush3.msk.msra.mxu0 %vm12647_vm3, %v4760_v25  ;;  %vm12657_vm3 = vmmov %vm12652_vm2  ;;  %v12673_v25 = vld [vmem:[#allocation32_spill] sm:$0xff] }
0x1e28   :  { %9002 = vmatmul.mubr.msk.f32.vlgmr.msra.gmra.mrb[92].mxu0 %vm12648_vm10, %v10950_v55  ;;  %9592 = vmatprep.subr.bf16.mxu0 %v12471_v36  ;;  %v4975_v55 = vld [vmem:[#allocation5 + $0x60] sm:$0xff]  ;;  %vm12658_vm10 = vmmov %vm12652_vm2 }
0x1e29   :  { %9004 = vmatprep.mubr.msk.f32.mxu0 %vm12609_vm12, %v12472_v30 }
0x1e2c   :  { %9005 = vmatmul.mubr.msk.f32.gmra.mrb[94].mxu0 %vm12649_vm7, %v10956_v22  ;;  %v4976_v22 = vld [vmem:[#allocation5 + $0x68] sm:$0xff]  ;;  %vm12659_vm7 = vnez %v12446_v41  ;;  %v161_v41 = vld [vmem:[%s12243_s7] sm:$0xff] }
0x1e2d   :  { %9007 = vmatprep.mubr.msk.f32.mxu0 %vm12609_vm12, %v12472_v30  ;;  %v9593_v0 = vpack.c.bf16 %v4976_v22, %v4975_v55  ;;  %v9605_v10 = vpack.c.bf16 %v162_v57, %v161_v41  ;;  %v157_v22 = vld [vmem:[%s12242_s6] sm:$0xff] }
0x1e2f   :  { %9594 = vmatpush3.bf16.msra.mxu0 %v9593_v0  ;;  %v158_v0 = vld [vmem:[%s12242_s6 + $0x8] sm:$0xff] }
0x1e30   :  { %9008 = vmatmul.mubr.msk.f32.gmra.mrb[96].mxu0 %vm12650_vm14, %v10962_v29  ;;  %9595 = vmatprep.subr.bf16.mxu0 %v12471_v36  ;;  %vm12661_vm14 = vnez %v12660_v42  ;;  %v12687_v42 = vld [vmem:[#allocation26_spill] sm:$0xff] }
0x1e31   :  { %9010 = vmatprep.mubr.msk.f32.mxu0 %vm12609_vm12, %v12472_v30 }
0x1e34   :  { %9011 = vmatmul.mubr.msk.f32.gmra.mrb[98].mxu0 %vm12651_vm5, %v10968_v51  ;;  %vm12662_vm5 = vmand %vm12659_vm7, %vm12661_vm14 }
0x1e35   :  { %9013 = vmatprep.mubr.msk.f32.mxu0 %vm12609_vm12, %v12472_v30  ;;  %v984_v39 = vsel %vm12662_vm5, 1.0, %v12472_v30 }
0x1e38   :  { %9014 = vmatmul.mubr.msk.f32.gmra.mrb[100].mxu0 %vm12652_vm2, %v10974_v23 }
0x1e39   :  { %9049 = vmatprep.mubr.msk.f32.mxu0 %vm12609_vm12, %v12472_v30 }
0x1efb   :  { %v4833_v29 = vpop.f32.mrb[92].mxu0 }
0x1efc   :  { %v9003_v54 = vpop.f32.mrb[93].mxu0  ;;  %v4857_v53 = vmax.f32 %v4833_v29, 0.0  ;;  %v159_v29 = vld [vmem:[%s12242_s6 + $0x10] sm:$0xff] }
0x1efd   :  { %v9611_v54 = vpack.c.bf16 %v158_v0, %v157_v22 }
0x1eff   :  { %v4838_v14 = vpop.f32.mrb[94].mxu0 }
0x1f00   :  { %v4858_v51 = vmax.f32 %v4838_v14, 0.0  ;;  %v9006_v31 = vpop.f32.mrb[95].mxu0  ;;  %v160_v14 = vld [vmem:[%s12242_s6 + $0x18] sm:$0xff] }
0x1f02   :  { %v9587_v63 = vpack.c.bf16 %v4858_v51, %v4857_v53  ;;  %v9614_v53 = vpack.c.bf16 %v160_v14, %v159_v29 }
0x1f03   :  { %v4843_v19 = vpop.f32.mrb[96].mxu0 }
0x1f04   :  { %v9009_v8 = vpop.f32.mrb[97].mxu0  ;;  %9588 = vmatpush3.bf16.msra.mxu1 %v9587_v63  ;;  %v4859_v34 = vmax.f32 %v4843_v19, 0.0 }
0x1f05   :  { %9589 = vmatprep.subr.bf16.mxu1 %v12471_v36 }
0x1f07   :  { %v4848_v23 = vpop.f32.mrb[98].mxu0 }
0x1f08   :  { %v4860_v13 = vmax.f32 %v4848_v23, 0.0  ;;  %v9012_v52 = vpop.f32.mrb[99].mxu0 }
0x1f0a   :  { %v9590_v3 = vpack.c.bf16 %v4860_v13, %v4859_v34 }
0x1f0b   :  { %v4853_v45 = vpop.f32.mrb[100].mxu0 }
0x1f0c   :  { %v9015_v35 = vpop.f32.mrb[101].mxu0  ;;  %9591 = vmatpush3.bf16.msra.mxu1 %v9590_v3  ;;  %v4861_v15 = vmax.f32 %v4853_v45, 0.0 }
0x1f0d   :  { %9024 = vmatprep.subr.mxu1 %v12472_v30 }
0x1f10   :  { %9025 = vmatpush3.msk.msra.mxu1 %vm12654_vm8, %v4861_v15  ;;  %vm12666_vm8 = vcmask 261120   ;;  %v12681_v15 = vld [vmem:[#allocation23_spill] sm:$0xff] }
0x1f11   :  { %9027 = vmatmul.mubr.msk.f32.vlgmr.msra.gmra.mrb[110].mxu1 %vm12655_vm9, %v981_v17  ;;  %9598 = vmatprep.subr.bf16.mxu1 %v12471_v36  ;;  %vm12668_vm9 = vmmov %vm12666_vm8  ;;  %v12683_v17 = vld [vmem:[#allocation24_spill] sm:$0xff] }
0x1f12   :  { %9029 = vmatprep.mubr.msk.f32.mxu1 %vm12609_vm12, %v12472_v30  ;;  %vm12670_vm13 = vmmov %vm12666_vm8 }
0x1f15   :  { %9030 = vmatmul.mubr.msk.f32.gmra.mrb[112].mxu1 %vm12657_vm3, %v982_v50  ;;  %vm12672_vm3 = vmmov %vm12666_vm8  ;;  %v12685_v50 = vld [vmem:[#allocation25_spill] sm:$0xff] }
0x1f16   :  { %9032 = vmatprep.mubr.msk.f32.mxu1 %vm12609_vm12, %v12472_v30  ;;  %vm12675_vm7 = vmmov %vm12672_vm3 }
0x1f17   :  { %vm12676_vm14 = vmmov %vm12672_vm3 }
0x1f18   :  { %vm12677_vm5 = vmmov %vm12672_vm3 }
0x1f19   :  { %9033 = vmatmul.mubr.msk.f32.gmra.mrb[114].mxu1 %vm12658_vm10, %v10790_v24  ;;  %v4977_v24 = vld [vmem:[#allocation5 + $0x70] sm:$0xff]  ;;  %vm12674_vm10 = vmmov %vm12672_vm3 }
0x1f1a   :  { %9035 = vmatprep.mubr.msk.f32.mxu1 %vm12609_vm12, %v12472_v30  ;;  %v9596_v12 = vpack.c.bf16 %v4978_v59, %v4977_v24 }
0x1f1c   :  { %9597 = vmatpush3.bf16.msra.mxu0 %v9596_v12 }
0x1f1d   :  { %9036 = vmatmul.mubr.msk.f32.gmra.mrb[116].mxu1 %vm12652_vm2, %v984_v39  ;;  %9604 = vmatprep.subr.bf16.mxu0 %v12471_v36  ;;  %vm12678_vm2 = vmmov %vm12672_vm3  ;;  %v12689_v39 = vld [vmem:[#allocation27_spill] sm:$0xff] }
0x1f1e   :  { %9038 = vmatprep.mubr.msk.f32.mxu1 %vm12609_vm12, %v12472_v30 }
0x1f21   :  { %9039 = vmatmul.mubr.msk.f32.gmra.mrb[118].mxu1 %vm12664_vm15, %v12663_v11  ;;  %vm12679_vm15 = vmmov %vm12678_vm2 }
0x1f22   :  { %9074 = vmatprep.mubr.msk.f32.mxu1 %vm12609_vm12, %v12472_v30 }
0x1fe4   :  { %v4945_v40 = vpop.f32.mrb[110].mxu1 }
0x1fe5   :  { %v4969_v38 = vadd.f32 %v4945_v40, %v12665_v47  ;;  %v9028_v4 = vpop.f32.mrb[111].mxu1 }
0x1fe7   :  { %9050 = vmatmul.mubr.msk.f32.vlgmr.msra.gmra.mrb[102].mxu0 %vm12666_vm8, %v4969_v38  ;;  %vm12680_vm8 = vcmask 1043456  }
0x1fe8   :  { %v4950_v18 = vpop.f32.mrb[112].mxu1  ;;  %9052 = vmatprep.mubr.msk.f32.mxu0 %vm12609_vm12, %v12472_v30  ;;  %9606 = vmatpush3.bf16.msra.mxu0 %v9605_v10 }
0x1fe9   :  { %v4970_v48 = vadd.f32 %v4950_v18, %v12667_v60  ;;  %v9031_v33 = vpop.f32.mrb[113].mxu1  ;;  %9607 = vmatprep.subr.bf16.mxu0 %v12471_v36 }
0x1feb   :  { %9053 = vmatmul.mubr.msk.f32.gmra.mrb[104].mxu0 %vm12668_vm9, %v4970_v48  ;;  %vm12682_vm9 = vcmask 293888  }
0x1fec   :  { %v4955_v56 = vpop.f32.mrb[114].mxu1  ;;  %9055 = vmatprep.mubr.msk.f32.mxu0 %vm12609_vm12, %v12472_v30  ;;  %9609 = vmatpush3.bf16.msra.mxu0 %v9608_v37 }
0x1fed   :  { %v4971_v7 = vadd.f32 %v4955_v56, %v12669_v46  ;;  %v9034_v26 = vpop.f32.mrb[115].mxu1  ;;  %9610 = vmatprep.subr.bf16.mxu0 %v12471_v36 }
0x1fef   :  { %9056 = vmatmul.mubr.msk.f32.gmra.mrb[106].mxu0 %vm12670_vm13, %v4971_v7  ;;  %vm12684_vm13 = vmmov %vm12682_vm9 }
0x1ff0   :  { %v4960_v9 = vpop.f32.mrb[116].mxu1  ;;  %9058 = vmatprep.mubr.msk.f32.mxu0 %vm12609_vm12, %v12472_v30 }
0x1ff1   :  { %v4972_v58 = vadd.f32 %v4960_v9, %v12671_v6  ;;  %v9037_v27 = vpop.f32.mrb[117].mxu1 }
0x1ff3   :  { %9059 = vmatmul.mubr.msk.f32.gmra.mrb[108].mxu0 %vm12672_vm3, %v4972_v58  ;;  %vm12686_vm3 = vmmov %vm12682_vm9 }
0x1ff4   :  { %v4965_v44 = vpop.f32.mrb[118].mxu1  ;;  %9061 = vmatprep.mubr.msk.f32.mxu0 %vm12609_vm12, %v12472_v30 }
0x1ff5   :  { %v4973_v28 = vadd.f32 %v4965_v44, %v12673_v25  ;;  %v9040_v55 = vpop.f32.mrb[119].mxu1 }
0x1ff7   :  { %9062 = vmatmul.mubr.msk.f32.gmra.mrb[110].mxu0 %vm12674_vm10, %v4973_v28  ;;  %vm12688_vm10 = vmmov %vm12686_vm3 }
0x1ff8   :  { %9097 = vmatprep.mubr.msk.f32.mxu0 %vm12609_vm12, %v12472_v30 }
0x1ffb   :  { %9098 = vmatmul.mubr.msk.f32.vlgmr.msra.gmra.mrb[112].mxu0 %vm12675_vm7, %v12665_v47  ;;  %vm12690_vm7 = vmmov %vm12686_vm3 }
0x1ffc   :  { %9100 = vmatprep.mubr.msk.f32.mxu0 %vm12609_vm12, %v12472_v30  ;;  %9612 = vmatpush3.bf16.msra.mxu0 %v9611_v54 }
0x1ffd   :  { %9613 = vmatprep.subr.bf16.mxu0 %v12471_v36 }
0x1fff   :  { %9101 = vmatmul.mubr.msk.f32.gmra.mrb[114].mxu0 %vm12676_vm14, %v12667_v60  ;;  %vm12691_vm14 = vmmov %vm12678_vm2 }
0x2000   :  { %9103 = vmatprep.mubr.msk.f32.mxu0 %vm12609_vm12, %v12472_v30  ;;  %9615 = vmatpush3.bf16.msra.mxu0 %v9614_v53  ;;  %v9631_v53 = vpack.c.bf16 %v12546_v32, %v12472_v30 }
0x2003   :  { %9104 = vmatmul.mubr.msk.f32.gmra.mrb[116].mxu0 %vm12677_vm5, %v12669_v46  ;;  %vm12692_vm5 = vmmov %vm12678_vm2 }
0x2004   :  { %9106 = vmatprep.mubr.msk.f32.mxu0 %vm12609_vm12, %v12472_v30 }
0x2007   :  { %9107 = vmatmul.mubr.msk.f32.gmra.mrb[118].mxu0 %vm12678_vm2, %v12671_v6 }
0x2008   :  { %9109 = vmatprep.mubr.msk.f32.mxu0 %vm12609_vm12, %v12472_v30 }
0x200b   :  { %9110 = vmatmul.mubr.msk.f32.gmra.mrb[120].mxu0 %vm12679_vm15, %v12673_v25  ;;  %vm12693_vm15 = vmmov %vm12678_vm2 }
0x200c   :  { %9120 = vmatprep.mubr.msk.f32.mxu0 %vm12609_vm12, %v12472_v30 }
0x20ba   :  { %v5060_v51 = vpop.f32.mrb[102].mxu0 }
0x20bb   :  { %v9051_v31 = vpop.f32.mrb[103].mxu0 }
0x20be   :  { %v5065_v63 = vpop.f32.mrb[104].mxu0 }
0x20bf   :  { %v9599_v19 = vpack.c.bf16 %v5065_v63, %v5060_v51  ;;  %v9054_v8 = vpop.f32.mrb[105].mxu0 }
0x20c1   :  { %9600 = vmatpush3.bf16.msra.mxu1 %v9599_v19 }
0x20c2   :  { %v5070_v23 = vpop.f32.mrb[106].mxu0  ;;  %9601 = vmatprep.subr.bf16.mxu1 %v12471_v36 }
0x20c3   :  { %v9057_v34 = vpop.f32.mrb[107].mxu0 }
0x20c6   :  { %v5075_v13 = vpop.f32.mrb[108].mxu0 }
0x20c7   :  { %v9602_v52 = vpack.c.bf16 %v5075_v13, %v5070_v23  ;;  %v9060_v3 = vpop.f32.mrb[109].mxu0 }
0x20c9   :  { %9603 = vmatpush3.bf16.msra.mxu1 %v9602_v52 }
0x20ca   :  { %v5080_v45 = vpop.f32.mrb[110].mxu0  ;;  %9072 = vmatprep.subr.mxu1 %v12472_v30 }
0x20cb   :  { %v9063_v35 = vpop.f32.mrb[111].mxu0 }
0x20cc   :  { %v5465_v35 = vld [vmem:[#allocation7] sm:$0xff] }
0x20cd   :  { %9073 = vmatpush3.msk.msra.mxu1 %vm12680_vm8, %v5080_v45  ;;  %vm12694_vm8 = vmmov %vm12678_vm2 }
0x20ce   :  { %9075 = vmatmul.mubr.msk.f32.vlgmr.msra.gmra.mrb[120].mxu1 %vm12682_vm9, %v12681_v15  ;;  %9616 = vmatprep.subr.bf16.mxu1 %v12471_v36  ;;  %vm12695_vm9 = vcmask 1043456  }
0x20cf   :  { %9077 = vmatprep.mubr.msk.f32.mxu1 %vm12609_vm12, %v12472_v30 }
0x20d2   :  { %9078 = vmatmul.mubr.msk.f32.gmra.mrb[122].mxu1 %vm12684_vm13, %v12683_v17  ;;  %vm12696_vm13 = vmmov %vm12686_vm3 }
0x20d3   :  { %9080 = vmatprep.mubr.msk.f32.mxu1 %vm12609_vm12, %v12472_v30 }
0x20d6   :  { %9081 = vmatmul.mubr.msk.f32.gmra.mrb[124].mxu1 %vm12686_vm3, %v12685_v50 }
0x20d7   :  { %9083 = vmatprep.mubr.msk.f32.mxu1 %vm12609_vm12, %v12472_v30 }
0x20da   :  { %9084 = vmatmul.mubr.msk.f32.gmra.mrb[126].mxu1 %vm12688_vm10, %v12687_v42  ;;  %vm12697_vm10 = vmmov %vm12686_vm3 }
0x20db   :  { %9086 = vmatprep.mubr.msk.f32.mxu1 %vm12609_vm12, %v12472_v30 }
0x20de   :  { %9087 = vmatmul.mubr.msk.f32.gmra.mrb[128].mxu1 %vm12690_vm7, %v12689_v39  ;;  %vm12698_vm7 = vmmov %vm12686_vm3 }
0x20df   :  { %9145 = vmatprep.mubr.msk.f32.mxu1 %vm12609_vm12, %v12472_v30 }
0x21a1   :  { %v5153_v11 = vpop.f32.mrb[120].mxu1 }
0x21a2   :  { %v9076_v24 = vpop.f32.mrb[121].mxu1  ;;  %9121 = vmatmul.mubr.msk.f32.vlgmr.msra.gmra.mrb[112].mxu0 %vm12691_vm14, %v5153_v11  ;;  %vm12699_vm14 = vmmov %vm12686_vm3 }
0x21a3   :  { %9123 = vmatprep.mubr.msk.f32.mxu0 %vm12609_vm12, %v12472_v30  ;;  %v12715_v24 = vld [vmem:[#allocation33_spill] sm:$0xff] }
0x21a5   :  { %v5158_v59 = vpop.f32.mrb[122].mxu1 }
0x21a6   :  { %v9079_v12 = vpop.f32.mrb[123].mxu1  ;;  %9124 = vmatmul.mubr.msk.f32.gmra.mrb[114].mxu0 %vm12692_vm5, %v5158_v59  ;;  %vm12700_vm5 = vcmask 130048  }
0x21a7   :  { %9126 = vmatprep.mubr.msk.f32.mxu0 %vm12609_vm12, %v12472_v30 }
0x21a9   :  { %v5163_v41 = vpop.f32.mrb[124].mxu1 }
0x21aa   :  { %v9082_v57 = vpop.f32.mrb[125].mxu1  ;;  %9127 = vmatmul.mubr.msk.f32.gmra.mrb[116].mxu0 %vm12678_vm2, %v5163_v41  ;;  %vm9624_vm2 = vmpackc.low %vm12700_vm5, %vm12700_vm5 }
0x21ab   :  { %9129 = vmatprep.mubr.msk.f32.mxu0 %vm12609_vm12, %v12472_v30 }
0x21ad   :  { %v5168_v40 = vpop.f32.mrb[126].mxu1 }
0x21ae   :  { %v9085_v10 = vpop.f32.mrb[127].mxu1  ;;  %9130 = vmatmul.mubr.msk.f32.gmra.mrb[118].mxu0 %vm12693_vm15, %v5168_v40  ;;  %vm12701_vm15 = vmmov %vm12695_vm9  ;;  %v12721_v40 = vld [vmem:[#allocation21_spill] sm:$0xff] }
0x21af   :  { %9132 = vmatprep.mubr.msk.f32.mxu0 %vm12609_vm12, %v12472_v30 }
0x21b1   :  { %v5173_v47 = vpop.f32.mrb[128].mxu1 }
0x21b2   :  { %v9088_v38 = vpop.f32.mrb[129].mxu1  ;;  %9133 = vmatmul.mubr.msk.f32.gmra.mrb[120].mxu0 %vm12694_vm8, %v5173_v47  ;;  %vm12702_vm8 = vmmov %vm12695_vm9 }
0x21b3   :  { %v12725_v38 = vld [vmem:[#allocation35_spill] sm:$0xff] }
0x2275   :  { %v5348_v4 = vpop.f32.mrb[112].mxu0 }
0x2276   :  { %v9122_v49 = vpop.f32.mrb[113].mxu0 }
0x2279   :  { %v5353_v16 = vpop.f32.mrb[114].mxu0 }
0x227a   :  { %v9617_v18 = vpack.c.bf16 %v5353_v16, %v5348_v4  ;;  %v9125_v37 = vpop.f32.mrb[115].mxu0 }
0x227b   :  { %v12728_v37 = vld [vmem:[#allocation22_spill] sm:$0xff] }
0x227c   :  { %9618 = vmatpush3.bf16.msra.mxu1 %v9617_v18 }
0x227d   :  { %v5358_v60 = vpop.f32.mrb[116].mxu0  ;;  %9619 = vmatprep.subr.bf16.mxu1 %v12471_v36 }
0x227e   :  { %v9128_v48 = vpop.f32.mrb[117].mxu0 }
0x227f   :  { %v12730_v48 = vld [vmem:[#allocation36_spill] sm:$0xff] }
0x2281   :  { %v5363_v33 = vpop.f32.mrb[118].mxu0 }
0x2282   :  { %v9620_v56 = vpack.c.bf16 %v5363_v33, %v5358_v60  ;;  %v9131_v46 = vpop.f32.mrb[119].mxu0 }
0x2284   :  { %9621 = vmatpush3.bf16.msra.mxu1 %v9620_v56 }
0x2285   :  { %v5368_v7 = vpop.f32.mrb[120].mxu0  ;;  %9143 = vmatprep.subr.mxu1 %v12472_v30 }
0x2286   :  { %v9134_v26 = vpop.f32.mrb[121].mxu0 }
0x2288   :  { %9144 = vmatpush3.msk.msra.mxu1 %vm12695_vm9, %v5368_v7  ;;  %vm5475_vm9 = vcmp.eq.s32.totalorder %v10245_v2, 15 }
0x2289   :  { %9146 = vmatmul.mubr.msk.f32.vlgmr.msra.gmra.mrb[130].mxu1 %vm12696_vm13, %v12681_v15  ;;  %9622 = vmatprep.subr.bf16.mxu1 %v12471_v36  ;;  %vm5478_vm13 = vcmp.eq.s32.totalorder %v10256_v5, 15  ;;  %v5476_v14 = vsel %vm5475_vm9, 1.0, %v12472_v30  ;;  %v10036_v5 = vmov 0   ;;  %v5466_v15 = vld [vmem:[#allocation7 + $0x8] sm:$0xff] }
0x228a   :  { %9148 = vmatprep.mubr.msk.f32.mxu1 %vm12609_vm12, %v12472_v30  ;;  %9749 = vset.pattern.permute.xlu0 %v10036_v5 }
0x228b   :  { %9750 = vset.pattern.permute.xlu1 %v10036_v5 }
0x228d   :  { %9149 = vmatmul.mubr.msk.f32.gmra.mrb[132].mxu1 %vm12686_vm3, %v12683_v17  ;;  %vm12703_vm3 = vmmov %vm12700_vm5  ;;  %v11965_v17 = vpack.c.bf16 %v5466_v15, %v5465_v35 }
0x228e   :  { %9151 = vmatprep.mubr.msk.f32.mxu1 %vm12609_vm12, %v12472_v30  ;;  %vm12706_vm5 = vmmov %vm12703_vm3 }
0x2291   :  { %9152 = vmatmul.mubr.msk.f32.gmra.mrb[134].mxu1 %vm12697_vm10, %v12685_v50  ;;  %vm12704_vm10 = vmmov 1  }
0x2292   :  { %9154 = vmatprep.mubr.msk.f32.mxu1 %vm12609_vm12, %v12472_v30 }
0x2295   :  { %9155 = vmatmul.mubr.msk.f32.gmra.mrb[136].mxu1 %vm12698_vm7, %v12687_v42  ;;  %vm9632_vm7 = vmpackc.low %vm5478_vm13, %vm12704_vm10 }
0x2296   :  { %9157 = vmatprep.mubr.msk.f32.mxu1 %vm12609_vm12, %v12472_v30 }
0x2299   :  { %9158 = vmatmul.mubr.msk.f32.gmra.mrb[138].mxu1 %vm12699_vm14, %v12689_v39  ;;  %vm12705_vm14 = vmmov %vm12703_vm3 }
0x229a   :  { %9170 = vmatprep.mubr.msk.f32.mxu1 %vm12609_vm12, %v12472_v30 }
0x235c   :  { %v5441_v9 = vpop.f32.mrb[130].mxu1 }
0x235d   :  { %v9147_v6 = vpop.f32.mrb[131].mxu1 }
0x2360   :  { %v5446_v58 = vpop.f32.mrb[132].mxu1 }
0x2361   :  { %v9623_v27 = vpack.c.bf16 %v5446_v58, %v5441_v9  ;;  %v9150_v44 = vpop.f32.mrb[133].mxu1 }
0x2363   :  { %9625 = vmatpush3.bf16.xpose.msk.msra.mxu1 %vm9624_vm2, %v9623_v27  ;;  %9635 = vmatprep.subr.bf16.mxu0 %v9623_v27 }
0x2364   :  { %v5451_v25 = vpop.f32.mrb[134].mxu1  ;;  %9637 = vmatpush3.bf16.msra.mxu0 %v9623_v27  ;;  %9626 = vmatprep.subr.bf16.mxu1 %v12471_v36 }
0x2365   :  { %v9153_v28 = vpop.f32.mrb[135].mxu1 }
0x2368   :  { %v5456_v55 = vpop.f32.mrb[136].mxu1 }
0x2369   :  { %v9627_v22 = vpack.c.bf16 %v5456_v55, %v5451_v25  ;;  %v9156_v0 = vpop.f32.mrb[137].mxu1 }
0x236b   :  { %9629 = vmatpush3.bf16.xpose.msk.msra.mxu1 %vm9624_vm2, %v9627_v22  ;;  %9639 = vmatprep.subr.bf16.mxu0 %v9627_v22  ;;  %vm12707_vm2 = vmmov %vm12703_vm3 }
0x236c   :  { %v5461_v29 = vpop.f32.mrb[138].mxu1  ;;  %9641 = vmatpush3.bf16.msra.mxu0 %v9627_v22  ;;  %9168 = vmatprep.subr.mxu1 %v12472_v30  ;;  %vm12710_vm9 = vmmov %vm12707_vm2 }
0x236d   :  { %v9159_v54 = vpop.f32.mrb[139].mxu1  ;;  %9200 = vmatprep.subr.msk.mxu0 %vm12701_vm15, %v5461_v29  ;;  %vm12708_vm15 = vmmov %vm12707_vm2 }
0x2370   :  { %9201 = vmatpush3.msk.msra.mxu0 %vm12702_vm8, %v5461_v29  ;;  %vm12709_vm8 = vmmov %vm12707_vm2 }
0x2371   :  { %9643 = vmatprep.subr.bf16.mxu0 %v11965_v17 }
0x2373   :  { %9169 = vmatpush3.xpose.msk.msra.mxu1 %vm12703_vm3, %v5461_v29 }
0x2374   :  { %9630 = vmatprep.subr.bf16.mxu1 %v12471_v36 }
0x2376   :  { %9171 = vmatmul.mubr.msk.f32.vlgmr.msra.gmra.mrb[140].mxu1 %vm12705_vm14, %v5476_v14 }
0x2377   :  { %9633 = vmatpush3.bf16.msk.msra.mxu1 %vm9632_vm7, %v9631_v53  ;;  %9177 = vmatprep.mubr.msk.f32.mxu1 %vm12609_vm12, %v12472_v30 }
0x237a   :  { %9178 = vmatmul.mubr.msk.f32.vlgmr.msra.gmra.mrb[142].mxu1 %vm12706_vm5, %v5441_v9 }
0x237b   :  { %9180 = vmatprep.mubr.msk.f32.mxu1 %vm12609_vm12, %v12472_v30 }
0x237e   :  { %9181 = vmatmul.mubr.msk.f32.gmra.mrb[144].mxu1 %vm12707_vm2, %v5446_v58  ;;  %v7972_v58 = vadd.s32 4294967280, %v12721_v40 }
0x237f   :  { %9183 = vmatprep.mubr.msk.f32.mxu1 %vm12609_vm12, %v12472_v30 }
0x2382   :  { %9184 = vmatmul.mubr.msk.f32.gmra.mrb[146].mxu1 %vm12708_vm15, %v5451_v25  ;;  %v5782_v25 = vcvt.s32.f32 %v7972_v58 }
0x2383   :  { %9186 = vmatprep.mubr.msk.f32.mxu1 %vm12609_vm12, %v12472_v30 }
0x2386   :  { %9187 = vmatmul.mubr.msk.f32.gmra.mrb[148].mxu1 %vm12709_vm8, %v5456_v55  ;;  %vm12711_vm8 = vcmp.lt.s32.totalorder %v10245_v2, 20  ;;  %v12733_v55 = vld [vmem:[#allocation37_spill] sm:$0xff] }
0x2387   :  { %9189 = vmatprep.mubr.msk.f32.mxu1 %vm12609_vm12, %v12472_v30  ;;  %vm12712_vm4 = vmmov %vm12711_vm8 }
0x238a   :  { %9190 = vmatmul.mubr.msk.f32.gmra.mrb[150].mxu1 %vm12710_vm9, %v5461_v29 }
0x2449   :  { %v5565_v32 = vpop.f32.mrb[140].mxu1 }
0x244a   :  { %v9172_v51 = vpop.f32.mrb[141].mxu1  ;;  %v5687_v50 = vrot.slane %v5565_v32, %v10450_v21  ;;  %v12713_v21 = vld [vmem:[#allocation20_spill] sm:$0xff]  ;;  %v6004_v32 = vmul.u32 2, %v10243_v1 }
0x244c   :  { %v6010_v51 = vadd.s32 1, %v6004_v32 }
0x244d   :  { %v5635_v31 = vpop.f32.mrb[142].mxu1 }
0x244e   :  { %5661 = vperm.xlu0 %9749, %v5635_v31   ;;  %v9179_v63 = vpop.f32.mrb[143].mxu1 }
0x2451   :  { %v5640_v19 = vpop.f32.mrb[144].mxu1 }
0x2452   :  { %5666 = vperm.xlu1 %9750, %v5640_v19   ;;  %v9182_v8 = vpop.f32.mrb[145].mxu1  ;;  %v7978_v19 = vld [vmem:[%s12245_s9] ss:$0 sm:$0xff] }
0x2455   :  { %v5645_v23 = vpop.f32.mrb[146].mxu1 }
0x2456   :  { %5671 = vperm.xlu1 %9750, %v5645_v23   ;;  %v9185_v34 = vpop.f32.mrb[147].mxu1 }
0x2459   :  { %v5650_v13 = vpop.f32.mrb[148].mxu1 }
0x245a   :  { %5676 = vperm.xlu1 %9750, %v5650_v13   ;;  %v9188_v52 = vpop.f32.mrb[149].mxu1 }
0x245b   :  { %v6020_v52 = vadd.s32 16, %v6004_v32 }
0x245d   :  { %v5655_v3 = vpop.f32.mrb[150].mxu1 }
0x245e   :  { %5681 = vperm.xlu1 %9750, %v5655_v3   ;;  %v9191_v45 = vpop.f32.mrb[151].mxu1 }
0x24cd   :  { %v5662_v42 = vpop.permute.xlu0 %5661 }
0x24ce   :  { %vm5693_vm13 = vcmp.eq.f32.partialorder %v5662_v42, %v5687_v50  ;;  %vm5688_vm3 = vcmp.gt.f32.partialorder %v5662_v42, %v5687_v50 }
0x24cf   :  { %vm5698_vm10 = vmand %vm5693_vm13, %vm12566_vm11  ;;  %vm12714_vm11 = vcmp.lt.s32.totalorder %v12713_v21, %v10245_v2 }
0x24d0   :  { %vm5703_vm7 = vmor %vm5688_vm3, %vm5698_vm10  ;;  %vm12716_vm10 = vnez %v12715_v24 }
0x24d1   :  { %v5667_v39 = vpop.permute.xlu1 %5666  ;;  %vm5708_vm1 = vmand %vm12712_vm4, %vm5703_vm7 }
0x24d2   :  { %vm5689_vm14 = vcmp.gt.f32.partialorder %v5667_v39, %v5687_v50  ;;  %vm5694_vm5 = vcmp.eq.f32.partialorder %v5667_v39, %v5687_v50  ;;  %v5713_v12 = vsel %vm5708_vm1, 1.0, %v12472_v30  ;;  %v6026_v39 = vadd.s32 1, %v6020_v52 }
0x24d3   :  { %vm5699_vm2 = vmand %vm5694_vm5, %vm12599_vm6  ;;  %vm12718_vm6 = vnez %v12717_v62 }
0x24d4   :  { %vm5704_vm15 = vmor %vm5689_vm14, %vm5699_vm2  ;;  %vm12720_vm2 = vcmask 293888  }
0x24d5   :  { %vm5709_vm9 = vmand %vm12711_vm8, %vm5704_vm15  ;;  %v5672_v11 = vpop.permute.xlu1 %5671 }
0x24d6   :  { %vm5690_vm0 = vcmp.gt.f32.partialorder %v5672_v11, %v5687_v50  ;;  %vm5695_vm12 = vcmp.eq.f32.partialorder %v5672_v11, %v5687_v50  ;;  %v5714_v61 = vsel %vm5709_vm9, 1.0, %v12472_v30  ;;  %vm12719_vm14 = vmor %vm12716_vm10, %vm12718_vm6  ;;  %vm12729_vm6 = vcmp.lt.s32.totalorder %v12728_v37, %v10245_v2 }
0x24d7   :  { %vm5700_vm13 = vmand %vm5695_vm12, %vm12714_vm11  ;;  %v5719_v57 = vsel %vm12720_vm2, %v5714_v61, 0.0  ;;  %vm12722_vm12 = vcmp.lt.s32.totalorder %v12721_v40, %v10245_v2  ;;  %vm12726_vm11 = vnez %v12725_v38  ;;  %v6285_v40 = vadd.s32 1, %v10243_v1 }
0x24d8   :  { %vm5705_vm3 = vmor %vm5690_vm0, %vm5700_vm13 }
0x24d9   :  { %vm5710_vm5 = vmand %vm12719_vm14, %vm5705_vm3  ;;  %v5677_v59 = vpop.permute.xlu1 %5676 }
0x24da   :  { %v5715_v41 = vsel %vm5710_vm5, 1.0, %v12472_v30  ;;  %vm5691_vm4 = vcmp.gt.f32.partialorder %v5677_v59, %v5687_v50  ;;  %vm5696_vm7 = vcmp.eq.f32.partialorder %v5677_v59, %v5687_v50  ;;  %vm12723_vm8 = vmmov %vm12720_vm2  ;;  %v6367_v59 = vld [vmem:[#allocation8 + $0x10] sm:$0xff] }
0x24db   :  { %vm5701_vm15 = vmand %vm5696_vm7, %vm12722_vm12  ;;  %v5718_v10 = vsel %vm12723_vm8, %v5713_v12, 0.0  ;;  %v6368_v12 = vld [vmem:[#allocation8 + $0x18] sm:$0xff] }
0x24dc   :  { %vm5706_vm0 = vmor %vm5691_vm4, %vm5701_vm15  ;;  %v5720_v49 = vadd.f32 %v5719_v57, %v5718_v10  ;;  %vm12731_vm4 = vnez %v12730_v48  ;;  %v6205_v57 = vadd.s32 8, %v11547_v20 }
0x24dd   :  { %vm12724_vm9 = vmmov %vm12720_vm2  ;;  %v5682_v4 = vpop.permute.xlu1 %5681 }
0x24de   :  { %v5721_v47 = vsel %vm12724_vm9, %v5715_v41, 0.0  ;;  %vm5711_vm13 = vmand %vm12726_vm11, %vm5706_vm0  ;;  %vm5692_vm1 = vcmp.gt.f32.partialorder %v5682_v4, %v5687_v50  ;;  %vm5697_vm3 = vcmp.eq.f32.partialorder %v5682_v4, %v5687_v50  ;;  %vm12734_vm0 = vcmp.lt.s32.totalorder %v10245_v2, 20 }
0x24df   :  { %v5716_v16 = vsel %vm5711_vm13, 1.0, %v12472_v30  ;;  %vm12727_vm10 = vmmov %vm12720_vm2  ;;  %v5722_v60 = vadd.f32 %v5721_v47, %v5720_v49  ;;  %vm12732_vm2 = vcmask 289792   ;;  %v9669_v41 = vpack.c.bf16 %v6368_v12, %v6367_v59 }
0x24e0   :  { %v5723_v18 = vsel %vm12727_vm10, %v5716_v16, 0.0  ;;  %vm5702_vm14 = vmand %vm5697_vm3, %vm12729_vm6  ;;  %v6288_v10 = vadd.s32 1, %v6205_v57 }
0x24e1   :  { %vm5707_vm5 = vmor %vm5692_vm1, %vm5702_vm14  ;;  %v5724_v33 = vadd.f32 %v5723_v18, %v5722_v60 }
0x24e2   :  { %vm5712_vm7 = vmand %vm12731_vm4, %vm5707_vm5 }
0x24e3   :  { %v5717_v56 = vsel %vm5712_vm7, 1.0, %v12472_v30  ;;  %vm12735_vm13 = vmmov %vm12734_vm0  ;;  %vm12740_vm7 = vcmask 130048  }
0x24e4   :  { %v5725_v46 = vsel %vm12732_vm2, %v5717_v56, 0.0  ;;  %vm12736_vm3 = vmmov %vm12727_vm10  ;;  %v6284_v56 = vld [vmem:[#allocation8 + $0x8] sm:$0xff] }
0x24e5   :  { %v5726_v7 = vadd.f32 %v5725_v46, %v5724_v33  ;;  %vm12737_vm6 = vmmov %vm12736_vm3  ;;  %v6283_v33 = vld [vmem:[#allocation8] sm:$0xff] }
0x24e6   :  { %vm12738_vm5 = vmmov %vm12736_vm3  ;;  %v9672_v46 = vpack.c.bf16 %v6284_v56, %v6283_v33  ;;  %v7073_v56 = vld [vmem:[#allocation10] sm:$0xff] }
0x24e7   :  { %v5727_v26 = vrot.slane %v5726_v7, 4  ;;  %vm12739_vm4 = vmmov %vm12736_vm3 }
0x24e8   :  { %vm12741_vm2 = vmmov %vm12740_vm7 }
0x24e9   :  { %v5728_v9 = vadd.f32 %v5727_v26, %v5726_v7  ;;  %v6515_v7 = vadd.s32 2, %v10243_v1  ;;  %v6518_v26 = vadd.s32 2, %v6205_v57 }
0x24eb   :  { %v5729_v6 = vrot.slane %v5728_v9, 2 }
0x24ed   :  { %v5730_v27 = vadd.f32 %v5729_v6, %v5728_v9  ;;  %v6673_v9 = vadd.s32 3, %v10243_v1  ;;  %v6676_v6 = vadd.s32 3, %v6205_v57 }
0x24ef   :  { %v5731_v44 = vrot.slane %v5730_v27, 1 }
0x24f1   :  { %v5732_v28 = vadd.f32 %v5731_v44, %v5730_v27  ;;  %v7381_v27 = vld [vmem:[#allocation10 + $0x40] sm:$0xff] }
0x24f3   :  { %vm5749_vm12 = vcmp.eq.f32.partialorder %v5732_v28, %v10615_v43  ;;  %vm5750_vm15 = vcmp.eq.f32.partialorder %v5732_v28, %v12733_v55  ;;  %vm5785_vm9 = vcmp.eq.f32.partialorder %v5732_v28, %v5782_v25  ;;  %v6831_v25 = vadd.s32 4, %v10243_v1 }
0x24f4   :  { %vm5753_vm8 = vmand %vm12734_vm0, %vm5749_vm12  ;;  %vm12744_vm0 = vcmask 261120   ;;  %v6834_v55 = vadd.s32 4, %v6205_v57 }
0x24f5   :  { %v5794_v22 = vsel %vm5753_vm8, 1.0, %v12472_v30  ;;  %vm5754_vm1 = vmand %vm12735_vm13, %vm5750_vm15  ;;  %vm6012_vm8 = vcmp.eq.s32.totalorder %v10245_v2, %v6010_v51  ;;  %vm6022_vm13 = vcmp.eq.s32.totalorder %v10245_v2, %v6020_v52 }
0x24f6   :  { %9202 = vmatprep.mubr.msk.f32.mxu0 %vm12736_vm3, %v5794_v22  ;;  %v5795_v0 = vsel %vm5754_vm1, 1.0, %v12472_v30  ;;  %vm5788_vm10 = vmand %vm12726_vm11, %vm5749_vm12  ;;  %v6118_v63 = vsel %vm6012_vm8, 1.0, %v12472_v30  ;;  %vm6028_vm1 = vcmp.eq.s32.totalorder %v10245_v2, %v6026_v39  ;;  %v6036_v24 = vsel %vm6022_vm13, 1.0, %v12472_v30 }
0x24f7   :  { %9203 = vmatmul.mubr.msk.f32.vlgmr.msra.gmra.mrb[122].mxu0 %vm12737_vm6, %v5795_v0  ;;  %v5796_v43 = vsel %vm5788_vm10, 1.0, %v12472_v30  ;;  %vm5789_vm14 = vmand %vm12726_vm11, %vm5785_vm9  ;;  %vm6006_vm11 = vcmp.eq.s32.totalorder %v10245_v2, %v6004_v32  ;;  %v6119_v62 = vsel %vm6028_vm1, 1.0, %v12472_v30  ;;  %vm12748_vm6 = vmmov 0   ;;  %v6598_v32 = vld [vmem:[#allocation8 + $0x28] sm:$0xff] }
0x24f8   :  { %9205 = vmatprep.mubr.msk.f32.mxu0 %vm12738_vm5, %v5796_v43  ;;  %9645 = vmatpush3.bf16.msra.mxu0 %v11965_v17  ;;  %v5797_v29 = vsel %vm5789_vm14, 1.0, %v12472_v30  ;;  %vm12742_vm12 = vmmov %vm12741_vm2  ;;  %v6035_v31 = vsel %vm6006_vm11, 1.0, %v12472_v30  ;;  %vm6203_vm14 = vcmp.eq.s32.totalorder %v10245_v2, %v10243_v1  ;;  %vm6206_vm5 = vcmp.eq.s32.totalorder %v10245_v2, %v6205_v57 }
0x24f9   :  { %vm12743_vm15 = vmmov %vm12741_vm2  ;;  %9226 = vmatprep.mubr.msk.f32.mxu1 %vm12744_vm0, %v6035_v31  ;;  %vm6289_vm11 = vcmp.eq.s32.totalorder %v10245_v2, %v6288_v10 }
0x24fa   :  { %vm12745_vm9 = vmmov %vm12744_vm0 }
0x24fb   :  { %9206 = vmatmul.mubr.msk.f32.gmra.mrb[124].mxu0 %vm12739_vm4, %v5797_v29  ;;  %vm12746_vm3 = vmmov %vm12744_vm0  ;;  %vm12749_vm4 = vcmp.lt.s32.totalorder %v10243_v1, 4 }
0x24fc   :  { %vm12747_vm10 = vmmov %vm12744_vm0 }
0x24fd   :  { %vm12753_vm8 = vmmov %vm12749_vm4 }
0x25ca   :  { %v9204_v54 = vpop.f32.mrb[122].mxu0 }
0x25cb   :  { %v5878_v14 = vpop.f32.mrb[123].mxu0 }
0x25cc   :  { %9212 = vmatprep.mubr.msk.f32.mxu0 %vm12740_vm7, %v5878_v14  ;;  %vm12059_vm7 = vmand %vm12749_vm4, %vm6203_vm14  ;;  %vm6519_vm4 = vcmp.eq.s32.totalorder %v10245_v2, %v6518_v26  ;;  %v7075_v26 = vld [vmem:[#allocation10 + $0x10] sm:$0xff] }
0x25cd   :  { %9213 = vmatmul.mubr.msk.f32.vlgmr.msra.gmra.mrb[126].mxu0 %vm12741_vm2, %v9204_v54  ;;  %vm12752_vm2 = vcmp.ge.s32.totalorder %v10243_v1, 4 }
0x25ce   :  { %v9207_v53 = vpop.f32.mrb[124].mxu0  ;;  %vm12754_vm13 = vmmov %vm12752_vm2 }
0x25cf   :  { %v5888_v5 = vpop.f32.mrb[125].mxu0  ;;  %vm6290_vm1 = vmand %vm12754_vm13, %vm6289_vm11  ;;  %vm6674_vm11 = vcmp.eq.s32.totalorder %v10245_v2, %v6673_v9  ;;  %v7076_v9 = vld [vmem:[#allocation10 + $0x18] sm:$0xff] }
0x25d0   :  { %9215 = vmatprep.mubr.msk.f32.mxu0 %vm12742_vm12, %v5888_v5  ;;  %vm6207_vm12 = vmand %vm12752_vm2, %vm6206_vm5  ;;  %vm6516_vm5 = vcmp.eq.s32.totalorder %v10245_v2, %v6515_v7  ;;  %v6597_v5 = vld [vmem:[#allocation8 + $0x20] sm:$0xff] }
0x25d1   :  { %9216 = vmatmul.mubr.msk.f32.gmra.mrb[128].mxu0 %vm12743_vm15, %v9207_v53  ;;  %vm6286_vm15 = vcmp.eq.s32.totalorder %v10245_v2, %v6285_v40  ;;  %vm6208_vm0 = vmor %vm12059_vm7, %vm6207_vm12  ;;  %v9678_v51 = vpack.c.bf16 %v6598_v32, %v6597_v5  ;;  %v7997_v40 = vld [vmem:[%s12247_s11] ss:$0 sm:$0xff]  ;;  %v7537_v32 = vld [vmem:[#allocation10 + $0x68] sm:$0xff] }
0x25d2   :  { %9237 = vmatprep.mubr.msk.f32.mxu0 %vm12745_vm9, %v6118_v63  ;;  %vm6287_vm9 = vmand %vm12753_vm8, %vm6286_vm15  ;;  %v6209_v60 = vsel %vm6208_vm0, 1.0, %v12472_v30  ;;  %vm6677_vm0 = vcmp.eq.s32.totalorder %v10245_v2, %v6676_v6  ;;  %v9702_v6 = vpack.c.bf16 %v7076_v9, %v7075_v26 }
0x25d3   :  { %vm12757_vm7 = vmmov %vm12753_vm8 }
0x25d4   :  { %vm12090_vm2 = vmand %vm12757_vm7, %vm6516_vm5 }
0x25d5   :  { %vm12760_vm12 = vmmov %vm12754_vm13 }
0x25d6   :  { %vm12096_vm15 = vmand %vm12760_vm12, %vm6519_vm4  ;;  %vm6835_vm4 = vcmp.eq.s32.totalorder %v10245_v2, %v6834_v55 }
0x25d7   :  { %vm6521_vm8 = vmor %vm12090_vm2, %vm12096_vm15 }
0x25d8   :  { %vm12764_vm13 = vmmov %vm12757_vm7  ;;  %v6522_v54 = vsel %vm6521_vm8, 1.0, %v12472_v30 }
0x25d9   :  { %vm12771_vm2 = vmmov %vm12764_vm13 }
0x26a0   :  { %v9214_v8 = vpop.f32.mrb[126].mxu0 }
0x26a1   :  { %v5987_v23 = vadd.f32 %v9214_v8, %v7978_v19  ;;  %v5981_v34 = vpop.f32.mrb[127].mxu0  ;;  %v6756_v8 = vld [vmem:[#allocation8 + $0x38] sm:$0xff] }
0x26a2   :  { %v5982_v13 = vadd.f32 %v7978_v19, %v5981_v34 }
0x26a3   :  { %v6001_v3 = vmax.f32 %v5987_v23, 0.0 }
0x26a4   :  { %v6000_v45 = vmax.f32 %v5982_v13, 0.0  ;;  %v9217_v35 = vpop.f32.mrb[128].mxu0 }
0x26a5   :  { %v5997_v15 = vadd.f32 %v9217_v35, %v7978_v19  ;;  %v5991_v17 = vpop.f32.mrb[129].mxu0 }
0x26a6   :  { %v9646_v50 = vpack.c.bf16 %v6001_v3, %v6000_v45  ;;  %v5992_v42 = vadd.f32 %v7978_v19, %v5991_v17  ;;  %v6755_v19 = vld [vmem:[#allocation8 + $0x30] sm:$0xff]  ;;  %v6913_v3 = vld [vmem:[#allocation8 + $0x40] sm:$0xff]  ;;  %v6914_v45 = vld [vmem:[#allocation8 + $0x48] sm:$0xff] }
0x26a7   :  { %v6003_v11 = vmax.f32 %v5997_v15, 0.0  ;;  %v9684_v52 = vpack.c.bf16 %v6756_v8, %v6755_v19  ;;  %v9690_v17 = vpack.c.bf16 %v6914_v45, %v6913_v3 }
0x26a8   :  { %v6002_v21 = vmax.f32 %v5992_v42, 0.0  ;;  %9647 = vmatprep.subr.bf16.mxu1 %v9646_v50  ;;  %9655 = vmatprep.subr.bf16.mxu0 %v9646_v50 }
0x26a9   :  { %9649 = vmatpush3.bf16.msra.mxu1 %v9646_v50  ;;  %9657 = vmatpush3.bf16.msra.mxu0 %v9646_v50 }
0x26aa   :  { %v9650_v61 = vpack.c.bf16 %v6003_v11, %v6002_v21 }
0x26ac   :  { %9651 = vmatprep.subr.bf16.mxu1 %v9650_v61  ;;  %9659 = vmatprep.subr.bf16.mxu0 %v9650_v61 }
0x26ad   :  { %9653 = vmatpush3.bf16.msra.mxu1 %v9650_v61  ;;  %9661 = vmatpush3.bf16.msra.mxu0 %v9650_v61 }
0x26ae   :  { %9662 = vmatprep.subr.bf16.mxu1 %v12471_v36  ;;  %9668 = vmatprep.subr.bf16.mxu0 %v12471_v36 }
0x26b0   :  { %9227 = vmatmul.mubr.msk.f32.vlgmr.msra.gmra.mrb[152].mxu1 %vm12746_vm3, %v6036_v24  ;;  %9238 = vmatmul.mubr.msk.f32.vlgmr.msra.gmra.mrb[130].mxu0 %vm12747_vm10, %v6119_v62  ;;  %vm6291_vm3 = vmor %vm6287_vm9, %vm6290_vm1  ;;  %vm12755_vm10 = vcmask 130048   ;;  %v6997_v62 = vmul.u32 4, %v10243_v1 }
0x26b1   :  { %9244 = vmatprep.mubr.msk.f32.mxu1 %vm12748_vm6, %v12472_v30  ;;  %9258 = vmatprep.mubr.msk.f32.mxu0 %vm12748_vm6, %v12472_v30  ;;  %v6292_v48 = vsel %vm6291_vm3, 1.0, %v12472_v30  ;;  %vm12756_vm14 = vmmov %vm12755_vm10 }
0x26b2   :  { %9670 = vmatpush3.bf16.msra.mxu0 %v9669_v41  ;;  %vm12763_vm9 = vmmov %vm12755_vm10  ;;  %v7077_v57 = vadd.s32 1, %v6997_v62  ;;  %v7304_v58 = vadd.s32 2, %v6997_v62 }
0x26b3   :  { %9674 = vmatprep.subr.bf16.mxu0 %v12471_v36  ;;  %vm12110_vm1 = vmand %vm12764_vm13, %vm6674_vm11 }
0x26b4   :  { %vm12767_vm3 = vmmov %vm12760_vm12 }
0x26b5   :  { %vm12770_vm5 = vmmov %vm12763_vm9 }
0x26b6   :  { %vm12772_vm15 = vmmov %vm12767_vm3 }
0x26b7   :  { %vm6836_vm11 = vmand %vm12772_vm15, %vm6835_vm4  ;;  %vm12779_vm4 = vcmask 64512  }
0x2783   :  { %v9228_v38 = vpop.f32.mrb[152].mxu1  ;;  %v9239_v4 = vpop.f32.mrb[130].mxu0 }
0x2784   :  { %v6202_v20 = vmax.f32 %v9228_v38, %v9239_v4  ;;  %v6109_v49 = vpop.f32.mrb[153].mxu1  ;;  %v6192_v16 = vpop.f32.mrb[131].mxu0 }
0x2785   :  { %v6201_v18 = vmax.f32 %v6109_v49, %v6192_v16  ;;  %v7155_v49 = vld [vmem:[#allocation10 + $0x28] sm:$0xff] }
0x2787   :  { %v9663_v37 = vpack.c.bf16 %v6202_v20, %v6201_v18  ;;  %v7154_v20 = vld [vmem:[#allocation10 + $0x20] sm:$0xff] }
0x2789   :  { %9664 = vmatpush3.bf16.msra.mxu1 %v9663_v37 }
0x278a   :  { %9665 = vmatprep.subr.bf16.mxu1 %v12471_v36 }
0x278c   :  { %9245 = vmatmul.mubr.msk.f32.vlgmr.msra.gmra.mrb[154].mxu1 %vm12755_vm10, %v6209_v60  ;;  %vm12118_vm10 = vmand %vm12767_vm3, %vm6677_vm0  ;;  %v7156_v60 = vld [vmem:[#allocation10 + $0x30] sm:$0xff] }
0x278d   :  { %9667 = vmatpush3.bf16.msra.mxu1 %v9663_v37  ;;  %9251 = vmatprep.mubr.msk.f32.mxu1 %vm12748_vm6, %v12472_v30  ;;  %vm6679_vm7 = vmor %vm12110_vm1, %vm12118_vm10 }
0x278e   :  { %9671 = vmatprep.subr.bf16.mxu1 %v12471_v36  ;;  %vm12773_vm0 = vmmov %vm12770_vm5  ;;  %v6680_v14 = vsel %vm6679_vm7, 1.0, %v12472_v30 }
0x278f   :  { %vm12775_vm13 = vmmov %vm12773_vm0 }
0x2790   :  { %9252 = vmatmul.mubr.msk.f32.vlgmr.msra.gmra.mrb[156].mxu1 %vm12756_vm14, %v6292_v48  ;;  %vm6832_vm14 = vcmp.eq.s32.totalorder %v10245_v2, %v6831_v25  ;;  %vm12776_vm1 = vmmov %vm12773_vm0  ;;  %v7157_v48 = vld [vmem:[#allocation10 + $0x38] sm:$0xff]  ;;  %v7459_v25 = vadd.s32 3, %v6997_v62 }
0x2791   :  { %9265 = vmatprep.mubr.msk.f32.mxu1 %vm12748_vm6, %v12472_v30  ;;  %9673 = vmatpush3.bf16.msra.mxu1 %v9672_v46  ;;  %vm6833_vm12 = vmand %vm12771_vm2, %vm6832_vm14  ;;  %vm7078_vm14 = vcmp.eq.s32.totalorder %v10245_v2, %v7077_v57  ;;  %v9696_v33 = vpack.c.bf16 %v7157_v48, %v7156_v60  ;;  %v7074_v46 = vld [vmem:[#allocation10 + $0x8] sm:$0xff]  ;;  %vm7305_vm2 = vcmp.eq.s32.totalorder %v10245_v2, %v7304_v58 }
0x2792   :  { %9677 = vmatprep.subr.bf16.mxu1 %v12471_v36  ;;  %vm6837_vm8 = vmor %vm6833_vm12, %vm6836_vm11  ;;  %v7079_v1 = vsel %vm7078_vm14, 1.0, %v12472_v30  ;;  %v9699_v7 = vpack.c.bf16 %v7074_v46, %v7073_v56  ;;  %vm12781_vm12 = vcmask 261120   ;;  %vm7460_vm11 = vcmp.eq.s32.totalorder %v10245_v2, %v7459_v25 }
0x2793   :  { %v6838_v53 = vsel %vm6837_vm8, 1.0, %v12472_v30  ;;  %vm12777_vm3 = vmmov %vm12773_vm0 }
0x2794   :  { %vm12778_vm10 = vmmov %vm12773_vm0 }
0x2795   :  { %vm12780_vm7 = vmmov %vm12779_vm4 }
0x2796   :  { %vm12782_vm15 = vmmov %vm12781_vm12 }
0x285f   :  { %v6279_v44 = vpop.f32.mrb[154].mxu1 }
0x2860   :  { %v9246_v28 = vpop.f32.mrb[155].mxu1  ;;  %9266 = vmatmul.mubr.msk.f32.vlgmr.msra.gmra.mrb[158].mxu1 %vm12763_vm9, %v6279_v44  ;;  %vm12774_vm9 = vmmov %vm12773_vm0  ;;  %v7382_v44 = vld [vmem:[#allocation10 + $0x48] sm:$0xff] }
0x2861   :  { %9279 = vmatprep.mubr.msk.f32.mxu1 %vm12748_vm6, %v12472_v30  ;;  %9679 = vmatpush3.bf16.msra.mxu1 %v9678_v51  ;;  %v9705_v28 = vpack.c.bf16 %v7382_v44, %v7381_v27 }
0x2862   :  { %9683 = vmatprep.subr.bf16.mxu1 %v12471_v36 }
0x2863   :  { %v6362_v43 = vpop.f32.mrb[156].mxu1 }
0x2864   :  { %9259 = vmatmul.mubr.msk.f32.vlgmr.msra.gmra.mrb[132].mxu0 %vm12770_vm5, %v6362_v43  ;;  %v9253_v29 = vpop.f32.mrb[157].mxu1  ;;  %vm6998_vm5 = vcmp.eq.s32.totalorder %v10245_v2, %v6997_v62  ;;  %v7383_v2 = vld [vmem:[#allocation10 + $0x50] sm:$0xff]  ;;  %v8006_v62 = vld [vmem:[#allocation11] ss:$0 sm:$0xff] }
0x2865   :  { %9676 = vmatpush3.bf16.msra.mxu0 %v9663_v37  ;;  %9272 = vmatprep.mubr.msk.f32.mxu0 %vm12748_vm6, %v12472_v30  ;;  %v6999_v18 = vsel %vm6998_vm5, 1.0, %v12472_v30  ;;  %v7306_v29 = vsel %vm7305_vm2, 1.0, %v12472_v30 }
0x2866   :  { %9680 = vmatprep.subr.bf16.mxu0 %v12471_v36 }
0x2868   :  { %9273 = vmatmul.mubr.msk.f32.vlgmr.msra.gmra.mrb[134].mxu0 %vm12773_vm0, %v6522_v54  ;;  %vm12783_vm0 = vmmov %vm12779_vm4  ;;  %v7461_v54 = vsel %vm7460_vm11, 1.0, %v12472_v30 }
0x2869   :  { %9682 = vmatpush3.bf16.msra.mxu0 %v9663_v37  ;;  %9286 = vmatprep.mubr.msk.f32.mxu0 %vm12748_vm6, %v12472_v30  ;;  %vm12784_vm8 = vmmov %vm12783_vm0 }
0x286a   :  { %9686 = vmatprep.subr.bf16.mxu0 %v12471_v36 }
0x286c   :  { %9287 = vmatmul.mubr.msk.f32.vlgmr.msra.gmra.mrb[136].mxu0 %vm12774_vm9, %v6680_v14  ;;  %v7384_v14 = vld [vmem:[#allocation10 + $0x58] sm:$0xff]  ;;  %vm12785_vm9 = vmmov %vm12781_vm12 }
0x286d   :  { %9688 = vmatpush3.bf16.msra.mxu0 %v9663_v37  ;;  %9300 = vmatprep.mubr.msk.f32.mxu0 %vm12748_vm6, %v12472_v30  ;;  %v9693_v37 = vpack.c.bf16 %v7155_v49, %v7154_v20  ;;  %v9708_v5 = vpack.c.bf16 %v7384_v14, %v7383_v2 }
0x286e   :  { %9310 = vmatprep.subr.mxu0 %v12472_v30 }
0x2870   :  { %9301 = vmatmul.mubr.msk.f32.vlgmr.msra.gmra.mrb[138].mxu0 %vm12775_vm13, %v6838_v53  ;;  %v7536_v53 = vld [vmem:[#allocation10 + $0x60] sm:$0xff]  ;;  %vm12786_vm13 = vmmov %vm12785_vm9 }
0x2871   :  { %9312 = vmatprep.mubr.msk.f32.mxu0 %vm12748_vm6, %v12472_v30  ;;  %v9711_v51 = vpack.c.bf16 %v7537_v32, %v7536_v53 }
0x2933   :  { %v6511_v31 = vpop.f32.mrb[158].mxu1 }
0x2934   :  { %v9267_v63 = vpop.f32.mrb[159].mxu1 }
0x2935   :  { %v7539_v63 = vld [vmem:[#allocation10 + $0x78] sm:$0xff] }
0x2937   :  { %v6438_v23 = vpop.f32.mrb[132].mxu0 }
0x2938   :  { %v9260_v34 = vpop.f32.mrb[133].mxu0  ;;  %v6512_v13 = vadd.f32 %v6511_v31, %v6438_v23  ;;  %v7538_v31 = vld [vmem:[#allocation10 + $0x70] sm:$0xff] }
0x2939   :  { %v9714_v19 = vpack.c.bf16 %v7539_v63, %v7538_v31 }
0x293b   :  { %v6592_v35 = vpop.f32.mrb[134].mxu0 }
0x293c   :  { %9280 = vmatmul.mubr.msk.f32.vlgmr.msra.gmra.mrb[160].mxu1 %vm12776_vm1, %v6592_v35  ;;  %v9274_v15 = vpop.f32.mrb[135].mxu0  ;;  %vm7701_vm1 = vcmask 25600  }
0x293d   :  { %9685 = vmatpush3.bf16.msra.mxu1 %v9684_v52  ;;  %9293 = vmatprep.mubr.msk.f32.mxu1 %vm12748_vm6, %v12472_v30 }
0x293e   :  { %9689 = vmatprep.subr.bf16.mxu1 %v12471_v36 }
0x293f   :  { %v6750_v50 = vpop.f32.mrb[136].mxu0 }
0x2940   :  { %9294 = vmatmul.mubr.msk.f32.vlgmr.msra.gmra.mrb[162].mxu1 %vm12777_vm3, %v6750_v50  ;;  %v9288_v42 = vpop.f32.mrb[137].mxu0  ;;  %v5471_v50 = vld [vmem:[%s12250_s14 + $0x8] sm:$0xff] }
0x2941   :  { %9691 = vmatpush3.bf16.msra.mxu1 %v9690_v17  ;;  %9307 = vmatprep.mubr.msk.f32.mxu1 %vm12748_vm6, %v12472_v30  ;;  %v5470_v17 = vld [vmem:[%s12250_s14] sm:$0xff] }
0x2942   :  { %9315 = vmatprep.subr.mxu1 %v12472_v30  ;;  %v9717_v42 = vpack.c.bf16 %v5471_v50, %v5470_v17 }
0x2943   :  { %v6908_v39 = vpop.f32.mrb[138].mxu0 }
0x2944   :  { %9308 = vmatmul.mubr.msk.f32.vlgmr.msra.gmra.mrb[164].mxu1 %vm12778_vm10, %v6908_v39  ;;  %v9302_v11 = vpop.f32.mrb[139].mxu0  ;;  %v5473_v39 = vld [vmem:[%s12250_s14 + $0x18] sm:$0xff] }
0x2945   :  { %9317 = vmatprep.mubr.msk.f32.mxu1 %vm12748_vm6, %v12472_v30 }
0x2a0f   :  { %v6668_v21 = vpop.f32.mrb[160].mxu1 }
0x2a10   :  { %v6672_v61 = vadd.f32 %v6668_v21, %v6512_v13  ;;  %v9281_v24 = vpop.f32.mrb[161].mxu1 }
0x2a13   :  { %v6826_v59 = vpop.f32.mrb[162].mxu1 }
0x2a14   :  { %v6830_v12 = vadd.f32 %v6826_v59, %v6672_v61  ;;  %v9295_v41 = vpop.f32.mrb[163].mxu1 }
0x2a17   :  { %v6984_v10 = vpop.f32.mrb[164].mxu1 }
0x2a18   :  { %v6988_v47 = vadd.f32 %v6984_v10, %v6830_v12  ;;  %v9309_v38 = vpop.f32.mrb[165].mxu1 }
0x2a1a   :  { %v6995_v4 = vadd.f32 %v7997_v40, %v6988_v47 }
0x2a1c   :  { %v6996_v16 = vmax.f32 %v6995_v4, 0.0 }
0x2a1e   :  { %9311 = vmatpush3.msra.mxu0 %v6996_v16  ;;  %9316 = vmatpush3.msra.mxu1 %v6996_v16 }
0x2a1f   :  { %9318 = vmatmul.mubr.msk.f32.vlgmr.msra.gmra.mrb[166].mxu1 %vm12779_vm4, %v7079_v1  ;;  %9313 = vmatmul.mubr.msk.f32.vlgmr.msra.gmra.mrb[140].mxu0 %vm12780_vm7, %v6999_v18 }
0x2a20   :  { %9692 = vmatprep.subr.bf16.mxu0 %v12471_v36  ;;  %9328 = vmatprep.mubr.msk.f32.mxu0 %vm12748_vm6, %v12472_v30 }
0x2a21   :  { %9694 = vmatpush3.bf16.msra.mxu0 %v9693_v37  ;;  %9698 = vmatprep.subr.bf16.mxu1 %v12471_v36 }
0x2a22   :  { %9695 = vmatprep.subr.bf16.mxu0 %v12471_v36  ;;  %9339 = vmatprep.mubr.msk.f32.mxu1 %vm12748_vm6, %v12472_v30 }
0x2a23   :  { %9700 = vmatpush3.bf16.msra.mxu1 %v9699_v7 }
0x2a24   :  { %9701 = vmatprep.subr.bf16.mxu1 %v12471_v36 }
0x2a25   :  { %9697 = vmatpush3.bf16.msra.mxu0 %v9696_v33 }
0x2a26   :  { %9342 = vmatprep.subr.mxu0 %v12472_v30 }
0x2a27   :  { %9703 = vmatpush3.bf16.msra.mxu1 %v9702_v6 }
0x2a28   :  { %9704 = vmatprep.subr.bf16.mxu1 %v12471_v36 }
0x2af2   :  { %v7149_v55 = vpop.f32.mrb[166].mxu1  ;;  %v7069_v22 = vpop.f32.mrb[140].mxu0 }
0x2af3   :  { %9329 = vmatmul.mubr.msk.f32.vlgmr.msra.gmra.mrb[142].mxu0 %vm12781_vm12, %v7149_v55  ;;  %v9319_v0 = vpop.f32.mrb[167].mxu1  ;;  %9340 = vmatmul.mubr.msk.f32.vlgmr.msra.gmra.mrb[168].mxu1 %vm12782_vm15, %v7069_v22  ;;  %v9314_v43 = vpop.f32.mrb[141].mxu0 }
0x2af4   :  { %9343 = vmatpush3.msra.mxu0 %v6996_v16  ;;  %9344 = vmatprep.mubr.msk.f32.mxu0 %vm12748_vm6, %v12472_v30 }
0x2af5   :  { %9358 = vmatprep.subr.mxu0 %v12472_v30  ;;  %9706 = vmatpush3.bf16.msra.mxu1 %v9705_v28 }
0x2af6   :  { %9707 = vmatprep.subr.bf16.mxu1 %v12471_v36  ;;  %9355 = vmatprep.mubr.msk.f32.mxu1 %vm12748_vm6, %v12472_v30 }
0x2af7   :  { %9345 = vmatmul.mubr.msk.f32.vlgmr.msra.gmra.mrb[144].mxu0 %vm12783_vm0, %v7306_v29 }
0x2af8   :  { %9359 = vmatpush3.msra.mxu0 %v6996_v16  ;;  %9360 = vmatprep.mubr.msk.f32.mxu0 %vm12748_vm6, %v12472_v30 }
0x2af9   :  { %9710 = vmatprep.subr.bf16.mxu0 %v12471_v36  ;;  %9709 = vmatpush3.bf16.msra.mxu1 %v9708_v5 }
0x2afa   :  { %9716 = vmatprep.subr.bf16.mxu1 %v12471_v36 }
0x2afb   :  { %9361 = vmatmul.mubr.msk.f32.vlgmr.msra.gmra.mrb[146].mxu0 %vm12784_vm8, %v7461_v54 }
0x2afc   :  { %9371 = vmatprep.mubr.msk.f32.mxu0 %vm12748_vm6, %v12472_v30  ;;  %9712 = vmatpush3.bf16.msra.mxu0 %v9711_v51 }
0x2afd   :  { %9713 = vmatprep.subr.bf16.mxu0 %v12471_v36 }
0x2b00   :  { %9715 = vmatpush3.bf16.msra.mxu0 %v9714_v19 }
0x2bc6   :  { %v7227_v8 = vpop.f32.mrb[142].mxu0  ;;  %v7300_v23 = vpop.f32.mrb[168].mxu1 }
0x2bc7   :  { %v9330_v34 = vpop.f32.mrb[143].mxu0  ;;  %v7301_v13 = vadd.f32 %v7300_v23, %v7227_v8  ;;  %v9341_v52 = vpop.f32.mrb[169].mxu1 }
0x2bca   :  { %v7376_v3 = vpop.f32.mrb[144].mxu0 }
0x2bcb   :  { %9356 = vmatmul.mubr.msk.f32.vlgmr.msra.gmra.mrb[170].mxu1 %vm12785_vm9, %v7376_v3  ;;  %v9346_v45 = vpop.f32.mrb[145].mxu0 }
0x2bcc   :  { %9382 = vmatprep.mubr.msk.f32.mxu1 %vm12748_vm6, %v12472_v30  ;;  %9718 = vmatpush3.bf16.msra.mxu1 %v9717_v42  ;;  %v5472_v30 = vld [vmem:[%s12250_s14 + $0x10] sm:$0xff]  ;;  %vm12787_vm6 = vmmov %vm12785_vm9  ;;  %s10037_s14 = smov [#allocation14]  }
0x2bcd   :  { %9719 = vmatprep.subr.bf16.mxu1 %v12471_v36  ;;  %v9720_v11 = vpack.c.bf16 %v5473_v39, %v5472_v30  ;;  %v8007_v36 = vld [vmem:[#allocation13] ss:$0 sm:$0xff]  ;;  %s7721_s28 = sshll.u32 %s10037_s14, 4  ;;  %s7722_s28 = int_to_ptr.vmem [resolvable:$true] %s7721_s28 }
0x2bce   :  { %v7531_v35 = vpop.f32.mrb[146].mxu0  ;;  %s9989_s3 = scalar_lea.vmem %s7722_s28, 32  ;;  %p9994_p1 = scmp.lt.s32.totalorder %s7722_s28, %s7722_s28 }
0x2bcf   :  { %9372 = vmatmul.mubr.msk.f32.vlgmr.msra.gmra.mrb[148].mxu0 %vm12786_vm13, %v7531_v35  ;;  %v9362_v15 = vpop.f32.mrb[147].mxu0  ;;  %p9990_p0 = scmp.ne.s32.totalorder %s7722_s28, %s9989_s3  ;;  %p9995_p2 = scmp.lt.s32.totalorder %s9989_s3, %s9989_s3 }
0x2bd0   :  { %9721 = vmatpush3.bf16.msra.mxu1 %v9720_v11 }
0x2bd1   :  { %p9996_p3 = por %p9995_p2, %p9994_p1 }
0x2bd3   :  { %p9997_p4 = pnand %p9996_p3, %p9990_p0 }
0x2c9e   :  { %v7454_v21 = vpop.f32.mrb[170].mxu1 }
0x2c9f   :  { %v7458_v61 = vadd.f32 %v7454_v21, %v7301_v13  ;;  %v9357_v24 = vpop.f32.mrb[171].mxu1 }
0x2ca2   :  { %v7609_v59 = vpop.f32.mrb[148].mxu0 }
0x2ca3   :  { %v7613_v12 = vadd.f32 %v7609_v59, %v7458_v61  ;;  %v9373_v41 = vpop.f32.mrb[149].mxu0 }
0x2ca5   :  { %v7620_v57 = vadd.f32 %v8006_v62, %v7613_v12 }
0x2ca7   :  { %v7621_v40 = vmax.f32 %v7620_v57, 0.0 }
0x2ca9   :  { %9383 = vmatmul.mubr.msk.f32.vlgmr.msra.gmra.mrb[172].mxu1 %vm12787_vm6, %v7621_v40 }
0x2d7c   :  { %v7697_v10 = vpop.f32.mrb[172].mxu1 }
0x2d7d   :  { %v7698_v47 = vadd.f32 %v8007_v36, %v7697_v10  ;;  %v9384_v38 = vpop.f32.mrb[173].mxu1 }
0x2d7f   :  { %v7702_v4 = vsel %vm7701_vm1, %v7698_v47, -inf }
0x2d80   :  { %7703 = vmax.xlane.f32.xlu1 %v7702_v4 }
0x2e0d   :  { %v7704_v20 = vpop.xlane.xlu1 %7703 }
0x2e0e   :  { %v7705_v49 = vsub.f32 %v7698_v47, %v7704_v20 }
0x2e10   :  { %v7706_v16 = vmul.f32 1.442695, %v7705_v49 }
0x2e12   :  { %9831 = vpow2.f32 %v7706_v16 }
0x2e1c   :  { %v9832_v1 = vpop.eup %9831 }
0x2e1d   :  { %v7708_v18 = vsel %vm7701_vm1, %v9832_v1, 0.0 }
0x2e1e   :  { %7709 = vadd.xlane.f32.xlu0 %v7708_v18 }
0x2eab   :  { %v7710_v37 = vpop.xlane.xlu0 %7709 }
0x2eac   :  { %9833 = vlog2.f32 %v7710_v37 }
0x2eb6   :  { %v9834_v60 = vpop.eup %9833 }
0x2eb7   :  { %v7712_v48 = vmul.f32 0.6931472, %v9834_v60 }
0x2eb9   :  { %v7713_v33 = vsub.f32 %v7705_v49, %v7712_v48 }
0x2ebb   :  { %7714 = vst.msk [vmem:[#allocation14] sm:$0x3] %vm7701_vm1, %v7713_v33 }
0x2ebc   :  { %10000 = shalt.err (!%p9997_p4)
}
0x2ebd   :  { %s10001_s29 = scalar_lea.hbm %s12252_s16, 32 }
0x2ebe   :  { %p10002_p5 = scmp.ne.s32.totalorder %s12252_s16, %s10001_s29  ;;  %p10005_p6 = scmp.lt.u32.totalorder %s10001_s29, %s12252_s16 }
0x2ec0   :  { %p10007_p7 = pnand %p10005_p6, %p10002_p5 }
0x2ec2   :  { %10010 = shalt.err (!%p10007_p7)
}
0x2ec3   :  { %7724 = dma.vmem_to_hbm [thread:$0]  %s7722_s28, 32, %s12252_s16, [#allocation4]  }
0x2ec4   :  { %10019 = dma.done.wait [#allocation4], 32  }
0x2ec5   :  { %10020 = vsyncadd [#allocation4], 4294967264 }
0x2ec6   :  { %7728 = vsyncpa [#allocation3], 1 }
0x2ec7   :  { %7729 = vsyncpa [#allocation6], 1 }
0x2ec8   :  { %7730 = vsyncpa [#allocation9], 1 }
0x2ec9   :  { %7731 = vsyncpa [#allocation12], 1 }
0x2eca   :  { %7732 = vsyncpa [#allocation4], 1 }

</bundles_post_ra>
